<compile_context>
chip_gen: v5e
topology: v5e:2x2
jax: 0.10.0
libtpu: 0.0.40
codegen_flags: <defaults>
</compile_context>

<pallas_src>
import functools
import math

import numpy as np
import jax
import jax.numpy as jnp
from jax import lax
from jax.experimental import pallas as pl
from jax.experimental.pallas import tpu as pltpu


# ----------------------------------------------------------------------------
# small helpers (trace-time / in-kernel)
# ----------------------------------------------------------------------------
def _ln(x, g, b, eps=1e-5):
    mu = jnp.mean(x, axis=-1, keepdims=True)
    var = jnp.mean((x - mu) ** 2, axis=-1, keepdims=True)
    return (x - mu) * lax.rsqrt(var + eps) * g + b


def sinusoidal_pos_emb(L, D):
    half = D // 2
    freqs = np.exp(np.arange(half) * -(math.log(10000.0) / (half - 1)))
    pos = np.arange(1, L + 1, dtype=np.float32)
    args = pos[:, None] * freqs[None, :]
    pe = np.concatenate([np.sin(args), np.cos(args)], axis=1)
    if D % 2 == 1:
        pe = np.concatenate([pe, np.zeros((L, 1))], axis=1)
    return jnp.asarray(pe, jnp.float32)


def _block_diag_bias(B, Lrow, Lcol):
    """Additive attention bias: 0 within the same batch element, -1e30 across."""
    rb = np.repeat(np.arange(B), Lrow)
    cb = np.repeat(np.arange(B), Lcol)
    bias = np.where(rb[:, None] == cb[None, :], 0.0, -1e30).astype(np.float32)
    return jnp.asarray(bias)


def _pooling_matrix(B, L):
    """(B, B*L) one-hot matrix: pool @ x2d == per-batch sum over the sequence."""
    m = np.zeros((B, B * L), np.float32)
    for b in range(B):
        m[b, b * L:(b + 1) * L] = 1.0
    return jnp.asarray(m)


# ----------------------------------------------------------------------------
# Kernel 1: fused q2h / k2h input projections (single launch)
# ----------------------------------------------------------------------------
def _input_proj_kernel(qe_ref, qw_ref, qb_ref, ke_ref, kw_ref, kb_ref,
                       hq_ref, hk_ref):
    hq_ref[...] = (jnp.dot(qe_ref[...], qw_ref[...],
                           preferred_element_type=jnp.float32) + qb_ref[...])
    hk_ref[...] = (jnp.dot(ke_ref[...], kw_ref[...],
                           preferred_element_type=jnp.float32) + kb_ref[...])


def input_proj(q_emb, qw, qb, k_emb, kw, kb):
    Rq, Eq = q_emb.shape
    Rk, Ek = k_emb.shape
    D = qw.shape[1]
    return pl.pallas_call(
        _input_proj_kernel,
        out_shape=(jax.ShapeDtypeStruct((Rq, D), jnp.float32),
                   jax.ShapeDtypeStruct((Rk, D), jnp.float32)),
        grid=(1,),
        in_specs=[
            pl.BlockSpec((Rq, Eq), lambda i: (0, 0)),
            pl.BlockSpec((Eq, D), lambda i: (0, 0)),
            pl.BlockSpec((1, D), lambda i: (0, 0)),
            pl.BlockSpec((Rk, Ek), lambda i: (0, 0)),
            pl.BlockSpec((Ek, D), lambda i: (0, 0)),
            pl.BlockSpec((1, D), lambda i: (0, 0)),
        ],
        out_specs=[pl.BlockSpec((Rq, D), lambda i: (0, 0)),
                   pl.BlockSpec((Rk, D), lambda i: (0, 0))],
        compiler_params=pltpu.CompilerParams(dimension_semantics=("arbitrary",)),
    )(q_emb, qw, qb, k_emb, kw, kb)


# ----------------------------------------------------------------------------
# Kernel 2: full TransformerEncoder stack in one pallas_call (grid = layers)
# ----------------------------------------------------------------------------
PARAM_KEYS = ("ln0g", "ln0b", "wq", "bq", "wkv", "bkv", "wo", "bo",
              "ln1g", "ln1b", "w1", "b1", "w2", "b2", "fg", "fb")


def _encoder_stack_kernel(x_ref, kv_ref, posx_ref, poskv_ref, bias_ref,
                          ln0g, ln0b, wq, bq, wkv, bkv, wo, bo,
                          ln1g, ln1b, w1, b1, w2, b2, fg, fb,
                          o_ref, x_scr, *, num_heads, cross, scale):
    l = pl.program_id(0)
    D = x_scr.shape[-1]
    dh = D // num_heads

    # embed_scale * x + positional embedding once, then carry x in VMEM scratch
    @pl.when(l == 0)
    def _():
        x_scr[...] = scale * x_ref[...] + posx_ref[...]

    x = x_scr[...]                                     # (Rx, D), whole batch

    # --- multi-head attention block (pre-LN) ---
    g0 = ln0g[0]
    b0 = ln0b[0]
    xn = _ln(x, g0, b0)
    if cross:
        kv_in = scale * kv_ref[...] + poskv_ref[...]   # static source, tiny recompute
    else:
        kv_in = x                                      # self-attention on carried x
    kvn = _ln(kv_in, g0, b0)

    # head-scaling (dh**-0.5) is folded into wq/bq; K and V are one fused matmul
    q = jnp.dot(xn, wq[0], preferred_element_type=jnp.float32) + bq[0]
    kvp = jnp.dot(kvn, wkv[0], preferred_element_type=jnp.float32) + bkv[0]
    k = kvp[:, :D]
    v = kvp[:, D:]

    bias = bias_ref[...]                               # block-diagonal (Rx, Rk)
    heads = []
    for h in range(num_heads):
        qh = q[:, h * dh:(h + 1) * dh]
        kh = k[:, h * dh:(h + 1) * dh]
        vh = v[:, h * dh:(h + 1) * dh]
        s = lax.dot_general(qh, kh, (((1,), (1,)), ((), ())),
                            preferred_element_type=jnp.float32)
        s = s + bias
        m = jnp.max(s, axis=-1, keepdims=True)
        p = jnp.exp(s - m)
        p = p / jnp.sum(p, axis=-1, keepdims=True)
        heads.append(jnp.dot(p, vh, preferred_element_type=jnp.float32))
    attn = jnp.concatenate(heads, axis=-1)             # (Rx, D)
    attn = jnp.dot(attn, wo[0], preferred_element_type=jnp.float32) + bo[0]
    x = x + attn

    # --- feed-forward block (pre-LN) ---
    xn2 = _ln(x, ln1g[0], ln1b[0])
    h1 = jnp.maximum(
        jnp.dot(xn2, w1[0], preferred_element_type=jnp.float32) + b1[0], 0.0)
    x = x + jnp.dot(h1, w2[0], preferred_element_type=jnp.float32) + b2[0]

    x_scr[...] = x

    # final encoder LayerNorm fused into the last layer step
    @pl.when(l == pl.num_programs(0) - 1)
    def _():
        o_ref[...] = _ln(x, fg[...], fb[...])


def encoder_stack(x2d, kv2d, pos_x, pos_kv, bias, sp, *, num_heads, cross, scale):
    Rx, D = x2d.shape
    Rk = kv2d.shape[0]
    NL = sp["wq"].shape[0]

    in_specs = [
        pl.BlockSpec((Rx, D), lambda l: (0, 0)),       # x        (resident)
        pl.BlockSpec((Rk, D), lambda l: (0, 0)),       # kv       (resident)
        pl.BlockSpec((Rx, D), lambda l: (0, 0)),       # pos_x    (resident)
        pl.BlockSpec((Rk, D), lambda l: (0, 0)),       # pos_kv   (resident)
        pl.BlockSpec((Rx, Rk), lambda l: (0, 0)),      # attn bias(resident)
    ]
    args = [x2d, kv2d, pos_x, pos_kv, bias]
    for name in PARAM_KEYS:
        p = sp[name]
        if name in ("fg", "fb"):                       # final LN: not stacked
            in_specs.append(pl.BlockSpec(p.shape, lambda l: (0, 0)))
        else:                                          # per-layer stacked weights
            in_specs.append(pl.BlockSpec((1,) + p.shape[1:], lambda l: (l, 0, 0)))
        args.append(p)

    kernel = functools.partial(_encoder_stack_kernel, num_heads=num_heads,
                               cross=cross, scale=scale)
    return pl.pallas_call(
        kernel,
        out_shape=jax.ShapeDtypeStruct((Rx, D), jnp.float32),
        grid=(NL,),
        in_specs=in_specs,
        out_specs=pl.BlockSpec((Rx, D), lambda l: (0, 0)),
        scratch_shapes=[pltpu.VMEM((Rx, D), jnp.float32)],
        compiler_params=pltpu.CompilerParams(
            dimension_semantics=("arbitrary",)),       # layers carry state
    )(*args)


# ----------------------------------------------------------------------------
# Kernel 3: fused head  (per-batch seq-sum -> concat -> proj1 -> relu -> proj2
#                        -> glove similarity -> log_softmax, lane-dense output)
# ----------------------------------------------------------------------------
def _head_kernel(hk_ref, hq_ref, pk_ref, pq_ref, w1_ref, b1_ref, w2_ref, b2_ref,
                 gT_ref, cb_ref, o_ref):
    ks_sum = jnp.dot(pk_ref[...], hk_ref[...], preferred_element_type=jnp.float32)
    qs_sum = jnp.dot(pq_ref[...], hq_ref[...], preferred_element_type=jnp.float32)
    last = jnp.concatenate([ks_sum, qs_sum], axis=-1)                  # (B, 2D)
    h = jnp.maximum(
        jnp.dot(last, w1_ref[...], preferred_element_type=jnp.float32)
        + b1_ref[...], 0.0)
    out = jnp.dot(h, w2_ref[...], preferred_element_type=jnp.float32) + b2_ref[...]
    sim = (jnp.dot(out, gT_ref[...], preferred_element_type=jnp.float32)
           + cb_ref[...])                                              # (B, CPAD)
    m = jnp.max(sim, axis=-1, keepdims=True)
    lse = m + jnp.log(jnp.sum(jnp.exp(sim - m), axis=-1, keepdims=True))
    o_ref[...] = sim - lse                                             # log_softmax


def head(h_k2d, h_q2d, pool_k, pool_q, w1, b1, w2, b2, gT_pad, cand_bias):
    B = pool_k.shape[0]
    Rk, D = h_k2d.shape
    Rq = h_q2d.shape[0]
    D2 = w1.shape[0]
    NO = w2.shape[1]
    CP = gT_pad.shape[1]
    return pl.pallas_call(
        _head_kernel,
        out_shape=jax.ShapeDtypeStruct((B, CP), jnp.float32),
        grid=(1,),
        in_specs=[
            pl.BlockSpec((Rk, D), lambda i: (0, 0)),
            pl.BlockSpec((Rq, D), lambda i: (0, 0)),
            pl.BlockSpec((B, Rk), lambda i: (0, 0)),
            pl.BlockSpec((B, Rq), lambda i: (0, 0)),
            pl.BlockSpec((D2, D), lambda i: (0, 0)),
            pl.BlockSpec((1, D), lambda i: (0, 0)),
            pl.BlockSpec((D, NO), lambda i: (0, 0)),
            pl.BlockSpec((1, NO), lambda i: (0, 0)),
            pl.BlockSpec((NO, CP), lambda i: (0, 0)),
            pl.BlockSpec((1, CP), lambda i: (0, 0)),
        ],
        out_specs=pl.BlockSpec((B, CP), lambda i: (0, 0)),
        compiler_params=pltpu.CompilerParams(dimension_semantics=("arbitrary",)),
    )(h_k2d, h_q2d, pool_k, pool_q, w1, b1, w2, b2, gT_pad, cand_bias)


# ----------------------------------------------------------------------------
# Parameter construction (deterministic, synthetic — no checkpoint loads)
# ----------------------------------------------------------------------------
def _dense_init(key, fan_in, fan_out):
    k1, k2 = jax.random.split(key)
    lim = 1.0 / math.sqrt(fan_in)
    w = jax.random.uniform(k1, (fan_in, fan_out), jnp.float32, -lim, lim)
    b = jax.random.uniform(k2, (1, fan_out), jnp.float32, -lim, lim)
    return w, b


def _make_stack(key, D, n_layers, num_heads):
    dh = D // num_heads
    scaling = dh ** -0.5
    acc = {k: [] for k in PARAM_KEYS[:-2]}
    for lk in jax.random.split(key, n_layers):
        ks = jax.random.split(lk, 6)
        wq, bq = _dense_init(ks[0], D, D)
        wk, bk = _dense_init(ks[1], D, D)
        wv, bv = _dense_init(ks[2], D, D)
        wo, bo = _dense_init(ks[3], D, D)
        w1, b1 = _dense_init(ks[4], D, 4 * D)
        w2, b2 = _dense_init(ks[5], 4 * D, D)
        acc["ln0g"].append(jnp.ones((1, D), jnp.float32))
        acc["ln0b"].append(jnp.zeros((1, D), jnp.float32))
        acc["wq"].append(wq * scaling)                         # fold head scaling
        acc["bq"].append(bq * scaling)
        acc["wkv"].append(jnp.concatenate([wk, wv], axis=1))   # fused K/V proj
        acc["bkv"].append(jnp.concatenate([bk, bv], axis=1))
        acc["wo"].append(wo)
        acc["bo"].append(bo)
        acc["ln1g"].append(jnp.ones((1, D), jnp.float32))
        acc["ln1b"].append(jnp.zeros((1, D), jnp.float32))
        acc["w1"].append(w1)
        acc["b1"].append(b1)
        acc["w2"].append(w2)
        acc["b2"].append(b2)
    stack = {k: jnp.stack(v, axis=0) for k, v in acc.items()}
    stack["fg"] = jnp.ones((1, D), jnp.float32)                # final LayerNorm
    stack["fb"] = jnp.zeros((1, D), jnp.float32)
    return stack


def make_params(key, *, vocab, emb_dim, hidden, n_out, n_cands, n_knode,
                n_layer, n_mem_layer, n_head):
    ks = jax.random.split(key, 10)
    p = {}
    p["emb"] = 0.1 * jax.random.normal(ks[0], (vocab, emb_dim), jnp.float32)
    p["q2h_w"], p["q2h_b"] = _dense_init(ks[1], emb_dim * 1, hidden)
    p["k2h_w"], p["k2h_b"] = _dense_init(ks[2], emb_dim * n_knode, hidden)
    p["kq"] = _make_stack(ks[3], hidden, n_layer, n_head)
    p["qk"] = _make_stack(ks[4], hidden, n_layer, n_head)
    p["kmem"] = _make_stack(ks[5], hidden, n_mem_layer, n_head)
    p["qmem"] = _make_stack(ks[6], hidden, n_mem_layer, n_head)
    p["proj1_w"], p["proj1_b"] = _dense_init(ks[7], 2 * hidden, hidden)
    p["proj2_w"], p["proj2_b"] = _dense_init(ks[8], hidden, n_out)
    glove_cands = 0.1 * jax.random.normal(ks[9], (n_cands, n_out), jnp.float32)
    p["glove_T"] = glove_cands.T                               # (n_out, n_cands)
    return p


# ----------------------------------------------------------------------------
# Full forward pass
# ----------------------------------------------------------------------------
def forward(params, he_ques, he_kg, *, num_heads):
    B, Lq, _ = he_ques.shape
    _, Lk, _ = he_kg.shape
    D = params["q2h_w"].shape[1]
    scale = math.sqrt(D)

    # ClassEmbedding: gather + flatten to batch-major 2-D slabs (glue)
    q_emb = params["emb"][he_ques].reshape(B * Lq, -1)
    k_emb = params["emb"][he_kg].reshape(B * Lk, -1)

    # q2h / k2h projections (one fused Pallas call); input dropout = identity
    hq, hk = input_proj(q_emb, params["q2h_w"], params["q2h_b"],
                        k_emb, params["k2h_w"], params["k2h_b"])

    # trace-time constants: tiled positional embeddings, block-diag attention
    # biases (batch separation on flattened slabs), per-batch pooling matrices.
    pos_q = jnp.tile(sinusoidal_pos_emb(Lq, D), (B, 1))
    pos_k = jnp.tile(sinusoidal_pos_emb(Lk, D), (B, 1))
    bias_kq = _block_diag_bias(B, Lk, Lq)
    bias_qk = _block_diag_bias(B, Lq, Lk)
    bias_kk = _block_diag_bias(B, Lk, Lk)
    bias_qq = _block_diag_bias(B, Lq, Lq)

    # K branch: cross-attend to question, then self-attention memory stack
    h_k_with_q = encoder_stack(hk, hq, pos_k, pos_q, bias_kq, params["kq"],
                               num_heads=num_heads, cross=True, scale=scale)
    h_ks = encoder_stack(h_k_with_q, h_k_with_q, pos_k, pos_k, bias_kk,
                         params["kmem"], num_heads=num_heads, cross=False,
                         scale=scale)

    # Q branch: cross-attend to KG, then self-attention memory stack
    h_q_with_k = encoder_stack(hq, hk, pos_q, pos_k, bias_qk, params["qk"],
                               num_heads=num_heads, cross=True, scale=scale)
    h_qs = encoder_stack(h_q_with_k, h_q_with_k, pos_q, pos_q, bias_qq,
                         params["qmem"], num_heads=num_heads, cross=False,
                         scale=scale)

    # Fused head. Candidate dim padded to a lane-dense multiple of 128.
    pool_k = _pooling_matrix(B, Lk)
    pool_q = _pooling_matrix(B, Lq)
    gT = params["glove_T"]
    C = gT.shape[1]
    CP = ((C + 127) // 128) * 128
    gT_pad = jnp.pad(gT, ((0, 0), (0, CP - C)))
    cand_bias = jnp.concatenate(
        [jnp.zeros((1, C), jnp.float32),
         jnp.full((1, CP - C), -1e30, jnp.float32)], axis=1)

    pred_pad = head(h_ks, h_qs, pool_k, pool_q,
                    params["proj1_w"], params["proj1_b"],
                    params["proj2_w"], params["proj2_b"],
                    gT_pad, cand_bias)
    return pred_pad[:, :C]


# ----------------------------------------------------------------------------
# Main
# ----------------------------------------------------------------------------
if __name__ == "__main__":
    # Small synthetic config (cfg / args analogue)
    VOCAB = 64          # len(idx2vocab)
    EMB = 16            # NUM_WORD_EMB
    HIDDEN = 32         # NUM_HIDDEN
    N_OUT = 16          # NUM_OUT
    N_CANDS = 24        # glove answer candidates
    N_HEAD = 4          # NUM_HEAD
    N_LAYER = 2         # NUM_LAYER
    N_MEM_LAYER = 3     # max(NUM_LAYER, 3)
    N_KNODE = 3         # NUM_MAX_KNODE_{n_hop}H
    B, LQ, LK = 2, 4, 6

    key = jax.random.PRNGKey(0)
    kp, kq, kk = jax.random.split(key, 3)

    params = make_params(kp, vocab=VOCAB, emb_dim=EMB, hidden=HIDDEN,
                         n_out=N_OUT, n_cands=N_CANDS, n_knode=N_KNODE,
                         n_layer=N_LAYER, n_mem_layer=N_MEM_LAYER,
                         n_head=N_HEAD)

    he_ques = jax.random.randint(kq, (B, LQ, 1), 0, VOCAB, dtype=jnp.int32)
    he_kg = jax.random.randint(kk, (B, LK, N_KNODE), 0, VOCAB, dtype=jnp.int32)

    fwd = jax.jit(functools.partial(forward, num_heads=N_HEAD))
    pred = jax.block_until_ready(fwd(params, he_ques, he_kg))

    assert pred.shape == (B, N_CANDS), pred.shape
    # log_softmax rows must exponentiate to ~1
    row_sums = jnp.sum(jnp.exp(pred), axis=1)
    assert bool(jnp.all(jnp.abs(row_sums - 1.0) < 1e-3)), row_sums
    print("KERNEL_OK")
</pallas_src>

<mosaic_0001>
module attributes {stable_mosaic.version = 11 : i64} {
  func.func @_input_proj_kernel(%arg0: i32, %arg1: memref<8x16xf32, #tpu.memory_space<vmem>>, %arg2: memref<16x32xf32, #tpu.memory_space<vmem>>, %arg3: memref<1x32xf32, #tpu.memory_space<vmem>>, %arg4: memref<12x48xf32, #tpu.memory_space<vmem>>, %arg5: memref<48x32xf32, #tpu.memory_space<vmem>>, %arg6: memref<1x32xf32, #tpu.memory_space<vmem>>, %arg7: memref<8x32xf32, #tpu.memory_space<vmem>>, %arg8: memref<12x32xf32, #tpu.memory_space<vmem>>) attributes {dimension_semantics = [#tpu.dimension_semantics<arbitrary>], iteration_bounds = array<i64: 1>, scalar_prefetch = 0 : i64, scratch_operands = 0 : i64, tpu.core_type = #tpu.core_type<tc>, window_params = [{pipeline_mode = #tpu.pipeline_mode<synchronous>, transform_indices = @transform_0, window_bounds = array<i64: 8, 16>}, {pipeline_mode = #tpu.pipeline_mode<synchronous>, transform_indices = @transform_1, window_bounds = array<i64: 16, 32>}, {pipeline_mode = #tpu.pipeline_mode<synchronous>, transform_indices = @transform_2, window_bounds = array<i64: 1, 32>}, {pipeline_mode = #tpu.pipeline_mode<synchronous>, transform_indices = @transform_3, window_bounds = array<i64: 12, 48>}, {pipeline_mode = #tpu.pipeline_mode<synchronous>, transform_indices = @transform_4, window_bounds = array<i64: 48, 32>}, {pipeline_mode = #tpu.pipeline_mode<synchronous>, transform_indices = @transform_5, window_bounds = array<i64: 1, 32>}, {pipeline_mode = #tpu.pipeline_mode<synchronous>, transform_indices = @transform_6, window_bounds = array<i64: 8, 32>}, {pipeline_mode = #tpu.pipeline_mode<synchronous>, transform_indices = @transform_7, window_bounds = array<i64: 12, 32>}]} {
    %c0 = arith.constant 0 : index
    %c0_0 = arith.constant 0 : index
    %0 = vector.load %arg1[%c0, %c0_0] : memref<8x16xf32, #tpu.memory_space<vmem>>, vector<8x16xf32>
    %c0_1 = arith.constant 0 : index
    %c0_2 = arith.constant 0 : index
    %1 = vector.load %arg2[%c0_1, %c0_2] : memref<16x32xf32, #tpu.memory_space<vmem>>, vector<16x32xf32>
    %cst = arith.constant dense<0.000000e+00> : vector<8x32xf32>
    %2 = tpu.matmul %0, %1, %cst {dimension_numbers = #tpu.dot_dimension_numbers<[1], [0], [0], [1], [0, 0, 1, 1], [], []>} : vector<8x16xf32>, vector<16x32xf32>, vector<8x32xf32> -> vector<8x32xf32>
    %c0_3 = arith.constant 0 : index
    %c0_4 = arith.constant 0 : index
    %3 = vector.load %arg3[%c0_3, %c0_4] : memref<1x32xf32, #tpu.memory_space<vmem>>, vector<1x32xf32>
    %4 = vector.broadcast %3 : vector<1x32xf32> to vector<8x32xf32>
    %5 = arith.addf %2, %4 : vector<8x32xf32>
    %c0_5 = arith.constant 0 : index
    %c0_6 = arith.constant 0 : index
    %6 = vector.load %arg7[%c0_5, %c0_6] : memref<8x32xf32, #tpu.memory_space<vmem>>, vector<8x32xf32>
    tpu.vector_store %arg7[%c0_5, %c0_6], %5 {strides = array<i32>} : memref<8x32xf32, #tpu.memory_space<vmem>>, vector<8x32xf32>,
    %c0_7 = arith.constant 0 : index
    %c0_8 = arith.constant 0 : index
    %7 = vector.load %arg4[%c0_7, %c0_8] : memref<12x48xf32, #tpu.memory_space<vmem>>, vector<12x48xf32>
    %c0_9 = arith.constant 0 : index
    %c0_10 = arith.constant 0 : index
    %8 = vector.load %arg5[%c0_9, %c0_10] : memref<48x32xf32, #tpu.memory_space<vmem>>, vector<48x32xf32>
    %cst_11 = arith.constant dense<0.000000e+00> : vector<12x32xf32>
    %9 = tpu.matmul %7, %8, %cst_11 {dimension_numbers = #tpu.dot_dimension_numbers<[1], [0], [0], [1], [0, 0, 1, 1], [], []>} : vector<12x48xf32>, vector<48x32xf32>, vector<12x32xf32> -> vector<12x32xf32>
    %c0_12 = arith.constant 0 : index
    %c0_13 = arith.constant 0 : index
    %10 = vector.load %arg6[%c0_12, %c0_13] : memref<1x32xf32, #tpu.memory_space<vmem>>, vector<1x32xf32>
    %11 = vector.broadcast %10 : vector<1x32xf32> to vector<12x32xf32>
    %12 = arith.addf %9, %11 : vector<12x32xf32>
    %c0_14 = arith.constant 0 : index
    %c0_15 = arith.constant 0 : index
    %13 = vector.load %arg8[%c0_14, %c0_15] : memref<12x32xf32, #tpu.memory_space<vmem>>, vector<12x32xf32>
    tpu.vector_store %arg8[%c0_14, %c0_15], %12 {strides = array<i32>} : memref<12x32xf32, #tpu.memory_space<vmem>>, vector<12x32xf32>,
    return
  }
  func.func @transform_0(%arg0: i32) -> (i32, i32) {
    %c0_i32 = arith.constant 0 : i32
    %c0_i32_0 = arith.constant 0 : i32
    %c0_i32_1 = arith.constant 0 : i32
    return %c0_i32, %c0_i32_0 : i32, i32
  }
  func.func @transform_1(%arg0: i32) -> (i32, i32) {
    %c0_i32 = arith.constant 0 : i32
    %c0_i32_0 = arith.constant 0 : i32
    %c0_i32_1 = arith.constant 0 : i32
    return %c0_i32, %c0_i32_0 : i32, i32
  }
  func.func @transform_2(%arg0: i32) -> (i32, i32) {
    %c0_i32 = arith.constant 0 : i32
    %c0_i32_0 = arith.constant 0 : i32
    %c0_i32_1 = arith.constant 0 : i32
    return %c0_i32, %c0_i32_0 : i32, i32
  }
  func.func @transform_3(%arg0: i32) -> (i32, i32) {
    %c0_i32 = arith.constant 0 : i32
    %c0_i32_0 = arith.constant 0 : i32
    %c0_i32_1 = arith.constant 0 : i32
    return %c0_i32, %c0_i32_0 : i32, i32
  }
  func.func @transform_4(%arg0: i32) -> (i32, i32) {
    %c0_i32 = arith.constant 0 : i32
    %c0_i32_0 = arith.constant 0 : i32
    %c0_i32_1 = arith.constant 0 : i32
    return %c0_i32, %c0_i32_0 : i32, i32
  }
  func.func @transform_5(%arg0: i32) -> (i32, i32) {
    %c0_i32 = arith.constant 0 : i32
    %c0_i32_0 = arith.constant 0 : i32
    %c0_i32_1 = arith.constant 0 : i32
    return %c0_i32, %c0_i32_0 : i32, i32
  }
  func.func @transform_6(%arg0: i32) -> (i32, i32) {
    %c0_i32 = arith.constant 0 : i32
    %c0_i32_0 = arith.constant 0 : i32
    %c0_i32_1 = arith.constant 0 : i32
    return %c0_i32, %c0_i32_0 : i32, i32
  }
  func.func @transform_7(%arg0: i32) -> (i32, i32) {
    %c0_i32 = arith.constant 0 : i32
    %c0_i32_0 = arith.constant 0 : i32
    %c0_i32_1 = arith.constant 0 : i32
    return %c0_i32, %c0_i32_0 : i32, i32
  }
}

module attributes {stable_mosaic.version = 11 : i64} {
  func.func @_encoder_stack_kernel(%arg0: i32, %arg1: memref<8x32xf32, #tpu.memory_space<vmem>>, %arg2: memref<12x32xf32, #tpu.memory_space<vmem>>, %arg3: memref<8x32xf32, #tpu.memory_space<vmem>>, %arg4: memref<12x32xf32, #tpu.memory_space<vmem>>, %arg5: memref<8x12xf32, #tpu.memory_space<vmem>>, %arg6: memref<1x1x32xf32, #tpu.memory_space<vmem>>, %arg7: memref<1x1x32xf32, #tpu.memory_space<vmem>>, %arg8: memref<1x32x32xf32, #tpu.memory_space<vmem>>, %arg9: memref<1x1x32xf32, #tpu.memory_space<vmem>>, %arg10: memref<1x32x64xf32, #tpu.memory_space<vmem>>, %arg11: memref<1x1x64xf32, #tpu.memory_space<vmem>>, %arg12: memref<1x32x32xf32, #tpu.memory_space<vmem>>, %arg13: memref<1x1x32xf32, #tpu.memory_space<vmem>>, %arg14: memref<1x1x32xf32, #tpu.memory_space<vmem>>, %arg15: memref<1x1x32xf32, #tpu.memory_space<vmem>>, %arg16: memref<1x32x128xf32, #tpu.memory_space<vmem>>, %arg17: memref<1x1x128xf32, #tpu.memory_space<vmem>>, %arg18: memref<1x128x32xf32, #tpu.memory_space<vmem>>, %arg19: memref<1x1x32xf32, #tpu.memory_space<vmem>>, %arg20: memref<1x32xf32, #tpu.memory_space<vmem>>, %arg21: memref<1x32xf32, #tpu.memory_space<vmem>>, %arg22: memref<8x32xf32, #tpu.memory_space<vmem>>, %arg23: memref<8x32xf32, #tpu.memory_space<vmem>>) attributes {dimension_semantics = [#tpu.dimension_semantics<arbitrary>], iteration_bounds = array<i64: 2>, scalar_prefetch = 0 : i64, scratch_operands = 1 : i64, tpu.core_type = #tpu.core_type<tc>, window_params = [{pipeline_mode = #tpu.pipeline_mode<synchronous>, transform_indices = @transform_0, window_bounds = array<i64: 8, 32>}, {pipeline_mode = #tpu.pipeline_mode<synchronous>, transform_indices = @transform_1, window_bounds = array<i64: 12, 32>}, {pipeline_mode = #tpu.pipeline_mode<synchronous>, transform_indices = @transform_2, window_bounds = array<i64: 8, 32>}, {pipeline_mode = #tpu.pipeline_mode<synchronous>, transform_indices = @transform_3, window_bounds = array<i64: 12, 32>}, {pipeline_mode = #tpu.pipeline_mode<synchronous>, transform_indices = @transform_4, window_bounds = array<i64: 8, 12>}, {transform_indices = @transform_5, window_bounds = array<i64: 1, 1, 32>}, {transform_indices = @transform_6, window_bounds = array<i64: 1, 1, 32>}, {transform_indices = @transform_7, window_bounds = array<i64: 1, 32, 32>}, {transform_indices = @transform_8, window_bounds = array<i64: 1, 1, 32>}, {transform_indices = @transform_9, window_bounds = array<i64: 1, 32, 64>}, {transform_indices = @transform_10, window_bounds = array<i64: 1, 1, 64>}, {transform_indices = @transform_11, window_bounds = array<i64: 1, 32, 32>}, {transform_indices = @transform_12, window_bounds = array<i64: 1, 1, 32>}, {transform_indices = @transform_13, window_bounds = array<i64: 1, 1, 32>}, {transform_indices = @transform_14, window_bounds = array<i64: 1, 1, 32>}, {transform_indices = @transform_15, window_bounds = array<i64: 1, 32, 128>}, {transform_indices = @transform_16, window_bounds = array<i64: 1, 1, 128>}, {transform_indices = @transform_17, window_bounds = array<i64: 1, 128, 32>}, {transform_indices = @transform_18, window_bounds = array<i64: 1, 1, 32>}, {pipeline_mode = #tpu.pipeline_mode<synchronous>, transform_indices = @transform_19, window_bounds = array<i64: 1, 32>}, {pipeline_mode = #tpu.pipeline_mode<synchronous>, transform_indices = @transform_20, window_bounds = array<i64: 1, 32>}, {pipeline_mode = #tpu.pipeline_mode<synchronous>, transform_indices = @transform_21, window_bounds = array<i64: 8, 32>}]} {
    %c0_i32 = arith.constant 0 : i32
    %0 = arith.cmpi eq, %arg0, %c0_i32 : i32
    %1 = arith.extui %0 : i1 to i32
    %c0_i32_0 = arith.constant 0 : i32
    %2 = arith.cmpi ne, %1, %c0_i32_0 : i32
    scf.if %2 {
      %c0_90 = arith.constant 0 : index
      %c0_91 = arith.constant 0 : index
      %190 = vector.load %arg1[%c0_90, %c0_91] : memref<8x32xf32, #tpu.memory_space<vmem>>, vector<8x32xf32>
      %cst_92 = arith.constant 5.65685415 : f32
      %191 = vector.broadcast %cst_92 : f32 to vector<8x32xf32>
      %192 = arith.mulf %191, %190 : vector<8x32xf32>
      %c0_93 = arith.constant 0 : index
      %c0_94 = arith.constant 0 : index
      %193 = vector.load %arg3[%c0_93, %c0_94] : memref<8x32xf32, #tpu.memory_space<vmem>>, vector<8x32xf32>
      %194 = arith.addf %192, %193 : vector<8x32xf32>
      %c0_95 = arith.constant 0 : index
      %c0_96 = arith.constant 0 : index
      %195 = vector.load %arg23[%c0_95, %c0_96] : memref<8x32xf32, #tpu.memory_space<vmem>>, vector<8x32xf32>
      tpu.vector_store %arg23[%c0_95, %c0_96], %194 {strides = array<i32>} : memref<8x32xf32, #tpu.memory_space<vmem>>, vector<8x32xf32>,
    } else {
    }
    %c0 = arith.constant 0 : index
    %c0_1 = arith.constant 0 : index
    %3 = vector.load %arg23[%c0, %c0_1] : memref<8x32xf32, #tpu.memory_space<vmem>>, vector<8x32xf32>
    %c0_2 = arith.constant 0 : index
    %c0_3 = arith.constant 0 : index
    %c0_4 = arith.constant 0 : index
    %4 = vector.load %arg6[%c0_2, %c0_3, %c0_4] : memref<1x1x32xf32, #tpu.memory_space<vmem>>, vector<1x1x32xf32>
    %5 = vector.shape_cast %4 : vector<1x1x32xf32> to vector<1x32xf32>
    %c0_5 = arith.constant 0 : index
    %c0_6 = arith.constant 0 : index
    %c0_7 = arith.constant 0 : index
    %6 = vector.load %arg7[%c0_5, %c0_6, %c0_7] : memref<1x1x32xf32, #tpu.memory_space<vmem>>, vector<1x1x32xf32>
    %7 = vector.shape_cast %6 : vector<1x1x32xf32> to vector<1x32xf32>
    %cst = arith.constant dense<0.000000e+00> : vector<8xf32>
    %8 = vector.multi_reduction <add>, %3, %cst [1] : vector<8x32xf32> to vector<8xf32>
    %9 = vector.shape_cast %8 : vector<8xf32> to vector<8x1xf32>
    %cst_8 = arith.constant 3.200000e+01 : f32
    %10 = vector.broadcast %cst_8 : f32 to vector<8x1xf32>
    %11 = arith.divf %9, %10 : vector<8x1xf32>
    %12 = vector.broadcast %11 : vector<8x1xf32> to vector<8x32xf32>
    %13 = arith.subf %3, %12 : vector<8x32xf32>
    %14 = arith.mulf %13, %13 : vector<8x32xf32>
    %cst_9 = arith.constant dense<0.000000e+00> : vector<8xf32>
    %15 = vector.multi_reduction <add>, %14, %cst_9 [1] : vector<8x32xf32> to vector<8xf32>
    %16 = vector.shape_cast %15 : vector<8xf32> to vector<8x1xf32>
    %cst_10 = arith.constant 3.200000e+01 : f32
    %17 = vector.broadcast %cst_10 : f32 to vector<8x1xf32>
    %18 = arith.divf %16, %17 : vector<8x1xf32>
    %19 = vector.broadcast %11 : vector<8x1xf32> to vector<8x32xf32>
    %20 = arith.subf %3, %19 : vector<8x32xf32>
    %cst_11 = arith.constant 9.99999974E-6 : f32
    %21 = vector.broadcast %cst_11 : f32 to vector<8x1xf32>
    %22 = arith.addf %18, %21 : vector<8x1xf32>
    %23 = math.rsqrt %22 : vector<8x1xf32>
    %24 = vector.broadcast %23 : vector<8x1xf32> to vector<8x32xf32>
    %25 = arith.mulf %20, %24 : vector<8x32xf32>
    %26 = vector.broadcast %5 : vector<1x32xf32> to vector<8x32xf32>
    %27 = arith.mulf %25, %26 : vector<8x32xf32>
    %28 = vector.broadcast %7 : vector<1x32xf32> to vector<8x32xf32>
    %29 = arith.addf %27, %28 : vector<8x32xf32>
    %c0_12 = arith.constant 0 : index
    %c0_13 = arith.constant 0 : index
    %30 = vector.load %arg2[%c0_12, %c0_13] : memref<12x32xf32, #tpu.memory_space<vmem>>, vector<12x32xf32>
    %cst_14 = arith.constant 5.65685415 : f32
    %31 = vector.broadcast %cst_14 : f32 to vector<12x32xf32>
    %32 = arith.mulf %31, %30 : vector<12x32xf32>
    %c0_15 = arith.constant 0 : index
    %c0_16 = arith.constant 0 : index
    %33 = vector.load %arg4[%c0_15, %c0_16] : memref<12x32xf32, #tpu.memory_space<vmem>>, vector<12x32xf32>
    %34 = arith.addf %32, %33 : vector<12x32xf32>
    %cst_17 = arith.constant dense<0.000000e+00> : vector<12xf32>
    %35 = vector.multi_reduction <add>, %34, %cst_17 [1] : vector<12x32xf32> to vector<12xf32>
    %36 = vector.shape_cast %35 : vector<12xf32> to vector<12x1xf32>
    %cst_18 = arith.constant 3.200000e+01 : f32
    %37 = vector.broadcast %cst_18 : f32 to vector<12x1xf32>
    %38 = arith.divf %36, %37 : vector<12x1xf32>
    %39 = vector.broadcast %38 : vector<12x1xf32> to vector<12x32xf32>
    %40 = arith.subf %34, %39 : vector<12x32xf32>
    %41 = arith.mulf %40, %40 : vector<12x32xf32>
    %cst_19 = arith.constant dense<0.000000e+00> : vector<12xf32>
    %42 = vector.multi_reduction <add>, %41, %cst_19 [1] : vector<12x32xf32> to vector<12xf32>
    %43 = vector.shape_cast %42 : vector<12xf32> to vector<12x1xf32>
    %cst_20 = arith.constant 3.200000e+01 : f32
    %44 = vector.broadcast %cst_20 : f32 to vector<12x1xf32>
    %45 = arith.divf %43, %44 : vector<12x1xf32>
    %46 = vector.broadcast %38 : vector<12x1xf32> to vector<12x32xf32>
    %47 = arith.subf %34, %46 : vector<12x32xf32>
    %cst_21 = arith.constant 9.99999974E-6 : f32
    %48 = vector.broadcast %cst_21 : f32 to vector<12x1xf32>
    %49 = arith.addf %45, %48 : vector<12x1xf32>
    %50 = math.rsqrt %49 : vector<12x1xf32>
    %51 = vector.broadcast %50 : vector<12x1xf32> to vector<12x32xf32>
    %52 = arith.mulf %47, %51 : vector<12x32xf32>
    %53 = vector.broadcast %5 : vector<1x32xf32> to vector<12x32xf32>
    %54 = arith.mulf %52, %53 : vector<12x32xf32>
    %55 = vector.broadcast %7 : vector<1x32xf32> to vector<12x32xf32>
    %56 = arith.addf %54, %55 : vector<12x32xf32>
    %c0_22 = arith.constant 0 : index
    %c0_23 = arith.constant 0 : index
    %c0_24 = arith.constant 0 : index
    %57 = vector.load %arg8[%c0_22, %c0_23, %c0_24] : memref<1x32x32xf32, #tpu.memory_space<vmem>>, vector<1x32x32xf32>
    %58 = vector.shape_cast %57 : vector<1x32x32xf32> to vector<32x32xf32>
    %cst_25 = arith.constant dense<0.000000e+00> : vector<8x32xf32>
    %59 = tpu.matmul %29, %58, %cst_25 {dimension_numbers = #tpu.dot_dimension_numbers<[1], [0], [0], [1], [0, 0, 1, 1], [], []>} : vector<8x32xf32>, vector<32x32xf32>, vector<8x32xf32> -> vector<8x32xf32>
    %c0_26 = arith.constant 0 : index
    %c0_27 = arith.constant 0 : index
    %c0_28 = arith.constant 0 : index
    %60 = vector.load %arg9[%c0_26, %c0_27, %c0_28] : memref<1x1x32xf32, #tpu.memory_space<vmem>>, vector<1x1x32xf32>
    %61 = vector.shape_cast %60 : vector<1x1x32xf32> to vector<1x32xf32>
    %62 = vector.broadcast %61 : vector<1x32xf32> to vector<8x32xf32>
    %63 = arith.addf %59, %62 : vector<8x32xf32>
    %c0_29 = arith.constant 0 : index
    %c0_30 = arith.constant 0 : index
    %c0_31 = arith.constant 0 : index
    %64 = vector.load %arg10[%c0_29, %c0_30, %c0_31] : memref<1x32x64xf32, #tpu.memory_space<vmem>>, vector<1x32x64xf32>
    %65 = vector.shape_cast %64 : vector<1x32x64xf32> to vector<32x64xf32>
    %cst_32 = arith.constant dense<0.000000e+00> : vector<12x64xf32>
    %66 = tpu.matmul %56, %65, %cst_32 {dimension_numbers = #tpu.dot_dimension_numbers<[1], [0], [0], [1], [0, 0, 1, 1], [], []>} : vector<12x32xf32>, vector<32x64xf32>, vector<12x64xf32> -> vector<12x64xf32>
    %c0_33 = arith.constant 0 : index
    %c0_34 = arith.constant 0 : index
    %c0_35 = arith.constant 0 : index
    %67 = vector.load %arg11[%c0_33, %c0_34, %c0_35] : memref<1x1x64xf32, #tpu.memory_space<vmem>>, vector<1x1x64xf32>
    %68 = vector.shape_cast %67 : vector<1x1x64xf32> to vector<1x64xf32>
    %69 = vector.broadcast %68 : vector<1x64xf32> to vector<12x64xf32>
    %70 = arith.addf %66, %69 : vector<12x64xf32>
    %71 = vector.extract_strided_slice %70 {offsets = [0, 0], sizes = [12, 32], strides = [1, 1]} : vector<12x64xf32> to vector<12x32xf32>
    %72 = vector.extract_strided_slice %70 {offsets = [0, 32], sizes = [12, 32], strides = [1, 1]} : vector<12x64xf32> to vector<12x32xf32>
    %c0_36 = arith.constant 0 : index
    %c0_37 = arith.constant 0 : index
    %73 = vector.load %arg5[%c0_36, %c0_37] : memref<8x12xf32, #tpu.memory_space<vmem>>, vector<8x12xf32>
    %74 = vector.extract_strided_slice %63 {offsets = [0, 0], sizes = [8, 8], strides = [1, 1]} : vector<8x32xf32> to vector<8x8xf32>
    %75 = vector.extract_strided_slice %71 {offsets = [0, 0], sizes = [12, 8], strides = [1, 1]} : vector<12x32xf32> to vector<12x8xf32>
    %76 = vector.extract_strided_slice %72 {offsets = [0, 0], sizes = [12, 8], strides = [1, 1]} : vector<12x32xf32> to vector<12x8xf32>
    %cst_38 = arith.constant dense<0.000000e+00> : vector<8x12xf32>
    %77 = tpu.matmul %74, %75, %cst_38 {dimension_numbers = #tpu.dot_dimension_numbers<[1], [1], [0], [0], [0, 0, 1, 0], [], []>} : vector<8x8xf32>, vector<12x8xf32>, vector<8x12xf32> -> vector<8x12xf32>
    %78 = arith.addf %77, %73 : vector<8x12xf32>
    %cst_39 = arith.constant dense<0xFF800000> : vector<8xf32>
    %79 = vector.multi_reduction <maximumf>, %78, %cst_39 [1] : vector<8x12xf32> to vector<8xf32>
    %80 = vector.shape_cast %79 : vector<8xf32> to vector<8x1xf32>
    %81 = vector.broadcast %80 : vector<8x1xf32> to vector<8x12xf32>
    %82 = arith.subf %78, %81 : vector<8x12xf32>
    %83 = math.exp %82 : vector<8x12xf32>
    %cst_40 = arith.constant dense<0.000000e+00> : vector<8xf32>
    %84 = vector.multi_reduction <add>, %83, %cst_40 [1] : vector<8x12xf32> to vector<8xf32>
    %85 = vector.shape_cast %84 : vector<8xf32> to vector<8x1xf32>
    %86 = vector.broadcast %85 : vector<8x1xf32> to vector<8x12xf32>
    %87 = arith.divf %83, %86 : vector<8x12xf32>
    %cst_41 = arith.constant dense<0.000000e+00> : vector<8x8xf32>
    %88 = tpu.matmul %87, %76, %cst_41 {dimension_numbers = #tpu.dot_dimension_numbers<[1], [0], [0], [1], [0, 0, 1, 1], [], []>} : vector<8x12xf32>, vector<12x8xf32>, vector<8x8xf32> -> vector<8x8xf32>
    %89 = vector.extract_strided_slice %63 {offsets = [0, 8], sizes = [8, 8], strides = [1, 1]} : vector<8x32xf32> to vector<8x8xf32>
    %90 = vector.extract_strided_slice %71 {offsets = [0, 8], sizes = [12, 8], strides = [1, 1]} : vector<12x32xf32> to vector<12x8xf32>
    %91 = vector.extract_strided_slice %72 {offsets = [0, 8], sizes = [12, 8], strides = [1, 1]} : vector<12x32xf32> to vector<12x8xf32>
    %cst_42 = arith.constant dense<0.000000e+00> : vector<8x12xf32>
    %92 = tpu.matmul %89, %90, %cst_42 {dimension_numbers = #tpu.dot_dimension_numbers<[1], [1], [0], [0], [0, 0, 1, 0], [], []>} : vector<8x8xf32>, vector<12x8xf32>, vector<8x12xf32> -> vector<8x12xf32>
    %93 = arith.addf %92, %73 : vector<8x12xf32>
    %cst_43 = arith.constant dense<0xFF800000> : vector<8xf32>
    %94 = vector.multi_reduction <maximumf>, %93, %cst_43 [1] : vector<8x12xf32> to vector<8xf32>
    %95 = vector.shape_cast %94 : vector<8xf32> to vector<8x1xf32>
    %96 = vector.broadcast %95 : vector<8x1xf32> to vector<8x12xf32>
    %97 = arith.subf %93, %96 : vector<8x12xf32>
    %98 = math.exp %97 : vector<8x12xf32>
    %cst_44 = arith.constant dense<0.000000e+00> : vector<8xf32>
    %99 = vector.multi_reduction <add>, %98, %cst_44 [1] : vector<8x12xf32> to vector<8xf32>
    %100 = vector.shape_cast %99 : vector<8xf32> to vector<8x1xf32>
    %101 = vector.broadcast %100 : vector<8x1xf32> to vector<8x12xf32>
    %102 = arith.divf %98, %101 : vector<8x12xf32>
    %cst_45 = arith.constant dense<0.000000e+00> : vector<8x8xf32>
    %103 = tpu.matmul %102, %91, %cst_45 {dimension_numbers = #tpu.dot_dimension_numbers<[1], [0], [0], [1], [0, 0, 1, 1], [], []>} : vector<8x12xf32>, vector<12x8xf32>, vector<8x8xf32> -> vector<8x8xf32>
    %104 = vector.extract_strided_slice %63 {offsets = [0, 16], sizes = [8, 8], strides = [1, 1]} : vector<8x32xf32> to vector<8x8xf32>
    %105 = vector.extract_strided_slice %71 {offsets = [0, 16], sizes = [12, 8], strides = [1, 1]} : vector<12x32xf32> to vector<12x8xf32>
    %106 = vector.extract_strided_slice %72 {offsets = [0, 16], sizes = [12, 8], strides = [1, 1]} : vector<12x32xf32> to vector<12x8xf32>
    %cst_46 = arith.constant dense<0.000000e+00> : vector<8x12xf32>
    %107 = tpu.matmul %104, %105, %cst_46 {dimension_numbers = #tpu.dot_dimension_numbers<[1], [1], [0], [0], [0, 0, 1, 0], [], []>} : vector<8x8xf32>, vector<12x8xf32>, vector<8x12xf32> -> vector<8x12xf32>
    %108 = arith.addf %107, %73 : vector<8x12xf32>
    %cst_47 = arith.constant dense<0xFF800000> : vector<8xf32>
    %109 = vector.multi_reduction <maximumf>, %108, %cst_47 [1] : vector<8x12xf32> to vector<8xf32>
    %110 = vector.shape_cast %109 : vector<8xf32> to vector<8x1xf32>
    %111 = vector.broadcast %110 : vector<8x1xf32> to vector<8x12xf32>
    %112 = arith.subf %108, %111 : vector<8x12xf32>
    %113 = math.exp %112 : vector<8x12xf32>
    %cst_48 = arith.constant dense<0.000000e+00> : vector<8xf32>
    %114 = vector.multi_reduction <add>, %113, %cst_48 [1] : vector<8x12xf32> to vector<8xf32>
    %115 = vector.shape_cast %114 : vector<8xf32> to vector<8x1xf32>
    %116 = vector.broadcast %115 : vector<8x1xf32> to vector<8x12xf32>
    %117 = arith.divf %113, %116 : vector<8x12xf32>
    %cst_49 = arith.constant dense<0.000000e+00> : vector<8x8xf32>
    %118 = tpu.matmul %117, %106, %cst_49 {dimension_numbers = #tpu.dot_dimension_numbers<[1], [0], [0], [1], [0, 0, 1, 1], [], []>} : vector<8x12xf32>, vector<12x8xf32>, vector<8x8xf32> -> vector<8x8xf32>
    %119 = vector.extract_strided_slice %63 {offsets = [0, 24], sizes = [8, 8], strides = [1, 1]} : vector<8x32xf32> to vector<8x8xf32>
    %120 = vector.extract_strided_slice %71 {offsets = [0, 24], sizes = [12, 8], strides = [1, 1]} : vector<12x32xf32> to vector<12x8xf32>
    %121 = vector.extract_strided_slice %72 {offsets = [0, 24], sizes = [12, 8], strides = [1, 1]} : vector<12x32xf32> to vector<12x8xf32>
    %cst_50 = arith.constant dense<0.000000e+00> : vector<8x12xf32>
    %122 = tpu.matmul %119, %120, %cst_50 {dimension_numbers = #tpu.dot_dimension_numbers<[1], [1], [0], [0], [0, 0, 1, 0], [], []>} : vector<8x8xf32>, vector<12x8xf32>, vector<8x12xf32> -> vector<8x12xf32>
    %123 = arith.addf %122, %73 : vector<8x12xf32>
    %cst_51 = arith.constant dense<0xFF800000> : vector<8xf32>
    %124 = vector.multi_reduction <maximumf>, %123, %cst_51 [1] : vector<8x12xf32> to vector<8xf32>
    %125 = vector.shape_cast %124 : vector<8xf32> to vector<8x1xf32>
    %126 = vector.broadcast %125 : vector<8x1xf32> to vector<8x12xf32>
    %127 = arith.subf %123, %126 : vector<8x12xf32>
    %128 = math.exp %127 : vector<8x12xf32>
    %cst_52 = arith.constant dense<0.000000e+00> : vector<8xf32>
    %129 = vector.multi_reduction <add>, %128, %cst_52 [1] : vector<8x12xf32> to vector<8xf32>
    %130 = vector.shape_cast %129 : vector<8xf32> to vector<8x1xf32>
    %131 = vector.broadcast %130 : vector<8x1xf32> to vector<8x12xf32>
    %132 = arith.divf %128, %131 : vector<8x12xf32>
    %cst_53 = arith.constant dense<0.000000e+00> : vector<8x8xf32>
    %133 = tpu.matmul %132, %121, %cst_53 {dimension_numbers = #tpu.dot_dimension_numbers<[1], [0], [0], [1], [0, 0, 1, 1], [], []>} : vector<8x12xf32>, vector<12x8xf32>, vector<8x8xf32> -> vector<8x8xf32>
    %134 = tpu.concatenate %88, %103, %118, %133 in 1 : vector<8x8xf32>, vector<8x8xf32>, vector<8x8xf32>, vector<8x8xf32> -> vector<8x32xf32>
    %c0_54 = arith.constant 0 : index
    %c0_55 = arith.constant 0 : index
    %c0_56 = arith.constant 0 : index
    %135 = vector.load %arg12[%c0_54, %c0_55, %c0_56] : memref<1x32x32xf32, #tpu.memory_space<vmem>>, vector<1x32x32xf32>
    %136 = vector.shape_cast %135 : vector<1x32x32xf32> to vector<32x32xf32>
    %cst_57 = arith.constant dense<0.000000e+00> : vector<8x32xf32>
    %137 = tpu.matmul %134, %136, %cst_57 {dimension_numbers = #tpu.dot_dimension_numbers<[1], [0], [0], [1], [0, 0, 1, 1], [], []>} : vector<8x32xf32>, vector<32x32xf32>, vector<8x32xf32> -> vector<8x32xf32>
    %c0_58 = arith.constant 0 : index
    %c0_59 = arith.constant 0 : index
    %c0_60 = arith.constant 0 : index
    %138 = vector.load %arg13[%c0_58, %c0_59, %c0_60] : memref<1x1x32xf32, #tpu.memory_space<vmem>>, vector<1x1x32xf32>
    %139 = vector.shape_cast %138 : vector<1x1x32xf32> to vector<1x32xf32>
    %140 = vector.broadcast %139 : vector<1x32xf32> to vector<8x32xf32>
    %141 = arith.addf %137, %140 : vector<8x32xf32>
    %142 = arith.addf %3, %141 : vector<8x32xf32>
    %c0_61 = arith.constant 0 : index
    %c0_62 = arith.constant 0 : index
    %c0_63 = arith.constant 0 : index
    %143 = vector.load %arg14[%c0_61, %c0_62, %c0_63] : memref<1x1x32xf32, #tpu.memory_space<vmem>>, vector<1x1x32xf32>
    %144 = vector.shape_cast %143 : vector<1x1x32xf32> to vector<1x32xf32>
    %c0_64 = arith.constant 0 : index
    %c0_65 = arith.constant 0 : index
    %c0_66 = arith.constant 0 : index
    %145 = vector.load %arg15[%c0_64, %c0_65, %c0_66] : memref<1x1x32xf32, #tpu.memory_space<vmem>>, vector<1x1x32xf32>
    %146 = vector.shape_cast %145 : vector<1x1x32xf32> to vector<1x32xf32>
    %cst_67 = arith.constant dense<0.000000e+00> : vector<8xf32>
    %147 = vector.multi_reduction <add>, %142, %cst_67 [1] : vector<8x32xf32> to vector<8xf32>
    %148 = vector.shape_cast %147 : vector<8xf32> to vector<8x1xf32>
    %cst_68 = arith.constant 3.200000e+01 : f32
    %149 = vector.broadcast %cst_68 : f32 to vector<8x1xf32>
    %150 = arith.divf %148, %149 : vector<8x1xf32>
    %151 = vector.broadcast %150 : vector<8x1xf32> to vector<8x32xf32>
    %152 = arith.subf %142, %151 : vector<8x32xf32>
    %153 = arith.mulf %152, %152 : vector<8x32xf32>
    %cst_69 = arith.constant dense<0.000000e+00> : vector<8xf32>
    %154 = vector.multi_reduction <add>, %153, %cst_69 [1] : vector<8x32xf32> to vector<8xf32>
    %155 = vector.shape_cast %154 : vector<8xf32> to vector<8x1xf32>
    %cst_70 = arith.constant 3.200000e+01 : f32
    %156 = vector.broadcast %cst_70 : f32 to vector<8x1xf32>
    %157 = arith.divf %155, %156 : vector<8x1xf32>
    %158 = vector.broadcast %150 : vector<8x1xf32> to vector<8x32xf32>
    %159 = arith.subf %142, %158 : vector<8x32xf32>
    %cst_71 = arith.constant 9.99999974E-6 : f32
    %160 = vector.broadcast %cst_71 : f32 to vector<8x1xf32>
    %161 = arith.addf %157, %160 : vector<8x1xf32>
    %162 = math.rsqrt %161 : vector<8x1xf32>
    %163 = vector.broadcast %162 : vector<8x1xf32> to vector<8x32xf32>
    %164 = arith.mulf %159, %163 : vector<8x32xf32>
    %165 = vector.broadcast %144 : vector<1x32xf32> to vector<8x32xf32>
    %166 = arith.mulf %164, %165 : vector<8x32xf32>
    %167 = vector.broadcast %146 : vector<1x32xf32> to vector<8x32xf32>
    %168 = arith.addf %166, %167 : vector<8x32xf32>
    %c0_72 = arith.constant 0 : index
    %c0_73 = arith.constant 0 : index
    %c0_74 = arith.constant 0 : index
    %169 = vector.load %arg16[%c0_72, %c0_73, %c0_74] : memref<1x32x128xf32, #tpu.memory_space<vmem>>, vector<1x32x128xf32>
    %170 = vector.shape_cast %169 : vector<1x32x128xf32> to vector<32x128xf32>
    %cst_75 = arith.constant dense<0.000000e+00> : vector<8x128xf32>
    %171 = tpu.matmul %168, %170, %cst_75 {dimension_numbers = #tpu.dot_dimension_numbers<[1], [0], [0], [1], [0, 0, 1, 1], [], []>} : vector<8x32xf32>, vector<32x128xf32>, vector<8x128xf32> -> vector<8x128xf32>
    %c0_76 = arith.constant 0 : index
    %c0_77 = arith.constant 0 : index
    %c0_78 = arith.constant 0 : index
    %172 = vector.load %arg17[%c0_76, %c0_77, %c0_78] : memref<1x1x128xf32, #tpu.memory_space<vmem>>, vector<1x1x128xf32>
    %173 = vector.shape_cast %172 : vector<1x1x128xf32> to vector<1x128xf32>
    %174 = vector.broadcast %173 : vector<1x128xf32> to vector<8x128xf32>
    %175 = arith.addf %171, %174 : vector<8x128xf32>
    %cst_79 = arith.constant 0.000000e+00 : f32
    %176 = vector.broadcast %cst_79 : f32 to vector<8x128xf32>
    %177 = arith.maximumf %175, %176 : vector<8x128xf32>
    %c0_80 = arith.constant 0 : index
    %c0_81 = arith.constant 0 : index
    %c0_82 = arith.constant 0 : index
    %178 = vector.load %arg18[%c0_80, %c0_81, %c0_82] : memref<1x128x32xf32, #tpu.memory_space<vmem>>, vector<1x128x32xf32>
    %179 = vector.shape_cast %178 : vector<1x128x32xf32> to vector<128x32xf32>
    %cst_83 = arith.constant dense<0.000000e+00> : vector<8x32xf32>
    %180 = tpu.matmul %177, %179, %cst_83 {dimension_numbers = #tpu.dot_dimension_numbers<[1], [0], [0], [1], [0, 0, 1, 1], [], []>} : vector<8x128xf32>, vector<128x32xf32>, vector<8x32xf32> -> vector<8x32xf32>
    %181 = arith.addf %142, %180 : vector<8x32xf32>
    %c0_84 = arith.constant 0 : index
    %c0_85 = arith.constant 0 : index
    %c0_86 = arith.constant 0 : index
    %182 = vector.load %arg19[%c0_84, %c0_85, %c0_86] : memref<1x1x32xf32, #tpu.memory_space<vmem>>, vector<1x1x32xf32>
    %183 = vector.shape_cast %182 : vector<1x1x32xf32> to vector<1x32xf32>
    %184 = vector.broadcast %183 : vector<1x32xf32> to vector<8x32xf32>
    %185 = arith.addf %181, %184 : vector<8x32xf32>
    %c0_87 = arith.constant 0 : index
    %c0_88 = arith.constant 0 : index
    %186 = vector.load %arg23[%c0_87, %c0_88] : memref<8x32xf32, #tpu.memory_space<vmem>>, vector<8x32xf32>
    tpu.vector_store %arg23[%c0_87, %c0_88], %185 {strides = array<i32>} : memref<8x32xf32, #tpu.memory_space<vmem>>, vector<8x32xf32>,
    %c1_i32 = arith.constant 1 : i32
    %187 = arith.cmpi eq, %arg0, %c1_i32 : i32
    %188 = arith.extui %187 : i1 to i32
    %c0_i32_89 = arith.constant 0 : i32
    %189 = arith.cmpi ne, %188, %c0_i32_89 : i32
    scf.if %189 {
      %c0_90 = arith.constant 0 : index
      %c0_91 = arith.constant 0 : index
      %190 = vector.load %arg20[%c0_90, %c0_91] : memref<1x32xf32, #tpu.memory_space<vmem>>, vector<1x32xf32>
      %c0_92 = arith.constant 0 : index
      %c0_93 = arith.constant 0 : index
      %191 = vector.load %arg21[%c0_92, %c0_93] : memref<1x32xf32, #tpu.memory_space<vmem>>, vector<1x32xf32>
      %cst_94 = arith.constant dense<0.000000e+00> : vector<8xf32>
      %192 = vector.multi_reduction <add>, %185, %cst_94 [1] : vector<8x32xf32> to vector<8xf32>
      %193 = vector.shape_cast %192 : vector<8xf32> to vector<8x1xf32>
      %cst_95 = arith.constant 3.200000e+01 : f32
      %194 = vector.broadcast %cst_95 : f32 to vector<8x1xf32>
      %195 = arith.divf %193, %194 : vector<8x1xf32>
      %196 = vector.broadcast %195 : vector<8x1xf32> to vector<8x32xf32>
      %197 = arith.subf %185, %196 : vector<8x32xf32>
      %198 = arith.mulf %197, %197 : vector<8x32xf32>
      %cst_96 = arith.constant dense<0.000000e+00> : vector<8xf32>
      %199 = vector.multi_reduction <add>, %198, %cst_96 [1] : vector<8x32xf32> to vector<8xf32>
      %200 = vector.shape_cast %199 : vector<8xf32> to vector<8x1xf32>
      %cst_97 = arith.constant 3.200000e+01 : f32
      %201 = vector.broadcast %cst_97 : f32 to vector<8x1xf32>
      %202 = arith.divf %200, %201 : vector<8x1xf32>
      %203 = vector.broadcast %195 : vector<8x1xf32> to vector<8x32xf32>
      %204 = arith.subf %185, %203 : vector<8x32xf32>
      %cst_98 = arith.constant 9.99999974E-6 : f32
      %205 = vector.broadcast %cst_98 : f32 to vector<8x1xf32>
      %206 = arith.addf %202, %205 : vector<8x1xf32>
      %207 = math.rsqrt %206 : vector<8x1xf32>
      %208 = vector.broadcast %207 : vector<8x1xf32> to vector<8x32xf32>
      %209 = arith.mulf %204, %208 : vector<8x32xf32>
      %210 = vector.broadcast %190 : vector<1x32xf32> to vector<8x32xf32>
      %211 = arith.mulf %209, %210 : vector<8x32xf32>
      %212 = vector.broadcast %191 : vector<1x32xf32> to vector<8x32xf32>
      %213 = arith.addf %211, %212 : vector<8x32xf32>
      %c0_99 = arith.constant 0 : index
      %c0_100 = arith.constant 0 : index
      %214 = vector.load %arg22[%c0_99, %c0_100] : memref<8x32xf32, #tpu.memory_space<vmem>>, vector<8x32xf32>
      tpu.vector_store %arg22[%c0_99, %c0_100], %213 {strides = array<i32>} : memref<8x32xf32, #tpu.memory_space<vmem>>, vector<8x32xf32>,
    } else {
    }
    return
  }
  func.func @transform_0(%arg0: i32) -> (i32, i32) {
    %c0_i32 = arith.constant 0 : i32
    %c0_i32_0 = arith.constant 0 : i32
    %c0_i32_1 = arith.constant 0 : i32
    return %c0_i32, %c0_i32_0 : i32, i32
  }
  func.func @transform_1(%arg0: i32) -> (i32, i32) {
    %c0_i32 = arith.constant 0 : i32
    %c0_i32_0 = arith.constant 0 : i32
    %c0_i32_1 = arith.constant 0 : i32
    return %c0_i32, %c0_i32_0 : i32, i32
  }
  func.func @transform_2(%arg0: i32) -> (i32, i32) {
    %c0_i32 = arith.constant 0 : i32
    %c0_i32_0 = arith.constant 0 : i32
    %c0_i32_1 = arith.constant 0 : i32
    return %c0_i32, %c0_i32_0 : i32, i32
  }
  func.func @transform_3(%arg0: i32) -> (i32, i32) {
    %c0_i32 = arith.constant 0 : i32
    %c0_i32_0 = arith.constant 0 : i32
    %c0_i32_1 = arith.constant 0 : i32
    return %c0_i32, %c0_i32_0 : i32, i32
  }
  func.func @transform_4(%arg0: i32) -> (i32, i32) {
    %c0_i32 = arith.constant 0 : i32
    %c0_i32_0 = arith.constant 0 : i32
    %c0_i32_1 = arith.constant 0 : i32
    return %c0_i32, %c0_i32_0 : i32, i32
  }
  func.func @transform_5(%arg0: i32) -> (i32, i32, i32) {
    %c0_i32 = arith.constant 0 : i32
    %c0_i32_0 = arith.constant 0 : i32
    %c0_i32_1 = arith.constant 0 : i32
    return %arg0, %c0_i32, %c0_i32_0 : i32, i32, i32
  }
  func.func @transform_6(%arg0: i32) -> (i32, i32, i32) {
    %c0_i32 = arith.constant 0 : i32
    %c0_i32_0 = arith.constant 0 : i32
    %c0_i32_1 = arith.constant 0 : i32
    return %arg0, %c0_i32, %c0_i32_0 : i32, i32, i32
  }
  func.func @transform_7(%arg0: i32) -> (i32, i32, i32) {
    %c0_i32 = arith.constant 0 : i32
    %c0_i32_0 = arith.constant 0 : i32
    %c0_i32_1 = arith.constant 0 : i32
    return %arg0, %c0_i32, %c0_i32_0 : i32, i32, i32
  }
  func.func @transform_8(%arg0: i32) -> (i32, i32, i32) {
    %c0_i32 = arith.constant 0 : i32
    %c0_i32_0 = arith.constant 0 : i32
    %c0_i32_1 = arith.constant 0 : i32
    return %arg0, %c0_i32, %c0_i32_0 : i32, i32, i32
  }
  func.func @transform_9(%arg0: i32) -> (i32, i32, i32) {
    %c0_i32 = arith.constant 0 : i32
    %c0_i32_0 = arith.constant 0 : i32
    %c0_i32_1 = arith.constant 0 : i32
    return %arg0, %c0_i32, %c0_i32_0 : i32, i32, i32
  }
  func.func @transform_10(%arg0: i32) -> (i32, i32, i32) {
    %c0_i32 = arith.constant 0 : i32
    %c0_i32_0 = arith.constant 0 : i32
    %c0_i32_1 = arith.constant 0 : i32
    return %arg0, %c0_i32, %c0_i32_0 : i32, i32, i32
  }
  func.func @transform_11(%arg0: i32) -> (i32, i32, i32) {
    %c0_i32 = arith.constant 0 : i32
    %c0_i32_0 = arith.constant 0 : i32
    %c0_i32_1 = arith.constant 0 : i32
    return %arg0, %c0_i32, %c0_i32_0 : i32, i32, i32
  }
  func.func @transform_12(%arg0: i32) -> (i32, i32, i32) {
    %c0_i32 = arith.constant 0 : i32
    %c0_i32_0 = arith.constant 0 : i32
    %c0_i32_1 = arith.constant 0 : i32
    return %arg0, %c0_i32, %c0_i32_0 : i32, i32, i32
  }
  func.func @transform_13(%arg0: i32) -> (i32, i32, i32) {
    %c0_i32 = arith.constant 0 : i32
    %c0_i32_0 = arith.constant 0 : i32
    %c0_i32_1 = arith.constant 0 : i32
    return %arg0, %c0_i32, %c0_i32_0 : i32, i32, i32
  }
  func.func @transform_14(%arg0: i32) -> (i32, i32, i32) {
    %c0_i32 = arith.constant 0 : i32
    %c0_i32_0 = arith.constant 0 : i32
    %c0_i32_1 = arith.constant 0 : i32
    return %arg0, %c0_i32, %c0_i32_0 : i32, i32, i32
  }
  func.func @transform_15(%arg0: i32) -> (i32, i32, i32) {
    %c0_i32 = arith.constant 0 : i32
    %c0_i32_0 = arith.constant 0 : i32
    %c0_i32_1 = arith.constant 0 : i32
    return %arg0, %c0_i32, %c0_i32_0 : i32, i32, i32
  }
  func.func @transform_16(%arg0: i32) -> (i32, i32, i32) {
    %c0_i32 = arith.constant 0 : i32
    %c0_i32_0 = arith.constant 0 : i32
    %c0_i32_1 = arith.constant 0 : i32
    return %arg0, %c0_i32, %c0_i32_0 : i32, i32, i32
  }
  func.func @transform_17(%arg0: i32) -> (i32, i32, i32) {
    %c0_i32 = arith.constant 0 : i32
    %c0_i32_0 = arith.constant 0 : i32
    %c0_i32_1 = arith.constant 0 : i32
    return %arg0, %c0_i32, %c0_i32_0 : i32, i32, i32
  }
  func.func @transform_18(%arg0: i32) -> (i32, i32, i32) {
    %c0_i32 = arith.constant 0 : i32
    %c0_i32_0 = arith.constant 0 : i32
    %c0_i32_1 = arith.constant 0 : i32
    return %arg0, %c0_i32, %c0_i32_0 : i32, i32, i32
  }
  func.func @transform_19(%arg0: i32) -> (i32, i32) {
    %c0_i32 = arith.constant 0 : i32
    %c0_i32_0 = arith.constant 0 : i32
    %c0_i32_1 = arith.constant 0 : i32
    return %c0_i32, %c0_i32_0 : i32, i32
  }
  func.func @transform_20(%arg0: i32) -> (i32, i32) {
    %c0_i32 = arith.constant 0 : i32
    %c0_i32_0 = arith.constant 0 : i32
    %c0_i32_1 = arith.constant 0 : i32
    return %c0_i32, %c0_i32_0 : i32, i32
  }
  func.func @transform_21(%arg0: i32) -> (i32, i32) {
    %c0_i32 = arith.constant 0 : i32
    %c0_i32_0 = arith.constant 0 : i32
    %c0_i32_1 = arith.constant 0 : i32
    return %c0_i32, %c0_i32_0 : i32, i32
  }
}

module attributes {stable_mosaic.version = 11 : i64} {
  func.func @_encoder_stack_kernel(%arg0: i32, %arg1: memref<8x32xf32, #tpu.memory_space<vmem>>, %arg2: memref<8x32xf32, #tpu.memory_space<vmem>>, %arg3: memref<8x32xf32, #tpu.memory_space<vmem>>, %arg4: memref<8x32xf32, #tpu.memory_space<vmem>>, %arg5: memref<8x8xf32, #tpu.memory_space<vmem>>, %arg6: memref<1x1x32xf32, #tpu.memory_space<vmem>>, %arg7: memref<1x1x32xf32, #tpu.memory_space<vmem>>, %arg8: memref<1x32x32xf32, #tpu.memory_space<vmem>>, %arg9: memref<1x1x32xf32, #tpu.memory_space<vmem>>, %arg10: memref<1x32x64xf32, #tpu.memory_space<vmem>>, %arg11: memref<1x1x64xf32, #tpu.memory_space<vmem>>, %arg12: memref<1x32x32xf32, #tpu.memory_space<vmem>>, %arg13: memref<1x1x32xf32, #tpu.memory_space<vmem>>, %arg14: memref<1x1x32xf32, #tpu.memory_space<vmem>>, %arg15: memref<1x1x32xf32, #tpu.memory_space<vmem>>, %arg16: memref<1x32x128xf32, #tpu.memory_space<vmem>>, %arg17: memref<1x1x128xf32, #tpu.memory_space<vmem>>, %arg18: memref<1x128x32xf32, #tpu.memory_space<vmem>>, %arg19: memref<1x1x32xf32, #tpu.memory_space<vmem>>, %arg20: memref<1x32xf32, #tpu.memory_space<vmem>>, %arg21: memref<1x32xf32, #tpu.memory_space<vmem>>, %arg22: memref<8x32xf32, #tpu.memory_space<vmem>>, %arg23: memref<8x32xf32, #tpu.memory_space<vmem>>) attributes {dimension_semantics = [#tpu.dimension_semantics<arbitrary>], iteration_bounds = array<i64: 3>, scalar_prefetch = 0 : i64, scratch_operands = 1 : i64, tpu.core_type = #tpu.core_type<tc>, window_params = [{pipeline_mode = #tpu.pipeline_mode<synchronous>, transform_indices = @transform_0, window_bounds = array<i64: 8, 32>}, {pipeline_mode = #tpu.pipeline_mode<synchronous>, transform_indices = @transform_1, window_bounds = array<i64: 8, 32>}, {pipeline_mode = #tpu.pipeline_mode<synchronous>, transform_indices = @transform_2, window_bounds = array<i64: 8, 32>}, {pipeline_mode = #tpu.pipeline_mode<synchronous>, transform_indices = @transform_3, window_bounds = array<i64: 8, 32>}, {pipeline_mode = #tpu.pipeline_mode<synchronous>, transform_indices = @transform_4, window_bounds = array<i64: 8, 8>}, {transform_indices = @transform_5, window_bounds = array<i64: 1, 1, 32>}, {transform_indices = @transform_6, window_bounds = array<i64: 1, 1, 32>}, {transform_indices = @transform_7, window_bounds = array<i64: 1, 32, 32>}, {transform_indices = @transform_8, window_bounds = array<i64: 1, 1, 32>}, {transform_indices = @transform_9, window_bounds = array<i64: 1, 32, 64>}, {transform_indices = @transform_10, window_bounds = array<i64: 1, 1, 64>}, {transform_indices = @transform_11, window_bounds = array<i64: 1, 32, 32>}, {transform_indices = @transform_12, window_bounds = array<i64: 1, 1, 32>}, {transform_indices = @transform_13, window_bounds = array<i64: 1, 1, 32>}, {transform_indices = @transform_14, window_bounds = array<i64: 1, 1, 32>}, {transform_indices = @transform_15, window_bounds = array<i64: 1, 32, 128>}, {transform_indices = @transform_16, window_bounds = array<i64: 1, 1, 128>}, {transform_indices = @transform_17, window_bounds = array<i64: 1, 128, 32>}, {transform_indices = @transform_18, window_bounds = array<i64: 1, 1, 32>}, {pipeline_mode = #tpu.pipeline_mode<synchronous>, transform_indices = @transform_19, window_bounds = array<i64: 1, 32>}, {pipeline_mode = #tpu.pipeline_mode<synchronous>, transform_indices = @transform_20, window_bounds = array<i64: 1, 32>}, {pipeline_mode = #tpu.pipeline_mode<synchronous>, transform_indices = @transform_21, window_bounds = array<i64: 8, 32>}]} {
    %c0_i32 = arith.constant 0 : i32
    %0 = arith.cmpi eq, %arg0, %c0_i32 : i32
    %1 = arith.extui %0 : i1 to i32
    %c0_i32_0 = arith.constant 0 : i32
    %2 = arith.cmpi ne, %1, %c0_i32_0 : i32
    scf.if %2 {
      %c0_85 = arith.constant 0 : index
      %c0_86 = arith.constant 0 : index
      %185 = vector.load %arg1[%c0_85, %c0_86] : memref<8x32xf32, #tpu.memory_space<vmem>>, vector<8x32xf32>
      %cst_87 = arith.constant 5.65685415 : f32
      %186 = vector.broadcast %cst_87 : f32 to vector<8x32xf32>
      %187 = arith.mulf %186, %185 : vector<8x32xf32>
      %c0_88 = arith.constant 0 : index
      %c0_89 = arith.constant 0 : index
      %188 = vector.load %arg3[%c0_88, %c0_89] : memref<8x32xf32, #tpu.memory_space<vmem>>, vector<8x32xf32>
      %189 = arith.addf %187, %188 : vector<8x32xf32>
      %c0_90 = arith.constant 0 : index
      %c0_91 = arith.constant 0 : index
      %190 = vector.load %arg23[%c0_90, %c0_91] : memref<8x32xf32, #tpu.memory_space<vmem>>, vector<8x32xf32>
      tpu.vector_store %arg23[%c0_90, %c0_91], %189 {strides = array<i32>} : memref<8x32xf32, #tpu.memory_space<vmem>>, vector<8x32xf32>,
    } else {
    }
    %c0 = arith.constant 0 : index
    %c0_1 = arith.constant 0 : index
    %3 = vector.load %arg23[%c0, %c0_1] : memref<8x32xf32, #tpu.memory_space<vmem>>, vector<8x32xf32>
    %c0_2 = arith.constant 0 : index
    %c0_3 = arith.constant 0 : index
    %c0_4 = arith.constant 0 : index
    %4 = vector.load %arg6[%c0_2, %c0_3, %c0_4] : memref<1x1x32xf32, #tpu.memory_space<vmem>>, vector<1x1x32xf32>
    %5 = vector.shape_cast %4 : vector<1x1x32xf32> to vector<1x32xf32>
    %c0_5 = arith.constant 0 : index
    %c0_6 = arith.constant 0 : index
    %c0_7 = arith.constant 0 : index
    %6 = vector.load %arg7[%c0_5, %c0_6, %c0_7] : memref<1x1x32xf32, #tpu.memory_space<vmem>>, vector<1x1x32xf32>
    %7 = vector.shape_cast %6 : vector<1x1x32xf32> to vector<1x32xf32>
    %cst = arith.constant dense<0.000000e+00> : vector<8xf32>
    %8 = vector.multi_reduction <add>, %3, %cst [1] : vector<8x32xf32> to vector<8xf32>
    %9 = vector.shape_cast %8 : vector<8xf32> to vector<8x1xf32>
    %cst_8 = arith.constant 3.200000e+01 : f32
    %10 = vector.broadcast %cst_8 : f32 to vector<8x1xf32>
    %11 = arith.divf %9, %10 : vector<8x1xf32>
    %12 = vector.broadcast %11 : vector<8x1xf32> to vector<8x32xf32>
    %13 = arith.subf %3, %12 : vector<8x32xf32>
    %14 = arith.mulf %13, %13 : vector<8x32xf32>
    %cst_9 = arith.constant dense<0.000000e+00> : vector<8xf32>
    %15 = vector.multi_reduction <add>, %14, %cst_9 [1] : vector<8x32xf32> to vector<8xf32>
    %16 = vector.shape_cast %15 : vector<8xf32> to vector<8x1xf32>
    %cst_10 = arith.constant 3.200000e+01 : f32
    %17 = vector.broadcast %cst_10 : f32 to vector<8x1xf32>
    %18 = arith.divf %16, %17 : vector<8x1xf32>
    %19 = vector.broadcast %11 : vector<8x1xf32> to vector<8x32xf32>
    %20 = arith.subf %3, %19 : vector<8x32xf32>
    %cst_11 = arith.constant 9.99999974E-6 : f32
    %21 = vector.broadcast %cst_11 : f32 to vector<8x1xf32>
    %22 = arith.addf %18, %21 : vector<8x1xf32>
    %23 = math.rsqrt %22 : vector<8x1xf32>
    %24 = vector.broadcast %23 : vector<8x1xf32> to vector<8x32xf32>
    %25 = arith.mulf %20, %24 : vector<8x32xf32>
    %26 = vector.broadcast %5 : vector<1x32xf32> to vector<8x32xf32>
    %27 = arith.mulf %25, %26 : vector<8x32xf32>
    %28 = vector.broadcast %7 : vector<1x32xf32> to vector<8x32xf32>
    %29 = arith.addf %27, %28 : vector<8x32xf32>
    %cst_12 = arith.constant dense<0.000000e+00> : vector<8xf32>
    %30 = vector.multi_reduction <add>, %3, %cst_12 [1] : vector<8x32xf32> to vector<8xf32>
    %31 = vector.shape_cast %30 : vector<8xf32> to vector<8x1xf32>
    %cst_13 = arith.constant 3.200000e+01 : f32
    %32 = vector.broadcast %cst_13 : f32 to vector<8x1xf32>
    %33 = arith.divf %31, %32 : vector<8x1xf32>
    %34 = vector.broadcast %33 : vector<8x1xf32> to vector<8x32xf32>
    %35 = arith.subf %3, %34 : vector<8x32xf32>
    %36 = arith.mulf %35, %35 : vector<8x32xf32>
    %cst_14 = arith.constant dense<0.000000e+00> : vector<8xf32>
    %37 = vector.multi_reduction <add>, %36, %cst_14 [1] : vector<8x32xf32> to vector<8xf32>
    %38 = vector.shape_cast %37 : vector<8xf32> to vector<8x1xf32>
    %cst_15 = arith.constant 3.200000e+01 : f32
    %39 = vector.broadcast %cst_15 : f32 to vector<8x1xf32>
    %40 = arith.divf %38, %39 : vector<8x1xf32>
    %41 = vector.broadcast %33 : vector<8x1xf32> to vector<8x32xf32>
    %42 = arith.subf %3, %41 : vector<8x32xf32>
    %cst_16 = arith.constant 9.99999974E-6 : f32
    %43 = vector.broadcast %cst_16 : f32 to vector<8x1xf32>
    %44 = arith.addf %40, %43 : vector<8x1xf32>
    %45 = math.rsqrt %44 : vector<8x1xf32>
    %46 = vector.broadcast %45 : vector<8x1xf32> to vector<8x32xf32>
    %47 = arith.mulf %42, %46 : vector<8x32xf32>
    %48 = vector.broadcast %5 : vector<1x32xf32> to vector<8x32xf32>
    %49 = arith.mulf %47, %48 : vector<8x32xf32>
    %50 = vector.broadcast %7 : vector<1x32xf32> to vector<8x32xf32>
    %51 = arith.addf %49, %50 : vector<8x32xf32>
    %c0_17 = arith.constant 0 : index
    %c0_18 = arith.constant 0 : index
    %c0_19 = arith.constant 0 : index
    %52 = vector.load %arg8[%c0_17, %c0_18, %c0_19] : memref<1x32x32xf32, #tpu.memory_space<vmem>>, vector<1x32x32xf32>
    %53 = vector.shape_cast %52 : vector<1x32x32xf32> to vector<32x32xf32>
    %cst_20 = arith.constant dense<0.000000e+00> : vector<8x32xf32>
    %54 = tpu.matmul %29, %53, %cst_20 {dimension_numbers = #tpu.dot_dimension_numbers<[1], [0], [0], [1], [0, 0, 1, 1], [], []>} : vector<8x32xf32>, vector<32x32xf32>, vector<8x32xf32> -> vector<8x32xf32>
    %c0_21 = arith.constant 0 : index
    %c0_22 = arith.constant 0 : index
    %c0_23 = arith.constant 0 : index
    %55 = vector.load %arg9[%c0_21, %c0_22, %c0_23] : memref<1x1x32xf32, #tpu.memory_space<vmem>>, vector<1x1x32xf32>
    %56 = vector.shape_cast %55 : vector<1x1x32xf32> to vector<1x32xf32>
    %57 = vector.broadcast %56 : vector<1x32xf32> to vector<8x32xf32>
    %58 = arith.addf %54, %57 : vector<8x32xf32>
    %c0_24 = arith.constant 0 : index
    %c0_25 = arith.constant 0 : index
    %c0_26 = arith.constant 0 : index
    %59 = vector.load %arg10[%c0_24, %c0_25, %c0_26] : memref<1x32x64xf32, #tpu.memory_space<vmem>>, vector<1x32x64xf32>
    %60 = vector.shape_cast %59 : vector<1x32x64xf32> to vector<32x64xf32>
    %cst_27 = arith.constant dense<0.000000e+00> : vector<8x64xf32>
    %61 = tpu.matmul %51, %60, %cst_27 {dimension_numbers = #tpu.dot_dimension_numbers<[1], [0], [0], [1], [0, 0, 1, 1], [], []>} : vector<8x32xf32>, vector<32x64xf32>, vector<8x64xf32> -> vector<8x64xf32>
    %c0_28 = arith.constant 0 : index
    %c0_29 = arith.constant 0 : index
    %c0_30 = arith.constant 0 : index
    %62 = vector.load %arg11[%c0_28, %c0_29, %c0_30] : memref<1x1x64xf32, #tpu.memory_space<vmem>>, vector<1x1x64xf32>
    %63 = vector.shape_cast %62 : vector<1x1x64xf32> to vector<1x64xf32>
    %64 = vector.broadcast %63 : vector<1x64xf32> to vector<8x64xf32>
    %65 = arith.addf %61, %64 : vector<8x64xf32>
    %66 = vector.extract_strided_slice %65 {offsets = [0, 0], sizes = [8, 32], strides = [1, 1]} : vector<8x64xf32> to vector<8x32xf32>
    %67 = vector.extract_strided_slice %65 {offsets = [0, 32], sizes = [8, 32], strides = [1, 1]} : vector<8x64xf32> to vector<8x32xf32>
    %c0_31 = arith.constant 0 : index
    %c0_32 = arith.constant 0 : index
    %68 = vector.load %arg5[%c0_31, %c0_32] : memref<8x8xf32, #tpu.memory_space<vmem>>, vector<8x8xf32>
    %69 = vector.extract_strided_slice %58 {offsets = [0, 0], sizes = [8, 8], strides = [1, 1]} : vector<8x32xf32> to vector<8x8xf32>
    %70 = vector.extract_strided_slice %66 {offsets = [0, 0], sizes = [8, 8], strides = [1, 1]} : vector<8x32xf32> to vector<8x8xf32>
    %71 = vector.extract_strided_slice %67 {offsets = [0, 0], sizes = [8, 8], strides = [1, 1]} : vector<8x32xf32> to vector<8x8xf32>
    %cst_33 = arith.constant dense<0.000000e+00> : vector<8x8xf32>
    %72 = tpu.matmul %69, %70, %cst_33 {dimension_numbers = #tpu.dot_dimension_numbers<[1], [1], [0], [0], [0, 0, 1, 0], [], []>} : vector<8x8xf32>, vector<8x8xf32>, vector<8x8xf32> -> vector<8x8xf32>
    %73 = arith.addf %72, %68 : vector<8x8xf32>
    %cst_34 = arith.constant dense<0xFF800000> : vector<8xf32>
    %74 = vector.multi_reduction <maximumf>, %73, %cst_34 [1] : vector<8x8xf32> to vector<8xf32>
    %75 = vector.shape_cast %74 : vector<8xf32> to vector<8x1xf32>
    %76 = vector.broadcast %75 : vector<8x1xf32> to vector<8x8xf32>
    %77 = arith.subf %73, %76 : vector<8x8xf32>
    %78 = math.exp %77 : vector<8x8xf32>
    %cst_35 = arith.constant dense<0.000000e+00> : vector<8xf32>
    %79 = vector.multi_reduction <add>, %78, %cst_35 [1] : vector<8x8xf32> to vector<8xf32>
    %80 = vector.shape_cast %79 : vector<8xf32> to vector<8x1xf32>
    %81 = vector.broadcast %80 : vector<8x1xf32> to vector<8x8xf32>
    %82 = arith.divf %78, %81 : vector<8x8xf32>
    %cst_36 = arith.constant dense<0.000000e+00> : vector<8x8xf32>
    %83 = tpu.matmul %82, %71, %cst_36 {dimension_numbers = #tpu.dot_dimension_numbers<[1], [0], [0], [1], [0, 0, 1, 1], [], []>} : vector<8x8xf32>, vector<8x8xf32>, vector<8x8xf32> -> vector<8x8xf32>
    %84 = vector.extract_strided_slice %58 {offsets = [0, 8], sizes = [8, 8], strides = [1, 1]} : vector<8x32xf32> to vector<8x8xf32>
    %85 = vector.extract_strided_slice %66 {offsets = [0, 8], sizes = [8, 8], strides = [1, 1]} : vector<8x32xf32> to vector<8x8xf32>
    %86 = vector.extract_strided_slice %67 {offsets = [0, 8], sizes = [8, 8], strides = [1, 1]} : vector<8x32xf32> to vector<8x8xf32>
    %cst_37 = arith.constant dense<0.000000e+00> : vector<8x8xf32>
    %87 = tpu.matmul %84, %85, %cst_37 {dimension_numbers = #tpu.dot_dimension_numbers<[1], [1], [0], [0], [0, 0, 1, 0], [], []>} : vector<8x8xf32>, vector<8x8xf32>, vector<8x8xf32> -> vector<8x8xf32>
    %88 = arith.addf %87, %68 : vector<8x8xf32>
    %cst_38 = arith.constant dense<0xFF800000> : vector<8xf32>
    %89 = vector.multi_reduction <maximumf>, %88, %cst_38 [1] : vector<8x8xf32> to vector<8xf32>
    %90 = vector.shape_cast %89 : vector<8xf32> to vector<8x1xf32>
    %91 = vector.broadcast %90 : vector<8x1xf32> to vector<8x8xf32>
    %92 = arith.subf %88, %91 : vector<8x8xf32>
    %93 = math.exp %92 : vector<8x8xf32>
    %cst_39 = arith.constant dense<0.000000e+00> : vector<8xf32>
    %94 = vector.multi_reduction <add>, %93, %cst_39 [1] : vector<8x8xf32> to vector<8xf32>
    %95 = vector.shape_cast %94 : vector<8xf32> to vector<8x1xf32>
    %96 = vector.broadcast %95 : vector<8x1xf32> to vector<8x8xf32>
    %97 = arith.divf %93, %96 : vector<8x8xf32>
    %cst_40 = arith.constant dense<0.000000e+00> : vector<8x8xf32>
    %98 = tpu.matmul %97, %86, %cst_40 {dimension_numbers = #tpu.dot_dimension_numbers<[1], [0], [0], [1], [0, 0, 1, 1], [], []>} : vector<8x8xf32>, vector<8x8xf32>, vector<8x8xf32> -> vector<8x8xf32>
    %99 = vector.extract_strided_slice %58 {offsets = [0, 16], sizes = [8, 8], strides = [1, 1]} : vector<8x32xf32> to vector<8x8xf32>
    %100 = vector.extract_strided_slice %66 {offsets = [0, 16], sizes = [8, 8], strides = [1, 1]} : vector<8x32xf32> to vector<8x8xf32>
    %101 = vector.extract_strided_slice %67 {offsets = [0, 16], sizes = [8, 8], strides = [1, 1]} : vector<8x32xf32> to vector<8x8xf32>
    %cst_41 = arith.constant dense<0.000000e+00> : vector<8x8xf32>
    %102 = tpu.matmul %99, %100, %cst_41 {dimension_numbers = #tpu.dot_dimension_numbers<[1], [1], [0], [0], [0, 0, 1, 0], [], []>} : vector<8x8xf32>, vector<8x8xf32>, vector<8x8xf32> -> vector<8x8xf32>
    %103 = arith.addf %102, %68 : vector<8x8xf32>
    %cst_42 = arith.constant dense<0xFF800000> : vector<8xf32>
    %104 = vector.multi_reduction <maximumf>, %103, %cst_42 [1] : vector<8x8xf32> to vector<8xf32>
    %105 = vector.shape_cast %104 : vector<8xf32> to vector<8x1xf32>
    %106 = vector.broadcast %105 : vector<8x1xf32> to vector<8x8xf32>
    %107 = arith.subf %103, %106 : vector<8x8xf32>
    %108 = math.exp %107 : vector<8x8xf32>
    %cst_43 = arith.constant dense<0.000000e+00> : vector<8xf32>
    %109 = vector.multi_reduction <add>, %108, %cst_43 [1] : vector<8x8xf32> to vector<8xf32>
    %110 = vector.shape_cast %109 : vector<8xf32> to vector<8x1xf32>
    %111 = vector.broadcast %110 : vector<8x1xf32> to vector<8x8xf32>
    %112 = arith.divf %108, %111 : vector<8x8xf32>
    %cst_44 = arith.constant dense<0.000000e+00> : vector<8x8xf32>
    %113 = tpu.matmul %112, %101, %cst_44 {dimension_numbers = #tpu.dot_dimension_numbers<[1], [0], [0], [1], [0, 0, 1, 1], [], []>} : vector<8x8xf32>, vector<8x8xf32>, vector<8x8xf32> -> vector<8x8xf32>
    %114 = vector.extract_strided_slice %58 {offsets = [0, 24], sizes = [8, 8], strides = [1, 1]} : vector<8x32xf32> to vector<8x8xf32>
    %115 = vector.extract_strided_slice %66 {offsets = [0, 24], sizes = [8, 8], strides = [1, 1]} : vector<8x32xf32> to vector<8x8xf32>
    %116 = vector.extract_strided_slice %67 {offsets = [0, 24], sizes = [8, 8], strides = [1, 1]} : vector<8x32xf32> to vector<8x8xf32>
    %cst_45 = arith.constant dense<0.000000e+00> : vector<8x8xf32>
    %117 = tpu.matmul %114, %115, %cst_45 {dimension_numbers = #tpu.dot_dimension_numbers<[1], [1], [0], [0], [0, 0, 1, 0], [], []>} : vector<8x8xf32>, vector<8x8xf32>, vector<8x8xf32> -> vector<8x8xf32>
    %118 = arith.addf %117, %68 : vector<8x8xf32>
    %cst_46 = arith.constant dense<0xFF800000> : vector<8xf32>
    %119 = vector.multi_reduction <maximumf>, %118, %cst_46 [1] : vector<8x8xf32> to vector<8xf32>
    %120 = vector.shape_cast %119 : vector<8xf32> to vector<8x1xf32>
    %121 = vector.broadcast %120 : vector<8x1xf32> to vector<8x8xf32>
    %122 = arith.subf %118, %121 : vector<8x8xf32>
    %123 = math.exp %122 : vector<8x8xf32>
    %cst_47 = arith.constant dense<0.000000e+00> : vector<8xf32>
    %124 = vector.multi_reduction <add>, %123, %cst_47 [1] : vector<8x8xf32> to vector<8xf32>
    %125 = vector.shape_cast %124 : vector<8xf32> to vector<8x1xf32>
    %126 = vector.broadcast %125 : vector<8x1xf32> to vector<8x8xf32>
    %127 = arith.divf %123, %126 : vector<8x8xf32>
    %cst_48 = arith.constant dense<0.000000e+00> : vector<8x8xf32>
    %128 = tpu.matmul %127, %116, %cst_48 {dimension_numbers = #tpu.dot_dimension_numbers<[1], [0], [0], [1], [0, 0, 1, 1], [], []>} : vector<8x8xf32>, vector<8x8xf32>, vector<8x8xf32> -> vector<8x8xf32>
    %129 = tpu.concatenate %83, %98, %113, %128 in 1 : vector<8x8xf32>, vector<8x8xf32>, vector<8x8xf32>, vector<8x8xf32> -> vector<8x32xf32>
    %c0_49 = arith.constant 0 : index
    %c0_50 = arith.constant 0 : index
    %c0_51 = arith.constant 0 : index
    %130 = vector.load %arg12[%c0_49, %c0_50, %c0_51] : memref<1x32x32xf32, #tpu.memory_space<vmem>>, vector<1x32x32xf32>
    %131 = vector.shape_cast %130 : vector<1x32x32xf32> to vector<32x32xf32>
    %cst_52 = arith.constant dense<0.000000e+00> : vector<8x32xf32>
    %132 = tpu.matmul %129, %131, %cst_52 {dimension_numbers = #tpu.dot_dimension_numbers<[1], [0], [0], [1], [0, 0, 1, 1], [], []>} : vector<8x32xf32>, vector<32x32xf32>, vector<8x32xf32> -> vector<8x32xf32>
    %c0_53 = arith.constant 0 : index
    %c0_54 = arith.constant 0 : index
    %c0_55 = arith.constant 0 : index
    %133 = vector.load %arg13[%c0_53, %c0_54, %c0_55] : memref<1x1x32xf32, #tpu.memory_space<vmem>>, vector<1x1x32xf32>
    %134 = vector.shape_cast %133 : vector<1x1x32xf32> to vector<1x32xf32>
    %135 = vector.broadcast %134 : vector<1x32xf32> to vector<8x32xf32>
    %136 = arith.addf %132, %135 : vector<8x32xf32>
    %137 = arith.addf %3, %136 : vector<8x32xf32>
    %c0_56 = arith.constant 0 : index
    %c0_57 = arith.constant 0 : index
    %c0_58 = arith.constant 0 : index
    %138 = vector.load %arg14[%c0_56, %c0_57, %c0_58] : memref<1x1x32xf32, #tpu.memory_space<vmem>>, vector<1x1x32xf32>
    %139 = vector.shape_cast %138 : vector<1x1x32xf32> to vector<1x32xf32>
    %c0_59 = arith.constant 0 : index
    %c0_60 = arith.constant 0 : index
    %c0_61 = arith.constant 0 : index
    %140 = vector.load %arg15[%c0_59, %c0_60, %c0_61] : memref<1x1x32xf32, #tpu.memory_space<vmem>>, vector<1x1x32xf32>
    %141 = vector.shape_cast %140 : vector<1x1x32xf32> to vector<1x32xf32>
    %cst_62 = arith.constant dense<0.000000e+00> : vector<8xf32>
    %142 = vector.multi_reduction <add>, %137, %cst_62 [1] : vector<8x32xf32> to vector<8xf32>
    %143 = vector.shape_cast %142 : vector<8xf32> to vector<8x1xf32>
    %cst_63 = arith.constant 3.200000e+01 : f32
    %144 = vector.broadcast %cst_63 : f32 to vector<8x1xf32>
    %145 = arith.divf %143, %144 : vector<8x1xf32>
    %146 = vector.broadcast %145 : vector<8x1xf32> to vector<8x32xf32>
    %147 = arith.subf %137, %146 : vector<8x32xf32>
    %148 = arith.mulf %147, %147 : vector<8x32xf32>
    %cst_64 = arith.constant dense<0.000000e+00> : vector<8xf32>
    %149 = vector.multi_reduction <add>, %148, %cst_64 [1] : vector<8x32xf32> to vector<8xf32>
    %150 = vector.shape_cast %149 : vector<8xf32> to vector<8x1xf32>
    %cst_65 = arith.constant 3.200000e+01 : f32
    %151 = vector.broadcast %cst_65 : f32 to vector<8x1xf32>
    %152 = arith.divf %150, %151 : vector<8x1xf32>
    %153 = vector.broadcast %145 : vector<8x1xf32> to vector<8x32xf32>
    %154 = arith.subf %137, %153 : vector<8x32xf32>
    %cst_66 = arith.constant 9.99999974E-6 : f32
    %155 = vector.broadcast %cst_66 : f32 to vector<8x1xf32>
    %156 = arith.addf %152, %155 : vector<8x1xf32>
    %157 = math.rsqrt %156 : vector<8x1xf32>
    %158 = vector.broadcast %157 : vector<8x1xf32> to vector<8x32xf32>
    %159 = arith.mulf %154, %158 : vector<8x32xf32>
    %160 = vector.broadcast %139 : vector<1x32xf32> to vector<8x32xf32>
    %161 = arith.mulf %159, %160 : vector<8x32xf32>
    %162 = vector.broadcast %141 : vector<1x32xf32> to vector<8x32xf32>
    %163 = arith.addf %161, %162 : vector<8x32xf32>
    %c0_67 = arith.constant 0 : index
    %c0_68 = arith.constant 0 : index
    %c0_69 = arith.constant 0 : index
    %164 = vector.load %arg16[%c0_67, %c0_68, %c0_69] : memref<1x32x128xf32, #tpu.memory_space<vmem>>, vector<1x32x128xf32>
    %165 = vector.shape_cast %164 : vector<1x32x128xf32> to vector<32x128xf32>
    %cst_70 = arith.constant dense<0.000000e+00> : vector<8x128xf32>
    %166 = tpu.matmul %163, %165, %cst_70 {dimension_numbers = #tpu.dot_dimension_numbers<[1], [0], [0], [1], [0, 0, 1, 1], [], []>} : vector<8x32xf32>, vector<32x128xf32>, vector<8x128xf32> -> vector<8x128xf32>
    %c0_71 = arith.constant 0 : index
    %c0_72 = arith.constant 0 : index
    %c0_73 = arith.constant 0 : index
    %167 = vector.load %arg17[%c0_71, %c0_72, %c0_73] : memref<1x1x128xf32, #tpu.memory_space<vmem>>, vector<1x1x128xf32>
    %168 = vector.shape_cast %167 : vector<1x1x128xf32> to vector<1x128xf32>
    %169 = vector.broadcast %168 : vector<1x128xf32> to vector<8x128xf32>
    %170 = arith.addf %166, %169 : vector<8x128xf32>
    %cst_74 = arith.constant 0.000000e+00 : f32
    %171 = vector.broadcast %cst_74 : f32 to vector<8x128xf32>
    %172 = arith.maximumf %170, %171 : vector<8x128xf32>
    %c0_75 = arith.constant 0 : index
    %c0_76 = arith.constant 0 : index
    %c0_77 = arith.constant 0 : index
    %173 = vector.load %arg18[%c0_75, %c0_76, %c0_77] : memref<1x128x32xf32, #tpu.memory_space<vmem>>, vector<1x128x32xf32>
    %174 = vector.shape_cast %173 : vector<1x128x32xf32> to vector<128x32xf32>
    %cst_78 = arith.constant dense<0.000000e+00> : vector<8x32xf32>
    %175 = tpu.matmul %172, %174, %cst_78 {dimension_numbers = #tpu.dot_dimension_numbers<[1], [0], [0], [1], [0, 0, 1, 1], [], []>} : vector<8x128xf32>, vector<128x32xf32>, vector<8x32xf32> -> vector<8x32xf32>
    %176 = arith.addf %137, %175 : vector<8x32xf32>
    %c0_79 = arith.constant 0 : index
    %c0_80 = arith.constant 0 : index
    %c0_81 = arith.constant 0 : index
    %177 = vector.load %arg19[%c0_79, %c0_80, %c0_81] : memref<1x1x32xf32, #tpu.memory_space<vmem>>, vector<1x1x32xf32>
    %178 = vector.shape_cast %177 : vector<1x1x32xf32> to vector<1x32xf32>
    %179 = vector.broadcast %178 : vector<1x32xf32> to vector<8x32xf32>
    %180 = arith.addf %176, %179 : vector<8x32xf32>
    %c0_82 = arith.constant 0 : index
    %c0_83 = arith.constant 0 : index
    %181 = vector.load %arg23[%c0_82, %c0_83] : memref<8x32xf32, #tpu.memory_space<vmem>>, vector<8x32xf32>
    tpu.vector_store %arg23[%c0_82, %c0_83], %180 {strides = array<i32>} : memref<8x32xf32, #tpu.memory_space<vmem>>, vector<8x32xf32>,
    %c2_i32 = arith.constant 2 : i32
    %182 = arith.cmpi eq, %arg0, %c2_i32 : i32
    %183 = arith.extui %182 : i1 to i32
    %c0_i32_84 = arith.constant 0 : i32
    %184 = arith.cmpi ne, %183, %c0_i32_84 : i32
    scf.if %184 {
      %c0_85 = arith.constant 0 : index
      %c0_86 = arith.constant 0 : index
      %185 = vector.load %arg20[%c0_85, %c0_86] : memref<1x32xf32, #tpu.memory_space<vmem>>, vector<1x32xf32>
      %c0_87 = arith.constant 0 : index
      %c0_88 = arith.constant 0 : index
      %186 = vector.load %arg21[%c0_87, %c0_88] : memref<1x32xf32, #tpu.memory_space<vmem>>, vector<1x32xf32>
      %cst_89 = arith.constant dense<0.000000e+00> : vector<8xf32>
      %187 = vector.multi_reduction <add>, %180, %cst_89 [1] : vector<8x32xf32> to vector<8xf32>
      %188 = vector.shape_cast %187 : vector<8xf32> to vector<8x1xf32>
      %cst_90 = arith.constant 3.200000e+01 : f32
      %189 = vector.broadcast %cst_90 : f32 to vector<8x1xf32>
      %190 = arith.divf %188, %189 : vector<8x1xf32>
      %191 = vector.broadcast %190 : vector<8x1xf32> to vector<8x32xf32>
      %192 = arith.subf %180, %191 : vector<8x32xf32>
      %193 = arith.mulf %192, %192 : vector<8x32xf32>
      %cst_91 = arith.constant dense<0.000000e+00> : vector<8xf32>
      %194 = vector.multi_reduction <add>, %193, %cst_91 [1] : vector<8x32xf32> to vector<8xf32>
      %195 = vector.shape_cast %194 : vector<8xf32> to vector<8x1xf32>
      %cst_92 = arith.constant 3.200000e+01 : f32
      %196 = vector.broadcast %cst_92 : f32 to vector<8x1xf32>
      %197 = arith.divf %195, %196 : vector<8x1xf32>
      %198 = vector.broadcast %190 : vector<8x1xf32> to vector<8x32xf32>
      %199 = arith.subf %180, %198 : vector<8x32xf32>
      %cst_93 = arith.constant 9.99999974E-6 : f32
      %200 = vector.broadcast %cst_93 : f32 to vector<8x1xf32>
      %201 = arith.addf %197, %200 : vector<8x1xf32>
      %202 = math.rsqrt %201 : vector<8x1xf32>
      %203 = vector.broadcast %202 : vector<8x1xf32> to vector<8x32xf32>
      %204 = arith.mulf %199, %203 : vector<8x32xf32>
      %205 = vector.broadcast %185 : vector<1x32xf32> to vector<8x32xf32>
      %206 = arith.mulf %204, %205 : vector<8x32xf32>
      %207 = vector.broadcast %186 : vector<1x32xf32> to vector<8x32xf32>
      %208 = arith.addf %206, %207 : vector<8x32xf32>
      %c0_94 = arith.constant 0 : index
      %c0_95 = arith.constant 0 : index
      %209 = vector.load %arg22[%c0_94, %c0_95] : memref<8x32xf32, #tpu.memory_space<vmem>>, vector<8x32xf32>
      tpu.vector_store %arg22[%c0_94, %c0_95], %208 {strides = array<i32>} : memref<8x32xf32, #tpu.memory_space<vmem>>, vector<8x32xf32>,
    } else {
    }
    return
  }
  func.func @transform_0(%arg0: i32) -> (i32, i32) {
    %c0_i32 = arith.constant 0 : i32
    %c0_i32_0 = arith.constant 0 : i32
    %c0_i32_1 = arith.constant 0 : i32
    return %c0_i32, %c0_i32_0 : i32, i32
  }
  func.func @transform_1(%arg0: i32) -> (i32, i32) {
    %c0_i32 = arith.constant 0 : i32
    %c0_i32_0 = arith.constant 0 : i32
    %c0_i32_1 = arith.constant 0 : i32
    return %c0_i32, %c0_i32_0 : i32, i32
  }
  func.func @transform_2(%arg0: i32) -> (i32, i32) {
    %c0_i32 = arith.constant 0 : i32
    %c0_i32_0 = arith.constant 0 : i32
    %c0_i32_1 = arith.constant 0 : i32
    return %c0_i32, %c0_i32_0 : i32, i32
  }
  func.func @transform_3(%arg0: i32) -> (i32, i32) {
    %c0_i32 = arith.constant 0 : i32
    %c0_i32_0 = arith.constant 0 : i32
    %c0_i32_1 = arith.constant 0 : i32
    return %c0_i32, %c0_i32_0 : i32, i32
  }
  func.func @transform_4(%arg0: i32) -> (i32, i32) {
    %c0_i32 = arith.constant 0 : i32
    %c0_i32_0 = arith.constant 0 : i32
    %c0_i32_1 = arith.constant 0 : i32
    return %c0_i32, %c0_i32_0 : i32, i32
  }
  func.func @transform_5(%arg0: i32) -> (i32, i32, i32) {
    %c0_i32 = arith.constant 0 : i32
    %c0_i32_0 = arith.constant 0 : i32
    %c0_i32_1 = arith.constant 0 : i32
    return %arg0, %c0_i32, %c0_i32_0 : i32, i32, i32
  }
  func.func @transform_6(%arg0: i32) -> (i32, i32, i32) {
    %c0_i32 = arith.constant 0 : i32
    %c0_i32_0 = arith.constant 0 : i32
    %c0_i32_1 = arith.constant 0 : i32
    return %arg0, %c0_i32, %c0_i32_0 : i32, i32, i32
  }
  func.func @transform_7(%arg0: i32) -> (i32, i32, i32) {
    %c0_i32 = arith.constant 0 : i32
    %c0_i32_0 = arith.constant 0 : i32
    %c0_i32_1 = arith.constant 0 : i32
    return %arg0, %c0_i32, %c0_i32_0 : i32, i32, i32
  }
  func.func @transform_8(%arg0: i32) -> (i32, i32, i32) {
    %c0_i32 = arith.constant 0 : i32
    %c0_i32_0 = arith.constant 0 : i32
    %c0_i32_1 = arith.constant 0 : i32
    return %arg0, %c0_i32, %c0_i32_0 : i32, i32, i32
  }
  func.func @transform_9(%arg0: i32) -> (i32, i32, i32) {
    %c0_i32 = arith.constant 0 : i32
    %c0_i32_0 = arith.constant 0 : i32
    %c0_i32_1 = arith.constant 0 : i32
    return %arg0, %c0_i32, %c0_i32_0 : i32, i32, i32
  }
  func.func @transform_10(%arg0: i32) -> (i32, i32, i32) {
    %c0_i32 = arith.constant 0 : i32
    %c0_i32_0 = arith.constant 0 : i32
    %c0_i32_1 = arith.constant 0 : i32
    return %arg0, %c0_i32, %c0_i32_0 : i32, i32, i32
  }
  func.func @transform_11(%arg0: i32) -> (i32, i32, i32) {
    %c0_i32 = arith.constant 0 : i32
    %c0_i32_0 = arith.constant 0 : i32
    %c0_i32_1 = arith.constant 0 : i32
    return %arg0, %c0_i32, %c0_i32_0 : i32, i32, i32
  }
  func.func @transform_12(%arg0: i32) -> (i32, i32, i32) {
    %c0_i32 = arith.constant 0 : i32
    %c0_i32_0 = arith.constant 0 : i32
    %c0_i32_1 = arith.constant 0 : i32
    return %arg0, %c0_i32, %c0_i32_0 : i32, i32, i32
  }
  func.func @transform_13(%arg0: i32) -> (i32, i32, i32) {
    %c0_i32 = arith.constant 0 : i32
    %c0_i32_0 = arith.constant 0 : i32
    %c0_i32_1 = arith.constant 0 : i32
    return %arg0, %c0_i32, %c0_i32_0 : i32, i32, i32
  }
  func.func @transform_14(%arg0: i32) -> (i32, i32, i32) {
    %c0_i32 = arith.constant 0 : i32
    %c0_i32_0 = arith.constant 0 : i32
    %c0_i32_1 = arith.constant 0 : i32
    return %arg0, %c0_i32, %c0_i32_0 : i32, i32, i32
  }
  func.func @transform_15(%arg0: i32) -> (i32, i32, i32) {
    %c0_i32 = arith.constant 0 : i32
    %c0_i32_0 = arith.constant 0 : i32
    %c0_i32_1 = arith.constant 0 : i32
    return %arg0, %c0_i32, %c0_i32_0 : i32, i32, i32
  }
  func.func @transform_16(%arg0: i32) -> (i32, i32, i32) {
    %c0_i32 = arith.constant 0 : i32
    %c0_i32_0 = arith.constant 0 : i32
    %c0_i32_1 = arith.constant 0 : i32
    return %arg0, %c0_i32, %c0_i32_0 : i32, i32, i32
  }
  func.func @transform_17(%arg0: i32) -> (i32, i32, i32) {
    %c0_i32 = arith.constant 0 : i32
    %c0_i32_0 = arith.constant 0 : i32
    %c0_i32_1 = arith.constant 0 : i32
    return %arg0, %c0_i32, %c0_i32_0 : i32, i32, i32
  }
  func.func @transform_18(%arg0: i32) -> (i32, i32, i32) {
    %c0_i32 = arith.constant 0 : i32
    %c0_i32_0 = arith.constant 0 : i32
    %c0_i32_1 = arith.constant 0 : i32
    return %arg0, %c0_i32, %c0_i32_0 : i32, i32, i32
  }
  func.func @transform_19(%arg0: i32) -> (i32, i32) {
    %c0_i32 = arith.constant 0 : i32
    %c0_i32_0 = arith.constant 0 : i32
    %c0_i32_1 = arith.constant 0 : i32
    return %c0_i32, %c0_i32_0 : i32, i32
  }
  func.func @transform_20(%arg0: i32) -> (i32, i32) {
    %c0_i32 = arith.constant 0 : i32
    %c0_i32_0 = arith.constant 0 : i32
    %c0_i32_1 = arith.constant 0 : i32
    return %c0_i32, %c0_i32_0 : i32, i32
  }
  func.func @transform_21(%arg0: i32) -> (i32, i32) {
    %c0_i32 = arith.constant 0 : i32
    %c0_i32_0 = arith.constant 0 : i32
    %c0_i32_1 = arith.constant 0 : i32
    return %c0_i32, %c0_i32_0 : i32, i32
  }
}

module attributes {stable_mosaic.version = 11 : i64} {
  func.func @_encoder_stack_kernel(%arg0: i32, %arg1: memref<12x32xf32, #tpu.memory_space<vmem>>, %arg2: memref<8x32xf32, #tpu.memory_space<vmem>>, %arg3: memref<12x32xf32, #tpu.memory_space<vmem>>, %arg4: memref<8x32xf32, #tpu.memory_space<vmem>>, %arg5: memref<12x8xf32, #tpu.memory_space<vmem>>, %arg6: memref<1x1x32xf32, #tpu.memory_space<vmem>>, %arg7: memref<1x1x32xf32, #tpu.memory_space<vmem>>, %arg8: memref<1x32x32xf32, #tpu.memory_space<vmem>>, %arg9: memref<1x1x32xf32, #tpu.memory_space<vmem>>, %arg10: memref<1x32x64xf32, #tpu.memory_space<vmem>>, %arg11: memref<1x1x64xf32, #tpu.memory_space<vmem>>, %arg12: memref<1x32x32xf32, #tpu.memory_space<vmem>>, %arg13: memref<1x1x32xf32, #tpu.memory_space<vmem>>, %arg14: memref<1x1x32xf32, #tpu.memory_space<vmem>>, %arg15: memref<1x1x32xf32, #tpu.memory_space<vmem>>, %arg16: memref<1x32x128xf32, #tpu.memory_space<vmem>>, %arg17: memref<1x1x128xf32, #tpu.memory_space<vmem>>, %arg18: memref<1x128x32xf32, #tpu.memory_space<vmem>>, %arg19: memref<1x1x32xf32, #tpu.memory_space<vmem>>, %arg20: memref<1x32xf32, #tpu.memory_space<vmem>>, %arg21: memref<1x32xf32, #tpu.memory_space<vmem>>, %arg22: memref<12x32xf32, #tpu.memory_space<vmem>>, %arg23: memref<12x32xf32, #tpu.memory_space<vmem>>) attributes {dimension_semantics = [#tpu.dimension_semantics<arbitrary>], iteration_bounds = array<i64: 2>, scalar_prefetch = 0 : i64, scratch_operands = 1 : i64, tpu.core_type = #tpu.core_type<tc>, window_params = [{pipeline_mode = #tpu.pipeline_mode<synchronous>, transform_indices = @transform_0, window_bounds = array<i64: 12, 32>}, {pipeline_mode = #tpu.pipeline_mode<synchronous>, transform_indices = @transform_1, window_bounds = array<i64: 8, 32>}, {pipeline_mode = #tpu.pipeline_mode<synchronous>, transform_indices = @transform_2, window_bounds = array<i64: 12, 32>}, {pipeline_mode = #tpu.pipeline_mode<synchronous>, transform_indices = @transform_3, window_bounds = array<i64: 8, 32>}, {pipeline_mode = #tpu.pipeline_mode<synchronous>, transform_indices = @transform_4, window_bounds = array<i64: 12, 8>}, {transform_indices = @transform_5, window_bounds = array<i64: 1, 1, 32>}, {transform_indices = @transform_6, window_bounds = array<i64: 1, 1, 32>}, {transform_indices = @transform_7, window_bounds = array<i64: 1, 32, 32>}, {transform_indices = @transform_8, window_bounds = array<i64: 1, 1, 32>}, {transform_indices = @transform_9, window_bounds = array<i64: 1, 32, 64>}, {transform_indices = @transform_10, window_bounds = array<i64: 1, 1, 64>}, {transform_indices = @transform_11, window_bounds = array<i64: 1, 32, 32>}, {transform_indices = @transform_12, window_bounds = array<i64: 1, 1, 32>}, {transform_indices = @transform_13, window_bounds = array<i64: 1, 1, 32>}, {transform_indices = @transform_14, window_bounds = array<i64: 1, 1, 32>}, {transform_indices = @transform_15, window_bounds = array<i64: 1, 32, 128>}, {transform_indices = @transform_16, window_bounds = array<i64: 1, 1, 128>}, {transform_indices = @transform_17, window_bounds = array<i64: 1, 128, 32>}, {transform_indices = @transform_18, window_bounds = array<i64: 1, 1, 32>}, {pipeline_mode = #tpu.pipeline_mode<synchronous>, transform_indices = @transform_19, window_bounds = array<i64: 1, 32>}, {pipeline_mode = #tpu.pipeline_mode<synchronous>, transform_indices = @transform_20, window_bounds = array<i64: 1, 32>}, {pipeline_mode = #tpu.pipeline_mode<synchronous>, transform_indices = @transform_21, window_bounds = array<i64: 12, 32>}]} {
    %c0_i32 = arith.constant 0 : i32
    %0 = arith.cmpi eq, %arg0, %c0_i32 : i32
    %1 = arith.extui %0 : i1 to i32
    %c0_i32_0 = arith.constant 0 : i32
    %2 = arith.cmpi ne, %1, %c0_i32_0 : i32
    scf.if %2 {
      %c0_90 = arith.constant 0 : index
      %c0_91 = arith.constant 0 : index
      %190 = vector.load %arg1[%c0_90, %c0_91] : memref<12x32xf32, #tpu.memory_space<vmem>>, vector<12x32xf32>
      %cst_92 = arith.constant 5.65685415 : f32
      %191 = vector.broadcast %cst_92 : f32 to vector<12x32xf32>
      %192 = arith.mulf %191, %190 : vector<12x32xf32>
      %c0_93 = arith.constant 0 : index
      %c0_94 = arith.constant 0 : index
      %193 = vector.load %arg3[%c0_93, %c0_94] : memref<12x32xf32, #tpu.memory_space<vmem>>, vector<12x32xf32>
      %194 = arith.addf %192, %193 : vector<12x32xf32>
      %c0_95 = arith.constant 0 : index
      %c0_96 = arith.constant 0 : index
      %195 = vector.load %arg23[%c0_95, %c0_96] : memref<12x32xf32, #tpu.memory_space<vmem>>, vector<12x32xf32>
      tpu.vector_store %arg23[%c0_95, %c0_96], %194 {strides = array<i32>} : memref<12x32xf32, #tpu.memory_space<vmem>>, vector<12x32xf32>,
    } else {
    }
    %c0 = arith.constant 0 : index
    %c0_1 = arith.constant 0 : index
    %3 = vector.load %arg23[%c0, %c0_1] : memref<12x32xf32, #tpu.memory_space<vmem>>, vector<12x32xf32>
    %c0_2 = arith.constant 0 : index
    %c0_3 = arith.constant 0 : index
    %c0_4 = arith.constant 0 : index
    %4 = vector.load %arg6[%c0_2, %c0_3, %c0_4] : memref<1x1x32xf32, #tpu.memory_space<vmem>>, vector<1x1x32xf32>
    %5 = vector.shape_cast %4 : vector<1x1x32xf32> to vector<1x32xf32>
    %c0_5 = arith.constant 0 : index
    %c0_6 = arith.constant 0 : index
    %c0_7 = arith.constant 0 : index
    %6 = vector.load %arg7[%c0_5, %c0_6, %c0_7] : memref<1x1x32xf32, #tpu.memory_space<vmem>>, vector<1x1x32xf32>
    %7 = vector.shape_cast %6 : vector<1x1x32xf32> to vector<1x32xf32>
    %cst = arith.constant dense<0.000000e+00> : vector<12xf32>
    %8 = vector.multi_reduction <add>, %3, %cst [1] : vector<12x32xf32> to vector<12xf32>
    %9 = vector.shape_cast %8 : vector<12xf32> to vector<12x1xf32>
    %cst_8 = arith.constant 3.200000e+01 : f32
    %10 = vector.broadcast %cst_8 : f32 to vector<12x1xf32>
    %11 = arith.divf %9, %10 : vector<12x1xf32>
    %12 = vector.broadcast %11 : vector<12x1xf32> to vector<12x32xf32>
    %13 = arith.subf %3, %12 : vector<12x32xf32>
    %14 = arith.mulf %13, %13 : vector<12x32xf32>
    %cst_9 = arith.constant dense<0.000000e+00> : vector<12xf32>
    %15 = vector.multi_reduction <add>, %14, %cst_9 [1] : vector<12x32xf32> to vector<12xf32>
    %16 = vector.shape_cast %15 : vector<12xf32> to vector<12x1xf32>
    %cst_10 = arith.constant 3.200000e+01 : f32
    %17 = vector.broadcast %cst_10 : f32 to vector<12x1xf32>
    %18 = arith.divf %16, %17 : vector<12x1xf32>
    %19 = vector.broadcast %11 : vector<12x1xf32> to vector<12x32xf32>
    %20 = arith.subf %3, %19 : vector<12x32xf32>
    %cst_11 = arith.constant 9.99999974E-6 : f32
    %21 = vector.broadcast %cst_11 : f32 to vector<12x1xf32>
    %22 = arith.addf %18, %21 : vector<12x1xf32>
    %23 = math.rsqrt %22 : vector<12x1xf32>
    %24 = vector.broadcast %23 : vector<12x1xf32> to vector<12x32xf32>
    %25 = arith.mulf %20, %24 : vector<12x32xf32>
    %26 = vector.broadcast %5 : vector<1x32xf32> to vector<12x32xf32>
    %27 = arith.mulf %25, %26 : vector<12x32xf32>
    %28 = vector.broadcast %7 : vector<1x32xf32> to vector<12x32xf32>
    %29 = arith.addf %27, %28 : vector<12x32xf32>
    %c0_12 = arith.constant 0 : index
    %c0_13 = arith.constant 0 : index
    %30 = vector.load %arg2[%c0_12, %c0_13] : memref<8x32xf32, #tpu.memory_space<vmem>>, vector<8x32xf32>
    %cst_14 = arith.constant 5.65685415 : f32
    %31 = vector.broadcast %cst_14 : f32 to vector<8x32xf32>
    %32 = arith.mulf %31, %30 : vector<8x32xf32>
    %c0_15 = arith.constant 0 : index
    %c0_16 = arith.constant 0 : index
    %33 = vector.load %arg4[%c0_15, %c0_16] : memref<8x32xf32, #tpu.memory_space<vmem>>, vector<8x32xf32>
    %34 = arith.addf %32, %33 : vector<8x32xf32>
    %cst_17 = arith.constant dense<0.000000e+00> : vector<8xf32>
    %35 = vector.multi_reduction <add>, %34, %cst_17 [1] : vector<8x32xf32> to vector<8xf32>
    %36 = vector.shape_cast %35 : vector<8xf32> to vector<8x1xf32>
    %cst_18 = arith.constant 3.200000e+01 : f32
    %37 = vector.broadcast %cst_18 : f32 to vector<8x1xf32>
    %38 = arith.divf %36, %37 : vector<8x1xf32>
    %39 = vector.broadcast %38 : vector<8x1xf32> to vector<8x32xf32>
    %40 = arith.subf %34, %39 : vector<8x32xf32>
    %41 = arith.mulf %40, %40 : vector<8x32xf32>
    %cst_19 = arith.constant dense<0.000000e+00> : vector<8xf32>
    %42 = vector.multi_reduction <add>, %41, %cst_19 [1] : vector<8x32xf32> to vector<8xf32>
    %43 = vector.shape_cast %42 : vector<8xf32> to vector<8x1xf32>
    %cst_20 = arith.constant 3.200000e+01 : f32
    %44 = vector.broadcast %cst_20 : f32 to vector<8x1xf32>
    %45 = arith.divf %43, %44 : vector<8x1xf32>
    %46 = vector.broadcast %38 : vector<8x1xf32> to vector<8x32xf32>
    %47 = arith.subf %34, %46 : vector<8x32xf32>
    %cst_21 = arith.constant 9.99999974E-6 : f32
    %48 = vector.broadcast %cst_21 : f32 to vector<8x1xf32>
    %49 = arith.addf %45, %48 : vector<8x1xf32>
    %50 = math.rsqrt %49 : vector<8x1xf32>
    %51 = vector.broadcast %50 : vector<8x1xf32> to vector<8x32xf32>
    %52 = arith.mulf %47, %51 : vector<8x32xf32>
    %53 = vector.broadcast %5 : vector<1x32xf32> to vector<8x32xf32>
    %54 = arith.mulf %52, %53 : vector<8x32xf32>
    %55 = vector.broadcast %7 : vector<1x32xf32> to vector<8x32xf32>
    %56 = arith.addf %54, %55 : vector<8x32xf32>
    %c0_22 = arith.constant 0 : index
    %c0_23 = arith.constant 0 : index
    %c0_24 = arith.constant 0 : index
    %57 = vector.load %arg8[%c0_22, %c0_23, %c0_24] : memref<1x32x32xf32, #tpu.memory_space<vmem>>, vector<1x32x32xf32>
    %58 = vector.shape_cast %57 : vector<1x32x32xf32> to vector<32x32xf32>
    %cst_25 = arith.constant dense<0.000000e+00> : vector<12x32xf32>
    %59 = tpu.matmul %29, %58, %cst_25 {dimension_numbers = #tpu.dot_dimension_numbers<[1], [0], [0], [1], [0, 0, 1, 1], [], []>} : vector<12x32xf32>, vector<32x32xf32>, vector<12x32xf32> -> vector<12x32xf32>
    %c0_26 = arith.constant 0 : index
    %c0_27 = arith.constant 0 : index
    %c0_28 = arith.constant 0 : index
    %60 = vector.load %arg9[%c0_26, %c0_27, %c0_28] : memref<1x1x32xf32, #tpu.memory_space<vmem>>, vector<1x1x32xf32>
    %61 = vector.shape_cast %60 : vector<1x1x32xf32> to vector<1x32xf32>
    %62 = vector.broadcast %61 : vector<1x32xf32> to vector<12x32xf32>
    %63 = arith.addf %59, %62 : vector<12x32xf32>
    %c0_29 = arith.constant 0 : index
    %c0_30 = arith.constant 0 : index
    %c0_31 = arith.constant 0 : index
    %64 = vector.load %arg10[%c0_29, %c0_30, %c0_31] : memref<1x32x64xf32, #tpu.memory_space<vmem>>, vector<1x32x64xf32>
    %65 = vector.shape_cast %64 : vector<1x32x64xf32> to vector<32x64xf32>
    %cst_32 = arith.constant dense<0.000000e+00> : vector<8x64xf32>
    %66 = tpu.matmul %56, %65, %cst_32 {dimension_numbers = #tpu.dot_dimension_numbers<[1], [0], [0], [1], [0, 0, 1, 1], [], []>} : vector<8x32xf32>, vector<32x64xf32>, vector<8x64xf32> -> vector<8x64xf32>
    %c0_33 = arith.constant 0 : index
    %c0_34 = arith.constant 0 : index
    %c0_35 = arith.constant 0 : index
    %67 = vector.load %arg11[%c0_33, %c0_34, %c0_35] : memref<1x1x64xf32, #tpu.memory_space<vmem>>, vector<1x1x64xf32>
    %68 = vector.shape_cast %67 : vector<1x1x64xf32> to vector<1x64xf32>
    %69 = vector.broadcast %68 : vector<1x64xf32> to vector<8x64xf32>
    %70 = arith.addf %66, %69 : vector<8x64xf32>
    %71 = vector.extract_strided_slice %70 {offsets = [0, 0], sizes = [8, 32], strides = [1, 1]} : vector<8x64xf32> to vector<8x32xf32>
    %72 = vector.extract_strided_slice %70 {offsets = [0, 32], sizes = [8, 32], strides = [1, 1]} : vector<8x64xf32> to vector<8x32xf32>
    %c0_36 = arith.constant 0 : index
    %c0_37 = arith.constant 0 : index
    %73 = vector.load %arg5[%c0_36, %c0_37] : memref<12x8xf32, #tpu.memory_space<vmem>>, vector<12x8xf32>
    %74 = vector.extract_strided_slice %63 {offsets = [0, 0], sizes = [12, 8], strides = [1, 1]} : vector<12x32xf32> to vector<12x8xf32>
    %75 = vector.extract_strided_slice %71 {offsets = [0, 0], sizes = [8, 8], strides = [1, 1]} : vector<8x32xf32> to vector<8x8xf32>
    %76 = vector.extract_strided_slice %72 {offsets = [0, 0], sizes = [8, 8], strides = [1, 1]} : vector<8x32xf32> to vector<8x8xf32>
    %cst_38 = arith.constant dense<0.000000e+00> : vector<12x8xf32>
    %77 = tpu.matmul %74, %75, %cst_38 {dimension_numbers = #tpu.dot_dimension_numbers<[1], [1], [0], [0], [0, 0, 1, 0], [], []>} : vector<12x8xf32>, vector<8x8xf32>, vector<12x8xf32> -> vector<12x8xf32>
    %78 = arith.addf %77, %73 : vector<12x8xf32>
    %cst_39 = arith.constant dense<0xFF800000> : vector<12xf32>
    %79 = vector.multi_reduction <maximumf>, %78, %cst_39 [1] : vector<12x8xf32> to vector<12xf32>
    %80 = vector.shape_cast %79 : vector<12xf32> to vector<12x1xf32>
    %81 = vector.broadcast %80 : vector<12x1xf32> to vector<12x8xf32>
    %82 = arith.subf %78, %81 : vector<12x8xf32>
    %83 = math.exp %82 : vector<12x8xf32>
    %cst_40 = arith.constant dense<0.000000e+00> : vector<12xf32>
    %84 = vector.multi_reduction <add>, %83, %cst_40 [1] : vector<12x8xf32> to vector<12xf32>
    %85 = vector.shape_cast %84 : vector<12xf32> to vector<12x1xf32>
    %86 = vector.broadcast %85 : vector<12x1xf32> to vector<12x8xf32>
    %87 = arith.divf %83, %86 : vector<12x8xf32>
    %cst_41 = arith.constant dense<0.000000e+00> : vector<12x8xf32>
    %88 = tpu.matmul %87, %76, %cst_41 {dimension_numbers = #tpu.dot_dimension_numbers<[1], [0], [0], [1], [0, 0, 1, 1], [], []>} : vector<12x8xf32>, vector<8x8xf32>, vector<12x8xf32> -> vector<12x8xf32>
    %89 = vector.extract_strided_slice %63 {offsets = [0, 8], sizes = [12, 8], strides = [1, 1]} : vector<12x32xf32> to vector<12x8xf32>
    %90 = vector.extract_strided_slice %71 {offsets = [0, 8], sizes = [8, 8], strides = [1, 1]} : vector<8x32xf32> to vector<8x8xf32>
    %91 = vector.extract_strided_slice %72 {offsets = [0, 8], sizes = [8, 8], strides = [1, 1]} : vector<8x32xf32> to vector<8x8xf32>
    %cst_42 = arith.constant dense<0.000000e+00> : vector<12x8xf32>
    %92 = tpu.matmul %89, %90, %cst_42 {dimension_numbers = #tpu.dot_dimension_numbers<[1], [1], [0], [0], [0, 0, 1, 0], [], []>} : vector<12x8xf32>, vector<8x8xf32>, vector<12x8xf32> -> vector<12x8xf32>
    %93 = arith.addf %92, %73 : vector<12x8xf32>
    %cst_43 = arith.constant dense<0xFF800000> : vector<12xf32>
    %94 = vector.multi_reduction <maximumf>, %93, %cst_43 [1] : vector<12x8xf32> to vector<12xf32>
    %95 = vector.shape_cast %94 : vector<12xf32> to vector<12x1xf32>
    %96 = vector.broadcast %95 : vector<12x1xf32> to vector<12x8xf32>
    %97 = arith.subf %93, %96 : vector<12x8xf32>
    %98 = math.exp %97 : vector<12x8xf32>
    %cst_44 = arith.constant dense<0.000000e+00> : vector<12xf32>
    %99 = vector.multi_reduction <add>, %98, %cst_44 [1] : vector<12x8xf32> to vector<12xf32>
    %100 = vector.shape_cast %99 : vector<12xf32> to vector<12x1xf32>
    %101 = vector.broadcast %100 : vector<12x1xf32> to vector<12x8xf32>
    %102 = arith.divf %98, %101 : vector<12x8xf32>
    %cst_45 = arith.constant dense<0.000000e+00> : vector<12x8xf32>
    %103 = tpu.matmul %102, %91, %cst_45 {dimension_numbers = #tpu.dot_dimension_numbers<[1], [0], [0], [1], [0, 0, 1, 1], [], []>} : vector<12x8xf32>, vector<8x8xf32>, vector<12x8xf32> -> vector<12x8xf32>
    %104 = vector.extract_strided_slice %63 {offsets = [0, 16], sizes = [12, 8], strides = [1, 1]} : vector<12x32xf32> to vector<12x8xf32>
    %105 = vector.extract_strided_slice %71 {offsets = [0, 16], sizes = [8, 8], strides = [1, 1]} : vector<8x32xf32> to vector<8x8xf32>
    %106 = vector.extract_strided_slice %72 {offsets = [0, 16], sizes = [8, 8], strides = [1, 1]} : vector<8x32xf32> to vector<8x8xf32>
    %cst_46 = arith.constant dense<0.000000e+00> : vector<12x8xf32>
    %107 = tpu.matmul %104, %105, %cst_46 {dimension_numbers = #tpu.dot_dimension_numbers<[1], [1], [0], [0], [0, 0, 1, 0], [], []>} : vector<12x8xf32>, vector<8x8xf32>, vector<12x8xf32> -> vector<12x8xf32>
    %108 = arith.addf %107, %73 : vector<12x8xf32>
    %cst_47 = arith.constant dense<0xFF800000> : vector<12xf32>
    %109 = vector.multi_reduction <maximumf>, %108, %cst_47 [1] : vector<12x8xf32> to vector<12xf32>
    %110 = vector.shape_cast %109 : vector<12xf32> to vector<12x1xf32>
    %111 = vector.broadcast %110 : vector<12x1xf32> to vector<12x8xf32>
    %112 = arith.subf %108, %111 : vector<12x8xf32>
    %113 = math.exp %112 : vector<12x8xf32>
    %cst_48 = arith.constant dense<0.000000e+00> : vector<12xf32>
    %114 = vector.multi_reduction <add>, %113, %cst_48 [1] : vector<12x8xf32> to vector<12xf32>
    %115 = vector.shape_cast %114 : vector<12xf32> to vector<12x1xf32>
    %116 = vector.broadcast %115 : vector<12x1xf32> to vector<12x8xf32>
    %117 = arith.divf %113, %116 : vector<12x8xf32>
    %cst_49 = arith.constant dense<0.000000e+00> : vector<12x8xf32>
    %118 = tpu.matmul %117, %106, %cst_49 {dimension_numbers = #tpu.dot_dimension_numbers<[1], [0], [0], [1], [0, 0, 1, 1], [], []>} : vector<12x8xf32>, vector<8x8xf32>, vector<12x8xf32> -> vector<12x8xf32>
    %119 = vector.extract_strided_slice %63 {offsets = [0, 24], sizes = [12, 8], strides = [1, 1]} : vector<12x32xf32> to vector<12x8xf32>
    %120 = vector.extract_strided_slice %71 {offsets = [0, 24], sizes = [8, 8], strides = [1, 1]} : vector<8x32xf32> to vector<8x8xf32>
    %121 = vector.extract_strided_slice %72 {offsets = [0, 24], sizes = [8, 8], strides = [1, 1]} : vector<8x32xf32> to vector<8x8xf32>
    %cst_50 = arith.constant dense<0.000000e+00> : vector<12x8xf32>
    %122 = tpu.matmul %119, %120, %cst_50 {dimension_numbers = #tpu.dot_dimension_numbers<[1], [1], [0], [0], [0, 0, 1, 0], [], []>} : vector<12x8xf32>, vector<8x8xf32>, vector<12x8xf32> -> vector<12x8xf32>
    %123 = arith.addf %122, %73 : vector<12x8xf32>
    %cst_51 = arith.constant dense<0xFF800000> : vector<12xf32>
    %124 = vector.multi_reduction <maximumf>, %123, %cst_51 [1] : vector<12x8xf32> to vector<12xf32>
    %125 = vector.shape_cast %124 : vector<12xf32> to vector<12x1xf32>
    %126 = vector.broadcast %125 : vector<12x1xf32> to vector<12x8xf32>
    %127 = arith.subf %123, %126 : vector<12x8xf32>
    %128 = math.exp %127 : vector<12x8xf32>
    %cst_52 = arith.constant dense<0.000000e+00> : vector<12xf32>
    %129 = vector.multi_reduction <add>, %128, %cst_52 [1] : vector<12x8xf32> to vector<12xf32>
    %130 = vector.shape_cast %129 : vector<12xf32> to vector<12x1xf32>
    %131 = vector.broadcast %130 : vector<12x1xf32> to vector<12x8xf32>
    %132 = arith.divf %128, %131 : vector<12x8xf32>
    %cst_53 = arith.constant dense<0.000000e+00> : vector<12x8xf32>
    %133 = tpu.matmul %132, %121, %cst_53 {dimension_numbers = #tpu.dot_dimension_numbers<[1], [0], [0], [1], [0, 0, 1, 1], [], []>} : vector<12x8xf32>, vector<8x8xf32>, vector<12x8xf32> -> vector<12x8xf32>
    %134 = tpu.concatenate %88, %103, %118, %133 in 1 : vector<12x8xf32>, vector<12x8xf32>, vector<12x8xf32>, vector<12x8xf32> -> vector<12x32xf32>
    %c0_54 = arith.constant 0 : index
    %c0_55 = arith.constant 0 : index
    %c0_56 = arith.constant 0 : index
    %135 = vector.load %arg12[%c0_54, %c0_55, %c0_56] : memref<1x32x32xf32, #tpu.memory_space<vmem>>, vector<1x32x32xf32>
    %136 = vector.shape_cast %135 : vector<1x32x32xf32> to vector<32x32xf32>
    %cst_57 = arith.constant dense<0.000000e+00> : vector<12x32xf32>
    %137 = tpu.matmul %134, %136, %cst_57 {dimension_numbers = #tpu.dot_dimension_numbers<[1], [0], [0], [1], [0, 0, 1, 1], [], []>} : vector<12x32xf32>, vector<32x32xf32>, vector<12x32xf32> -> vector<12x32xf32>
    %c0_58 = arith.constant 0 : index
    %c0_59 = arith.constant 0 : index
    %c0_60 = arith.constant 0 : index
    %138 = vector.load %arg13[%c0_58, %c0_59, %c0_60] : memref<1x1x32xf32, #tpu.memory_space<vmem>>, vector<1x1x32xf32>
    %139 = vector.shape_cast %138 : vector<1x1x32xf32> to vector<1x32xf32>
    %140 = vector.broadcast %139 : vector<1x32xf32> to vector<12x32xf32>
    %141 = arith.addf %137, %140 : vector<12x32xf32>
    %142 = arith.addf %3, %141 : vector<12x32xf32>
    %c0_61 = arith.constant 0 : index
    %c0_62 = arith.constant 0 : index
    %c0_63 = arith.constant 0 : index
    %143 = vector.load %arg14[%c0_61, %c0_62, %c0_63] : memref<1x1x32xf32, #tpu.memory_space<vmem>>, vector<1x1x32xf32>
    %144 = vector.shape_cast %143 : vector<1x1x32xf32> to vector<1x32xf32>
    %c0_64 = arith.constant 0 : index
    %c0_65 = arith.constant 0 : index
    %c0_66 = arith.constant 0 : index
    %145 = vector.load %arg15[%c0_64, %c0_65, %c0_66] : memref<1x1x32xf32, #tpu.memory_space<vmem>>, vector<1x1x32xf32>
    %146 = vector.shape_cast %145 : vector<1x1x32xf32> to vector<1x32xf32>
    %cst_67 = arith.constant dense<0.000000e+00> : vector<12xf32>
    %147 = vector.multi_reduction <add>, %142, %cst_67 [1] : vector<12x32xf32> to vector<12xf32>
    %148 = vector.shape_cast %147 : vector<12xf32> to vector<12x1xf32>
    %cst_68 = arith.constant 3.200000e+01 : f32
    %149 = vector.broadcast %cst_68 : f32 to vector<12x1xf32>
    %150 = arith.divf %148, %149 : vector<12x1xf32>
    %151 = vector.broadcast %150 : vector<12x1xf32> to vector<12x32xf32>
    %152 = arith.subf %142, %151 : vector<12x32xf32>
    %153 = arith.mulf %152, %152 : vector<12x32xf32>
    %cst_69 = arith.constant dense<0.000000e+00> : vector<12xf32>
    %154 = vector.multi_reduction <add>, %153, %cst_69 [1] : vector<12x32xf32> to vector<12xf32>
    %155 = vector.shape_cast %154 : vector<12xf32> to vector<12x1xf32>
    %cst_70 = arith.constant 3.200000e+01 : f32
    %156 = vector.broadcast %cst_70 : f32 to vector<12x1xf32>
    %157 = arith.divf %155, %156 : vector<12x1xf32>
    %158 = vector.broadcast %150 : vector<12x1xf32> to vector<12x32xf32>
    %159 = arith.subf %142, %158 : vector<12x32xf32>
    %cst_71 = arith.constant 9.99999974E-6 : f32
    %160 = vector.broadcast %cst_71 : f32 to vector<12x1xf32>
    %161 = arith.addf %157, %160 : vector<12x1xf32>
    %162 = math.rsqrt %161 : vector<12x1xf32>
    %163 = vector.broadcast %162 : vector<12x1xf32> to vector<12x32xf32>
    %164 = arith.mulf %159, %163 : vector<12x32xf32>
    %165 = vector.broadcast %144 : vector<1x32xf32> to vector<12x32xf32>
    %166 = arith.mulf %164, %165 : vector<12x32xf32>
    %167 = vector.broadcast %146 : vector<1x32xf32> to vector<12x32xf32>
    %168 = arith.addf %166, %167 : vector<12x32xf32>
    %c0_72 = arith.constant 0 : index
    %c0_73 = arith.constant 0 : index
    %c0_74 = arith.constant 0 : index
    %169 = vector.load %arg16[%c0_72, %c0_73, %c0_74] : memref<1x32x128xf32, #tpu.memory_space<vmem>>, vector<1x32x128xf32>
    %170 = vector.shape_cast %169 : vector<1x32x128xf32> to vector<32x128xf32>
    %cst_75 = arith.constant dense<0.000000e+00> : vector<12x128xf32>
    %171 = tpu.matmul %168, %170, %cst_75 {dimension_numbers = #tpu.dot_dimension_numbers<[1], [0], [0], [1], [0, 0, 1, 1], [], []>} : vector<12x32xf32>, vector<32x128xf32>, vector<12x128xf32> -> vector<12x128xf32>
    %c0_76 = arith.constant 0 : index
    %c0_77 = arith.constant 0 : index
    %c0_78 = arith.constant 0 : index
    %172 = vector.load %arg17[%c0_76, %c0_77, %c0_78] : memref<1x1x128xf32, #tpu.memory_space<vmem>>, vector<1x1x128xf32>
    %173 = vector.shape_cast %172 : vector<1x1x128xf32> to vector<1x128xf32>
    %174 = vector.broadcast %173 : vector<1x128xf32> to vector<12x128xf32>
    %175 = arith.addf %171, %174 : vector<12x128xf32>
    %cst_79 = arith.constant 0.000000e+00 : f32
    %176 = vector.broadcast %cst_79 : f32 to vector<12x128xf32>
    %177 = arith.maximumf %175, %176 : vector<12x128xf32>
    %c0_80 = arith.constant 0 : index
    %c0_81 = arith.constant 0 : index
    %c0_82 = arith.constant 0 : index
    %178 = vector.load %arg18[%c0_80, %c0_81, %c0_82] : memref<1x128x32xf32, #tpu.memory_space<vmem>>, vector<1x128x32xf32>
    %179 = vector.shape_cast %178 : vector<1x128x32xf32> to vector<128x32xf32>
    %cst_83 = arith.constant dense<0.000000e+00> : vector<12x32xf32>
    %180 = tpu.matmul %177, %179, %cst_83 {dimension_numbers = #tpu.dot_dimension_numbers<[1], [0], [0], [1], [0, 0, 1, 1], [], []>} : vector<12x128xf32>, vector<128x32xf32>, vector<12x32xf32> -> vector<12x32xf32>
    %181 = arith.addf %142, %180 : vector<12x32xf32>
    %c0_84 = arith.constant 0 : index
    %c0_85 = arith.constant 0 : index
    %c0_86 = arith.constant 0 : index
    %182 = vector.load %arg19[%c0_84, %c0_85, %c0_86] : memref<1x1x32xf32, #tpu.memory_space<vmem>>, vector<1x1x32xf32>
    %183 = vector.shape_cast %182 : vector<1x1x32xf32> to vector<1x32xf32>
    %184 = vector.broadcast %183 : vector<1x32xf32> to vector<12x32xf32>
    %185 = arith.addf %181, %184 : vector<12x32xf32>
    %c0_87 = arith.constant 0 : index
    %c0_88 = arith.constant 0 : index
    %186 = vector.load %arg23[%c0_87, %c0_88] : memref<12x32xf32, #tpu.memory_space<vmem>>, vector<12x32xf32>
    tpu.vector_store %arg23[%c0_87, %c0_88], %185 {strides = array<i32>} : memref<12x32xf32, #tpu.memory_space<vmem>>, vector<12x32xf32>,
    %c1_i32 = arith.constant 1 : i32
    %187 = arith.cmpi eq, %arg0, %c1_i32 : i32
    %188 = arith.extui %187 : i1 to i32
    %c0_i32_89 = arith.constant 0 : i32
    %189 = arith.cmpi ne, %188, %c0_i32_89 : i32
    scf.if %189 {
      %c0_90 = arith.constant 0 : index
      %c0_91 = arith.constant 0 : index
      %190 = vector.load %arg20[%c0_90, %c0_91] : memref<1x32xf32, #tpu.memory_space<vmem>>, vector<1x32xf32>
      %c0_92 = arith.constant 0 : index
      %c0_93 = arith.constant 0 : index
      %191 = vector.load %arg21[%c0_92, %c0_93] : memref<1x32xf32, #tpu.memory_space<vmem>>, vector<1x32xf32>
      %cst_94 = arith.constant dense<0.000000e+00> : vector<12xf32>
      %192 = vector.multi_reduction <add>, %185, %cst_94 [1] : vector<12x32xf32> to vector<12xf32>
      %193 = vector.shape_cast %192 : vector<12xf32> to vector<12x1xf32>
      %cst_95 = arith.constant 3.200000e+01 : f32
      %194 = vector.broadcast %cst_95 : f32 to vector<12x1xf32>
      %195 = arith.divf %193, %194 : vector<12x1xf32>
      %196 = vector.broadcast %195 : vector<12x1xf32> to vector<12x32xf32>
      %197 = arith.subf %185, %196 : vector<12x32xf32>
      %198 = arith.mulf %197, %197 : vector<12x32xf32>
      %cst_96 = arith.constant dense<0.000000e+00> : vector<12xf32>
      %199 = vector.multi_reduction <add>, %198, %cst_96 [1] : vector<12x32xf32> to vector<12xf32>
      %200 = vector.shape_cast %199 : vector<12xf32> to vector<12x1xf32>
      %cst_97 = arith.constant 3.200000e+01 : f32
      %201 = vector.broadcast %cst_97 : f32 to vector<12x1xf32>
      %202 = arith.divf %200, %201 : vector<12x1xf32>
      %203 = vector.broadcast %195 : vector<12x1xf32> to vector<12x32xf32>
      %204 = arith.subf %185, %203 : vector<12x32xf32>
      %cst_98 = arith.constant 9.99999974E-6 : f32
      %205 = vector.broadcast %cst_98 : f32 to vector<12x1xf32>
      %206 = arith.addf %202, %205 : vector<12x1xf32>
      %207 = math.rsqrt %206 : vector<12x1xf32>
      %208 = vector.broadcast %207 : vector<12x1xf32> to vector<12x32xf32>
      %209 = arith.mulf %204, %208 : vector<12x32xf32>
      %210 = vector.broadcast %190 : vector<1x32xf32> to vector<12x32xf32>
      %211 = arith.mulf %209, %210 : vector<12x32xf32>
      %212 = vector.broadcast %191 : vector<1x32xf32> to vector<12x32xf32>
      %213 = arith.addf %211, %212 : vector<12x32xf32>
      %c0_99 = arith.constant 0 : index
      %c0_100 = arith.constant 0 : index
      %214 = vector.load %arg22[%c0_99, %c0_100] : memref<12x32xf32, #tpu.memory_space<vmem>>, vector<12x32xf32>
      tpu.vector_store %arg22[%c0_99, %c0_100], %213 {strides = array<i32>} : memref<12x32xf32, #tpu.memory_space<vmem>>, vector<12x32xf32>,
    } else {
    }
    return
  }
  func.func @transform_0(%arg0: i32) -> (i32, i32) {
    %c0_i32 = arith.constant 0 : i32
    %c0_i32_0 = arith.constant 0 : i32
    %c0_i32_1 = arith.constant 0 : i32
    return %c0_i32, %c0_i32_0 : i32, i32
  }
  func.func @transform_1(%arg0: i32) -> (i32, i32) {
    %c0_i32 = arith.constant 0 : i32
    %c0_i32_0 = arith.constant 0 : i32
    %c0_i32_1 = arith.constant 0 : i32
    return %c0_i32, %c0_i32_0 : i32, i32
  }
  func.func @transform_2(%arg0: i32) -> (i32, i32) {
    %c0_i32 = arith.constant 0 : i32
    %c0_i32_0 = arith.constant 0 : i32
    %c0_i32_1 = arith.constant 0 : i32
    return %c0_i32, %c0_i32_0 : i32, i32
  }
  func.func @transform_3(%arg0: i32) -> (i32, i32) {
    %c0_i32 = arith.constant 0 : i32
    %c0_i32_0 = arith.constant 0 : i32
    %c0_i32_1 = arith.constant 0 : i32
    return %c0_i32, %c0_i32_0 : i32, i32
  }
  func.func @transform_4(%arg0: i32) -> (i32, i32) {
    %c0_i32 = arith.constant 0 : i32
    %c0_i32_0 = arith.constant 0 : i32
    %c0_i32_1 = arith.constant 0 : i32
    return %c0_i32, %c0_i32_0 : i32, i32
  }
  func.func @transform_5(%arg0: i32) -> (i32, i32, i32) {
    %c0_i32 = arith.constant 0 : i32
    %c0_i32_0 = arith.constant 0 : i32
    %c0_i32_1 = arith.constant 0 : i32
    return %arg0, %c0_i32, %c0_i32_0 : i32, i32, i32
  }
  func.func @transform_6(%arg0: i32) -> (i32, i32, i32) {
    %c0_i32 = arith.constant 0 : i32
    %c0_i32_0 = arith.constant 0 : i32
    %c0_i32_1 = arith.constant 0 : i32
    return %arg0, %c0_i32, %c0_i32_0 : i32, i32, i32
  }
  func.func @transform_7(%arg0: i32) -> (i32, i32, i32) {
    %c0_i32 = arith.constant 0 : i32
    %c0_i32_0 = arith.constant 0 : i32
    %c0_i32_1 = arith.constant 0 : i32
    return %arg0, %c0_i32, %c0_i32_0 : i32, i32, i32
  }
  func.func @transform_8(%arg0: i32) -> (i32, i32, i32) {
    %c0_i32 = arith.constant 0 : i32
    %c0_i32_0 = arith.constant 0 : i32
    %c0_i32_1 = arith.constant 0 : i32
    return %arg0, %c0_i32, %c0_i32_0 : i32, i32, i32
  }
  func.func @transform_9(%arg0: i32) -> (i32, i32, i32) {
    %c0_i32 = arith.constant 0 : i32
    %c0_i32_0 = arith.constant 0 : i32
    %c0_i32_1 = arith.constant 0 : i32
    return %arg0, %c0_i32, %c0_i32_0 : i32, i32, i32
  }
  func.func @transform_10(%arg0: i32) -> (i32, i32, i32) {
    %c0_i32 = arith.constant 0 : i32
    %c0_i32_0 = arith.constant 0 : i32
    %c0_i32_1 = arith.constant 0 : i32
    return %arg0, %c0_i32, %c0_i32_0 : i32, i32, i32
  }
  func.func @transform_11(%arg0: i32) -> (i32, i32, i32) {
    %c0_i32 = arith.constant 0 : i32
    %c0_i32_0 = arith.constant 0 : i32
    %c0_i32_1 = arith.constant 0 : i32
    return %arg0, %c0_i32, %c0_i32_0 : i32, i32, i32
  }
  func.func @transform_12(%arg0: i32) -> (i32, i32, i32) {
    %c0_i32 = arith.constant 0 : i32
    %c0_i32_0 = arith.constant 0 : i32
    %c0_i32_1 = arith.constant 0 : i32
    return %arg0, %c0_i32, %c0_i32_0 : i32, i32, i32
  }
  func.func @transform_13(%arg0: i32) -> (i32, i32, i32) {
    %c0_i32 = arith.constant 0 : i32
    %c0_i32_0 = arith.constant 0 : i32
    %c0_i32_1 = arith.constant 0 : i32
    return %arg0, %c0_i32, %c0_i32_0 : i32, i32, i32
  }
  func.func @transform_14(%arg0: i32) -> (i32, i32, i32) {
    %c0_i32 = arith.constant 0 : i32
    %c0_i32_0 = arith.constant 0 : i32
    %c0_i32_1 = arith.constant 0 : i32
    return %arg0, %c0_i32, %c0_i32_0 : i32, i32, i32
  }
  func.func @transform_15(%arg0: i32) -> (i32, i32, i32) {
    %c0_i32 = arith.constant 0 : i32
    %c0_i32_0 = arith.constant 0 : i32
    %c0_i32_1 = arith.constant 0 : i32
    return %arg0, %c0_i32, %c0_i32_0 : i32, i32, i32
  }
  func.func @transform_16(%arg0: i32) -> (i32, i32, i32) {
    %c0_i32 = arith.constant 0 : i32
    %c0_i32_0 = arith.constant 0 : i32
    %c0_i32_1 = arith.constant 0 : i32
    return %arg0, %c0_i32, %c0_i32_0 : i32, i32, i32
  }
  func.func @transform_17(%arg0: i32) -> (i32, i32, i32) {
    %c0_i32 = arith.constant 0 : i32
    %c0_i32_0 = arith.constant 0 : i32
    %c0_i32_1 = arith.constant 0 : i32
    return %arg0, %c0_i32, %c0_i32_0 : i32, i32, i32
  }
  func.func @transform_18(%arg0: i32) -> (i32, i32, i32) {
    %c0_i32 = arith.constant 0 : i32
    %c0_i32_0 = arith.constant 0 : i32
    %c0_i32_1 = arith.constant 0 : i32
    return %arg0, %c0_i32, %c0_i32_0 : i32, i32, i32
  }
  func.func @transform_19(%arg0: i32) -> (i32, i32) {
    %c0_i32 = arith.constant 0 : i32
    %c0_i32_0 = arith.constant 0 : i32
    %c0_i32_1 = arith.constant 0 : i32
    return %c0_i32, %c0_i32_0 : i32, i32
  }
  func.func @transform_20(%arg0: i32) -> (i32, i32) {
    %c0_i32 = arith.constant 0 : i32
    %c0_i32_0 = arith.constant 0 : i32
    %c0_i32_1 = arith.constant 0 : i32
    return %c0_i32, %c0_i32_0 : i32, i32
  }
  func.func @transform_21(%arg0: i32) -> (i32, i32) {
    %c0_i32 = arith.constant 0 : i32
    %c0_i32_0 = arith.constant 0 : i32
    %c0_i32_1 = arith.constant 0 : i32
    return %c0_i32, %c0_i32_0 : i32, i32
  }
}

module attributes {stable_mosaic.version = 11 : i64} {
  func.func @_encoder_stack_kernel(%arg0: i32, %arg1: memref<12x32xf32, #tpu.memory_space<vmem>>, %arg2: memref<12x32xf32, #tpu.memory_space<vmem>>, %arg3: memref<12x32xf32, #tpu.memory_space<vmem>>, %arg4: memref<12x32xf32, #tpu.memory_space<vmem>>, %arg5: memref<12x12xf32, #tpu.memory_space<vmem>>, %arg6: memref<1x1x32xf32, #tpu.memory_space<vmem>>, %arg7: memref<1x1x32xf32, #tpu.memory_space<vmem>>, %arg8: memref<1x32x32xf32, #tpu.memory_space<vmem>>, %arg9: memref<1x1x32xf32, #tpu.memory_space<vmem>>, %arg10: memref<1x32x64xf32, #tpu.memory_space<vmem>>, %arg11: memref<1x1x64xf32, #tpu.memory_space<vmem>>, %arg12: memref<1x32x32xf32, #tpu.memory_space<vmem>>, %arg13: memref<1x1x32xf32, #tpu.memory_space<vmem>>, %arg14: memref<1x1x32xf32, #tpu.memory_space<vmem>>, %arg15: memref<1x1x32xf32, #tpu.memory_space<vmem>>, %arg16: memref<1x32x128xf32, #tpu.memory_space<vmem>>, %arg17: memref<1x1x128xf32, #tpu.memory_space<vmem>>, %arg18: memref<1x128x32xf32, #tpu.memory_space<vmem>>, %arg19: memref<1x1x32xf32, #tpu.memory_space<vmem>>, %arg20: memref<1x32xf32, #tpu.memory_space<vmem>>, %arg21: memref<1x32xf32, #tpu.memory_space<vmem>>, %arg22: memref<12x32xf32, #tpu.memory_space<vmem>>, %arg23: memref<12x32xf32, #tpu.memory_space<vmem>>) attributes {dimension_semantics = [#tpu.dimension_semantics<arbitrary>], iteration_bounds = array<i64: 3>, scalar_prefetch = 0 : i64, scratch_operands = 1 : i64, tpu.core_type = #tpu.core_type<tc>, window_params = [{pipeline_mode = #tpu.pipeline_mode<synchronous>, transform_indices = @transform_0, window_bounds = array<i64: 12, 32>}, {pipeline_mode = #tpu.pipeline_mode<synchronous>, transform_indices = @transform_1, window_bounds = array<i64: 12, 32>}, {pipeline_mode = #tpu.pipeline_mode<synchronous>, transform_indices = @transform_2, window_bounds = array<i64: 12, 32>}, {pipeline_mode = #tpu.pipeline_mode<synchronous>, transform_indices = @transform_3, window_bounds = array<i64: 12, 32>}, {pipeline_mode = #tpu.pipeline_mode<synchronous>, transform_indices = @transform_4, window_bounds = array<i64: 12, 12>}, {transform_indices = @transform_5, window_bounds = array<i64: 1, 1, 32>}, {transform_indices = @transform_6, window_bounds = array<i64: 1, 1, 32>}, {transform_indices = @transform_7, window_bounds = array<i64: 1, 32, 32>}, {transform_indices = @transform_8, window_bounds = array<i64: 1, 1, 32>}, {transform_indices = @transform_9, window_bounds = array<i64: 1, 32, 64>}, {transform_indices = @transform_10, window_bounds = array<i64: 1, 1, 64>}, {transform_indices = @transform_11, window_bounds = array<i64: 1, 32, 32>}, {transform_indices = @transform_12, window_bounds = array<i64: 1, 1, 32>}, {transform_indices = @transform_13, window_bounds = array<i64: 1, 1, 32>}, {transform_indices = @transform_14, window_bounds = array<i64: 1, 1, 32>}, {transform_indices = @transform_15, window_bounds = array<i64: 1, 32, 128>}, {transform_indices = @transform_16, window_bounds = array<i64: 1, 1, 128>}, {transform_indices = @transform_17, window_bounds = array<i64: 1, 128, 32>}, {transform_indices = @transform_18, window_bounds = array<i64: 1, 1, 32>}, {pipeline_mode = #tpu.pipeline_mode<synchronous>, transform_indices = @transform_19, window_bounds = array<i64: 1, 32>}, {pipeline_mode = #tpu.pipeline_mode<synchronous>, transform_indices = @transform_20, window_bounds = array<i64: 1, 32>}, {pipeline_mode = #tpu.pipeline_mode<synchronous>, transform_indices = @transform_21, window_bounds = array<i64: 12, 32>}]} {
    %c0_i32 = arith.constant 0 : i32
    %0 = arith.cmpi eq, %arg0, %c0_i32 : i32
    %1 = arith.extui %0 : i1 to i32
    %c0_i32_0 = arith.constant 0 : i32
    %2 = arith.cmpi ne, %1, %c0_i32_0 : i32
    scf.if %2 {
      %c0_85 = arith.constant 0 : index
      %c0_86 = arith.constant 0 : index
      %185 = vector.load %arg1[%c0_85, %c0_86] : memref<12x32xf32, #tpu.memory_space<vmem>>, vector<12x32xf32>
      %cst_87 = arith.constant 5.65685415 : f32
      %186 = vector.broadcast %cst_87 : f32 to vector<12x32xf32>
      %187 = arith.mulf %186, %185 : vector<12x32xf32>
      %c0_88 = arith.constant 0 : index
      %c0_89 = arith.constant 0 : index
      %188 = vector.load %arg3[%c0_88, %c0_89] : memref<12x32xf32, #tpu.memory_space<vmem>>, vector<12x32xf32>
      %189 = arith.addf %187, %188 : vector<12x32xf32>
      %c0_90 = arith.constant 0 : index
      %c0_91 = arith.constant 0 : index
      %190 = vector.load %arg23[%c0_90, %c0_91] : memref<12x32xf32, #tpu.memory_space<vmem>>, vector<12x32xf32>
      tpu.vector_store %arg23[%c0_90, %c0_91], %189 {strides = array<i32>} : memref<12x32xf32, #tpu.memory_space<vmem>>, vector<12x32xf32>,
    } else {
    }
    %c0 = arith.constant 0 : index
    %c0_1 = arith.constant 0 : index
    %3 = vector.load %arg23[%c0, %c0_1] : memref<12x32xf32, #tpu.memory_space<vmem>>, vector<12x32xf32>
    %c0_2 = arith.constant 0 : index
    %c0_3 = arith.constant 0 : index
    %c0_4 = arith.constant 0 : index
    %4 = vector.load %arg6[%c0_2, %c0_3, %c0_4] : memref<1x1x32xf32, #tpu.memory_space<vmem>>, vector<1x1x32xf32>
    %5 = vector.shape_cast %4 : vector<1x1x32xf32> to vector<1x32xf32>
    %c0_5 = arith.constant 0 : index
    %c0_6 = arith.constant 0 : index
    %c0_7 = arith.constant 0 : index
    %6 = vector.load %arg7[%c0_5, %c0_6, %c0_7] : memref<1x1x32xf32, #tpu.memory_space<vmem>>, vector<1x1x32xf32>
    %7 = vector.shape_cast %6 : vector<1x1x32xf32> to vector<1x32xf32>
    %cst = arith.constant dense<0.000000e+00> : vector<12xf32>
    %8 = vector.multi_reduction <add>, %3, %cst [1] : vector<12x32xf32> to vector<12xf32>
    %9 = vector.shape_cast %8 : vector<12xf32> to vector<12x1xf32>
    %cst_8 = arith.constant 3.200000e+01 : f32
    %10 = vector.broadcast %cst_8 : f32 to vector<12x1xf32>
    %11 = arith.divf %9, %10 : vector<12x1xf32>
    %12 = vector.broadcast %11 : vector<12x1xf32> to vector<12x32xf32>
    %13 = arith.subf %3, %12 : vector<12x32xf32>
    %14 = arith.mulf %13, %13 : vector<12x32xf32>
    %cst_9 = arith.constant dense<0.000000e+00> : vector<12xf32>
    %15 = vector.multi_reduction <add>, %14, %cst_9 [1] : vector<12x32xf32> to vector<12xf32>
    %16 = vector.shape_cast %15 : vector<12xf32> to vector<12x1xf32>
    %cst_10 = arith.constant 3.200000e+01 : f32
    %17 = vector.broadcast %cst_10 : f32 to vector<12x1xf32>
    %18 = arith.divf %16, %17 : vector<12x1xf32>
    %19 = vector.broadcast %11 : vector<12x1xf32> to vector<12x32xf32>
    %20 = arith.subf %3, %19 : vector<12x32xf32>
    %cst_11 = arith.constant 9.99999974E-6 : f32
    %21 = vector.broadcast %cst_11 : f32 to vector<12x1xf32>
    %22 = arith.addf %18, %21 : vector<12x1xf32>
    %23 = math.rsqrt %22 : vector<12x1xf32>
    %24 = vector.broadcast %23 : vector<12x1xf32> to vector<12x32xf32>
    %25 = arith.mulf %20, %24 : vector<12x32xf32>
    %26 = vector.broadcast %5 : vector<1x32xf32> to vector<12x32xf32>
    %27 = arith.mulf %25, %26 : vector<12x32xf32>
    %28 = vector.broadcast %7 : vector<1x32xf32> to vector<12x32xf32>
    %29 = arith.addf %27, %28 : vector<12x32xf32>
    %cst_12 = arith.constant dense<0.000000e+00> : vector<12xf32>
    %30 = vector.multi_reduction <add>, %3, %cst_12 [1] : vector<12x32xf32> to vector<12xf32>
    %31 = vector.shape_cast %30 : vector<12xf32> to vector<12x1xf32>
    %cst_13 = arith.constant 3.200000e+01 : f32
    %32 = vector.broadcast %cst_13 : f32 to vector<12x1xf32>
    %33 = arith.divf %31, %32 : vector<12x1xf32>
    %34 = vector.broadcast %33 : vector<12x1xf32> to vector<12x32xf32>
    %35 = arith.subf %3, %34 : vector<12x32xf32>
    %36 = arith.mulf %35, %35 : vector<12x32xf32>
    %cst_14 = arith.constant dense<0.000000e+00> : vector<12xf32>
    %37 = vector.multi_reduction <add>, %36, %cst_14 [1] : vector<12x32xf32> to vector<12xf32>
    %38 = vector.shape_cast %37 : vector<12xf32> to vector<12x1xf32>
    %cst_15 = arith.constant 3.200000e+01 : f32
    %39 = vector.broadcast %cst_15 : f32 to vector<12x1xf32>
    %40 = arith.divf %38, %39 : vector<12x1xf32>
    %41 = vector.broadcast %33 : vector<12x1xf32> to vector<12x32xf32>
    %42 = arith.subf %3, %41 : vector<12x32xf32>
    %cst_16 = arith.constant 9.99999974E-6 : f32
    %43 = vector.broadcast %cst_16 : f32 to vector<12x1xf32>
    %44 = arith.addf %40, %43 : vector<12x1xf32>
    %45 = math.rsqrt %44 : vector<12x1xf32>
    %46 = vector.broadcast %45 : vector<12x1xf32> to vector<12x32xf32>
    %47 = arith.mulf %42, %46 : vector<12x32xf32>
    %48 = vector.broadcast %5 : vector<1x32xf32> to vector<12x32xf32>
    %49 = arith.mulf %47, %48 : vector<12x32xf32>
    %50 = vector.broadcast %7 : vector<1x32xf32> to vector<12x32xf32>
    %51 = arith.addf %49, %50 : vector<12x32xf32>
    %c0_17 = arith.constant 0 : index
    %c0_18 = arith.constant 0 : index
    %c0_19 = arith.constant 0 : index
    %52 = vector.load %arg8[%c0_17, %c0_18, %c0_19] : memref<1x32x32xf32, #tpu.memory_space<vmem>>, vector<1x32x32xf32>
    %53 = vector.shape_cast %52 : vector<1x32x32xf32> to vector<32x32xf32>
    %cst_20 = arith.constant dense<0.000000e+00> : vector<12x32xf32>
    %54 = tpu.matmul %29, %53, %cst_20 {dimension_numbers = #tpu.dot_dimension_numbers<[1], [0], [0], [1], [0, 0, 1, 1], [], []>} : vector<12x32xf32>, vector<32x32xf32>, vector<12x32xf32> -> vector<12x32xf32>
    %c0_21 = arith.constant 0 : index
    %c0_22 = arith.constant 0 : index
    %c0_23 = arith.constant 0 : index
    %55 = vector.load %arg9[%c0_21, %c0_22, %c0_23] : memref<1x1x32xf32, #tpu.memory_space<vmem>>, vector<1x1x32xf32>
    %56 = vector.shape_cast %55 : vector<1x1x32xf32> to vector<1x32xf32>
    %57 = vector.broadcast %56 : vector<1x32xf32> to vector<12x32xf32>
    %58 = arith.addf %54, %57 : vector<12x32xf32>
    %c0_24 = arith.constant 0 : index
    %c0_25 = arith.constant 0 : index
    %c0_26 = arith.constant 0 : index
    %59 = vector.load %arg10[%c0_24, %c0_25, %c0_26] : memref<1x32x64xf32, #tpu.memory_space<vmem>>, vector<1x32x64xf32>
    %60 = vector.shape_cast %59 : vector<1x32x64xf32> to vector<32x64xf32>
    %cst_27 = arith.constant dense<0.000000e+00> : vector<12x64xf32>
    %61 = tpu.matmul %51, %60, %cst_27 {dimension_numbers = #tpu.dot_dimension_numbers<[1], [0], [0], [1], [0, 0, 1, 1], [], []>} : vector<12x32xf32>, vector<32x64xf32>, vector<12x64xf32> -> vector<12x64xf32>
    %c0_28 = arith.constant 0 : index
    %c0_29 = arith.constant 0 : index
    %c0_30 = arith.constant 0 : index
    %62 = vector.load %arg11[%c0_28, %c0_29, %c0_30] : memref<1x1x64xf32, #tpu.memory_space<vmem>>, vector<1x1x64xf32>
    %63 = vector.shape_cast %62 : vector<1x1x64xf32> to vector<1x64xf32>
    %64 = vector.broadcast %63 : vector<1x64xf32> to vector<12x64xf32>
    %65 = arith.addf %61, %64 : vector<12x64xf32>
    %66 = vector.extract_strided_slice %65 {offsets = [0, 0], sizes = [12, 32], strides = [1, 1]} : vector<12x64xf32> to vector<12x32xf32>
    %67 = vector.extract_strided_slice %65 {offsets = [0, 32], sizes = [12, 32], strides = [1, 1]} : vector<12x64xf32> to vector<12x32xf32>
    %c0_31 = arith.constant 0 : index
    %c0_32 = arith.constant 0 : index
    %68 = vector.load %arg5[%c0_31, %c0_32] : memref<12x12xf32, #tpu.memory_space<vmem>>, vector<12x12xf32>
    %69 = vector.extract_strided_slice %58 {offsets = [0, 0], sizes = [12, 8], strides = [1, 1]} : vector<12x32xf32> to vector<12x8xf32>
    %70 = vector.extract_strided_slice %66 {offsets = [0, 0], sizes = [12, 8], strides = [1, 1]} : vector<12x32xf32> to vector<12x8xf32>
    %71 = vector.extract_strided_slice %67 {offsets = [0, 0], sizes = [12, 8], strides = [1, 1]} : vector<12x32xf32> to vector<12x8xf32>
    %cst_33 = arith.constant dense<0.000000e+00> : vector<12x12xf32>
    %72 = tpu.matmul %69, %70, %cst_33 {dimension_numbers = #tpu.dot_dimension_numbers<[1], [1], [0], [0], [0, 0, 1, 0], [], []>} : vector<12x8xf32>, vector<12x8xf32>, vector<12x12xf32> -> vector<12x12xf32>
    %73 = arith.addf %72, %68 : vector<12x12xf32>
    %cst_34 = arith.constant dense<0xFF800000> : vector<12xf32>
    %74 = vector.multi_reduction <maximumf>, %73, %cst_34 [1] : vector<12x12xf32> to vector<12xf32>
    %75 = vector.shape_cast %74 : vector<12xf32> to vector<12x1xf32>
    %76 = vector.broadcast %75 : vector<12x1xf32> to vector<12x12xf32>
    %77 = arith.subf %73, %76 : vector<12x12xf32>
    %78 = math.exp %77 : vector<12x12xf32>
    %cst_35 = arith.constant dense<0.000000e+00> : vector<12xf32>
    %79 = vector.multi_reduction <add>, %78, %cst_35 [1] : vector<12x12xf32> to vector<12xf32>
    %80 = vector.shape_cast %79 : vector<12xf32> to vector<12x1xf32>
    %81 = vector.broadcast %80 : vector<12x1xf32> to vector<12x12xf32>
    %82 = arith.divf %78, %81 : vector<12x12xf32>
    %cst_36 = arith.constant dense<0.000000e+00> : vector<12x8xf32>
    %83 = tpu.matmul %82, %71, %cst_36 {dimension_numbers = #tpu.dot_dimension_numbers<[1], [0], [0], [1], [0, 0, 1, 1], [], []>} : vector<12x12xf32>, vector<12x8xf32>, vector<12x8xf32> -> vector<12x8xf32>
    %84 = vector.extract_strided_slice %58 {offsets = [0, 8], sizes = [12, 8], strides = [1, 1]} : vector<12x32xf32> to vector<12x8xf32>
    %85 = vector.extract_strided_slice %66 {offsets = [0, 8], sizes = [12, 8], strides = [1, 1]} : vector<12x32xf32> to vector<12x8xf32>
    %86 = vector.extract_strided_slice %67 {offsets = [0, 8], sizes = [12, 8], strides = [1, 1]} : vector<12x32xf32> to vector<12x8xf32>
    %cst_37 = arith.constant dense<0.000000e+00> : vector<12x12xf32>
    %87 = tpu.matmul %84, %85, %cst_37 {dimension_numbers = #tpu.dot_dimension_numbers<[1], [1], [0], [0], [0, 0, 1, 0], [], []>} : vector<12x8xf32>, vector<12x8xf32>, vector<12x12xf32> -> vector<12x12xf32>
    %88 = arith.addf %87, %68 : vector<12x12xf32>
    %cst_38 = arith.constant dense<0xFF800000> : vector<12xf32>
    %89 = vector.multi_reduction <maximumf>, %88, %cst_38 [1] : vector<12x12xf32> to vector<12xf32>
    %90 = vector.shape_cast %89 : vector<12xf32> to vector<12x1xf32>
    %91 = vector.broadcast %90 : vector<12x1xf32> to vector<12x12xf32>
    %92 = arith.subf %88, %91 : vector<12x12xf32>
    %93 = math.exp %92 : vector<12x12xf32>
    %cst_39 = arith.constant dense<0.000000e+00> : vector<12xf32>
    %94 = vector.multi_reduction <add>, %93, %cst_39 [1] : vector<12x12xf32> to vector<12xf32>
    %95 = vector.shape_cast %94 : vector<12xf32> to vector<12x1xf32>
    %96 = vector.broadcast %95 : vector<12x1xf32> to vector<12x12xf32>
    %97 = arith.divf %93, %96 : vector<12x12xf32>
    %cst_40 = arith.constant dense<0.000000e+00> : vector<12x8xf32>
    %98 = tpu.matmul %97, %86, %cst_40 {dimension_numbers = #tpu.dot_dimension_numbers<[1], [0], [0], [1], [0, 0, 1, 1], [], []>} : vector<12x12xf32>, vector<12x8xf32>, vector<12x8xf32> -> vector<12x8xf32>
    %99 = vector.extract_strided_slice %58 {offsets = [0, 16], sizes = [12, 8], strides = [1, 1]} : vector<12x32xf32> to vector<12x8xf32>
    %100 = vector.extract_strided_slice %66 {offsets = [0, 16], sizes = [12, 8], strides = [1, 1]} : vector<12x32xf32> to vector<12x8xf32>
    %101 = vector.extract_strided_slice %67 {offsets = [0, 16], sizes = [12, 8], strides = [1, 1]} : vector<12x32xf32> to vector<12x8xf32>
    %cst_41 = arith.constant dense<0.000000e+00> : vector<12x12xf32>
    %102 = tpu.matmul %99, %100, %cst_41 {dimension_numbers = #tpu.dot_dimension_numbers<[1], [1], [0], [0], [0, 0, 1, 0], [], []>} : vector<12x8xf32>, vector<12x8xf32>, vector<12x12xf32> -> vector<12x12xf32>
    %103 = arith.addf %102, %68 : vector<12x12xf32>
    %cst_42 = arith.constant dense<0xFF800000> : vector<12xf32>
    %104 = vector.multi_reduction <maximumf>, %103, %cst_42 [1] : vector<12x12xf32> to vector<12xf32>
    %105 = vector.shape_cast %104 : vector<12xf32> to vector<12x1xf32>
    %106 = vector.broadcast %105 : vector<12x1xf32> to vector<12x12xf32>
    %107 = arith.subf %103, %106 : vector<12x12xf32>
    %108 = math.exp %107 : vector<12x12xf32>
    %cst_43 = arith.constant dense<0.000000e+00> : vector<12xf32>
    %109 = vector.multi_reduction <add>, %108, %cst_43 [1] : vector<12x12xf32> to vector<12xf32>
    %110 = vector.shape_cast %109 : vector<12xf32> to vector<12x1xf32>
    %111 = vector.broadcast %110 : vector<12x1xf32> to vector<12x12xf32>
    %112 = arith.divf %108, %111 : vector<12x12xf32>
    %cst_44 = arith.constant dense<0.000000e+00> : vector<12x8xf32>
    %113 = tpu.matmul %112, %101, %cst_44 {dimension_numbers = #tpu.dot_dimension_numbers<[1], [0], [0], [1], [0, 0, 1, 1], [], []>} : vector<12x12xf32>, vector<12x8xf32>, vector<12x8xf32> -> vector<12x8xf32>
    %114 = vector.extract_strided_slice %58 {offsets = [0, 24], sizes = [12, 8], strides = [1, 1]} : vector<12x32xf32> to vector<12x8xf32>
    %115 = vector.extract_strided_slice %66 {offsets = [0, 24], sizes = [12, 8], strides = [1, 1]} : vector<12x32xf32> to vector<12x8xf32>
    %116 = vector.extract_strided_slice %67 {offsets = [0, 24], sizes = [12, 8], strides = [1, 1]} : vector<12x32xf32> to vector<12x8xf32>
    %cst_45 = arith.constant dense<0.000000e+00> : vector<12x12xf32>
    %117 = tpu.matmul %114, %115, %cst_45 {dimension_numbers = #tpu.dot_dimension_numbers<[1], [1], [0], [0], [0, 0, 1, 0], [], []>} : vector<12x8xf32>, vector<12x8xf32>, vector<12x12xf32> -> vector<12x12xf32>
    %118 = arith.addf %117, %68 : vector<12x12xf32>
    %cst_46 = arith.constant dense<0xFF800000> : vector<12xf32>
    %119 = vector.multi_reduction <maximumf>, %118, %cst_46 [1] : vector<12x12xf32> to vector<12xf32>
    %120 = vector.shape_cast %119 : vector<12xf32> to vector<12x1xf32>
    %121 = vector.broadcast %120 : vector<12x1xf32> to vector<12x12xf32>
    %122 = arith.subf %118, %121 : vector<12x12xf32>
    %123 = math.exp %122 : vector<12x12xf32>
    %cst_47 = arith.constant dense<0.000000e+00> : vector<12xf32>
    %124 = vector.multi_reduction <add>, %123, %cst_47 [1] : vector<12x12xf32> to vector<12xf32>
    %125 = vector.shape_cast %124 : vector<12xf32> to vector<12x1xf32>
    %126 = vector.broadcast %125 : vector<12x1xf32> to vector<12x12xf32>
    %127 = arith.divf %123, %126 : vector<12x12xf32>
    %cst_48 = arith.constant dense<0.000000e+00> : vector<12x8xf32>
    %128 = tpu.matmul %127, %116, %cst_48 {dimension_numbers = #tpu.dot_dimension_numbers<[1], [0], [0], [1], [0, 0, 1, 1], [], []>} : vector<12x12xf32>, vector<12x8xf32>, vector<12x8xf32> -> vector<12x8xf32>
    %129 = tpu.concatenate %83, %98, %113, %128 in 1 : vector<12x8xf32>, vector<12x8xf32>, vector<12x8xf32>, vector<12x8xf32> -> vector<12x32xf32>
    %c0_49 = arith.constant 0 : index
    %c0_50 = arith.constant 0 : index
    %c0_51 = arith.constant 0 : index
    %130 = vector.load %arg12[%c0_49, %c0_50, %c0_51] : memref<1x32x32xf32, #tpu.memory_space<vmem>>, vector<1x32x32xf32>
    %131 = vector.shape_cast %130 : vector<1x32x32xf32> to vector<32x32xf32>
    %cst_52 = arith.constant dense<0.000000e+00> : vector<12x32xf32>
    %132 = tpu.matmul %129, %131, %cst_52 {dimension_numbers = #tpu.dot_dimension_numbers<[1], [0], [0], [1], [0, 0, 1, 1], [], []>} : vector<12x32xf32>, vector<32x32xf32>, vector<12x32xf32> -> vector<12x32xf32>
    %c0_53 = arith.constant 0 : index
    %c0_54 = arith.constant 0 : index
    %c0_55 = arith.constant 0 : index
    %133 = vector.load %arg13[%c0_53, %c0_54, %c0_55] : memref<1x1x32xf32, #tpu.memory_space<vmem>>, vector<1x1x32xf32>
    %134 = vector.shape_cast %133 : vector<1x1x32xf32> to vector<1x32xf32>
    %135 = vector.broadcast %134 : vector<1x32xf32> to vector<12x32xf32>
    %136 = arith.addf %132, %135 : vector<12x32xf32>
    %137 = arith.addf %3, %136 : vector<12x32xf32>
    %c0_56 = arith.constant 0 : index
    %c0_57 = arith.constant 0 : index
    %c0_58 = arith.constant 0 : index
    %138 = vector.load %arg14[%c0_56, %c0_57, %c0_58] : memref<1x1x32xf32, #tpu.memory_space<vmem>>, vector<1x1x32xf32>
    %139 = vector.shape_cast %138 : vector<1x1x32xf32> to vector<1x32xf32>
    %c0_59 = arith.constant 0 : index
    %c0_60 = arith.constant 0 : index
    %c0_61 = arith.constant 0 : index
    %140 = vector.load %arg15[%c0_59, %c0_60, %c0_61] : memref<1x1x32xf32, #tpu.memory_space<vmem>>, vector<1x1x32xf32>
    %141 = vector.shape_cast %140 : vector<1x1x32xf32> to vector<1x32xf32>
    %cst_62 = arith.constant dense<0.000000e+00> : vector<12xf32>
    %142 = vector.multi_reduction <add>, %137, %cst_62 [1] : vector<12x32xf32> to vector<12xf32>
    %143 = vector.shape_cast %142 : vector<12xf32> to vector<12x1xf32>
    %cst_63 = arith.constant 3.200000e+01 : f32
    %144 = vector.broadcast %cst_63 : f32 to vector<12x1xf32>
    %145 = arith.divf %143, %144 : vector<12x1xf32>
    %146 = vector.broadcast %145 : vector<12x1xf32> to vector<12x32xf32>
    %147 = arith.subf %137, %146 : vector<12x32xf32>
    %148 = arith.mulf %147, %147 : vector<12x32xf32>
    %cst_64 = arith.constant dense<0.000000e+00> : vector<12xf32>
    %149 = vector.multi_reduction <add>, %148, %cst_64 [1] : vector<12x32xf32> to vector<12xf32>
    %150 = vector.shape_cast %149 : vector<12xf32> to vector<12x1xf32>
    %cst_65 = arith.constant 3.200000e+01 : f32
    %151 = vector.broadcast %cst_65 : f32 to vector<12x1xf32>
    %152 = arith.divf %150, %151 : vector<12x1xf32>
    %153 = vector.broadcast %145 : vector<12x1xf32> to vector<12x32xf32>
    %154 = arith.subf %137, %153 : vector<12x32xf32>
    %cst_66 = arith.constant 9.99999974E-6 : f32
    %155 = vector.broadcast %cst_66 : f32 to vector<12x1xf32>
    %156 = arith.addf %152, %155 : vector<12x1xf32>
    %157 = math.rsqrt %156 : vector<12x1xf32>
    %158 = vector.broadcast %157 : vector<12x1xf32> to vector<12x32xf32>
    %159 = arith.mulf %154, %158 : vector<12x32xf32>
    %160 = vector.broadcast %139 : vector<1x32xf32> to vector<12x32xf32>
    %161 = arith.mulf %159, %160 : vector<12x32xf32>
    %162 = vector.broadcast %141 : vector<1x32xf32> to vector<12x32xf32>
    %163 = arith.addf %161, %162 : vector<12x32xf32>
    %c0_67 = arith.constant 0 : index
    %c0_68 = arith.constant 0 : index
    %c0_69 = arith.constant 0 : index
    %164 = vector.load %arg16[%c0_67, %c0_68, %c0_69] : memref<1x32x128xf32, #tpu.memory_space<vmem>>, vector<1x32x128xf32>
    %165 = vector.shape_cast %164 : vector<1x32x128xf32> to vector<32x128xf32>
    %cst_70 = arith.constant dense<0.000000e+00> : vector<12x128xf32>
    %166 = tpu.matmul %163, %165, %cst_70 {dimension_numbers = #tpu.dot_dimension_numbers<[1], [0], [0], [1], [0, 0, 1, 1], [], []>} : vector<12x32xf32>, vector<32x128xf32>, vector<12x128xf32> -> vector<12x128xf32>
    %c0_71 = arith.constant 0 : index
    %c0_72 = arith.constant 0 : index
    %c0_73 = arith.constant 0 : index
    %167 = vector.load %arg17[%c0_71, %c0_72, %c0_73] : memref<1x1x128xf32, #tpu.memory_space<vmem>>, vector<1x1x128xf32>
    %168 = vector.shape_cast %167 : vector<1x1x128xf32> to vector<1x128xf32>
    %169 = vector.broadcast %168 : vector<1x128xf32> to vector<12x128xf32>
    %170 = arith.addf %166, %169 : vector<12x128xf32>
    %cst_74 = arith.constant 0.000000e+00 : f32
    %171 = vector.broadcast %cst_74 : f32 to vector<12x128xf32>
    %172 = arith.maximumf %170, %171 : vector<12x128xf32>
    %c0_75 = arith.constant 0 : index
    %c0_76 = arith.constant 0 : index
    %c0_77 = arith.constant 0 : index
    %173 = vector.load %arg18[%c0_75, %c0_76, %c0_77] : memref<1x128x32xf32, #tpu.memory_space<vmem>>, vector<1x128x32xf32>
    %174 = vector.shape_cast %173 : vector<1x128x32xf32> to vector<128x32xf32>
    %cst_78 = arith.constant dense<0.000000e+00> : vector<12x32xf32>
    %175 = tpu.matmul %172, %174, %cst_78 {dimension_numbers = #tpu.dot_dimension_numbers<[1], [0], [0], [1], [0, 0, 1, 1], [], []>} : vector<12x128xf32>, vector<128x32xf32>, vector<12x32xf32> -> vector<12x32xf32>
    %176 = arith.addf %137, %175 : vector<12x32xf32>
    %c0_79 = arith.constant 0 : index
    %c0_80 = arith.constant 0 : index
    %c0_81 = arith.constant 0 : index
    %177 = vector.load %arg19[%c0_79, %c0_80, %c0_81] : memref<1x1x32xf32, #tpu.memory_space<vmem>>, vector<1x1x32xf32>
    %178 = vector.shape_cast %177 : vector<1x1x32xf32> to vector<1x32xf32>
    %179 = vector.broadcast %178 : vector<1x32xf32> to vector<12x32xf32>
    %180 = arith.addf %176, %179 : vector<12x32xf32>
    %c0_82 = arith.constant 0 : index
    %c0_83 = arith.constant 0 : index
    %181 = vector.load %arg23[%c0_82, %c0_83] : memref<12x32xf32, #tpu.memory_space<vmem>>, vector<12x32xf32>
    tpu.vector_store %arg23[%c0_82, %c0_83], %180 {strides = array<i32>} : memref<12x32xf32, #tpu.memory_space<vmem>>, vector<12x32xf32>,
    %c2_i32 = arith.constant 2 : i32
    %182 = arith.cmpi eq, %arg0, %c2_i32 : i32
    %183 = arith.extui %182 : i1 to i32
    %c0_i32_84 = arith.constant 0 : i32
    %184 = arith.cmpi ne, %183, %c0_i32_84 : i32
    scf.if %184 {
      %c0_85 = arith.constant 0 : index
      %c0_86 = arith.constant 0 : index
      %185 = vector.load %arg20[%c0_85, %c0_86] : memref<1x32xf32, #tpu.memory_space<vmem>>, vector<1x32xf32>
      %c0_87 = arith.constant 0 : index
      %c0_88 = arith.constant 0 : index
      %186 = vector.load %arg21[%c0_87, %c0_88] : memref<1x32xf32, #tpu.memory_space<vmem>>, vector<1x32xf32>
      %cst_89 = arith.constant dense<0.000000e+00> : vector<12xf32>
      %187 = vector.multi_reduction <add>, %180, %cst_89 [1] : vector<12x32xf32> to vector<12xf32>
      %188 = vector.shape_cast %187 : vector<12xf32> to vector<12x1xf32>
      %cst_90 = arith.constant 3.200000e+01 : f32
      %189 = vector.broadcast %cst_90 : f32 to vector<12x1xf32>
      %190 = arith.divf %188, %189 : vector<12x1xf32>
      %191 = vector.broadcast %190 : vector<12x1xf32> to vector<12x32xf32>
      %192 = arith.subf %180, %191 : vector<12x32xf32>
      %193 = arith.mulf %192, %192 : vector<12x32xf32>
      %cst_91 = arith.constant dense<0.000000e+00> : vector<12xf32>
      %194 = vector.multi_reduction <add>, %193, %cst_91 [1] : vector<12x32xf32> to vector<12xf32>
      %195 = vector.shape_cast %194 : vector<12xf32> to vector<12x1xf32>
      %cst_92 = arith.constant 3.200000e+01 : f32
      %196 = vector.broadcast %cst_92 : f32 to vector<12x1xf32>
      %197 = arith.divf %195, %196 : vector<12x1xf32>
      %198 = vector.broadcast %190 : vector<12x1xf32> to vector<12x32xf32>
      %199 = arith.subf %180, %198 : vector<12x32xf32>
      %cst_93 = arith.constant 9.99999974E-6 : f32
      %200 = vector.broadcast %cst_93 : f32 to vector<12x1xf32>
      %201 = arith.addf %197, %200 : vector<12x1xf32>
      %202 = math.rsqrt %201 : vector<12x1xf32>
      %203 = vector.broadcast %202 : vector<12x1xf32> to vector<12x32xf32>
      %204 = arith.mulf %199, %203 : vector<12x32xf32>
      %205 = vector.broadcast %185 : vector<1x32xf32> to vector<12x32xf32>
      %206 = arith.mulf %204, %205 : vector<12x32xf32>
      %207 = vector.broadcast %186 : vector<1x32xf32> to vector<12x32xf32>
      %208 = arith.addf %206, %207 : vector<12x32xf32>
      %c0_94 = arith.constant 0 : index
      %c0_95 = arith.constant 0 : index
      %209 = vector.load %arg22[%c0_94, %c0_95] : memref<12x32xf32, #tpu.memory_space<vmem>>, vector<12x32xf32>
      tpu.vector_store %arg22[%c0_94, %c0_95], %208 {strides = array<i32>} : memref<12x32xf32, #tpu.memory_space<vmem>>, vector<12x32xf32>,
    } else {
    }
    return
  }
  func.func @transform_0(%arg0: i32) -> (i32, i32) {
    %c0_i32 = arith.constant 0 : i32
    %c0_i32_0 = arith.constant 0 : i32
    %c0_i32_1 = arith.constant 0 : i32
    return %c0_i32, %c0_i32_0 : i32, i32
  }
  func.func @transform_1(%arg0: i32) -> (i32, i32) {
    %c0_i32 = arith.constant 0 : i32
    %c0_i32_0 = arith.constant 0 : i32
    %c0_i32_1 = arith.constant 0 : i32
    return %c0_i32, %c0_i32_0 : i32, i32
  }
  func.func @transform_2(%arg0: i32) -> (i32, i32) {
    %c0_i32 = arith.constant 0 : i32
    %c0_i32_0 = arith.constant 0 : i32
    %c0_i32_1 = arith.constant 0 : i32
    return %c0_i32, %c0_i32_0 : i32, i32
  }
  func.func @transform_3(%arg0: i32) -> (i32, i32) {
    %c0_i32 = arith.constant 0 : i32
    %c0_i32_0 = arith.constant 0 : i32
    %c0_i32_1 = arith.constant 0 : i32
    return %c0_i32, %c0_i32_0 : i32, i32
  }
  func.func @transform_4(%arg0: i32) -> (i32, i32) {
    %c0_i32 = arith.constant 0 : i32
    %c0_i32_0 = arith.constant 0 : i32
    %c0_i32_1 = arith.constant 0 : i32
    return %c0_i32, %c0_i32_0 : i32, i32
  }
  func.func @transform_5(%arg0: i32) -> (i32, i32, i32) {
    %c0_i32 = arith.constant 0 : i32
    %c0_i32_0 = arith.constant 0 : i32
    %c0_i32_1 = arith.constant 0 : i32
    return %arg0, %c0_i32, %c0_i32_0 : i32, i32, i32
  }
  func.func @transform_6(%arg0: i32) -> (i32, i32, i32) {
    %c0_i32 = arith.constant 0 : i32
    %c0_i32_0 = arith.constant 0 : i32
    %c0_i32_1 = arith.constant 0 : i32
    return %arg0, %c0_i32, %c0_i32_0 : i32, i32, i32
  }
  func.func @transform_7(%arg0: i32) -> (i32, i32, i32) {
    %c0_i32 = arith.constant 0 : i32
    %c0_i32_0 = arith.constant 0 : i32
    %c0_i32_1 = arith.constant 0 : i32
    return %arg0, %c0_i32, %c0_i32_0 : i32, i32, i32
  }
  func.func @transform_8(%arg0: i32) -> (i32, i32, i32) {
    %c0_i32 = arith.constant 0 : i32
    %c0_i32_0 = arith.constant 0 : i32
    %c0_i32_1 = arith.constant 0 : i32
    return %arg0, %c0_i32, %c0_i32_0 : i32, i32, i32
  }
  func.func @transform_9(%arg0: i32) -> (i32, i32, i32) {
    %c0_i32 = arith.constant 0 : i32
    %c0_i32_0 = arith.constant 0 : i32
    %c0_i32_1 = arith.constant 0 : i32
    return %arg0, %c0_i32, %c0_i32_0 : i32, i32, i32
  }
  func.func @transform_10(%arg0: i32) -> (i32, i32, i32) {
    %c0_i32 = arith.constant 0 : i32
    %c0_i32_0 = arith.constant 0 : i32
    %c0_i32_1 = arith.constant 0 : i32
    return %arg0, %c0_i32, %c0_i32_0 : i32, i32, i32
  }
  func.func @transform_11(%arg0: i32) -> (i32, i32, i32) {
    %c0_i32 = arith.constant 0 : i32
    %c0_i32_0 = arith.constant 0 : i32
    %c0_i32_1 = arith.constant 0 : i32
    return %arg0, %c0_i32, %c0_i32_0 : i32, i32, i32
  }
  func.func @transform_12(%arg0: i32) -> (i32, i32, i32) {
    %c0_i32 = arith.constant 0 : i32
    %c0_i32_0 = arith.constant 0 : i32
    %c0_i32_1 = arith.constant 0 : i32
    return %arg0, %c0_i32, %c0_i32_0 : i32, i32, i32
  }
  func.func @transform_13(%arg0: i32) -> (i32, i32, i32) {
    %c0_i32 = arith.constant 0 : i32
    %c0_i32_0 = arith.constant 0 : i32
    %c0_i32_1 = arith.constant 0 : i32
    return %arg0, %c0_i32, %c0_i32_0 : i32, i32, i32
  }
  func.func @transform_14(%arg0: i32) -> (i32, i32, i32) {
    %c0_i32 = arith.constant 0 : i32
    %c0_i32_0 = arith.constant 0 : i32
    %c0_i32_1 = arith.constant 0 : i32
    return %arg0, %c0_i32, %c0_i32_0 : i32, i32, i32
  }
  func.func @transform_15(%arg0: i32) -> (i32, i32, i32) {
    %c0_i32 = arith.constant 0 : i32
    %c0_i32_0 = arith.constant 0 : i32
    %c0_i32_1 = arith.constant 0 : i32
    return %arg0, %c0_i32, %c0_i32_0 : i32, i32, i32
  }
  func.func @transform_16(%arg0: i32) -> (i32, i32, i32) {
    %c0_i32 = arith.constant 0 : i32
    %c0_i32_0 = arith.constant 0 : i32
    %c0_i32_1 = arith.constant 0 : i32
    return %arg0, %c0_i32, %c0_i32_0 : i32, i32, i32
  }
  func.func @transform_17(%arg0: i32) -> (i32, i32, i32) {
    %c0_i32 = arith.constant 0 : i32
    %c0_i32_0 = arith.constant 0 : i32
    %c0_i32_1 = arith.constant 0 : i32
    return %arg0, %c0_i32, %c0_i32_0 : i32, i32, i32
  }
  func.func @transform_18(%arg0: i32) -> (i32, i32, i32) {
    %c0_i32 = arith.constant 0 : i32
    %c0_i32_0 = arith.constant 0 : i32
    %c0_i32_1 = arith.constant 0 : i32
    return %arg0, %c0_i32, %c0_i32_0 : i32, i32, i32
  }
  func.func @transform_19(%arg0: i32) -> (i32, i32) {
    %c0_i32 = arith.constant 0 : i32
    %c0_i32_0 = arith.constant 0 : i32
    %c0_i32_1 = arith.constant 0 : i32
    return %c0_i32, %c0_i32_0 : i32, i32
  }
  func.func @transform_20(%arg0: i32) -> (i32, i32) {
    %c0_i32 = arith.constant 0 : i32
    %c0_i32_0 = arith.constant 0 : i32
    %c0_i32_1 = arith.constant 0 : i32
    return %c0_i32, %c0_i32_0 : i32, i32
  }
  func.func @transform_21(%arg0: i32) -> (i32, i32) {
    %c0_i32 = arith.constant 0 : i32
    %c0_i32_0 = arith.constant 0 : i32
    %c0_i32_1 = arith.constant 0 : i32
    return %c0_i32, %c0_i32_0 : i32, i32
  }
}

module attributes {stable_mosaic.version = 11 : i64} {
  func.func @_head_kernel(%arg0: i32, %arg1: memref<12x32xf32, #tpu.memory_space<vmem>>, %arg2: memref<8x32xf32, #tpu.memory_space<vmem>>, %arg3: memref<2x12xf32, #tpu.memory_space<vmem>>, %arg4: memref<2x8xf32, #tpu.memory_space<vmem>>, %arg5: memref<64x32xf32, #tpu.memory_space<vmem>>, %arg6: memref<1x32xf32, #tpu.memory_space<vmem>>, %arg7: memref<32x16xf32, #tpu.memory_space<vmem>>, %arg8: memref<1x16xf32, #tpu.memory_space<vmem>>, %arg9: memref<16x128xf32, #tpu.memory_space<vmem>>, %arg10: memref<1x128xf32, #tpu.memory_space<vmem>>, %arg11: memref<2x128xf32, #tpu.memory_space<vmem>>) attributes {dimension_semantics = [#tpu.dimension_semantics<arbitrary>], iteration_bounds = array<i64: 1>, scalar_prefetch = 0 : i64, scratch_operands = 0 : i64, tpu.core_type = #tpu.core_type<tc>, window_params = [{pipeline_mode = #tpu.pipeline_mode<synchronous>, transform_indices = @transform_0, window_bounds = array<i64: 12, 32>}, {pipeline_mode = #tpu.pipeline_mode<synchronous>, transform_indices = @transform_1, window_bounds = array<i64: 8, 32>}, {pipeline_mode = #tpu.pipeline_mode<synchronous>, transform_indices = @transform_2, window_bounds = array<i64: 2, 12>}, {pipeline_mode = #tpu.pipeline_mode<synchronous>, transform_indices = @transform_3, window_bounds = array<i64: 2, 8>}, {pipeline_mode = #tpu.pipeline_mode<synchronous>, transform_indices = @transform_4, window_bounds = array<i64: 64, 32>}, {pipeline_mode = #tpu.pipeline_mode<synchronous>, transform_indices = @transform_5, window_bounds = array<i64: 1, 32>}, {pipeline_mode = #tpu.pipeline_mode<synchronous>, transform_indices = @transform_6, window_bounds = array<i64: 32, 16>}, {pipeline_mode = #tpu.pipeline_mode<synchronous>, transform_indices = @transform_7, window_bounds = array<i64: 1, 16>}, {pipeline_mode = #tpu.pipeline_mode<synchronous>, transform_indices = @transform_8, window_bounds = array<i64: 16, 128>}, {pipeline_mode = #tpu.pipeline_mode<synchronous>, transform_indices = @transform_9, window_bounds = array<i64: 1, 128>}, {pipeline_mode = #tpu.pipeline_mode<synchronous>, transform_indices = @transform_10, window_bounds = array<i64: 2, 128>}]} {
    %c0 = arith.constant 0 : index
    %c0_0 = arith.constant 0 : index
    %0 = vector.load %arg3[%c0, %c0_0] : memref<2x12xf32, #tpu.memory_space<vmem>>, vector<2x12xf32>
    %c0_1 = arith.constant 0 : index
    %c0_2 = arith.constant 0 : index
    %1 = vector.load %arg1[%c0_1, %c0_2] : memref<12x32xf32, #tpu.memory_space<vmem>>, vector<12x32xf32>
    %cst = arith.constant dense<0.000000e+00> : vector<2x32xf32>
    %2 = tpu.matmul %0, %1, %cst {dimension_numbers = #tpu.dot_dimension_numbers<[1], [0], [0], [1], [0, 0, 1, 1], [], []>} : vector<2x12xf32>, vector<12x32xf32>, vector<2x32xf32> -> vector<2x32xf32>
    %c0_3 = arith.constant 0 : index
    %c0_4 = arith.constant 0 : index
    %3 = vector.load %arg4[%c0_3, %c0_4] : memref<2x8xf32, #tpu.memory_space<vmem>>, vector<2x8xf32>
    %c0_5 = arith.constant 0 : index
    %c0_6 = arith.constant 0 : index
    %4 = vector.load %arg2[%c0_5, %c0_6] : memref<8x32xf32, #tpu.memory_space<vmem>>, vector<8x32xf32>
    %cst_7 = arith.constant dense<0.000000e+00> : vector<2x32xf32>
    %5 = tpu.matmul %3, %4, %cst_7 {dimension_numbers = #tpu.dot_dimension_numbers<[1], [0], [0], [1], [0, 0, 1, 1], [], []>} : vector<2x8xf32>, vector<8x32xf32>, vector<2x32xf32> -> vector<2x32xf32>
    %6 = tpu.concatenate %2, %5 in 1 : vector<2x32xf32>, vector<2x32xf32> -> vector<2x64xf32>
    %c0_8 = arith.constant 0 : index
    %c0_9 = arith.constant 0 : index
    %7 = vector.load %arg5[%c0_8, %c0_9] : memref<64x32xf32, #tpu.memory_space<vmem>>, vector<64x32xf32>
    %cst_10 = arith.constant dense<0.000000e+00> : vector<2x32xf32>
    %8 = tpu.matmul %6, %7, %cst_10 {dimension_numbers = #tpu.dot_dimension_numbers<[1], [0], [0], [1], [0, 0, 1, 1], [], []>} : vector<2x64xf32>, vector<64x32xf32>, vector<2x32xf32> -> vector<2x32xf32>
    %c0_11 = arith.constant 0 : index
    %c0_12 = arith.constant 0 : index
    %9 = vector.load %arg6[%c0_11, %c0_12] : memref<1x32xf32, #tpu.memory_space<vmem>>, vector<1x32xf32>
    %10 = vector.broadcast %9 : vector<1x32xf32> to vector<2x32xf32>
    %11 = arith.addf %8, %10 : vector<2x32xf32>
    %cst_13 = arith.constant 0.000000e+00 : f32
    %12 = vector.broadcast %cst_13 : f32 to vector<2x32xf32>
    %13 = arith.maximumf %11, %12 : vector<2x32xf32>
    %c0_14 = arith.constant 0 : index
    %c0_15 = arith.constant 0 : index
    %14 = vector.load %arg7[%c0_14, %c0_15] : memref<32x16xf32, #tpu.memory_space<vmem>>, vector<32x16xf32>
    %cst_16 = arith.constant dense<0.000000e+00> : vector<2x16xf32>
    %15 = tpu.matmul %13, %14, %cst_16 {dimension_numbers = #tpu.dot_dimension_numbers<[1], [0], [0], [1], [0, 0, 1, 1], [], []>} : vector<2x32xf32>, vector<32x16xf32>, vector<2x16xf32> -> vector<2x16xf32>
    %c0_17 = arith.constant 0 : index
    %c0_18 = arith.constant 0 : index
    %16 = vector.load %arg8[%c0_17, %c0_18] : memref<1x16xf32, #tpu.memory_space<vmem>>, vector<1x16xf32>
    %17 = vector.broadcast %16 : vector<1x16xf32> to vector<2x16xf32>
    %18 = arith.addf %15, %17 : vector<2x16xf32>
    %c0_19 = arith.constant 0 : index
    %c0_20 = arith.constant 0 : index
    %19 = vector.load %arg9[%c0_19, %c0_20] : memref<16x128xf32, #tpu.memory_space<vmem>>, vector<16x128xf32>
    %cst_21 = arith.constant dense<0.000000e+00> : vector<2x128xf32>
    %20 = tpu.matmul %18, %19, %cst_21 {dimension_numbers = #tpu.dot_dimension_numbers<[1], [0], [0], [1], [0, 0, 1, 1], [], []>} : vector<2x16xf32>, vector<16x128xf32>, vector<2x128xf32> -> vector<2x128xf32>
    %c0_22 = arith.constant 0 : index
    %c0_23 = arith.constant 0 : index
    %21 = vector.load %arg10[%c0_22, %c0_23] : memref<1x128xf32, #tpu.memory_space<vmem>>, vector<1x128xf32>
    %22 = vector.broadcast %21 : vector<1x128xf32> to vector<2x128xf32>
    %23 = arith.addf %20, %22 : vector<2x128xf32>
    %cst_24 = arith.constant dense<0xFF800000> : vector<2xf32>
    %24 = vector.multi_reduction <maximumf>, %23, %cst_24 [1] : vector<2x128xf32> to vector<2xf32>
    %25 = vector.shape_cast %24 : vector<2xf32> to vector<2x1xf32>
    %26 = vector.broadcast %25 : vector<2x1xf32> to vector<2x128xf32>
    %27 = arith.subf %23, %26 : vector<2x128xf32>
    %28 = math.exp %27 : vector<2x128xf32>
    %cst_25 = arith.constant dense<0.000000e+00> : vector<2xf32>
    %29 = vector.multi_reduction <add>, %28, %cst_25 [1] : vector<2x128xf32> to vector<2xf32>
    %30 = vector.shape_cast %29 : vector<2xf32> to vector<2x1xf32>
    %31 = math.log %30 : vector<2x1xf32>
    %32 = arith.addf %25, %31 : vector<2x1xf32>
    %33 = vector.broadcast %32 : vector<2x1xf32> to vector<2x128xf32>
    %34 = arith.subf %23, %33 : vector<2x128xf32>
    %c0_26 = arith.constant 0 : index
    %c0_27 = arith.constant 0 : index
    %35 = vector.load %arg11[%c0_26, %c0_27] : memref<2x128xf32, #tpu.memory_space<vmem>>, vector<2x128xf32>
    tpu.vector_store %arg11[%c0_26, %c0_27], %34 {strides = array<i32>} : memref<2x128xf32, #tpu.memory_space<vmem>>, vector<2x128xf32>,
    return
  }
  func.func @transform_0(%arg0: i32) -> (i32, i32) {
    %c0_i32 = arith.constant 0 : i32
    %c0_i32_0 = arith.constant 0 : i32
    %c0_i32_1 = arith.constant 0 : i32
    return %c0_i32, %c0_i32_0 : i32, i32
  }
  func.func @transform_1(%arg0: i32) -> (i32, i32) {
    %c0_i32 = arith.constant 0 : i32
    %c0_i32_0 = arith.constant 0 : i32
    %c0_i32_1 = arith.constant 0 : i32
    return %c0_i32, %c0_i32_0 : i32, i32
  }
  func.func @transform_2(%arg0: i32) -> (i32, i32) {
    %c0_i32 = arith.constant 0 : i32
    %c0_i32_0 = arith.constant 0 : i32
    %c0_i32_1 = arith.constant 0 : i32
    return %c0_i32, %c0_i32_0 : i32, i32
  }
  func.func @transform_3(%arg0: i32) -> (i32, i32) {
    %c0_i32 = arith.constant 0 : i32
    %c0_i32_0 = arith.constant 0 : i32
    %c0_i32_1 = arith.constant 0 : i32
    return %c0_i32, %c0_i32_0 : i32, i32
  }
  func.func @transform_4(%arg0: i32) -> (i32, i32) {
    %c0_i32 = arith.constant 0 : i32
    %c0_i32_0 = arith.constant 0 : i32
    %c0_i32_1 = arith.constant 0 : i32
    return %c0_i32, %c0_i32_0 : i32, i32
  }
  func.func @transform_5(%arg0: i32) -> (i32, i32) {
    %c0_i32 = arith.constant 0 : i32
    %c0_i32_0 = arith.constant 0 : i32
    %c0_i32_1 = arith.constant 0 : i32
    return %c0_i32, %c0_i32_0 : i32, i32
  }
  func.func @transform_6(%arg0: i32) -> (i32, i32) {
    %c0_i32 = arith.constant 0 : i32
    %c0_i32_0 = arith.constant 0 : i32
    %c0_i32_1 = arith.constant 0 : i32
    return %c0_i32, %c0_i32_0 : i32, i32
  }
  func.func @transform_7(%arg0: i32) -> (i32, i32) {
    %c0_i32 = arith.constant 0 : i32
    %c0_i32_0 = arith.constant 0 : i32
    %c0_i32_1 = arith.constant 0 : i32
    return %c0_i32, %c0_i32_0 : i32, i32
  }
  func.func @transform_8(%arg0: i32) -> (i32, i32) {
    %c0_i32 = arith.constant 0 : i32
    %c0_i32_0 = arith.constant 0 : i32
    %c0_i32_1 = arith.constant 0 : i32
    return %c0_i32, %c0_i32_0 : i32, i32
  }
  func.func @transform_9(%arg0: i32) -> (i32, i32) {
    %c0_i32 = arith.constant 0 : i32
    %c0_i32_0 = arith.constant 0 : i32
    %c0_i32_1 = arith.constant 0 : i32
    return %c0_i32, %c0_i32_0 : i32, i32
  }
  func.func @transform_10(%arg0: i32) -> (i32, i32) {
    %c0_i32 = arith.constant 0 : i32
    %c0_i32_0 = arith.constant 0 : i32
    %c0_i32_1 = arith.constant 0 : i32
    return %c0_i32, %c0_i32_0 : i32, i32
  }
}

</mosaic_0001>

<bundles_post_ra>
// kernel: tile.15
= control target key start
LH: loop header
LB: loop body
LE: loop exit
PB: predicated region body
PF: predicated region fallthrough
CT: control target
= control target key end

     0   :  { %vm3_vm0 = vcmask 261120   ;;  %s34_s0 = inlined_call_operand.vmem [shape: f32[2,6,32], index: 0, kind: input, shape index: {}]   ;;  %s35_s1 = inlined_call_operand.vmem [shape: f32[12,32], index: 1, kind: output, shape index: {}]  }
   0x1   :  { %v2_v0 = vld [vmem:[%s34_s0] sm:$0x3f]   ;;  %v10_v1 = vld [vmem:[%s34_s0 + $0x8] sm:$0x3f]  }
   0x2   :  { %4 = vst.msk [vmem:[%s35_s1] sm:$0x3f] %vm3_vm0, %v2_v0  }
   0x3   :  { %11 = vst.msk [vmem:[%s35_s1 + $0x6] sm:$0x3f] %vm3_vm0, %v10_v1  }

// kernel: forward.6
= control target key start
LH: loop header
LB: loop body
LE: loop exit
PB: predicated region body
PF: predicated region fallthrough
CT: control target
= control target key end

     0   :  { %vm32_vm0 = vcmask 130048   ;;  %vm70_vm1 = vcmask 392192   ;;  %vm56_vm2 = vcmask 261120   ;;  %vm101_vm3 = vcmask 257024   ;;  %s210_s4 = inlined_call_operand.vmem [shape: f32[48,32], index: 4, kind: input, shape index: {}]   ;;  %s211_s1 = inlined_call_operand.vmem [shape: f32[16,32], index: 1, kind: input, shape index: {}]   ;;  %s212_s0 = inlined_call_operand.vmem [shape: f32[8,16], index: 0, kind: input, shape index: {}]   ;;  %s213_s2 = inlined_call_operand.vmem [shape: f32[1,32], index: 2, kind: input, shape index: {}]   ;;  %s214_s3 = inlined_call_operand.vmem [shape: f32[12,48], index: 3, kind: input, shape index: {}]   ;;  %s215_s5 = inlined_call_operand.vmem [shape: f32[1,32], index: 5, kind: input, shape index: {}]   ;;  %s216_s6 = inlined_call_operand.vmem [shape: f32[8,32], index: 6, kind: output, shape index: {0}]   ;;  %s217_s7 = inlined_call_operand.vmem [shape: f32[12,32], index: 7, kind: output, shape index: {1}]  }
   0x1   :  { %v65_v0 = vld [vmem:[%s210_s4 + $0x28] sm:$0xff]  ;;  %v64_v1 = vld [vmem:[%s210_s4 + $0x20] sm:$0xff]  ;;  %v63_v2 = vld [vmem:[%s210_s4 + $0x18] sm:$0xff] }
   0x2   :  { %114 = vmatpush.msra.mxu2 %v65_v0  ;;  %87 = vmatpush.msra.mxu1 %v65_v0  ;;  %v27_v3 = vld [vmem:[%s211_s1 + $0x8] sm:$0xff]  ;;  %v26_v4 = vld [vmem:[%s211_s1] sm:$0xff]  ;;  %v62_v5 = vld [vmem:[%s210_s4 + $0x10] sm:$0xff] }
   0x3   :  { %50 = vmatpush.msra.mxu0 %v27_v3  ;;  %v25_v6 = vld [vmem:[%s212_s0] sm:$0xff]  ;;  %v61_v7 = vld [vmem:[%s210_s4 + $0x8] sm:$0xff] }
   0x4   :  { %115 = vmatpush.msra.mxu2 %v64_v1  ;;  %88 = vmatpush.msra.mxu1 %v64_v1  ;;  %v60_v8 = vld [vmem:[%s210_s4] sm:$0xff]  ;;  %v59_v9 = vld [vmem:[%s214_s3 + $0x8] sm:$0xf] }
   0x5   :  { %51 = vmatpush.msra.mxu0 %v26_v4  ;;  %v58_v10 = vld [vmem:[%s214_s3] sm:$0xff] }
   0x6   :  { %116 = vmatpush.msra.mxu2 %v63_v2  ;;  %89 = vmatpush.msra.mxu1 %v63_v2  ;;  %v120_v11 = vld [vmem:[%s213_s2] ss:$0 sm:$0xff] }
   0x7   :  { %111 = vmatmul.msk.f32.vlgmr.msra.gmra.mxu0 %vm32_vm0, %v25_v6  ;;  %v121_v14 = vld [vmem:[%s215_s5] ss:$0 sm:$0xff] }
   0x8   :  { %117 = vmatpush.msra.mxu2 %v62_v5  ;;  %90 = vmatpush.msra.mxu1 %v62_v5 }
   0xa   :  { %118 = vmatpush.msra.mxu2 %v61_v7  ;;  %91 = vmatpush.msra.mxu1 %v61_v7 }
   0xc   :  { %119 = vmatpush.msra.mxu2 %v60_v8  ;;  %92 = vmatpush.msra.mxu1 %v60_v8 }
   0xd   :  { %113 = vmatmul.msk.f32.vlgmr.msra.gmra.mxu2 %vm70_vm1, %v59_v9  ;;  %112 = vmatmul.msk.f32.vlgmr.msra.gmra.mxu1 %vm70_vm1, %v58_v10 }
  0x84   :  { %v53_v12 = vpop.f32.mrf.mxu0 }
  0x85   :  { %v54_v13 = vadd.f32 %v120_v11, %v53_v12 }
  0x87   :  { %57 = vst.msk [vmem:[%s216_s6] sm:$0xff] %vm56_vm2, %v54_v13 }
  0x8a   :  { %v94_v15 = vpop.f32.mrf.mxu1 }
  0x8b   :  { %v95_v16 = vadd.f32 %v121_v14, %v94_v15 }
  0x8d   :  { %100 = vst.msk [vmem:[%s217_s7] sm:$0xff] %vm56_vm2, %v95_v16 }
  0x90   :  { %v97_v17 = vpop.f32.mrf.mxu2 }
  0x91   :  { %v98_v18 = vadd.f32 %v121_v14, %v97_v17 }
  0x93   :  { %102 = vst.msk [vmem:[%s217_s7 + $0x8] sm:$0xf] %vm101_vm3, %v98_v18 }

// kernel: forward.10
= control target key start
LH: loop header
LB: loop body
LE: loop exit
PB: predicated region body
PF: predicated region fallthrough
CT: control target
= control target key end

     0   :  { %s2264_s0 = inlined_call_operand.vmem [shape: f32[8,32], index: 0, kind: input, shape index: {}, may-alias: {0,1}]   ;;  %s2265_s1 = inlined_call_operand.vmem [shape: f32[8,32], index: 1, kind: input, shape index: {}, may-alias: {0,1}]   ;;  %s2266_s2 = inlined_call_operand.vmem [shape: f32[8,32], index: 2, kind: input, shape index: {}, may-alias: {2,3}]   ;;  %s2267_s3 = inlined_call_operand.vmem [shape: f32[8,32], index: 3, kind: input, shape index: {}, may-alias: {2,3}]   ;;  %s2268_s4 = inlined_call_operand.vmem [shape: f32[8,8], index: 4, kind: input, shape index: {}]   ;;  %s2269_s5 = inlined_call_operand.vmem [shape: f32[3,1,32], index: 5, kind: input, shape index: {}]   ;;  %s2270_s6 = inlined_call_operand.vmem [shape: f32[3,1,32], index: 6, kind: input, shape index: {}]   ;;  %s2271_s7 = inlined_call_operand.vmem [shape: f32[3,32,32], index: 7, kind: input, shape index: {}]   ;;  %s2272_s8 = inlined_call_operand.vmem [shape: f32[3,1,32], index: 8, kind: input, shape index: {}]   ;;  %s2273_s9 = inlined_call_operand.vmem [shape: f32[3,32,64], index: 9, kind: input, shape index: {}]   ;;  %s2274_s10 = inlined_call_operand.vmem [shape: f32[3,1,64], index: 10, kind: input, shape index: {}]   ;;  %s2275_s11 = inlined_call_operand.vmem [shape: f32[3,32,32], index: 11, kind: input, shape index: {}]   ;;  %s2276_s12 = inlined_call_operand.vmem [shape: f32[3,1,32], index: 12, kind: input, shape index: {}]   ;;  %s2277_s13 = inlined_call_operand.vmem [shape: f32[3,1,32], index: 13, kind: input, shape index: {}]   ;;  %s2278_s14 = inlined_call_operand.vmem [shape: f32[3,1,32], index: 14, kind: input, shape index: {}]   ;;  %s2279_s15 = inlined_call_operand.vmem [shape: f32[3,32,128], index: 15, kind: input, shape index: {}]   ;;  %s2280_s16 = inlined_call_operand.vmem [shape: f32[3,1,128], index: 16, kind: input, shape index: {}]   ;;  %s2281_s17 = inlined_call_operand.vmem [shape: f32[3,128,32], index: 17, kind: input, shape index: {}]   ;;  %s2282_s18 = inlined_call_operand.vmem [shape: f32[3,1,32], index: 18, kind: input, shape index: {}]   ;;  %s2283_s19 = inlined_call_operand.hbm [shape: f32[1,32], index: 19, kind: input, shape index: {}]   ;;  %s2284_s20 = inlined_call_operand.hbm [shape: f32[1,32], index: 20, kind: input, shape index: {}]   ;;  %s2285_s21 = inlined_call_operand.vmem [shape: f32[8,32], index: 21, kind: output, shape index: {}]  }
   0x1   :  { %2287 = sst [smem:[#allocation10_spill]] %s2264_s0 }
   0x2   :  { %2288 = sst [smem:[#allocation11_spill]] %s2266_s2 }
   0x3   :  { %2289 = sst [smem:[#allocation12_spill]] %s2268_s4 }
   0x4   :  { %2290 = sst [smem:[#allocation13_spill]] %s2269_s5 }
   0x5   :  { %2291 = sst [smem:[#allocation14_spill]] %s2271_s7 }
   0x6   :  { %2292 = sst [smem:[#allocation15_spill]] %s2272_s8 }
   0x7   :  { %2293 = sst [smem:[#allocation16_spill]] %s2273_s9 }
   0x8   :  { %2294 = sst [smem:[#allocation17_spill]] %s2275_s11 }
   0x9   :  { %2295 = sst [smem:[#allocation18_spill]] %s2283_s19 }
   0xa   :  { %2296 = sst [smem:[#allocation19_spill]] %s2284_s20 }
   0xb   :  { %2297 = sst [smem:[#allocation20_spill]] %s2285_s21 }
   0xc   :  { %26 = vsyncpa [#allocation4], 0 }
   0xd   :  { %27 = vsyncpa [#allocation6], 0  ;;  %s1989_s2 = smov 0  }
   0xe LB: > { %2298 = sst [smem:[#allocation9_spill]] %s1864_s2  ;;  %s1998_s3 = sadd.s32 4294967295, %s1864_s2   ;;  %s1864_s2 = sphi %s1989_s2, %s33_s2  }
   0xf   : > { %s2299_s19 = sld [smem:[#allocation18_spill]]  ;;  %p1673_p0 = scmp.ge.s32.totalorder %s1864_s2, 1 }
  0x10   : > { %p570_p1 = scmp.lt.s32.totalorder %s1864_s2, 4  ;;  %p1674_p2 = scmp.ne.s32.totalorder %s1998_s3, 0 }
  0x11   : > { %p1730_p3 = scmp.eq.s32.totalorder %s1998_s3, 0  ;;  %s1866_s29 = smov [#allocation3]  }
  0x12   : > { %p2004_p4 = pnand %p1673_p0, %p570_p1  ;;  %s599_s0 = sshll.u32 %s1866_s29, 4  ;;  %s600_s0 = int_to_ptr.vmem [resolvable:$true] %s599_s0 }
  0x13   : > { %s2301_s20 = sld [smem:[#allocation19_spill]]  ;;  %s1867_s22 = smov [#allocation5]  }
  0x14   : > { %p1723_p5 = pneg %p2004_p4  ;;  %s611_s23 = sshll.u32 %s1867_s22, 4  ;;  %s612_s23 = int_to_ptr.vmem [resolvable:$true] %s611_s23 }
  0x15   : > { %s597_s27 = sshll.u32 %s2299_s19, 4  ;;  %s598_s27 = int_to_ptr.hbm [resolvable:$true] %s597_s27 }
  0x16   : > { %p1724_p6 = pnand %p1730_p3, %p1723_p5  ;;  %718 = sbr.rel (%p2004_p4) target bundleno = 2171 (0x87b), region = 104 }
  0x18   : > { %1726 = dma.hbm_to_vmem [thread:$0]  (!%p1724_p6), %s598_s27, 16, %s600_s0, [#allocation4]  }
  0x19   : > { %s609_s5 = sshll.u32 %s2301_s20, 4  ;;  %s610_s5 = int_to_ptr.hbm [resolvable:$true] %s609_s5 }
  0x1a   : > { %1729 = dma.hbm_to_vmem [thread:$0]  (!%p1724_p6), %s610_s5, 16, %s612_s23, [#allocation6]  }
  0x1b   : > { %1855 = dma.done.wait (%p1730_p3), [#allocation4], 16  }
  0x1c   : > { %1857 = vsyncadd (%p1730_p3), [#allocation4], 4294967280 }
  0x1d   : > { %1859 = dma.done.wait (%p1730_p3), [#allocation6], 16  }
  0x1e   : > { %1861 = vsyncadd (%p1730_p3), [#allocation6], 4294967280  ;;  %p826_p7 = scmp.lt.s32.totalorder %s1998_s3, 2  ;;  %s2304_s7 = sld [smem:[#allocation14_spill]] }
  0x1f   : > { %s2305_s9 = sld [smem:[#allocation16_spill]] }
  0x20   : > { %s2027_s1 = scalar_select %p826_p7, %s1998_s3, 2 }
  0x21   : > { %s2306_s11 = sld [smem:[#allocation17_spill]] }
  0x22   : > { %s1710_s4 = sshll.u32 %s2027_s1, 5  ;;  %s869_s28 = scalar_lea.vmem %s2280_s16, %s2027_s1 }
  0x23   : > { %s2076_s26 = scalar_lea.vmem %s2279_s15, %s1710_s4  ;;  %s877_s19 = scalar_lea.vmem %s2282_s18, %s2027_s1 }
  0x24   : > { %s2045_s25 = scalar_lea.vmem %s2304_s7, %s1710_s4  ;;  %s858_s7 = scalar_lea.vmem %s2277_s13, %s2027_s1 }
  0x25   : > { %s2050_s2 = scalar_lea.vmem %s2305_s9, %s1710_s4  ;;  %s861_s9 = scalar_lea.vmem %s2278_s14, %s2027_s1 }
  0x26   : > { %881 = sbr.rel (%p1674_p2) target bundleno = 50 (0x32), region = 116  ;;  %s2307_s20 = sld [smem:[#allocation10_spill]] (!%p1674_p2) }
  0x27   : > { %s2059_s21 = scalar_lea.vmem %s2306_s11, %s1710_s4  ;;  %s1714_s11 = sshll.u32 %s2027_s1, 7 }
  0x28   : > { %s2086_s23 = scalar_lea.vmem %s2281_s17, %s1714_s11  ;;  %s2308_s29 = sld [smem:[#allocation11_spill]] (!%p1674_p2) }
  0x2b   : > { %vm886_vm0 = vcmask 261120  }
  0x2c   : > { %v882_v0 = vld [vmem:[%s2307_s20] sm:$0xff] }
  0x2d   : > { %v883_v2 = vmul.f32 5.656854, %v882_v0 }
  0x2e   : > { %v884_v1 = vld [vmem:[%s2308_s29] sm:$0xff] }
  0x2f   : > { %v885_v3 = vadd.f32 %v884_v1, %v883_v2 }
  0x31   : > { %887 = vst.msk [vmem:[#allocation2] sm:$0xff] %vm886_vm0, %v885_v3 }
  0x32 PF: > { %vm891_vm1 = vcmask 261120   ;;  %v1868_v6 = vmov 32.0   ;;  %v932_v18 = vld [vmem:[%s2045_s25 + $0x18] sm:$0xff]  ;;  %v931_v20 = vld [vmem:[%s2045_s25 + $0x10] sm:$0xff]  ;;  %v930_v22 = vld [vmem:[%s2045_s25 + $0x8] sm:$0xff]  ;;  %s2311_s24 = scalar_lea.vmem %s2270_s6, %s2027_s1  ;;  %s2312_s20 = scalar_lea.vmem %s2274_s10, %s2027_s1  ;;  %vm989_vm6 = vcmask 64512  }
  0x33   : > { %1764 = vrcp.f32 %v1868_v6  ;;  %v963_v19 = vld [vmem:[%s2050_s2 + $0x18] sm:$0xff]  ;;  %952 = vmatpush.msra.mxu0 %v932_v18  ;;  %v962_v21 = vld [vmem:[%s2050_s2 + $0x10] sm:$0xff]  ;;  %v961_v23 = vld [vmem:[%s2050_s2 + $0x8] sm:$0xff]  ;;  %s2313_s29 = sld [smem:[#allocation15_spill]]  ;;  %s1872_s8 = smov 88  }
  0x34   : > { %980 = vmatpush.msra.mxu1 %v963_v19  ;;  %v929_v24 = vld [vmem:[%s2045_s25] sm:$0xff]  ;;  %s2309_s25 = sld [smem:[#allocation13_spill]]  ;;  %s1873_s4 = smov 80  }
  0x35   : > { %953 = vmatpush.msra.mxu0 %v931_v20  ;;  %v960_v25 = vld [vmem:[%s2050_s2] sm:$0xff]  ;;  %s1869_s2 = smov 104   ;;  %s1875_s27 = smov 72  }
  0x36   : > { %981 = vmatpush.msra.mxu1 %v962_v21  ;;  %v1756_v38 = vld [vmem:[%s2311_s24] ss:$0 sm:$0xff]  ;;  %s2315_s24 = sld [smem:[#allocation12_spill]]  ;;  %s1876_s0 = smov 8  }
  0x37   : > { %954 = vmatpush.msra.mxu0 %v930_v22  ;;  %v1758_v41 = vld [vmem:[%s2312_s20] ss:$0 sm:$0xff]  ;;  %s1874_s20 = smov 96   ;;  %p1707_p8 = scmp.ne.s32.totalorder %s1998_s3, 2 }
  0x38   : > { %v2100_v4 = vld [vmem:[#allocation2] sm:$0xff]  ;;  %982 = vmatpush.msra.mxu1 %v961_v23 }
  0x39   : > { %v892_v5 = vsel %vm891_vm1, %v2100_v4, 0.0  ;;  %v1765_v7 = vpop.eup %1764  ;;  %955 = vmatpush.msra.mxu0 %v929_v24  ;;  %s2314_s11 = scalar_lea.vmem %s2313_s29, %s2027_s1  ;;  %s1877_s29 = smov 16  }
  0x3a   : > { %893 = vadd.xlane.f32.xlu0 %v892_v5  ;;  %v896_v8 = vmul.f32 32.0, %v1765_v7  ;;  %vm900_vm2 = vweird.f32 %v1765_v7  ;;  %983 = vmatpush.msra.mxu1 %v960_v25  ;;  %s2310_s30 = scalar_lea.vmem %s2309_s25, %s2027_s1  ;;  %v1757_v43 = vld [vmem:[%s2314_s11] ss:$0 sm:$0xff]  ;;  %s1870_s25 = smov 112  }
  0x3b   : > { %v1755_v35 = vld [vmem:[%s2310_s30] ss:$0 sm:$0xff]  ;;  %s1871_s30 = smov 120   ;;  %s1878_s11 = smov 24  }
  0x3c   : > { %v897_v9 = vsub.f32 1.0, %v896_v8  ;;  %v988_v53 = vld [vmem:[%s2315_s24] sm:$0xff] }
  0x3e   : > { %v898_v10 = vmul.f32 %v1765_v7, %v897_v9 }
  0x40   : > { %v899_v11 = vadd.f32 %v1765_v7, %v898_v10 }
  0x42   : > { %v2104_v12 = vsel %vm900_vm2, %v1765_v7, %v899_v11 }
  0xad   : > { %v894_v13 = vpop.xlane.xlu0 %893 }
  0xae   : > { %v902_v14 = vmul.f32 %v2104_v12, %v894_v13 }
  0xb0   : > { %v903_v15 = vsub.f32 %v2100_v4, %v902_v14 }
  0xb2   : > { %v904_v16 = vmul.f32 %v903_v15, %v903_v15 }
  0xb4   : > { %v905_v17 = vsel %vm891_vm1, %v904_v16, 0.0 }
  0xb5   : > { %906 = vadd.xlane.f32.xlu0 %v905_v17 }
 0x128   : > { %v907_v26 = vpop.xlane.xlu0 %906 }
 0x129   : > { %v908_v27 = vmul.f32 %v907_v26, %v2104_v12 }
 0x12b   : > { %v909_v28 = vadd.f32 1e-05, %v908_v27 }
 0x12d   : > { %1766 = vrsqrt.f32 %v909_v28  ;;  %vm916_vm4 = vweird.f32 %v909_v28 }
 0x133   : > { %v1767_v29 = vpop.eup %1766 }
 0x134   : > { %v911_v30 = vmul.f32 %v1767_v29, %v909_v28  ;;  %vm917_vm3 = vweird.f32 %v1767_v29 }
 0x135   : > { %vm918_vm5 = vmor %vm916_vm4, %vm917_vm3 }
 0x136   : > { %v912_v31 = vmul.f32 %v1767_v29, %v911_v30 }
 0x138   : > { %v913_v32 = vmul.f32 0.5, %v912_v31 }
 0x13a   : > { %v914_v33 = vsub.f32 1.5, %v913_v32 }
 0x13c   : > { %v915_v34 = vmul.f32 %v1767_v29, %v914_v33 }
 0x13e   : > { %v919_v36 = vsel %vm918_vm5, %v1767_v29, %v915_v34 }
 0x13f   : > { %v920_v37 = vmul.f32 %v919_v36, %v903_v15 }
 0x141   : > { %v924_v39 = vmul.f32 %v1755_v35, %v920_v37 }
 0x143   : > { %v928_v40 = vadd.f32 %v1756_v38, %v924_v39 }
 0x145   : > { %1691 = vmatmul.msk.f32.vlgmr.msra.gmra.mxu0 %vm891_vm1, %v928_v40  ;;  %1692 = vmatmul.msk.f32.vlgmr.msra.gmra.mxu1 %vm891_vm1, %v928_v40 }
 0x1c2   : > { %v985_v42 = vpop.f32.mrf.mxu1  ;;  %v957_v45 = vpop.f32.mrf.mxu0 }
 0x1c3   : > { %v2140_v44 = vadd.f32 %v1758_v41, %v985_v42  ;;  %v958_v46 = vadd.f32 %v1757_v43, %v957_v45 }
 0x1c5   : > { %1224 = vrot.lane.b32.xlu0 %v2140_v44, %s1869_s2  ;;  %1146 = vrot.lane.b32.xlu2 %v2140_v44, %s1870_s25 }
 0x1c6   : > { %1068 = vrot.lane.b32.xlu1 %v2140_v44, %s1871_s30  ;;  %1693 = vmatpush.xpose.msk.msra.mxu2 %vm989_vm6, %v2140_v44 }
 0x1c9   : > { %1694 = vmatmul.msk.f32.vlgmr.msra.gmra.mxu2 %vm989_vm6, %v958_v46 }
 0x1cd   : > { %1144 = vrot.lane.b32.xlu2 %v958_v46, %s1870_s25 }
 0x1ce   : > { %1066 = vrot.lane.b32.xlu1 %v958_v46, %s1871_s30  ;;  %s2316_s30 = scalar_lea.vmem %s2276_s12, %s2027_s1 }
 0x1d6   : > { %1222 = vrot.lane.b32.xlu1 %v958_v46, %s1869_s2 }
 0x21f   : > { %v1147_v47 = vpop.permute.xlu2 %1146 }
 0x220   : > { %1699 = vmatpush.xpose.msk.msrb.mxu0 %vm989_vm6, %v1147_v47 }
 0x227   : > { %v1145_v48 = vpop.permute.xlu2 %1144 }
 0x228   : > { %1700 = vmatmul.msk.f32.vlgmr.msrb.gmra.mxu0 %vm989_vm6, %v1145_v48 }
 0x237   : > { %v1225_v49 = vpop.permute.xlu0 %1224 }
 0x238   : > { %v1069_v50 = vpop.permute.xlu1 %1068  ;;  %1702 = vmatpush.xpose.msk.msra.mxu0 %vm989_vm6, %v1225_v49 }
 0x239   : > { %1696 = vmatpush.xpose.msk.msrb.mxu2 %vm989_vm6, %v1069_v50 }
 0x240   : > { %v1067_v51 = vpop.permute.xlu1 %1066 }
 0x241   : > { %1697 = vmatmul.msk.f32.vlgmr.msrb.gmra.mxu2 %vm989_vm6, %v1067_v51 }
 0x248   : > { %v1223_v52 = vpop.permute.xlu1 %1222 }
 0x249   : > { %1703 = vmatmul.msk.f32.vlgmr.msra.gmra.mxu0 %vm989_vm6, %v1223_v52 }
 0x24c   : > { %v1013_v54 = vpop.f32.mrf.mxu2 }
 0x24d   : > { %v1014_v55 = vadd.f32 %v1013_v54, %v988_v53 }
 0x24f   : > { %v1016_v56 = vsel %vm989_vm6, %v1014_v55, -inf }
 0x250   : > { %1017 = vmax.xlane.f32.xlu1 %v1016_v56 }
 0x2a5   : > { %v1169_v57 = vpop.f32.mrf.mxu0 }
 0x2a6   : > { %v1170_v3 = vadd.f32 %v1169_v57, %v988_v53 }
 0x2a8   : > { %v1172_v6 = vsel %vm989_vm6, %v1170_v3, -inf }
 0x2c3   : > { %v1018_v58 = vpop.xlane.xlu1 %1017 }
 0x2c4   : > { %v1019_v59 = vsub.f32 %v1014_v55, %v1018_v58  ;;  %v1091_v60 = vpop.f32.mrf.mxu2 }
 0x2c5   : > { %v1092_v61 = vadd.f32 %v1091_v60, %v988_v53 }
 0x2c6   : > { %v1020_v62 = vmul.f32 1.442695, %v1019_v59  ;;  %v1247_v63 = vpop.f32.mrf.mxu0 }
 0x2c7   : > { %v1248_v0 = vadd.f32 %v1247_v63, %v988_v53  ;;  %v1094_v1 = vsel %vm989_vm6, %v1092_v61, -inf }
 0x2c8   : > { %1768 = vpow2.f32 %v1020_v62  ;;  %1095 = vmax.xlane.f32.xlu2 %v1094_v1 }
 0x2c9   : > { %v1250_v2 = vsel %vm989_vm6, %v1248_v0, -inf }
 0x2ca   : > { %1251 = vmax.xlane.f32.xlu0 %v1250_v2 }
 0x2ce   : > { %v2160_v5 = vpop.eup %1768 }
 0x2cf   : > { %v1022_v7 = vsel %vm989_vm6, %v2160_v5, 0.0 }
 0x2d0   : > { %1173 = vmax.xlane.f32.xlu2 %v1172_v6  ;;  %1023 = vadd.xlane.f32.xlu1 %v1022_v7 }
 0x2de   : > { %1118 = vrot.lane.b32.xlu0 %v2140_v44, %s1872_s8 }
 0x2e6   : > { %1196 = vrot.lane.b32.xlu0 %v2140_v44, %s1873_s4 }
 0x33b   : > { %v1096_v8 = vpop.xlane.xlu2 %1095 }
 0x33c   : > { %v1097_v9 = vsub.f32 %v1092_v61, %v1096_v8 }
 0x33d   : > { %v1252_v10 = vpop.xlane.xlu0 %1251 }
 0x33e   : > { %v1098_v11 = vmul.f32 1.442695, %v1097_v9  ;;  %v1253_v13 = vsub.f32 %v1248_v0, %v1252_v10 }
 0x340   : > { %1770 = vpow2.f32 %v1098_v11  ;;  %v1254_v14 = vmul.f32 1.442695, %v1253_v13 }
 0x342   : > { %1772 = vpow2.f32 %v1254_v14 }
 0x343   : > { %v1174_v15 = vpop.xlane.xlu2 %1173  ;;  %v1024_v25 = vpop.xlane.xlu1 %1023 }
 0x344   : > { %v1175_v16 = vsub.f32 %v1170_v3, %v1174_v15  ;;  %v1036_v33 = vand.u32 2147483648, %v1024_v25  ;;  %vm1030_vm8 = vweird.f32 %v1024_v25  ;;  %v1034_v34 = vand.u32 2147483647, %v1024_v25 }
 0x346   : > { %v2167_v17 = vpop.eup %1770  ;;  %v1176_v18 = vmul.f32 1.442695, %v1175_v16  ;;  %v1037_v40 = vor.u32 1.1754944e-38, %v1036_v33  ;;  %vm1035_vm10 = vcmp.eq.f32.partialorder %v1034_v34, 8.507059e+37 }
 0x347   : > { %v1100_v19 = vsel %vm989_vm6, %v2167_v17, 0.0 }
 0x348   : > { %1774 = vpow2.f32 %v1176_v18  ;;  %1101 = vadd.xlane.f32.xlu2 %v1100_v19  ;;  %v2171_v20 = vpop.eup %1772  ;;  %v1320_v18 = vld [vmem:[%s2059_s21 + $0x18] sm:$0xff]  ;;  %v1319_v19 = vld [vmem:[%s2059_s21 + $0x10] sm:$0xff] }
 0x349   : > { %v1256_v22 = vsel %vm989_vm6, %v2171_v20, 0.0  ;;  %1776 = vrcp.f32 %v1024_v25  ;;  %1340 = vmatpush.msrb.mxu0 %v1320_v18 }
 0x34b   : > { %1341 = vmatpush.msrb.mxu0 %v1319_v19 }
 0x34e   : > { %v2173_v21 = vpop.eup %1774 }
 0x34f   : > { %v1178_v23 = vsel %vm989_vm6, %v2173_v21, 0.0  ;;  %v1777_v26 = vpop.eup %1776 }
 0x350   : > { %v1119_v24 = vpop.permute.xlu0 %1118  ;;  %1257 = vadd.xlane.f32.xlu2 %v1256_v22  ;;  %1179 = vadd.xlane.f32.xlu1 %v1178_v23  ;;  %v1026_v27 = vmul.f32 %v1777_v26, %v1024_v25  ;;  %vm1031_vm7 = vweird.f32 %v1777_v26 }
 0x351   : > { %1139 = vmatpush.msra.mxu2 %v1119_v24  ;;  %vm1032_vm9 = vmor %vm1030_vm8, %vm1031_vm7 }
 0x352   : > { %v1027_v28 = vsub.f32 1.0, %v1026_v27 }
 0x354   : > { %v1028_v30 = vmul.f32 %v1777_v26, %v1027_v28  ;;  %v1759_v28 = vld [vmem:[%s2316_s30] ss:$0 sm:$0xff] }
 0x356   : > { %v1029_v31 = vadd.f32 %v1777_v26, %v1028_v30 }
 0x358   : > { %v1033_v39 = vsel %vm1032_vm9, %v1777_v26, %v1029_v31  ;;  %v1197_v55 = vpop.permute.xlu0 %1196  ;;  %vm1313_vm9 = vcmask 130048  }
 0x368   : > { %1040 = vrot.lane.b32.xlu2 %v2140_v44, %s1874_s20 }
 0x369   : > { %1274 = vrot.lane.b32.xlu1 %v2140_v44, %s1875_s27  ;;  %v1038_v44 = vsel %vm1035_vm10, %v1037_v40, %v1033_v39  ;;  %vm1315_vm10 = vcmask 195584   ;;  %v1382_v39 = vld [vmem:[%s2076_s26 + $0x8] sm:$0xff]  ;;  %v1381_v40 = vld [vmem:[%s2076_s26] sm:$0xff] }
 0x36a   : > { %v1039_v52 = vmul.f32 %v2160_v5, %v1038_v44 }
 0x3bb   : > { %v1102_v29 = vpop.xlane.xlu2 %1101 }
 0x3bc   : > { %1778 = vrcp.f32 %v1102_v29  ;;  %v1114_v41 = vand.u32 2147483648, %v1102_v29  ;;  %v1112_v43 = vand.u32 2147483647, %v1102_v29  ;;  %vm1108_vm12 = vweird.f32 %v1102_v29 }
 0x3be   : > { %v1115_v47 = vor.u32 1.1754944e-38, %v1114_v41  ;;  %vm1113_vm14 = vcmp.eq.f32.partialorder %v1112_v43, 8.507059e+37  ;;  %v1428_v41 = vld [vmem:[%s2086_s23 + $0x78] sm:$0xff]  ;;  %v1426_v43 = vld [vmem:[%s2086_s23 + $0x68] sm:$0xff] }
 0x3bf   : > { %1429 = vmatpush.msra.mxu3 %v1428_v41 }
 0x3c2   : > { %v1779_v32 = vpop.eup %1778 }
 0x3c3   : > { %v1104_v35 = vmul.f32 %v1779_v32, %v1102_v29  ;;  %v1258_v36 = vpop.xlane.xlu2 %1257  ;;  %v1180_v37 = vpop.xlane.xlu1 %1179  ;;  %vm1109_vm11 = vweird.f32 %v1779_v32 }
 0x3c4   : > { %1780 = vrcp.f32 %v1258_v36  ;;  %vm1110_vm13 = vmor %vm1108_vm12, %vm1109_vm11  ;;  %v1192_v60 = vand.u32 2147483648, %v1180_v37  ;;  %v1190_v62 = vand.u32 2147483647, %v1180_v37  ;;  %v1270_v0 = vand.u32 2147483648, %v1258_v36 }
 0x3c5   : > { %v1105_v38 = vsub.f32 1.0, %v1104_v35  ;;  %1782 = vrcp.f32 %v1180_v37  ;;  %vm1186_vm2 = vweird.f32 %v1180_v37  ;;  %vm1264_vm3 = vweird.f32 %v1258_v36 }
 0x3c6   : > { %v1268_v2 = vand.u32 2147483647, %v1258_v36  ;;  %v1193_v3 = vor.u32 1.1754944e-38, %v1192_v60  ;;  %vm1191_vm7 = vcmp.eq.f32.partialorder %v1190_v62, 8.507059e+37  ;;  %v1271_v8 = vor.u32 1.1754944e-38, %v1270_v0 }
 0x3c7   : > { %v1106_v42 = vmul.f32 %v1779_v32, %v1105_v38  ;;  %v1384_v38 = vld [vmem:[%s2076_s26 + $0x18] sm:$0xff] }
 0x3c8   : > { %vm1269_vm8 = vcmp.eq.f32.partialorder %v1268_v2, 8.507059e+37  ;;  %v1761_v2 = vld [vmem:[%s861_s9] ss:$0 sm:$0xff] }
 0x3c9   : > { %v1107_v45 = vadd.f32 %v1779_v32, %v1106_v42  ;;  %v1427_v42 = vld [vmem:[%s2086_s23 + $0x70] sm:$0xff] }
 0x3ca   : > { %v1781_v46 = vpop.eup %1780  ;;  %1430 = vmatpush.msra.mxu3 %v1427_v42 }
 0x3cb   : > { %v1783_v48 = vpop.eup %1782  ;;  %v1111_v49 = vsel %vm1110_vm13, %v1779_v32, %v1107_v45  ;;  %v1260_v50 = vmul.f32 %v1781_v46, %v1258_v36  ;;  %v1041_v51 = vpop.permute.xlu2 %1040  ;;  %vm1265_vm0 = vweird.f32 %v1781_v46 }
 0x3cc   : > { %v1116_v53 = vsel %vm1113_vm14, %v1115_v47, %v1111_v49  ;;  %v1182_v54 = vmul.f32 %v1783_v48, %v1180_v37  ;;  %1061 = vmatpush.msrb.mxu1 %v1041_v51  ;;  %vm1187_vm15 = vweird.f32 %v1783_v48  ;;  %vm1266_vm5 = vmor %vm1264_vm3, %vm1265_vm0  ;;  %1431 = vmatpush.msra.mxu3 %v1426_v43  ;;  %v1423_v49 = vld [vmem:[%s2086_s23 + $0x50] sm:$0xff]  ;;  %v1421_v51 = vld [vmem:[%s2086_s23 + $0x40] sm:$0xff] }
 0x3cd   : > { %v1261_v56 = vsub.f32 1.0, %v1260_v50  ;;  %1695 = vmatmul.msk.f32.vlgmr.msrb.gmra.mxu1 %vm989_vm6, %v1039_v52  ;;  %v1117_v57 = vmul.f32 %v2167_v17, %v1116_v53  ;;  %vm1188_vm4 = vmor %vm1186_vm2, %vm1187_vm15  ;;  %v1422_v50 = vld [vmem:[%s2086_s23 + $0x48] sm:$0xff]  ;;  %v1420_v53 = vld [vmem:[%s2086_s23 + $0x38] sm:$0xff] }
 0x3ce   : > { %v1183_v58 = vsub.f32 1.0, %v1182_v54  ;;  %1217 = vmatpush.msra.mxu1 %v1197_v55  ;;  %v1419_v55 = vld [vmem:[%s2086_s23 + $0x30] sm:$0xff] }
 0x3cf   : > { %v1262_v59 = vmul.f32 %v1781_v46, %v1261_v56  ;;  %1698 = vmatmul.msk.f32.vlgmr.msra.gmra.mxu2 %vm989_vm6, %v1117_v57  ;;  %v1418_v57 = vld [vmem:[%s2086_s23 + $0x28] sm:$0xff] }
 0x3d0   : > { %v1184_v61 = vmul.f32 %v1783_v48, %v1183_v58  ;;  %1404 = vmatpush.msrb.mxu1 %v1384_v38 }
 0x3d1   : > { %v1263_v63 = vadd.f32 %v1781_v46, %v1262_v59  ;;  %v1417_v59 = vld [vmem:[%s2086_s23 + $0x20] sm:$0xff] }
 0x3d2   : > { %v1185_v1 = vadd.f32 %v1783_v48, %v1184_v61  ;;  %v1416_v61 = vld [vmem:[%s2086_s23 + $0x18] sm:$0xff] }
 0x3d3   : > { %v1267_v6 = vsel %vm1266_vm5, %v1781_v46, %v1263_v63  ;;  %v1425_v46 = vld [vmem:[%s2086_s23 + $0x60] sm:$0xff] }
 0x3d4   : > { %v1189_v5 = vsel %vm1188_vm4, %v1783_v48, %v1185_v1  ;;  %v1272_v10 = vsel %vm1269_vm8, %v1271_v8, %v1267_v6  ;;  %v1424_v48 = vld [vmem:[%s2086_s23 + $0x58] sm:$0xff]  ;;  %1432 = vmatpush.msra.mxu3 %v1425_v46  ;;  %v1760_v63 = vld [vmem:[%s858_s7] ss:$0 sm:$0xff]  ;;  %v1415_v6 = vld [vmem:[%s2086_s23 + $0x10] sm:$0xff] }
 0x3d5   : > { %v1194_v7 = vsel %vm1191_vm7, %v1193_v3, %v1189_v5  ;;  %v1273_v13 = vmul.f32 %v2171_v20, %v1272_v10  ;;  %v1318_v20 = vld [vmem:[%s2059_s21 + $0x8] sm:$0xff]  ;;  %v1413_v8 = vld [vmem:[%s2086_s23] sm:$0xff] }
 0x3d6   : > { %v1195_v9 = vmul.f32 %v2173_v21, %v1194_v7  ;;  %1342 = vmatpush.msrb.mxu0 %v1318_v20  ;;  %v1317_v21 = vld [vmem:[%s2059_s21] sm:$0xff]  ;;  %1433 = vmatpush.msra.mxu3 %v1424_v48  ;;  %v1414_v7 = vld [vmem:[%s2086_s23 + $0x8] sm:$0xff] }
 0x3d8   : > { %1701 = vmatmul.msk.f32.vlgmr.msra.gmra.mxu1 %vm989_vm6, %v1195_v9  ;;  %1343 = vmatpush.msrb.mxu0 %v1317_v21  ;;  %v1762_v9 = vld [vmem:[%s869_s28] ss:$0 sm:$0xff]  ;;  %s2317_s28 = sld [smem:[#allocation20_spill]] (!%p1707_p8) }
 0x3d9   : > { %1434 = vmatpush.msra.mxu3 %v1423_v49 }
 0x3db   : > { %v1275_v11 = vpop.permute.xlu1 %1274  ;;  %1435 = vmatpush.msra.mxu3 %v1422_v50 }
 0x3dc   : > { %1295 = vmatpush.msrb.mxu2 %v1275_v11 }
 0x3dd   : > { %1704 = vmatmul.msk.f32.vlgmr.msrb.gmra.mxu2 %vm989_vm6, %v1273_v13  ;;  %1436 = vmatpush.msra.mxu3 %v1421_v51 }
 0x3df   : > { %1437 = vmatpush.msra.mxu3 %v1420_v53 }
 0x3e1   : > { %1438 = vmatpush.msra.mxu3 %v1419_v55 }
 0x3e3   : > { %1439 = vmatpush.msra.mxu3 %v1418_v57 }
 0x3e5   : > { %1440 = vmatpush.msra.mxu3 %v1417_v59 }
 0x3e7   : > { %1441 = vmatpush.msra.mxu3 %v1416_v61 }
 0x3e9   : > { %1442 = vmatpush.msra.mxu3 %v1415_v6 }
 0x3eb   : > { %1443 = vmatpush.msra.mxu3 %v1414_v7 }
 0x3ed   : > { %1444 = vmatpush.msra.mxu3 %v1413_v8 }
 0x44a   : > { %v1063_v14 = vpop.f32.mrf.mxu1 }
 0x452   : > { %v1141_v15 = vpop.f32.mrf.mxu2 }
 0x453   : > { %1301 = vrot.lane.b32.xlu2 %v1141_v15, %s1876_s0 }
 0x455   : > { %v1219_v16 = vpop.f32.mrf.mxu1 }
 0x456   : > { %1305 = vrot.lane.b32.xlu0 %v1219_v16, %s1877_s29 }
 0x460   : > { %v1297_v17 = vpop.f32.mrf.mxu2 }
 0x461   : > { %1309 = vrot.lane.b32.xlu1 %v1297_v17, %s1878_s11 }
 0x4ad   : > { %v1302_v22 = vpop.permute.xlu2 %1301 }
 0x4ae   : > { %v1312_v24 = vsel %vm989_vm6, %v1063_v14, %v1302_v22  ;;  %v1763_v14 = vld [vmem:[%s877_s19] ss:$0 sm:$0xff] }
 0x4c8   : > { %v1306_v23 = vpop.permute.xlu0 %1305 }
 0x4c9   : > { %v1314_v25 = vsel %vm1313_vm9, %v1312_v24, %v1306_v23 }
 0x4d3   : > { %v1310_v26 = vpop.permute.xlu1 %1309 }
 0x4d4   : > { %v1316_v27 = vsel %vm1315_vm10, %v1314_v25, %v1310_v26 }
 0x4d5   : > { %1705 = vmatmul.msk.f32.vlgmr.msrb.gmra.mxu0 %vm891_vm1, %v1316_v27 }
 0x552   : > { %v1345_v29 = vpop.f32.mrf.mxu0 }
 0x553   : > { %v1346_v30 = vadd.f32 %v1759_v28, %v1345_v29 }
 0x555   : > { %v2201_v31 = vadd.f32 %v1346_v30, %v2100_v4  ;;  %v1383_v4 = vld [vmem:[%s2076_s26 + $0x10] sm:$0xff] }
 0x556   : > { %1405 = vmatpush.msrb.mxu1 %v1383_v4 }
 0x557   : > { %v1351_v32 = vsel %vm891_vm1, %v2201_v31, 0.0 }
 0x558   : > { %1352 = vadd.xlane.f32.xlu2 %v1351_v32  ;;  %1406 = vmatpush.msrb.mxu1 %v1382_v39 }
 0x55a   : > { %1407 = vmatpush.msrb.mxu1 %v1381_v40 }
 0x5cb   : > { %v1353_v33 = vpop.xlane.xlu2 %1352 }
 0x5cc   : > { %v1354_v34 = vmul.f32 %v1353_v33, %v2104_v12 }
 0x5ce   : > { %v1355_v35 = vsub.f32 %v2201_v31, %v1354_v34 }
 0x5d0   : > { %v1356_v36 = vmul.f32 %v1355_v35, %v1355_v35 }
 0x5d2   : > { %v1357_v37 = vsel %vm891_vm1, %v1356_v36, 0.0 }
 0x5d3   : > { %1358 = vadd.xlane.f32.xlu0 %v1357_v37 }
 0x646   : > { %v1359_v44 = vpop.xlane.xlu0 %1358 }
 0x647   : > { %v1360_v45 = vmul.f32 %v1359_v44, %v2104_v12 }
 0x649   : > { %v1361_v47 = vadd.f32 1e-05, %v1360_v45 }
 0x64b   : > { %1784 = vrsqrt.f32 %v1361_v47  ;;  %vm1368_vm11 = vweird.f32 %v1361_v47 }
 0x651   : > { %v1785_v52 = vpop.eup %1784 }
 0x652   : > { %v1363_v54 = vmul.f32 %v1785_v52, %v1361_v47  ;;  %vm1369_vm6 = vweird.f32 %v1785_v52 }
 0x653   : > { %vm1370_vm12 = vmor %vm1368_vm11, %vm1369_vm6 }
 0x654   : > { %v1364_v56 = vmul.f32 %v1785_v52, %v1363_v54 }
 0x656   : > { %v1365_v58 = vmul.f32 0.5, %v1364_v56 }
 0x658   : > { %v1366_v60 = vsub.f32 1.5, %v1365_v58 }
 0x65a   : > { %v1367_v62 = vmul.f32 %v1785_v52, %v1366_v60 }
 0x65c   : > { %v1371_v0 = vsel %vm1370_vm12, %v1785_v52, %v1367_v62 }
 0x65d   : > { %v1372_v1 = vmul.f32 %v1371_v0, %v1355_v35 }
 0x65f   : > { %v1376_v3 = vmul.f32 %v1760_v63, %v1372_v1 }
 0x661   : > { %v1380_v5 = vadd.f32 %v1761_v2, %v1376_v3 }
 0x663   : > { %1706 = vmatmul.msk.f32.vlgmr.msrb.gmra.mxu1 %vm891_vm1, %v1380_v5 }
 0x6e0   : > { %v1409_v10 = vpop.f32.mrf.mxu1 }
 0x6e1   : > { %v1410_v11 = vadd.f32 %v1762_v9, %v1409_v10 }
 0x6e3   : > { %v1412_v13 = vmax.f32 %v1410_v11, 0.0 }
 0x6e5   : > { %1445 = vmatmul.f32.vlgmr.msra.gmra.mxu3 %v1412_v13 }
 0x768   : > { %v1446_v15 = vpop.f32.mrf.mxu3 }
 0x769   : > { %v1449_v16 = vadd.f32 %v1446_v15, %v2201_v31  ;;  %1459 = sbr.rel (%p1707_p8) target bundleno = 2171 (0x87b), region = 120 }
 0x76b   : > { %v1454_v17 = vadd.f32 %v1763_v14, %v1449_v16 }
 0x76d   : > { %1455 = vst.msk [vmem:[#allocation2] sm:$0xff] %vm891_vm1, %v1454_v17 }
 0x76e   : > { %v1462_v18 = vsel %vm891_vm1, %v1454_v17, 0.0  ;;  %v1786_v33 = vld [vmem:[#allocation3] ss:$0 sm:$0xff]  ;;  %v1787_v36 = vld [vmem:[#allocation5] ss:$0 sm:$0xff] }
 0x76f   : > { %1463 = vadd.xlane.f32.xlu0 %v1462_v18 }
 0x7e2   : > { %v1464_v19 = vpop.xlane.xlu0 %1463 }
 0x7e3   : > { %v1465_v20 = vmul.f32 %v1464_v19, %v2104_v12 }
 0x7e5   : > { %v1466_v21 = vsub.f32 %v1454_v17, %v1465_v20 }
 0x7e7   : > { %v1467_v22 = vmul.f32 %v1466_v21, %v1466_v21 }
 0x7e9   : > { %v1468_v23 = vsel %vm891_vm1, %v1467_v22, 0.0 }
 0x7ea   : > { %1469 = vadd.xlane.f32.xlu0 %v1468_v23 }
 0x85d   : > { %v1470_v24 = vpop.xlane.xlu0 %1469 }
 0x85e   : > { %v1471_v25 = vmul.f32 %v1470_v24, %v2104_v12 }
 0x860   : > { %v1472_v26 = vadd.f32 1e-05, %v1471_v25 }
 0x862   : > { %1788 = vrsqrt.f32 %v1472_v26  ;;  %vm1479_vm14 = vweird.f32 %v1472_v26 }
 0x868   : > { %v1789_v27 = vpop.eup %1788 }
 0x869   : > { %v1474_v28 = vmul.f32 %v1789_v27, %v1472_v26  ;;  %vm1480_vm13 = vweird.f32 %v1789_v27 }
 0x86a   : > { %vm1481_vm15 = vmor %vm1479_vm14, %vm1480_vm13 }
 0x86b   : > { %v1475_v29 = vmul.f32 %v1789_v27, %v1474_v28 }
 0x86d   : > { %v1476_v30 = vmul.f32 0.5, %v1475_v29 }
 0x86f   : > { %v1477_v31 = vsub.f32 1.5, %v1476_v30 }
 0x871   : > { %v1478_v32 = vmul.f32 %v1789_v27, %v1477_v31 }
 0x873   : > { %v1482_v34 = vsel %vm1481_vm15, %v1789_v27, %v1478_v32 }
 0x874   : > { %v1483_v35 = vmul.f32 %v1482_v34, %v1466_v21 }
 0x876   : > { %v1487_v37 = vmul.f32 %v1786_v33, %v1483_v35 }
 0x878   : > { %v1491_v38 = vadd.f32 %v1787_v36, %v1487_v37 }
 0x87a   : > { %1492 = vst.msk [vmem:[%s2317_s28] sm:$0xff] %vm891_vm1, %v1491_v38 }
 0x87b PF: > { %s2318_s23 = sld [smem:[#allocation9_spill]] }
 0x881   : > { %s33_s2 = sadd.s32 1, %s2318_s23  }
 0x882   : > { %p30_p9 = scmp.ge.s32.totalorder %s33_s2, 5  }
 0x884   :  { %32 = sbr.rel (!%p30_p9) target bundleno = 14 (0xe), region = 186 }
 0x889   :  { %1504 = vsyncpa [#allocation4], 1 }
 0x88a   :  { %1506 = vsyncpa [#allocation4 + $0x1], 1 }
 0x88b   :  { %1507 = vsyncpa [#allocation6], 1 }

// kernel: forward.9
= control target key start
LH: loop header
LB: loop body
LE: loop exit
PB: predicated region body
PF: predicated region fallthrough
CT: control target
= control target key end

     0   :  { %s2269_s0 = inlined_call_operand.vmem [shape: f32[8,32], index: 0, kind: input, shape index: {}]   ;;  %s2270_s1 = inlined_call_operand.vmem [shape: f32[12,32], index: 1, kind: input, shape index: {}]   ;;  %s2271_s2 = inlined_call_operand.vmem [shape: f32[8,32], index: 2, kind: input, shape index: {}]   ;;  %s2272_s3 = inlined_call_operand.vmem [shape: f32[12,32], index: 3, kind: input, shape index: {}]   ;;  %s2273_s4 = inlined_call_operand.vmem [shape: f32[8,12], index: 4, kind: input, shape index: {}]   ;;  %s2274_s5 = inlined_call_operand.vmem [shape: f32[2,1,32], index: 5, kind: input, shape index: {}]   ;;  %s2275_s6 = inlined_call_operand.vmem [shape: f32[2,1,32], index: 6, kind: input, shape index: {}]   ;;  %s2276_s7 = inlined_call_operand.vmem [shape: f32[2,32,32], index: 7, kind: input, shape index: {}]   ;;  %s2277_s8 = inlined_call_operand.vmem [shape: f32[2,1,32], index: 8, kind: input, shape index: {}]   ;;  %s2278_s9 = inlined_call_operand.vmem [shape: f32[2,32,64], index: 9, kind: input, shape index: {}]   ;;  %s2279_s10 = inlined_call_operand.vmem [shape: f32[2,1,64], index: 10, kind: input, shape index: {}]   ;;  %s2280_s11 = inlined_call_operand.vmem [shape: f32[2,32,32], index: 11, kind: input, shape index: {}]   ;;  %s2281_s12 = inlined_call_operand.vmem [shape: f32[2,1,32], index: 12, kind: input, shape index: {}]   ;;  %s2282_s13 = inlined_call_operand.vmem [shape: f32[2,1,32], index: 13, kind: input, shape index: {}]   ;;  %s2283_s14 = inlined_call_operand.vmem [shape: f32[2,1,32], index: 14, kind: input, shape index: {}]   ;;  %s2284_s15 = inlined_call_operand.vmem [shape: f32[2,32,128], index: 15, kind: input, shape index: {}]   ;;  %s2285_s16 = inlined_call_operand.vmem [shape: f32[2,1,128], index: 16, kind: input, shape index: {}]   ;;  %s2286_s17 = inlined_call_operand.vmem [shape: f32[2,128,32], index: 17, kind: input, shape index: {}]   ;;  %s2287_s18 = inlined_call_operand.vmem [shape: f32[2,1,32], index: 18, kind: input, shape index: {}]   ;;  %s2288_s19 = inlined_call_operand.vmem [shape: f32[1,32], index: 19, kind: input, shape index: {}]   ;;  %s2289_s20 = inlined_call_operand.vmem [shape: f32[1,32], index: 20, kind: input, shape index: {}]   ;;  %s2290_s21 = inlined_call_operand.vmem [shape: f32[8,32], index: 21, kind: output, shape index: {}]  }
   0x1   :  { %2294 = sst [smem:[#allocation4_spill]] %s2269_s0 }
   0x2   :  { %2295 = sst [smem:[#allocation5_spill]] %s2270_s1 }
   0x3   :  { %2296 = sst [smem:[#allocation6_spill]] %s2271_s2  ;;  %s1954_s2 = smov 0  }
   0x4   :  { %2297 = sst [smem:[#allocation7_spill]] %s2272_s3 }
   0x5   :  { %2298 = sst [smem:[#allocation8_spill]] %s2273_s4 }
   0x6   :  { %2299 = sst [smem:[#allocation9_spill]] %s2274_s5 }
   0x7   :  { %2300 = sst [smem:[#allocation10_spill]] %s2276_s7 }
   0x8   :  { %2301 = sst [smem:[#allocation11_spill]] %s2277_s8 }
   0x9   :  { %2302 = sst [smem:[#allocation12_spill]] %s2278_s9 }
   0xa   :  { %2303 = sst [smem:[#allocation13_spill]] %s2280_s11 }
   0xb   :  { %2304 = sst [smem:[#allocation14_spill]] %s2288_s19 }
   0xc   :  { %2305 = sst [smem:[#allocation15_spill]] %s2289_s20 }
   0xd   :  { %2306 = sst [smem:[#allocation16_spill]] %s2290_s21 }
   0xe LB: > { %2307 = sst [smem:[#allocation3_spill]] %s1831_s2  ;;  %s1960_s25 = sadd.s32 4294967295, %s1831_s2   ;;  %s1831_s2 = sphi %s1954_s2, %s31_s2  }
   0xf   : > { %p1722_p0 = scmp.ge.s32.totalorder %s1831_s2, 1  ;;  %p694_p1 = scmp.lt.s32.totalorder %s1831_s2, 3 }
  0x11   : > { %p695_p2 = pnand %p1722_p0, %p694_p1 }
  0x12   : > { %p796_p3 = scmp.lt.s32.totalorder (!%p695_p2), %s1960_s25, 1  ;;  %s2310_s7 = sld [smem:[#allocation10_spill]] (!%p695_p2) }
  0x13   : > { %698 = sbr.rel (%p695_p2) target bundleno = 2461 (0x99d), region = 104  ;;  %s2311_s9 = sld [smem:[#allocation12_spill]] (!%p695_p2) }
  0x14   : > { %s2312_s11 = sld [smem:[#allocation13_spill]] (!%p695_p2)  ;;  %p1733_p4 = scmp.ne.s32.totalorder (!%p695_p2), %s1960_s25, 0 }
  0x18   : > { %s1966_s26 = scalar_select %p796_p3, %s1960_s25, 1 }
  0x19   : > { %s2313_s2 = sld [smem:[#allocation4_spill]] (!%p1733_p4) }
  0x1a   : > { %s1762_s5 = sshll.u32 %s1966_s26, 5  ;;  %s839_s0 = scalar_lea.vmem %s2285_s16, %s1966_s26 }
  0x1b   : > { %s1984_s3 = scalar_lea.vmem %s2310_s7, %s1762_s5  ;;  %s1989_s20 = scalar_lea.vmem %s2311_s9, %s1762_s5 }
  0x1c   : > { %s1998_s19 = scalar_lea.vmem %s2312_s11, %s1762_s5  ;;  %s828_s7 = scalar_lea.vmem %s2282_s13, %s1966_s26 }
  0x1d   : > { %s831_s9 = scalar_lea.vmem %s2283_s14, %s1966_s26  ;;  %s2015_s28 = scalar_lea.vmem %s2284_s15, %s1762_s5 }
  0x1e   : > { %s1766_s11 = sshll.u32 %s1966_s26, 7  ;;  %s847_s21 = scalar_lea.vmem %s2287_s18, %s1966_s26 }
  0x1f   : > { %s2025_s24 = scalar_lea.vmem %s2286_s17, %s1766_s11  ;;  %851 = sbr.rel (%p1733_p4) target bundleno = 42 (0x2a), region = 108 }
  0x20   : > { %s2314_s4 = sld [smem:[#allocation6_spill]] (!%p1733_p4) }
  0x24   : > { %v852_v0 = vld [vmem:[%s2313_s2] sm:$0xff]  ;;  %vm856_vm0 = vcmask 261120  }
  0x25   : > { %v853_v2 = vmul.f32 5.656854, %v852_v0 }
  0x26   : > { %v854_v1 = vld [vmem:[%s2314_s4] sm:$0xff] }
  0x27   : > { %v855_v3 = vadd.f32 %v854_v1, %v853_v2 }
  0x29   : > { %857 = vst.msk [vmem:[#allocation2] sm:$0xff] %vm856_vm0, %v855_v3 }
  0x2a PF: > { %vm861_vm1 = vcmask 261120   ;;  %s2315_s23 = sld [smem:[#allocation5_spill]]  ;;  %vm910_vm2 = vcmask 257024   ;;  %v1833_v16 = vmov 32.0   ;;  %v959_v38 = vld [vmem:[%s1984_s3 + $0x18] sm:$0xff]  ;;  %v958_v39 = vld [vmem:[%s1984_s3 + $0x10] sm:$0xff]  ;;  %s2319_s27 = scalar_lea.vmem %s2275_s6, %s1966_s26 }
  0x2b   : > { %s2316_s8 = sld [smem:[#allocation7_spill]]  ;;  %1795 = vrcp.f32 %v1833_v16  ;;  %979 = vmatpush.msra.mxu1 %v959_v38  ;;  %v957_v40 = vld [vmem:[%s1984_s3 + $0x8] sm:$0xff]  ;;  %v956_v41 = vld [vmem:[%s1984_s3] sm:$0xff]  ;;  %v990_v42 = vld [vmem:[%s1989_s20 + $0x18] sm:$0xff]  ;;  %s2320_s29 = scalar_lea.vmem %s2279_s10, %s1966_s26  ;;  %vm1025_vm13 = vcmask 64512   ;;  %vm1055_vm14 = vcmask 97280  }
  0x2c   : > { %v989_v43 = vld [vmem:[%s1989_s20 + $0x10] sm:$0xff]  ;;  %v988_v46 = vld [vmem:[%s1989_s20 + $0x8] sm:$0xff]  ;;  %v987_v48 = vld [vmem:[%s1989_s20] sm:$0xff]  ;;  %s2317_s4 = sld [smem:[#allocation9_spill]]  ;;  %s1834_s30 = smov 96   ;;  %vm1088_vm15 = vcmask 1043456  }
  0x2d   : > { %980 = vmatpush.msra.mxu1 %v958_v39  ;;  %v1787_v3 = vld [vmem:[%s2319_s27] ss:$0 sm:$0xff]  ;;  %s1835_s20 = smov 104   ;;  %s1836_s3 = smov 112  }
  0x2e   : > { %s2321_s22 = sld [smem:[#allocation11_spill]]  ;;  %s2324_s5 = scalar_lea.vmem %s2281_s12, %s1966_s26 }
  0x2f   : > { %981 = vmatpush.msra.mxu1 %v957_v40  ;;  %s2323_s2 = sld [smem:[#allocation8_spill]]  ;;  %p1759_p5 = scmp.ne.s32.totalorder %s1960_s25, 1 }
  0x30   : > { %v2038_v4 = vld [vmem:[#allocation2] sm:$0xff]  ;;  %v900_v9 = vld [vmem:[%s2315_s23 + $0x8] sm:$0xf] }
  0x31   : > { %v899_v5 = vld [vmem:[%s2315_s23] sm:$0xff]  ;;  %v862_v7 = vsel %vm861_vm1, %v2038_v4, 0.0  ;;  %v902_v10 = vmul.f32 5.656854, %v900_v9  ;;  %v904_v11 = vld [vmem:[%s2316_s8 + $0x8] sm:$0xf]  ;;  %v1796_v17 = vpop.eup %1795  ;;  %982 = vmatpush.msra.mxu1 %v956_v41 }
  0x32   : > { %v903_v6 = vld [vmem:[%s2316_s8] sm:$0xff]  ;;  %v901_v8 = vmul.f32 5.656854, %v899_v5  ;;  %863 = vadd.xlane.f32.xlu0 %v862_v7  ;;  %v866_v18 = vmul.f32 32.0, %v1796_v17  ;;  %vm870_vm3 = vweird.f32 %v1796_v17  ;;  %s2318_s11 = scalar_lea.vmem %s2317_s4, %s1966_s26  ;;  %s1841_s4 = smov 16  }
  0x33   : > { %v906_v13 = vadd.f32 %v904_v11, %v902_v10  ;;  %1013 = vmatpush.msrb.mxu1 %v990_v42  ;;  %v1786_v63 = vld [vmem:[%s2318_s11] ss:$0 sm:$0xff]  ;;  %s1842_s11 = smov 8  }
  0x34   : > { %v905_v12 = vadd.f32 %v903_v6, %v901_v8  ;;  %v867_v19 = vsub.f32 1.0, %v866_v18  ;;  %s2322_s1 = scalar_lea.vmem %s2321_s22, %s1966_s26  ;;  %s1843_s22 = smov 24  }
  0x35   : > { %v911_v14 = vsel %vm910_vm2, %v906_v13, 0.0  ;;  %1014 = vmatpush.msrb.mxu1 %v989_v43  ;;  %v2134_v39 = vld [vmem:[%s2323_s2] sm:$0xff] }
  0x36   : > { %v907_v15 = vsel %vm861_vm1, %v905_v12, 0.0  ;;  %912 = vadd.xlane.f32.xlu1 %v911_v14  ;;  %v868_v20 = vmul.f32 %v1796_v17, %v867_v19 }
  0x37   : > { %1015 = vmatpush.msrb.mxu1 %v988_v46 }
  0x38   : > { %v869_v21 = vadd.f32 %v1796_v17, %v868_v20 }
  0x39   : > { %1016 = vmatpush.msrb.mxu1 %v987_v48 }
  0x3a   : > { %908 = vadd.xlane.f32.xlu0 %v907_v15  ;;  %v2056_v22 = vsel %vm870_vm3, %v1796_v17, %v869_v21 }
  0xa5   : > { %v864_v23 = vpop.xlane.xlu0 %863 }
  0xa6   : > { %v872_v24 = vmul.f32 %v2056_v22, %v864_v23 }
  0xa8   : > { %v873_v25 = vsub.f32 %v2038_v4, %v872_v24 }
  0xa9   : > { %v913_v27 = vpop.xlane.xlu1 %912 }
  0xaa   : > { %v874_v26 = vmul.f32 %v873_v25, %v873_v25  ;;  %v915_v31 = vmul.f32 %v913_v27, %v2056_v22 }
  0xac   : > { %v875_v28 = vsel %vm861_vm1, %v874_v26, 0.0  ;;  %v2065_v33 = vsub.f32 %v906_v13, %v915_v31  ;;  %v1789_v26 = vld [vmem:[%s2320_s29] ss:$0 sm:$0xff]  ;;  %s1837_s29 = smov 120  }
  0xad   : > { %876 = vadd.xlane.f32.xlu1 %v875_v28  ;;  %v909_v29 = vpop.xlane.xlu0 %908  ;;  %v1788_v31 = vld [vmem:[%s2322_s1] ss:$0 sm:$0xff] }
  0xae   : > { %v914_v30 = vmul.f32 %v909_v29, %v2056_v22  ;;  %v919_v36 = vmul.f32 %v2065_v33, %v2065_v33 }
  0xb0   : > { %v2063_v32 = vsub.f32 %v905_v12, %v914_v30  ;;  %v923_v37 = vsel %vm910_vm2, %v919_v36, 0.0 }
  0xb2   : > { %v918_v34 = vmul.f32 %v2063_v32, %v2063_v32 }
  0xb4   : > { %v920_v35 = vsel %vm861_vm1, %v918_v34, 0.0 }
  0xb5   : > { %921 = vadd.xlane.f32.xlu2 %v920_v35 }
  0xbd   : > { %924 = vadd.xlane.f32.xlu2 %v923_v37 }
 0x120   : > { %v877_v44 = vpop.xlane.xlu1 %876 }
 0x121   : > { %v878_v45 = vmul.f32 %v877_v44, %v2056_v22 }
 0x123   : > { %v879_v47 = vadd.f32 1e-05, %v878_v45 }
 0x125   : > { %1797 = vrsqrt.f32 %v879_v47  ;;  %vm886_vm5 = vweird.f32 %v879_v47 }
 0x128   : > { %v922_v49 = vpop.xlane.xlu2 %921 }
 0x129   : > { %v926_v50 = vmul.f32 %v922_v49, %v2056_v22 }
 0x12b   : > { %v1798_v51 = vpop.eup %1797  ;;  %v928_v52 = vadd.f32 1e-05, %v926_v50 }
 0x12c   : > { %v881_v53 = vmul.f32 %v1798_v51, %v879_v47  ;;  %vm887_vm4 = vweird.f32 %v1798_v51 }
 0x12d   : > { %1799 = vrsqrt.f32 %v928_v52  ;;  %vm888_vm6 = vmor %vm886_vm5, %vm887_vm4  ;;  %vm936_vm8 = vweird.f32 %v928_v52 }
 0x12e   : > { %v882_v54 = vmul.f32 %v1798_v51, %v881_v53 }
 0x130   : > { %v883_v55 = vmul.f32 0.5, %v882_v54  ;;  %v925_v56 = vpop.xlane.xlu2 %924 }
 0x131   : > { %v927_v57 = vmul.f32 %v925_v56, %v2056_v22 }
 0x132   : > { %v884_v58 = vsub.f32 1.5, %v883_v55 }
 0x133   : > { %v1800_v59 = vpop.eup %1799  ;;  %v929_v60 = vadd.f32 1e-05, %v927_v57 }
 0x134   : > { %v885_v61 = vmul.f32 %v1798_v51, %v884_v58  ;;  %v931_v62 = vmul.f32 %v1800_v59, %v928_v52  ;;  %vm937_vm7 = vweird.f32 %v1800_v59 }
 0x135   : > { %1801 = vrsqrt.f32 %v929_v60  ;;  %vm938_vm9 = vmor %vm936_vm8, %vm937_vm7  ;;  %vm946_vm11 = vweird.f32 %v929_v60 }
 0x136   : > { %v889_v0 = vsel %vm888_vm6, %v1798_v51, %v885_v61  ;;  %v932_v1 = vmul.f32 %v1800_v59, %v931_v62 }
 0x137   : > { %v890_v2 = vmul.f32 %v889_v0, %v873_v25 }
 0x138   : > { %v933_v5 = vmul.f32 0.5, %v932_v1 }
 0x139   : > { %v894_v6 = vmul.f32 %v1786_v63, %v890_v2 }
 0x13a   : > { %v934_v7 = vsub.f32 1.5, %v933_v5 }
 0x13b   : > { %v1802_v8 = vpop.eup %1801  ;;  %v898_v9 = vadd.f32 %v1787_v3, %v894_v6 }
 0x13c   : > { %v935_v10 = vmul.f32 %v1800_v59, %v934_v7  ;;  %v941_v11 = vmul.f32 %v1802_v8, %v929_v60  ;;  %vm947_vm10 = vweird.f32 %v1802_v8 }
 0x13d   : > { %1734 = vmatmul.msk.f32.vlgmr.msra.gmra.mxu1 %vm861_vm1, %v898_v9  ;;  %vm948_vm12 = vmor %vm946_vm11, %vm947_vm10 }
 0x13e   : > { %v939_v12 = vsel %vm938_vm9, %v1800_v59, %v935_v10  ;;  %v942_v13 = vmul.f32 %v1802_v8, %v941_v11 }
 0x13f   : > { %v950_v14 = vmul.f32 %v939_v12, %v2063_v32 }
 0x140   : > { %v943_v15 = vmul.f32 0.5, %v942_v13 }
 0x141   : > { %v952_v16 = vmul.f32 %v1786_v63, %v950_v14 }
 0x142   : > { %v944_v17 = vsub.f32 1.5, %v943_v15 }
 0x143   : > { %v954_v18 = vadd.f32 %v1787_v3, %v952_v16 }
 0x144   : > { %v945_v19 = vmul.f32 %v1802_v8, %v944_v17 }
 0x145   : > { %1735 = vmatmul.msk.f32.vlgmr.msrb.gmra.mxu1 %vm861_vm1, %v954_v18 }
 0x146   : > { %v949_v20 = vsel %vm948_vm12, %v1802_v8, %v945_v19 }
 0x147   : > { %v951_v21 = vmul.f32 %v949_v20, %v2065_v33 }
 0x149   : > { %v953_v23 = vmul.f32 %v1786_v63, %v951_v21 }
 0x14b   : > { %v955_v24 = vadd.f32 %v1787_v3, %v953_v23 }
 0x14d   : > { %1736 = vmatmul.msk.f32.gmra.mxu1 %vm861_vm1, %v955_v24 }
 0x1ba   : > { %v984_v25 = vpop.f32.mrf.mxu1 }
 0x1bb   : > { %v985_v32 = vadd.f32 %v1788_v31, %v984_v25 }
 0x1c2   : > { %v1018_v27 = vpop.f32.mrf.mxu1 }
 0x1c3   : > { %v2104_v28 = vadd.f32 %v1789_v26, %v1018_v27 }
 0x1c5   : > { %1080 = vrot.lane.b32.xlu1 %v2104_v28, %s1834_s30 }
 0x1ca   : > { %v1021_v29 = vpop.f32.mrf.mxu1 }
 0x1cb   : > { %v2108_v30 = vadd.f32 %v1789_v26, %v1021_v29 }
 0x1cd   : > { %1287 = vrot.lane.b32.xlu1 %v2108_v30, %s1835_s20  ;;  %1201 = vrot.lane.b32.xlu2 %v2108_v30, %s1836_s3 }
 0x1ce   : > { %1737 = vmatpush.xpose.msk.msra.mxu2 %vm1025_vm13, %v2108_v30 }
 0x1d2   : > { %1738 = vmatpush.xpose.msk.msra.mxu2 %vm1025_vm13, %v2104_v28 }
 0x1d5   : > { %1739 = vmatmul.msk.f32.vlgmr.msra.gmra.mxu2 %vm1025_vm13, %v985_v32  ;;  %1199 = vrot.lane.b32.xlu2 %v2104_v28, %s1836_s3 }
 0x1dd   : > { %1197 = vrot.lane.b32.xlu2 %v985_v32, %s1836_s3  ;;  %s1838_s3 = smov 80  }
 0x1e5   : > { %1285 = vrot.lane.b32.xlu2 %v2104_v28, %s1835_s20 }
 0x227   : > { %v1202_v33 = vpop.permute.xlu2 %1201 }
 0x228   : > { %1747 = vmatpush.xpose.msk.msrb.mxu2 %vm1025_vm13, %v1202_v33 }
 0x22f   : > { %v1200_v34 = vpop.permute.xlu2 %1199 }
 0x230   : > { %1748 = vmatpush.xpose.msk.msrb.mxu2 %vm1025_vm13, %v1200_v34 }
 0x237   : > { %v1081_v35 = vpop.permute.xlu1 %1080  ;;  %v1198_v36 = vpop.permute.xlu2 %1197 }
 0x238   : > { %1749 = vmatmul.msk.f32.vlgmr.msrb.gmra.mxu2 %vm1025_vm13, %v1198_v36 }
 0x23f   : > { %v1288_v37 = vpop.permute.xlu1 %1287  ;;  %v1286_v38 = vpop.permute.xlu2 %1285 }
 0x240   : > { %1752 = vmatpush.xpose.msk.msra.mxu2 %vm1025_vm13, %v1288_v37 }
 0x244   : > { %1753 = vmatpush.xpose.msk.msra.mxu2 %vm1025_vm13, %v1286_v38 }
 0x258   : > { %v1052_v40 = vpop.f32.mrf.mxu2 }
 0x259   : > { %v1053_v41 = vadd.f32 %v1052_v40, %v2134_v39 }
 0x25b   : > { %v1056_v42 = vsel %vm1055_vm14, %v1053_v41, -inf }
 0x25c   : > { %1057 = vmax.xlane.f32.xlu0 %v1056_v42 }
 0x270   : > { %1082 = vrot.lane.b32.xlu0 %v2108_v30, %s1834_s30  ;;  %s1839_s30 = smov 88  }
 0x278   : > { %1115 = vrot.lane.b32.xlu0 %v2108_v30, %s1837_s29 }
 0x280   : > { %1113 = vrot.lane.b32.xlu0 %v2104_v28, %s1837_s29 }
 0x288   : > { %1283 = vrot.lane.b32.xlu0 %v985_v32, %s1835_s20  ;;  %s1840_s20 = smov 72  }
 0x2bb   : > { %v1226_v43 = vpop.f32.mrf.mxu2 }
 0x2bc   : > { %v1227_v44 = vadd.f32 %v1226_v43, %v2134_v39 }
 0x2be   : > { %v1229_v45 = vsel %vm1055_vm14, %v1227_v44, -inf }
 0x2bf   : > { %1230 = vmax.xlane.f32.xlu2 %v1229_v45 }
 0x2cf   : > { %v1058_v46 = vpop.xlane.xlu0 %1057 }
 0x2d0   : > { %v1059_v47 = vsub.f32 %v1053_v41, %v1058_v46 }
 0x2d2   : > { %v1060_v48 = vmul.f32 1.442695, %v1059_v47 }
 0x2d4   : > { %1803 = vpow2.f32 %v1060_v48 }
 0x2d7   : > { %1255 = vrot.lane.b32.xlu2 %v2108_v30, %s1838_s3 }
 0x2da   : > { %v1804_v49 = vpop.eup %1803 }
 0x2db   : > { %v1062_v50 = vsel %vm1055_vm14, %v1804_v49, 0.0 }
 0x2dc   : > { %1063 = vadd.xlane.f32.xlu1 %v1062_v50 }
 0x2e2   : > { %v1083_v51 = vpop.permute.xlu0 %1082 }
 0x2e3   : > { %1740 = vmatpush.msk.msra.mxu3 %vm1088_vm15, %v1083_v51 }
 0x2e5   : > { %1106 = vmatpush.msra.mxu3 %v1081_v35 }
 0x2ea   : > { %v1116_v52 = vpop.permute.xlu0 %1115 }
 0x2eb   : > { %1742 = vmatpush.xpose.msk.msrb.mxu3 %vm1025_vm13, %v1116_v52 }
 0x2f2   : > { %v1114_v53 = vpop.permute.xlu0 %1113 }
 0x2f3   : > { %1743 = vmatpush.xpose.msk.msrb.mxu3 %vm1025_vm13, %v1114_v53 }
 0x2f5   : > { %1111 = vrot.lane.b32.xlu1 %v985_v32, %s1837_s29 }
 0x2fa   : > { %v1284_v54 = vpop.permute.xlu0 %1283 }
 0x2fb   : > { %1754 = vmatmul.msk.f32.vlgmr.msra.gmra.mxu2 %vm1025_vm13, %v1284_v54 }
 0x332   : > { %v1231_v55 = vpop.xlane.xlu2 %1230 }
 0x333   : > { %v1232_v56 = vsub.f32 %v1227_v44, %v1231_v55 }
 0x335   : > { %v1233_v57 = vmul.f32 1.442695, %v1232_v56 }
 0x337   : > { %1805 = vpow2.f32 %v1233_v57 }
 0x33a   : > { %v1256_v9 = vpop.permute.xlu2 %1255 }
 0x33d   : > { %v2152_v58 = vpop.eup %1805 }
 0x33e   : > { %v1235_v59 = vsel %vm1055_vm14, %v2152_v58, 0.0 }
 0x33f   : > { %1236 = vadd.xlane.f32.xlu2 %v1235_v59 }
 0x34f   : > { %v1064_v60 = vpop.xlane.xlu1 %1063 }
 0x350   : > { %1807 = vrcp.f32 %v1064_v60  ;;  %v1076_v0 = vand.u32 2147483648, %v1064_v60  ;;  %v1074_v2 = vand.u32 2147483647, %v1064_v60  ;;  %vm1070_vm2 = vweird.f32 %v1064_v60 }
 0x352   : > { %v1077_v5 = vor.u32 1.1754944e-38, %v1076_v0  ;;  %vm1075_vm4 = vcmp.eq.f32.partialorder %v1074_v2, 8.507059e+37 }
 0x356   : > { %v1808_v61 = vpop.eup %1807 }
 0x357   : > { %v1066_v62 = vmul.f32 %v1808_v61, %v1064_v60  ;;  %1167 = vrot.lane.b32.xlu2 %v2104_v28, %s1839_s30  ;;  %vm1071_vm0 = vweird.f32 %v1808_v61 }
 0x358   : > { %vm1072_vm3 = vmor %vm1070_vm2, %vm1071_vm0 }
 0x359   : > { %v1067_v63 = vsub.f32 1.0, %v1066_v62 }
 0x35b   : > { %v1068_v1 = vmul.f32 %v1808_v61, %v1067_v63 }
 0x35d   : > { %v1069_v3 = vadd.f32 %v1808_v61, %v1068_v1 }
 0x35f   : > { %v1073_v6 = vsel %vm1072_vm3, %v1808_v61, %v1069_v3 }
 0x360   : > { %v1078_v7 = vsel %vm1075_vm4, %v1077_v5, %v1073_v6  ;;  %vm1384_vm4 = vcmask 195584  }
 0x361   : > { %v1079_v8 = vmul.f32 %v1804_v49, %v1078_v7 }
 0x363   : > { %1741 = vmatmul.msk.f32.vlgmr.msra.gmra.mxu3 %vm1055_vm14, %v1079_v8 }
 0x364   : > { %1750 = vmatpush.msk.msra.mxu3 %vm1088_vm15, %v1256_v9 }
 0x367   : > { %v1112_v10 = vpop.permute.xlu1 %1111 }
 0x36b   : > { %1744 = vmatmul.msk.f32.vlgmr.msrb.gmra.mxu3 %vm1025_vm13, %v1112_v10  ;;  %v1389_v10 = vld [vmem:[%s1998_s19 + $0x18] sm:$0xff] }
 0x36c   : > { %1409 = vmatpush.msrb.mxu2 %v1389_v10 }
 0x37e   : > { %v1312_v11 = vpop.f32.mrf.mxu2 }
 0x37f   : > { %v1313_v12 = vadd.f32 %v1312_v11, %v2134_v39  ;;  %v1388_v11 = vld [vmem:[%s1998_s19 + $0x10] sm:$0xff] }
 0x380   : > { %1410 = vmatpush.msrb.mxu2 %v1388_v11 }
 0x381   : > { %v1315_v13 = vsel %vm1055_vm14, %v1313_v12, -inf }
 0x382   : > { %1316 = vmax.xlane.f32.xlu0 %v1315_v13  ;;  %v1386_v13 = vld [vmem:[%s1998_s19] sm:$0xff] }
 0x3b2   : > { %v1237_v24 = vpop.xlane.xlu2 %1236 }
 0x3b3   : > { %v1249_v37 = vand.u32 2147483648, %v1237_v24  ;;  %vm1243_vm6 = vweird.f32 %v1237_v24  ;;  %v1247_v38 = vand.u32 2147483647, %v1237_v24 }
 0x3b5   : > { %vm1248_vm8 = vcmp.eq.f32.partialorder %v1247_v38, 8.507059e+37  ;;  %v1495_v38 = vld [vmem:[%s2025_s24 + $0x68] sm:$0xff] }
 0x3ba   : > { %v1168_v45 = vpop.permute.xlu2 %1167 }
 0x3e6   : > { %v2163_v14 = vpop.f32.mrf.mxu3 }
 0x3ee   : > { %v1140_v15 = vpop.f32.mrf.mxu3 }
 0x3ef   : > { %v1141_v16 = vadd.f32 %v1140_v15, %v2134_v39  ;;  %v1250_v39 = vor.u32 1.1754944e-38, %v1249_v37  ;;  %v1496_v37 = vld [vmem:[%s2025_s24 + $0x70] sm:$0xff] }
 0x3f1   : > { %v1143_v17 = vsel %vm1055_vm14, %v1141_v16, -inf }
 0x3f2   : > { %1144 = vmax.xlane.f32.xlu1 %v1143_v17 }
 0x3f5   : > { %v1317_v18 = vpop.xlane.xlu0 %1316 }
 0x3f6   : > { %v1318_v19 = vsub.f32 %v1313_v12, %v1317_v18  ;;  %v1387_v12 = vld [vmem:[%s1998_s19 + $0x8] sm:$0xff] }
 0x3f7   : > { %1411 = vmatpush.msrb.mxu2 %v1387_v12 }
 0x3f8   : > { %v1319_v20 = vmul.f32 1.442695, %v1318_v19 }
 0x3f9   : > { %1412 = vmatpush.msrb.mxu2 %v1386_v13 }
 0x3fa   : > { %1809 = vpow2.f32 %v1319_v20 }
 0x3fb   : > { %1811 = vrcp.f32 %v1237_v24 }
 0x400   : > { %v2167_v21 = vpop.eup %1809 }
 0x401   : > { %v1321_v23 = vsel %vm1055_vm14, %v2167_v21, 0.0  ;;  %v1812_v25 = vpop.eup %1811 }
 0x402   : > { %1322 = vadd.xlane.f32.xlu0 %v1321_v23  ;;  %v1239_v29 = vmul.f32 %v1812_v25, %v1237_v24  ;;  %vm1244_vm5 = vweird.f32 %v1812_v25 }
 0x403   : > { %vm1245_vm7 = vmor %vm1243_vm6, %vm1244_vm5 }
 0x404   : > { %v1240_v32 = vsub.f32 1.0, %v1239_v29 }
 0x406   : > { %v1241_v33 = vmul.f32 %v1812_v25, %v1240_v32 }
 0x408   : > { %v1242_v36 = vadd.f32 %v1812_v25, %v1241_v33  ;;  %v1453_v33 = vld [vmem:[%s2015_s28 + $0x18] sm:$0xff] }
 0x40b   : > { %1253 = vrot.lane.b32.xlu1 %v2104_v28, %s1838_s3 }
 0x416   : > { %1169 = vrot.lane.b32.xlu0 %v2108_v30, %s1839_s30 }
 0x41e   : > { %1341 = vrot.lane.b32.xlu0 %v2108_v30, %s1840_s20  ;;  %v1246_v30 = vsel %vm1245_vm7, %v1812_v25, %v1242_v36  ;;  %v1497_v36 = vld [vmem:[%s2025_s24 + $0x78] sm:$0xff] }
 0x41f   : > { %v1251_v40 = vsel %vm1248_vm8, %v1250_v39, %v1246_v30 }
 0x420   : > { %v1252_v42 = vmul.f32 %v2152_v58, %v1251_v40  ;;  %v1494_v40 = vld [vmem:[%s2025_s24 + $0x60] sm:$0xff] }
 0x465   : > { %v1145_v26 = vpop.xlane.xlu1 %1144 }
 0x466   : > { %v1146_v27 = vsub.f32 %v1141_v16, %v1145_v26 }
 0x468   : > { %v1147_v31 = vmul.f32 1.442695, %v1146_v27 }
 0x46a   : > { %1813 = vpow2.f32 %v1147_v31 }
 0x470   : > { %v1814_v34 = vpop.eup %1813 }
 0x471   : > { %v1149_v35 = vsel %vm1055_vm14, %v1814_v34, 0.0 }
 0x472   : > { %1150 = vadd.xlane.f32.xlu1 %v1149_v35  ;;  %v1450_v35 = vld [vmem:[%s2015_s28] sm:$0xff] }
 0x475   : > { %v1323_v43 = vpop.xlane.xlu0 %1322 }
 0x476   : > { %1815 = vrcp.f32 %v1323_v43  ;;  %v1335_v59 = vand.u32 2147483648, %v1323_v43  ;;  %v1333_v61 = vand.u32 2147483647, %v1323_v43 }
 0x478   : > { %v1336_v2 = vor.u32 1.1754944e-38, %v1335_v59  ;;  %vm1334_vm3 = vcmp.eq.f32.partialorder %v1333_v61, 8.507059e+37  ;;  %v1792_v59 = vld [vmem:[%s831_s9] ss:$0 sm:$0xff] }
 0x47c   : > { %v1816_v47 = vpop.eup %1815 }
 0x47d   : > { %v1254_v41 = vpop.permute.xlu1 %1253  ;;  %v1325_v49 = vmul.f32 %v1816_v47, %v1323_v43  ;;  %vm1330_vm10 = vweird.f32 %v1816_v47 }
 0x47e   : > { %1278 = vmatpush.msra.mxu3 %v1254_v41 }
 0x47f   : > { %1751 = vmatmul.msk.f32.vlgmr.msra.gmra.mxu3 %vm1055_vm14, %v1252_v42  ;;  %v1326_v50 = vsub.f32 1.0, %v1325_v49  ;;  %v1493_v42 = vld [vmem:[%s2025_s24 + $0x58] sm:$0xff]  ;;  %v1488_v49 = vld [vmem:[%s2025_s24 + $0x30] sm:$0xff] }
 0x480   : > { %1473 = vmatpush.msrb.mxu3 %v1453_v33 }
 0x481   : > { %v1327_v53 = vmul.f32 %v1816_v47, %v1326_v50 }
 0x483   : > { %v1328_v58 = vadd.f32 %v1816_v47, %v1327_v53  ;;  %v1486_v53 = vld [vmem:[%s2025_s24 + $0x20] sm:$0xff] }
 0x488   : > { %v1170_v44 = vpop.permute.xlu0 %1169 }
 0x489   : > { %1745 = vmatpush.msk.msra.mxu0 %vm1088_vm15, %v1170_v44  ;;  %v1491_v44 = vld [vmem:[%s2025_s24 + $0x48] sm:$0xff] }
 0x48b   : > { %1339 = vrot.lane.b32.xlu1 %v2104_v28, %s1840_s20  ;;  %1192 = vmatpush.msra.mxu0 %v1168_v45  ;;  %v1490_v45 = vld [vmem:[%s2025_s24 + $0x40] sm:$0xff]  ;;  %s2326_s20 = sld [smem:[#allocation15_spill]] (!%p1759_p5) }
 0x48d   : > { %1498 = vmatpush.msrb.mxu0 %v1497_v36 }
 0x48f   : > { %1499 = vmatpush.msrb.mxu0 %v1496_v37 }
 0x490   : > { %v1342_v46 = vpop.permute.xlu0 %1341 }
 0x491   : > { %1755 = vmatpush.msk.msra.mxu1 %vm1088_vm15, %v1342_v46  ;;  %vm1329_vm15 = vweird.f32 %v1323_v43  ;;  %1500 = vmatpush.msrb.mxu0 %v1495_v38  ;;  %v1492_v43 = vld [vmem:[%s2025_s24 + $0x50] sm:$0xff] }
 0x492   : > { %vm1331_vm2 = vmor %vm1329_vm15, %vm1330_vm10 }
 0x493   : > { %v1332_v0 = vsel %vm1331_vm2, %v1816_v47, %v1328_v58  ;;  %1501 = vmatpush.msrb.mxu0 %v1494_v40  ;;  %v1489_v47 = vld [vmem:[%s2025_s24 + $0x38] sm:$0xff] }
 0x494   : > { %v1337_v3 = vsel %vm1334_vm3, %v1336_v2, %v1332_v0  ;;  %v1482_v0 = vld [vmem:[%s2025_s24] sm:$0xff] }
 0x495   : > { %v1338_v6 = vmul.f32 %v2167_v21, %v1337_v3  ;;  %v1790_v21 = vld [vmem:[%s2324_s5] ss:$0 sm:$0xff]  ;;  %1502 = vmatpush.msrb.mxu0 %v1493_v42 }
 0x497   : > { %1503 = vmatpush.msrb.mxu0 %v1492_v43 }
 0x499   : > { %1504 = vmatpush.msrb.mxu0 %v1491_v44 }
 0x49b   : > { %1505 = vmatpush.msrb.mxu0 %v1490_v45 }
 0x49d   : > { %1506 = vmatpush.msrb.mxu0 %v1489_v47 }
 0x49f   : > { %1507 = vmatpush.msrb.mxu0 %v1488_v49 }
 0x4e5   : > { %v1151_v48 = vpop.xlane.xlu1 %1150 }
 0x4e6   : > { %1817 = vrcp.f32 %v1151_v48  ;;  %v1163_v55 = vand.u32 2147483648, %v1151_v48  ;;  %v1161_v57 = vand.u32 2147483647, %v1151_v48  ;;  %vm1157_vm11 = vweird.f32 %v1151_v48 }
 0x4e8   : > { %v1164_v60 = vor.u32 1.1754944e-38, %v1163_v55  ;;  %vm1162_vm0 = vcmp.eq.f32.partialorder %v1161_v57, 8.507059e+37  ;;  %v1485_v55 = vld [vmem:[%s2025_s24 + $0x18] sm:$0xff]  ;;  %v1791_v57 = vld [vmem:[%s828_s7] ss:$0 sm:$0xff] }
 0x4ec   : > { %v1818_v51 = vpop.eup %1817 }
 0x4ed   : > { %v1153_v52 = vmul.f32 %v1818_v51, %v1151_v48  ;;  %vm1158_vm9 = vweird.f32 %v1818_v51 }
 0x4ee   : > { %vm1159_vm12 = vmor %vm1157_vm11, %vm1158_vm9 }
 0x4ef   : > { %v1154_v54 = vsub.f32 1.0, %v1153_v52 }
 0x4f1   : > { %v1155_v56 = vmul.f32 %v1818_v51, %v1154_v54 }
 0x4f3   : > { %v1156_v28 = vadd.f32 %v1818_v51, %v1155_v56 }
 0x4f5   : > { %v1160_v62 = vsel %vm1159_vm12, %v1818_v51, %v1156_v28  ;;  %v1487_v51 = vld [vmem:[%s2025_s24 + $0x28] sm:$0xff] }
 0x4f6   : > { %v1165_v63 = vsel %vm1162_vm0, %v1164_v60, %v1160_v62  ;;  %1508 = vmatpush.msrb.mxu0 %v1487_v51  ;;  %v1484_v62 = vld [vmem:[%s2025_s24 + $0x10] sm:$0xff] }
 0x4f7   : > { %v1166_v1 = vmul.f32 %v1814_v34, %v1165_v63  ;;  %v1451_v34 = vld [vmem:[%s2015_s28 + $0x8] sm:$0xff] }
 0x4f8   : > { %1509 = vmatpush.msrb.mxu0 %v1486_v53  ;;  %v1483_v63 = vld [vmem:[%s2025_s24 + $0x8] sm:$0xff] }
 0x4f9   : > { %1746 = vmatmul.msk.f32.vlgmr.msra.gmra.mxu0 %vm1055_vm14, %v1166_v1  ;;  %v1793_v1 = vld [vmem:[%s839_s0] ss:$0 sm:$0xff]  ;;  %s2325_s0 = sld [smem:[#allocation14_spill]] (!%p1759_p5) }
 0x4fa   : > { %1510 = vmatpush.msrb.mxu0 %v1485_v55 }
 0x4fc   : > { %1511 = vmatpush.msrb.mxu0 %v1484_v62 }
 0x4fd   : > { %v1340_v5 = vpop.permute.xlu1 %1339 }
 0x4fe   : > { %1364 = vmatpush.msra.mxu1 %v1340_v5  ;;  %1512 = vmatpush.msrb.mxu0 %v1483_v63 }
 0x4ff   : > { %1756 = vmatmul.msk.f32.vlgmr.msra.gmra.mxu1 %vm1055_vm14, %v1338_v6  ;;  %vm1382_vm14 = vcmask 130048   ;;  %v1794_v6 = vld [vmem:[%s847_s21] ss:$0 sm:$0xff] }
 0x500   : > { %1513 = vmatpush.msrb.mxu0 %v1482_v0 }
 0x502   : > { %v1280_v7 = vpop.f32.mrf.mxu3 }
 0x503   : > { %1374 = vrot.lane.b32.xlu0 %v1280_v7, %s1841_s4 }
 0x575   : > { %v1375_v17 = vpop.permute.xlu0 %1374 }
 0x576   : > { %v1194_v8 = vpop.f32.mrf.mxu0 }
 0x577   : > { %1370 = vrot.lane.b32.xlu2 %v1194_v8, %s1842_s11 }
 0x57c   : > { %v1366_v9 = vpop.f32.mrf.mxu1 }
 0x57d   : > { %1378 = vrot.lane.b32.xlu1 %v1366_v9, %s1843_s22  ;;  %s2327_s22 = sld [smem:[#allocation16_spill]] (!%p1759_p5) }
 0x5d1   : > { %v1371_v15 = vpop.permute.xlu2 %1370 }
 0x5d2   : > { %v1381_v16 = vsel %vm1025_vm13, %v2163_v14, %v1371_v15 }
 0x5d3   : > { %v1383_v19 = vsel %vm1382_vm14, %v1381_v16, %v1375_v17 }
 0x5ef   : > { %v1379_v18 = vpop.permute.xlu1 %1378 }
 0x5f0   : > { %v1385_v20 = vsel %vm1384_vm4, %v1383_v19, %v1379_v18 }
 0x5f1   : > { %1757 = vmatmul.msk.f32.vlgmr.msrb.gmra.mxu2 %vm861_vm1, %v1385_v20 }
 0x674   : > { %v1414_v23 = vpop.f32.mrf.mxu2 }
 0x675   : > { %v1415_v24 = vadd.f32 %v1790_v21, %v1414_v23 }
 0x677   : > { %v2200_v14 = vadd.f32 %v1415_v24, %v2038_v4  ;;  %v1452_v4 = vld [vmem:[%s2015_s28 + $0x10] sm:$0xff] }
 0x678   : > { %1474 = vmatpush.msrb.mxu3 %v1452_v4 }
 0x679   : > { %v1420_v25 = vsel %vm861_vm1, %v2200_v14, 0.0 }
 0x67a   : > { %1421 = vadd.xlane.f32.xlu2 %v1420_v25  ;;  %1475 = vmatpush.msrb.mxu3 %v1451_v34 }
 0x67c   : > { %1476 = vmatpush.msrb.mxu3 %v1450_v35 }
 0x6ed   : > { %v1422_v26 = vpop.xlane.xlu2 %1421 }
 0x6ee   : > { %v1423_v27 = vmul.f32 %v1422_v26, %v2056_v22 }
 0x6f0   : > { %v1424_v29 = vsub.f32 %v2200_v14, %v1423_v27 }
 0x6f2   : > { %v1425_v31 = vmul.f32 %v1424_v29, %v1424_v29 }
 0x6f4   : > { %v1426_v32 = vsel %vm861_vm1, %v1425_v31, 0.0 }
 0x6f5   : > { %1427 = vadd.xlane.f32.xlu0 %v1426_v32 }
 0x768   : > { %v1428_v30 = vpop.xlane.xlu0 %1427 }
 0x769   : > { %v1429_v39 = vmul.f32 %v1428_v30, %v2056_v22 }
 0x76b   : > { %v1430_v41 = vadd.f32 1e-05, %v1429_v39 }
 0x76d   : > { %1819 = vrsqrt.f32 %v1430_v41  ;;  %vm1437_vm5 = vweird.f32 %v1430_v41 }
 0x773   : > { %v1820_v46 = vpop.eup %1819 }
 0x774   : > { %v1432_v48 = vmul.f32 %v1820_v46, %v1430_v41  ;;  %vm1438_vm13 = vweird.f32 %v1820_v46 }
 0x775   : > { %vm1439_vm6 = vmor %vm1437_vm5, %vm1438_vm13 }
 0x776   : > { %v1433_v50 = vmul.f32 %v1820_v46, %v1432_v48 }
 0x778   : > { %v1434_v52 = vmul.f32 0.5, %v1433_v50 }
 0x77a   : > { %v1435_v54 = vsub.f32 1.5, %v1434_v52 }
 0x77c   : > { %v1436_v56 = vmul.f32 %v1820_v46, %v1435_v54 }
 0x77e   : > { %v1440_v58 = vsel %vm1439_vm6, %v1820_v46, %v1436_v56 }
 0x77f   : > { %v1441_v28 = vmul.f32 %v1440_v58, %v1424_v29 }
 0x781   : > { %v1445_v60 = vmul.f32 %v1791_v57, %v1441_v28 }
 0x783   : > { %v1449_v61 = vadd.f32 %v1792_v59, %v1445_v60 }
 0x785   : > { %1758 = vmatmul.msk.f32.vlgmr.msrb.gmra.mxu3 %vm861_vm1, %v1449_v61 }
 0x808   : > { %v1478_v2 = vpop.f32.mrf.mxu3 }
 0x809   : > { %v1479_v3 = vadd.f32 %v1793_v1, %v1478_v2 }
 0x80b   : > { %v1481_v5 = vmax.f32 %v1479_v3, 0.0 }
 0x80d   : > { %1514 = vmatmul.f32.vlgmr.msrb.gmra.mxu0 %v1481_v5 }
 0x88a   : > { %v1515_v7 = vpop.f32.mrf.mxu0 }
 0x88b   : > { %v1518_v8 = vadd.f32 %v1515_v7, %v2200_v14  ;;  %1528 = sbr.rel (%p1759_p5) target bundleno = 2461 (0x99d), region = 112 }
 0x88d   : > { %v1523_v9 = vadd.f32 %v1794_v6, %v1518_v8 }
 0x88f   : > { %1524 = vst.msk [vmem:[#allocation2] sm:$0xff] %vm861_vm1, %v1523_v9 }
 0x890   : > { %v1531_v10 = vsel %vm861_vm1, %v1523_v9, 0.0  ;;  %v1821_v26 = vld [vmem:[%s2325_s0] ss:$0 sm:$0xff] }
 0x891   : > { %1532 = vadd.xlane.f32.xlu0 %v1531_v10 }
 0x904   : > { %v1533_v11 = vpop.xlane.xlu0 %1532 }
 0x905   : > { %v1534_v12 = vmul.f32 %v1533_v11, %v2056_v22 }
 0x907   : > { %v1535_v13 = vsub.f32 %v1523_v9, %v1534_v12 }
 0x909   : > { %v1536_v15 = vmul.f32 %v1535_v13, %v1535_v13 }
 0x90b   : > { %v1537_v16 = vsel %vm861_vm1, %v1536_v15, 0.0 }
 0x90c   : > { %1538 = vadd.xlane.f32.xlu0 %v1537_v16 }
 0x97f   : > { %v1539_v17 = vpop.xlane.xlu0 %1538 }
 0x980   : > { %v1540_v18 = vmul.f32 %v1539_v17, %v2056_v22  ;;  %v1822_v22 = vld [vmem:[%s2326_s20] ss:$0 sm:$0xff] }
 0x982   : > { %v1541_v19 = vadd.f32 1e-05, %v1540_v18 }
 0x984   : > { %1823 = vrsqrt.f32 %v1541_v19  ;;  %vm1548_vm8 = vweird.f32 %v1541_v19 }
 0x98a   : > { %v1824_v20 = vpop.eup %1823 }
 0x98b   : > { %v1543_v21 = vmul.f32 %v1824_v20, %v1541_v19  ;;  %vm1549_vm7 = vweird.f32 %v1824_v20 }
 0x98c   : > { %vm1550_vm9 = vmor %vm1548_vm8, %vm1549_vm7 }
 0x98d   : > { %v1544_v23 = vmul.f32 %v1824_v20, %v1543_v21 }
 0x98f   : > { %v1545_v24 = vmul.f32 0.5, %v1544_v23 }
 0x991   : > { %v1546_v14 = vsub.f32 1.5, %v1545_v24 }
 0x993   : > { %v1547_v25 = vmul.f32 %v1824_v20, %v1546_v14 }
 0x995   : > { %v1551_v27 = vsel %vm1550_vm9, %v1824_v20, %v1547_v25 }
 0x996   : > { %v1552_v29 = vmul.f32 %v1551_v27, %v1535_v13 }
 0x998   : > { %v1556_v31 = vmul.f32 %v1821_v26, %v1552_v29 }
 0x99a   : > { %v1560_v32 = vadd.f32 %v1822_v22, %v1556_v31 }
 0x99c   : > { %1561 = vst.msk [vmem:[%s2327_s22] sm:$0xff] %vm861_vm1, %v1560_v32 }
 0x99d PF: > { %s2328_s1 = sld [smem:[#allocation3_spill]] }
 0x9a3   : > { %s31_s2 = sadd.s32 1, %s2328_s1  }
 0x9a4   : > { %p28_p6 = scmp.ge.s32.totalorder %s31_s2, 4  }
 0x9a6   :  { %30 = sbr.rel (!%p28_p6) target bundleno = 14 (0xe), region = 177 }

// kernel: forward.7
= control target key start
LH: loop header
LB: loop body
LE: loop exit
PB: predicated region body
PF: predicated region fallthrough
CT: control target
= control target key end

     0   :  { %s3585_s0 = inlined_call_operand.vmem [shape: f32[12,32], index: 0, kind: input, shape index: {}]   ;;  %s3586_s1 = inlined_call_operand.vmem [shape: f32[8,32], index: 1, kind: input, shape index: {}]   ;;  %s3587_s2 = inlined_call_operand.vmem [shape: f32[12,32], index: 2, kind: input, shape index: {}]   ;;  %s3588_s3 = inlined_call_operand.vmem [shape: f32[8,32], index: 3, kind: input, shape index: {}]   ;;  %s3589_s4 = inlined_call_operand.vmem [shape: f32[12,8], index: 4, kind: input, shape index: {}]   ;;  %s3590_s5 = inlined_call_operand.hbm [shape: f32[2,1,32], index: 5, kind: input, shape index: {}]   ;;  %s3591_s6 = inlined_call_operand.hbm [shape: f32[2,1,32], index: 6, kind: input, shape index: {}]   ;;  %s3592_s7 = inlined_call_operand.vmem [shape: f32[2,32,32], index: 7, kind: input, shape index: {}]   ;;  %s3593_s8 = inlined_call_operand.hbm [shape: f32[2,1,32], index: 8, kind: input, shape index: {}]   ;;  %s3594_s9 = inlined_call_operand.vmem [shape: f32[2,32,64], index: 9, kind: input, shape index: {}]   ;;  %s3595_s10 = inlined_call_operand.hbm [shape: f32[2,1,64], index: 10, kind: input, shape index: {}]   ;;  %s3596_s11 = inlined_call_operand.vmem [shape: f32[2,32,32], index: 11, kind: input, shape index: {}]   ;;  %s3597_s12 = inlined_call_operand.hbm [shape: f32[2,1,32], index: 12, kind: input, shape index: {}]   ;;  %s3598_s13 = inlined_call_operand.hbm [shape: f32[2,1,32], index: 13, kind: input, shape index: {}]   ;;  %s3599_s14 = inlined_call_operand.hbm [shape: f32[2,1,32], index: 14, kind: input, shape index: {}]   ;;  %s3600_s15 = inlined_call_operand.vmem [shape: f32[2,32,128], index: 15, kind: input, shape index: {}]   ;;  %s3601_s16 = inlined_call_operand.hbm [shape: f32[2,1,128], index: 16, kind: input, shape index: {}]   ;;  %s3602_s17 = inlined_call_operand.vmem [shape: f32[2,128,32], index: 17, kind: input, shape index: {}]   ;;  %s3603_s18 = inlined_call_operand.hbm [shape: f32[2,1,32], index: 18, kind: input, shape index: {}]   ;;  %s3604_s19 = inlined_call_operand.hbm [shape: f32[1,32], index: 19, kind: input, shape index: {}]   ;;  %s3605_s20 = inlined_call_operand.hbm [shape: f32[1,32], index: 20, kind: input, shape index: {}]   ;;  %s3606_s21 = inlined_call_operand.vmem [shape: f32[12,32], index: 21, kind: output, shape index: {}]  }
   0x1   :  { %3620 = sst [smem:[#allocation30_spill]] %s3585_s0 }
   0x2   :  { %3621 = sst [smem:[#allocation31_spill]] %s3586_s1 }
   0x3   :  { %3622 = sst [smem:[#allocation32_spill]] %s3587_s2 }
   0x4   :  { %3623 = sst [smem:[#allocation33_spill]] %s3588_s3 }
   0x5   :  { %3624 = sst [smem:[#allocation34_spill]] %s3589_s4 }
   0x6   :  { %3625 = sst [smem:[#allocation35_spill]] %s3590_s5 }
   0x7   :  { %3626 = sst [smem:[#allocation36_spill]] %s3591_s6 }
   0x8   :  { %3627 = sst [smem:[#allocation37_spill]] %s3592_s7 }
   0x9   :  { %3628 = sst [smem:[#allocation38_spill]] %s3594_s9 }
   0xa   :  { %3629 = sst [smem:[#allocation39_spill]] %s3595_s10 }
   0xb   :  { %3630 = sst [smem:[#allocation40_spill]] %s3596_s11 }
   0xc   :  { %3631 = sst [smem:[#allocation41_spill]] %s3600_s15 }
   0xd   :  { %3632 = sst [smem:[#allocation42_spill]] %s3602_s17 }
   0xe   :  { %3633 = sst [smem:[#allocation43_spill]] %s3604_s19 }
   0xf   :  { %3634 = sst [smem:[#allocation44_spill]] %s3606_s21 }
  0x10   :  { %26 = vsyncpa [#allocation4], 0 }
  0x11   :  { %28 = vsyncpa [#allocation4 + $0x1], 0 }
  0x12   :  { %29 = vsyncpa [#allocation6], 0 }
  0x13   :  { %31 = vsyncpa [#allocation6 + $0x1], 0 }
  0x14   :  { %32 = vsyncpa [#allocation9], 0 }
  0x15   :  { %34 = vsyncpa [#allocation9 + $0x1], 0 }
  0x16   :  { %35 = vsyncpa [#allocation12], 0 }
  0x17   :  { %37 = vsyncpa [#allocation12 + $0x1], 0 }
  0x18   :  { %38 = vsyncpa [#allocation15], 0 }
  0x19   :  { %40 = vsyncpa [#allocation15 + $0x1], 0 }
  0x1a   :  { %41 = vsyncpa [#allocation18], 0  ;;  %s2959_s2 = smov 0   ;;  %s2961_s25 = smov 0  }
  0x1b   :  { %s2963_s26 = smov 0   ;;  %s2965_s27 = smov 0  }
  0x1c LB: > { %3635 = sst [smem:[#allocation26_spill]] %s2830_s26  ;;  %s2978_s3 = sadd.s32 4294967295, %s2834_s27   ;;  %s2834_s27 = sphi %s2965_s27, %s3679_s27   ;;  %s2830_s26 = sphi %s2963_s26, %s3681_s26   ;;  %s2826_s25 = sphi %s2961_s25, %s3683_s25   ;;  %s2822_s2 = sphi %s2959_s2, %s3682_s2  }
  0x1d   : > { %3636 = sst [smem:[#allocation27_spill]] %s2978_s3  ;;  %s2981_s28 = sadd.s32 1, %s2834_s27  }
  0x1e   : > { %3637 = sst [smem:[#allocation28_spill]] %s2981_s28  ;;  %s156_s29 = ssub.s32 %s2834_s27, %s2981_s28 }
  0x1f   : > { %s159_s0 = sadd.s32 1, %s2830_s26  ;;  %p157_p0 = scmp.eq.s32.totalorder %s156_s29, 0 }
  0x20   : > { %p166_p1 = scmp.ne.s32.totalorder %s2830_s26, %s2826_s25  ;;  %p167_p2 = scmp.eq.s32.totalorder %s2834_s27, 0 }
  0x21   : > { %p172_p3 = scmp.ne.s32.totalorder %s2826_s25, %s2822_s2  ;;  %p173_p5 = scmp.eq.s32.totalorder %s2978_s3, 0 }
  0x22   : > { %s2991_s4 = scalar_select %p157_p0, %s2830_s26, %s159_s0  }
  0x23   : > { %p2993_p4 = por %p167_p2, %p166_p1  ;;  %p2226_p6 = scmp.ge.s32.totalorder %s2834_s27, 1 }
  0x24   : > { %3638 = sst [smem:[#allocation29_spill]] %s2991_s4  ;;  %p584_p7 = scmp.lt.s32.totalorder %s2834_s27, 3 }
  0x25   : > { %p3002_p8 = por %p173_p5, %p172_p3  ;;  %p2227_p9 = scmp.ne.s32.totalorder %s2978_s3, 0 }
  0x26   : > { %p3007_p10 = pnand %p2226_p6, %p584_p7  ;;  %s3642_s19 = sld [smem:[#allocation43_spill]] }
  0x27   : > { %s2836_s2 = smov [#allocation17]   ;;  %p2343_p13 = scmp.lt.s32.totalorder %s2834_s27, 2 }
  0x28   : > { %p2306_p11 = pneg %p3007_p10  ;;  %s613_s29 = sshll.u32 %s2836_s2, 4  ;;  %s614_s29 = int_to_ptr.vmem [resolvable:$true] %s613_s29 }
  0x29   : > { %s3024_s4 = sand.u32 1, %s2830_s26   ;;  %s3027_s28 = sand.u32 1, %s2834_s27  }
  0x2a   : > { %p3018_p12 = pnand %p2306_p11, %p173_p5  ;;  %p3031_p0 = pnand %p2343_p13, %p2993_p4 }
  0x2b   : > { %s3645_s6 = sld [smem:[#allocation36_spill]]  ;;  %s656_s17 = scalar_lea.vmem [#allocation5], %s3024_s4 }
  0x2c   : > { %s611_s24 = sshll.u32 %s3642_s19, 4  ;;  %s663_s26 = sshll.u32 %s656_s17, 4  ;;  %s612_s24 = int_to_ptr.hbm [resolvable:$true] %s611_s24  ;;  %s664_s26 = int_to_ptr.vmem [resolvable:$true] %s663_s26 }
  0x2d   : > { %2309 = dma.hbm_to_vmem [thread:$0]  (!%p3018_p12), %s612_s24, 16, %s614_s29, [#allocation18]  }
  0x2e   : > { %s3617_s15 = scalar_lea.sflag [#allocation6], %s3027_s28  ;;  %p3045_p2 = pneg %p3031_p0 }
  0x31   : > { %s659_s19 = scalar_lea.hbm %s3645_s6, %s2834_s27  ;;  %s2487_s17 = scalar_lea.hbm %s3645_s6, 2 }
  0x32   : > { %s661_s21 = sshll.u32 %s659_s19, 4  ;;  %s662_s21 = int_to_ptr.hbm [resolvable:$true] %s661_s21 }
  0x33   : > { %s2480_s11 = sshra.s32 %s662_s21, 4  ;;  %s2481_s11 = int_to_ptr.hbm [resolvable:$true] %s2480_s11 }
  0x34   : > { %s2482_s30 = scalar_lea.hbm %s2481_s11, 1  ;;  %p2488_p6 = scmp.lt.s32.totalorder %s2481_s11, %s3645_s6 }
  0x35   : > { %p2483_p1 = scmp.ne.s32.totalorder %s2481_s11, %s2482_s30  ;;  %p2489_p7 = scmp.lt.s32.totalorder %s2487_s17, %s2482_s30 }
  0x37   : > { %p2485_p3 = pnand %p3045_p2, %p2483_p1  ;;  %p2490_p11 = por %p2489_p7, %p2488_p6 }
  0x39   : > { %p2486_p4 = pneg %p2485_p3 }
  0x3b   : > { %p2491_p13 = pnand %p2490_p11, %p2486_p4 }
  0x3d   : > { %2494 = shalt.err (!%p2491_p13)
}
  0x3e   : > { %2319 = dma.hbm_to_vmem [thread:$0]  (!%p3031_p0), %s662_s21, 16, %s664_s26, %s3617_s15  }
  0x3f   : > { %s3647_s10 = sld [smem:[#allocation39_spill]]  ;;  %s706_s7 = scalar_lea.vmem [#allocation8], %s3024_s4 }
  0x40   : > { %s713_s29 = sshll.u32 %s706_s7, 4  ;;  %s3618_s30 = scalar_lea.sflag [#allocation9], %s3027_s28  ;;  %s714_s29 = int_to_ptr.vmem [resolvable:$true] %s713_s29 }
  0x45   : > { %s709_s19 = scalar_lea.hbm %s3647_s10, %s2834_s27  ;;  %s2517_s21 = scalar_lea.hbm %s3647_s10, 2 }
  0x46   : > { %s711_s11 = sshll.u32 %s709_s19, 4  ;;  %s712_s11 = int_to_ptr.hbm [resolvable:$true] %s711_s11 }
  0x47   : > { %s2510_s17 = sshra.s32 %s712_s11, 4  ;;  %s2511_s17 = int_to_ptr.hbm [resolvable:$true] %s2510_s17 }
  0x48   : > { %s2512_s1 = scalar_lea.hbm %s2511_s17, 1  ;;  %p2518_p6 = scmp.lt.s32.totalorder %s2511_s17, %s3647_s10 }
  0x49   : > { %p2513_p1 = scmp.ne.s32.totalorder %s2511_s17, %s2512_s1  ;;  %p2519_p7 = scmp.lt.s32.totalorder %s2517_s21, %s2512_s1 }
  0x4b   : > { %p2515_p3 = pnand %p2513_p1, %p3045_p2  ;;  %p2520_p11 = por %p2519_p7, %p2518_p6 }
  0x4d   : > { %p2516_p4 = pneg %p2515_p3 }
  0x4f   : > { %p2521_p13 = pnand %p2520_p11, %p2516_p4 }
  0x51   : > { %2524 = shalt.err (!%p2521_p13)
}
  0x52   : > { %2325 = dma.hbm_to_vmem [thread:$0]  (!%p3031_p0), %s712_s11, 16, %s714_s29, %s3618_s30  }
  0x53   : > { %s751_s3 = scalar_lea.hbm %s3598_s13, %s2834_s27  ;;  %s748_s19 = scalar_lea.vmem [#allocation11], %s3024_s4 }
  0x54   : > { %s753_s24 = sshll.u32 %s751_s3, 4  ;;  %s755_s17 = sshll.u32 %s748_s19, 4  ;;  %s754_s24 = int_to_ptr.hbm [resolvable:$true] %s753_s24  ;;  %s756_s17 = int_to_ptr.vmem [resolvable:$true] %s755_s17 }
  0x55   : > { %s3619_s1 = scalar_lea.sflag [#allocation12], %s3027_s28  ;;  %s2540_s21 = sshra.s32 %s754_s24, 4  ;;  %s2541_s21 = int_to_ptr.hbm [resolvable:$true] %s2540_s21 }
  0x56   : > { %s2542_s26 = scalar_lea.hbm %s2541_s21, 1  ;;  %s2547_s29 = scalar_lea.hbm %s3598_s13, 2 }
  0x57   : > { %p2543_p1 = scmp.ne.s32.totalorder %s2541_s21, %s2542_s26  ;;  %p2548_p6 = scmp.lt.s32.totalorder %s2541_s21, %s3598_s13 }
  0x58   : > { %p2549_p7 = scmp.lt.s32.totalorder %s2547_s29, %s2542_s26 }
  0x59   : > { %p2545_p3 = pnand %p2543_p1, %p3045_p2 }
  0x5a   : > { %p2550_p11 = por %p2549_p7, %p2548_p6 }
  0x5b   : > { %p2546_p4 = pneg %p2545_p3 }
  0x5d   : > { %p2551_p13 = pnand %p2550_p11, %p2546_p4 }
  0x5f   : > { %2554 = shalt.err (!%p2551_p13)
}
  0x60   : > { %2331 = dma.hbm_to_vmem [thread:$0]  (!%p3031_p0), %s754_s24, 16, %s756_s17, %s3619_s1  }
  0x61   : > { %s793_s3 = scalar_lea.hbm %s3601_s16, %s2834_s27  ;;  %s790_s19 = scalar_lea.vmem [#allocation14], %s3024_s4 }
  0x62   : > { %s797_s2 = sshll.u32 %s790_s19, 4  ;;  %s795_s21 = sshll.u32 %s793_s3, 4  ;;  %s798_s2 = int_to_ptr.vmem [resolvable:$true] %s797_s2  ;;  %s796_s21 = int_to_ptr.hbm [resolvable:$true] %s795_s21 }
  0x63   : > { %s623_s11 = sshll.u32 %s3605_s20, 4  ;;  %s788_s7 = scalar_lea.sflag [#allocation15], %s3027_s28  ;;  %s624_s11 = int_to_ptr.hbm [resolvable:$true] %s623_s11 }
  0x64   : > { %s2570_s30 = sshra.s32 %s796_s21, 4  ;;  %s2577_s6 = scalar_lea.hbm %s3601_s16, 2  ;;  %s2571_s30 = int_to_ptr.hbm [resolvable:$true] %s2570_s30 }
  0x65   : > { %s2572_s10 = scalar_lea.hbm %s2571_s30, 1  ;;  %p2578_p6 = scmp.lt.s32.totalorder %s2571_s30, %s3601_s16 }
  0x66   : > { %p2573_p1 = scmp.ne.s32.totalorder %s2571_s30, %s2572_s10  ;;  %p2579_p7 = scmp.lt.s32.totalorder %s2577_s6, %s2572_s10 }
  0x68   : > { %p2575_p3 = pnand %p2573_p1, %p3045_p2  ;;  %p2580_p11 = por %p2579_p7, %p2578_p6 }
  0x6a   : > { %p2576_p4 = pneg %p2575_p3 }
  0x6c   : > { %p2581_p13 = pnand %p2580_p11, %p2576_p4 }
  0x6e   : > { %2584 = shalt.err (!%p2581_p13)
}
  0x6f   : > { %2337 = dma.hbm_to_vmem [thread:$0]  (!%p3031_p0), %s796_s21, 16, %s798_s2, %s788_s7  }
  0x70   : > { %s2837_s19 = smov [#allocation19]   ;;  %s3648_s29 = sld [smem:[#allocation35_spill]] }
  0x71   : > { %s625_s26 = sshll.u32 %s2837_s19, 4  ;;  %s639_s17 = scalar_lea.vmem [#allocation3], %s3024_s4  ;;  %s626_s26 = int_to_ptr.vmem [resolvable:$true] %s625_s26 }
  0x72   : > { %2312 = dma.hbm_to_vmem [thread:$0]  (!%p3018_p12), %s624_s11, 16, %s626_s26, [#allocation18]  }
  0x73   : > { %s646_s6 = sshll.u32 %s639_s17, 4  ;;  %s637_s3 = scalar_lea.sflag [#allocation4], %s3024_s4  ;;  %s647_s6 = int_to_ptr.vmem [resolvable:$true] %s646_s6 }
  0x76   : > { %s642_s24 = scalar_lea.hbm %s3648_s29, %s2834_s27  ;;  %s2637_s11 = scalar_lea.hbm %s3648_s29, 2 }
  0x77   : > { %s644_s15 = sshll.u32 %s642_s24, 4  ;;  %s645_s15 = int_to_ptr.hbm [resolvable:$true] %s644_s15 }
  0x78   : > { %s2630_s1 = sshra.s32 %s645_s15, 4  ;;  %s2631_s1 = int_to_ptr.hbm [resolvable:$true] %s2630_s1 }
  0x79   : > { %s2632_s2 = scalar_lea.hbm %s2631_s1, 1  ;;  %p2638_p12 = scmp.lt.s32.totalorder %s2631_s1, %s3648_s29 }
  0x7a   : > { %p2633_p1 = scmp.ne.s32.totalorder %s2631_s1, %s2632_s2  ;;  %p2639_p6 = scmp.lt.s32.totalorder %s2637_s11, %s2632_s2 }
  0x7c   : > { %p2635_p3 = pnand %p2633_p1, %p3045_p2  ;;  %p2640_p7 = por %p2639_p6, %p2638_p12 }
  0x7e   : > { %p2636_p4 = pneg %p2635_p3 }
  0x80   : > { %p2641_p11 = pnand %p2640_p7, %p2636_p4 }
  0x82   : > { %2644 = shalt.err (!%p2641_p11)
}
  0x83   : > { %2316 = dma.hbm_to_vmem [thread:$0]  (!%p3031_p0), %s645_s15, 16, %s647_s6, %s637_s3  }
  0x84   : > { %s684_s24 = scalar_lea.hbm %s3593_s8, %s2834_s27  ;;  %s681_s17 = scalar_lea.vmem [#allocation7], %s3024_s4 }
  0x85   : > { %s688_s21 = sshll.u32 %s681_s17, 4  ;;  %s686_s0 = sshll.u32 %s684_s24, 4  ;;  %s689_s21 = int_to_ptr.vmem [resolvable:$true] %s688_s21  ;;  %s687_s0 = int_to_ptr.hbm [resolvable:$true] %s686_s0 }
  0x86   : > { %s2660_s1 = sshra.s32 %s687_s0, 4  ;;  %s2667_s6 = scalar_lea.hbm %s3593_s8, 2  ;;  %s2661_s1 = int_to_ptr.hbm [resolvable:$true] %s2660_s1 }
  0x87   : > { %s2662_s2 = scalar_lea.hbm %s2661_s1, 1  ;;  %p2668_p4 = scmp.lt.s32.totalorder %s2661_s1, %s3593_s8 }
  0x88   : > { %p2663_p13 = scmp.ne.s32.totalorder %s2661_s1, %s2662_s2  ;;  %p2669_p12 = scmp.lt.s32.totalorder %s2667_s6, %s2662_s2 }
  0x8a   : > { %p2665_p1 = pnand %p2663_p13, %p3045_p2  ;;  %p2670_p6 = por %p2669_p12, %p2668_p4 }
  0x8c   : > { %p2666_p3 = pneg %p2665_p1 }
  0x8e   : > { %p2671_p7 = pnand %p2670_p6, %p2666_p3 }
  0x90   : > { %2674 = shalt.err (!%p2671_p7)
}
  0x91   : > { %s3649_s26 = scalar_lea.sflag [#allocation6], %s3027_s28  ;;  %s734_s24 = scalar_lea.hbm %s3597_s12, %s2834_s27 }
  0x92   : > { %2322 = dma.hbm_to_vmem [thread:$0]  (!%p3031_p0), %s687_s0, 16, %s689_s21, %s3649_s26  }
  0x93   : > { %s731_s17 = scalar_lea.vmem [#allocation10], %s3024_s4  ;;  %s736_s19 = sshll.u32 %s734_s24, 4  ;;  %s737_s19 = int_to_ptr.hbm [resolvable:$true] %s736_s19 }
  0x94   : > { %s738_s11 = sshll.u32 %s731_s17, 4  ;;  %s2690_s1 = sshra.s32 %s737_s19, 4  ;;  %s739_s11 = int_to_ptr.vmem [resolvable:$true] %s738_s11  ;;  %s2691_s1 = int_to_ptr.hbm [resolvable:$true] %s2690_s1 }
  0x95   : > { %s2692_s2 = scalar_lea.hbm %s2691_s1, 1  ;;  %s2697_s21 = scalar_lea.hbm %s3597_s12, 2 }
  0x96   : > { %p2693_p11 = scmp.ne.s32.totalorder %s2691_s1, %s2692_s2  ;;  %p2698_p3 = scmp.lt.s32.totalorder %s2691_s1, %s3597_s12 }
  0x97   : > { %p2699_p4 = scmp.lt.s32.totalorder %s2697_s21, %s2692_s2 }
  0x98   : > { %p2695_p13 = pnand %p2693_p11, %p3045_p2 }
  0x99   : > { %p2700_p12 = por %p2699_p4, %p2698_p3 }
  0x9a   : > { %p2696_p1 = pneg %p2695_p13 }
  0x9c   : > { %p2701_p6 = pnand %p2700_p12, %p2696_p1 }
  0x9e   : > { %2704 = shalt.err (!%p2701_p6)
}
  0x9f   : > { %s3650_s26 = scalar_lea.sflag [#allocation9], %s3027_s28  ;;  %s768_s24 = scalar_lea.hbm %s3599_s14, %s2834_s27 }
  0xa0   : > { %2328 = dma.hbm_to_vmem [thread:$0]  (!%p3031_p0), %s737_s19, 16, %s739_s11, %s3650_s26  }
  0xa1   : > { %s765_s17 = scalar_lea.vmem [#allocation13], %s3024_s4  ;;  %s770_s15 = sshll.u32 %s768_s24, 4  ;;  %s771_s15 = int_to_ptr.hbm [resolvable:$true] %s770_s15 }
  0xa2   : > { %s772_s6 = sshll.u32 %s765_s17, 4  ;;  %s2720_s1 = sshra.s32 %s771_s15, 4  ;;  %s773_s6 = int_to_ptr.vmem [resolvable:$true] %s772_s6  ;;  %s2721_s1 = int_to_ptr.hbm [resolvable:$true] %s2720_s1 }
  0xa3   : > { %s2722_s2 = scalar_lea.hbm %s2721_s1, 1  ;;  %s2727_s11 = scalar_lea.hbm %s3599_s14, 2 }
  0xa4   : > { %p2723_p7 = scmp.ne.s32.totalorder %s2721_s1, %s2722_s2  ;;  %p2728_p1 = scmp.lt.s32.totalorder %s2721_s1, %s3599_s14 }
  0xa5   : > { %p2729_p3 = scmp.lt.s32.totalorder %s2727_s11, %s2722_s2 }
  0xa6   : > { %p2725_p11 = pnand %p2723_p7, %p3045_p2 }
  0xa7   : > { %p2730_p4 = por %p2729_p3, %p2728_p1 }
  0xa8   : > { %p2726_p13 = pneg %p2725_p11 }
  0xaa   : > { %p2731_p12 = pnand %p2730_p4, %p2726_p13 }
  0xac   : > { %2734 = shalt.err (!%p2731_p12)
}
  0xad   : > { %s3651_s26 = scalar_lea.sflag [#allocation12], %s3027_s28  ;;  %s818_s24 = scalar_lea.hbm %s3603_s18, %s2834_s27 }
  0xae   : > { %2334 = dma.hbm_to_vmem [thread:$0]  (!%p3031_p0), %s771_s15, 16, %s773_s6, %s3651_s26  }
  0xaf   : > { %s815_s17 = scalar_lea.vmem [#allocation16], %s3024_s4  ;;  %s820_s0 = sshll.u32 %s818_s24, 4  ;;  %s821_s0 = int_to_ptr.hbm [resolvable:$true] %s820_s0 }
  0xb0   : > { %s822_s21 = sshll.u32 %s815_s17, 4  ;;  %s2750_s1 = sshra.s32 %s821_s0, 4  ;;  %s823_s21 = int_to_ptr.vmem [resolvable:$true] %s822_s21  ;;  %s2751_s1 = int_to_ptr.hbm [resolvable:$true] %s2750_s1 }
  0xb1   : > { %s2752_s2 = scalar_lea.hbm %s2751_s1, 1  ;;  %s2757_s6 = scalar_lea.hbm %s3603_s18, 2 }
  0xb2   : > { %p2753_p6 = scmp.ne.s32.totalorder %s2751_s1, %s2752_s2  ;;  %p2758_p13 = scmp.lt.s32.totalorder %s2751_s1, %s3603_s18 }
  0xb3   : > { %p2759_p1 = scmp.lt.s32.totalorder %s2757_s6, %s2752_s2 }
  0xb4   : > { %p2755_p7 = pnand %p2753_p6, %p3045_p2 }
  0xb5   : > { %p2760_p3 = por %p2759_p1, %p2758_p13 }
  0xb6   : > { %p2756_p11 = pneg %p2755_p7 }
  0xb8   : > { %p2761_p4 = pnand %p2760_p3, %p2756_p11 }
  0xba   : > { %2764 = shalt.err (!%p2761_p4)
}
  0xbb   : > { %2340 = dma.hbm_to_vmem [thread:$0]  (!%p3031_p0), %s821_s0, 16, %s823_s21, %s788_s7  }
  0xbc   : > { %831 = sbr.rel (%p3007_p10) target bundleno = 2676 (0xa74), region = 104  ;;  %s3207_s9 = sand.u32 (!%p3007_p10), 1, %s2826_s25  }
  0xbd   : > { %s834_s27 = scalar_lea.sflag (!%p3007_p10), [#allocation4], %s3207_s9 }
  0xc1   : > { %2797 = dma.done.wait (%p3002_p8), %s834_s27, 16  }
  0xc2   : > { %2799 = vsyncadd (%p3002_p8), %s834_s27, 4294967280  ;;  %s3652_s23 = sld [smem:[#allocation27_spill]] }
  0xc8   : > { %s842_s28 = sand.u32 1, %s3652_s23  }
  0xc9   : > { %s843_s7 = scalar_lea.sflag [#allocation6], %s842_s28 }
  0xca   : > { %2801 = dma.done.wait (%p3002_p8), %s843_s7, 32  }
  0xcb   : > { %2803 = vsyncadd (%p3002_p8), %s843_s7, 4294967264  ;;  %s861_s10 = scalar_lea.sflag [#allocation9], %s842_s28 }
  0xcc   : > { %2805 = dma.done.wait (%p3002_p8), %s861_s10, 32  }
  0xcd   : > { %2807 = vsyncadd (%p3002_p8), %s861_s10, 4294967264  ;;  %s879_s17 = scalar_lea.sflag [#allocation12], %s842_s28 }
  0xce   : > { %2809 = dma.done.wait (%p3002_p8), %s879_s17, 32  }
  0xcf   : > { %2811 = vsyncadd (%p3002_p8), %s879_s17, 4294967264  ;;  %s897_s1 = scalar_lea.sflag [#allocation15], %s842_s28 }
  0xd0   : > { %2813 = dma.done.wait (%p3002_p8), %s897_s1, 32  }
  0xd1   : > { %2815 = vsyncadd (%p3002_p8), %s897_s1, 4294967264 }
  0xd2   : > { %2817 = dma.done.wait (%p173_p5), [#allocation18], 32  }
  0xd3   : > { %2819 = vsyncadd (%p173_p5), [#allocation18], 4294967264  ;;  %p1029_p10 = scmp.lt.s32.totalorder %s3652_s23, 1  ;;  %s3653_s28 = sld [smem:[#allocation37_spill]] }
  0xd4   : > { %s3654_s17 = sld [smem:[#allocation38_spill]] }
  0xd5   : > { %s1030_s19 = scalar_select %p1029_p10, %s3652_s23, 1 }
  0xd6   : > { %s3655_s0 = sld [smem:[#allocation40_spill]] }
  0xd7   : > { %s2274_s6 = sshll.u32 %s1030_s19, 5  ;;  %s2278_s15 = sshll.u32 %s1030_s19, 7 }
  0xd8   : > { %s3656_s30 = sld [smem:[#allocation41_spill]] }
  0xd9   : > { %s3249_s7 = scalar_lea.vmem %s3653_s28, %s2274_s6  ;;  %s3657_s3 = sld [smem:[#allocation42_spill]] }
  0xda   : > { %s3254_s1 = scalar_lea.vmem %s3654_s17, %s2274_s6  ;;  %s3658_s10 = sld [smem:[#allocation30_spill]] (!%p2227_p9) }
  0xdb   : > { %1057 = sbr.rel (%p2227_p9) target bundleno = 231 (0xe7), region = 152  ;;  %s3659_s11 = sld [smem:[#allocation32_spill]] (!%p2227_p9) }
  0xdc   : > { %s3259_s21 = scalar_lea.vmem %s3655_s0, %s2274_s6 }
  0xde   : > { %s3264_s22 = scalar_lea.vmem %s3656_s30, %s2274_s6 }
  0xdf   : > { %s3269_s27 = scalar_lea.vmem %s3657_s3, %s2278_s15 }
  0xe0   : > { %v1058_v0 = vld [vmem:[%s3658_s10] sm:$0xff]  ;;  %v1059_v2 = vld [vmem:[%s3658_s10 + $0x8] sm:$0xf]  ;;  %vm1066_vm0 = vcmask 261120   ;;  %vm1068_vm1 = vcmask 257024  }
  0xe1   : > { %v1062_v1 = vld [vmem:[%s3659_s11] sm:$0xff]  ;;  %v1060_v3 = vmul.f32 5.656854, %v1058_v0  ;;  %v1061_v4 = vmul.f32 5.656854, %v1059_v2 }
  0xe2   : > { %v1063_v5 = vld [vmem:[%s3659_s11 + $0x8] sm:$0xf] }
  0xe3   : > { %v1064_v6 = vadd.f32 %v1062_v1, %v1060_v3  ;;  %v1065_v7 = vadd.f32 %v1063_v5, %v1061_v4 }
  0xe5   : > { %1067 = vst.msk [vmem:[#allocation2] sm:$0xff] %vm1066_vm0, %v1064_v6 }
  0xe6   : > { %1069 = vst.msk [vmem:[#allocation2 + $0x8] sm:$0xf] %vm1068_vm1, %v1065_v7 }
  0xe7 PF: > { %s3660_s6 = sld [smem:[#allocation31_spill]]  ;;  %vm1078_vm2 = vcmask 257024   ;;  %vm1074_vm3 = vcmask 261120   ;;  %v2838_v17 = vmov 32.0   ;;  %v1205_v39 = vld [vmem:[%s3254_s1 + $0x18] sm:$0xff]  ;;  %v1204_v40 = vld [vmem:[%s3254_s1 + $0x10] sm:$0xff] }
  0xe8   : > { %s3661_s3 = sld [smem:[#allocation33_spill]]  ;;  %2400 = vrcp.f32 %v2838_v17  ;;  %1225 = vmatpush.msra.mxu1 %v1205_v39  ;;  %v1203_v41 = vld [vmem:[%s3254_s1 + $0x8] sm:$0xff]  ;;  %v1202_v42 = vld [vmem:[%s3254_s1] sm:$0xff]  ;;  %v1168_v43 = vld [vmem:[%s3249_s7 + $0x18] sm:$0xff]  ;;  %s3663_s1 = scalar_lea.vmem [#allocation5], %s3207_s9  ;;  %vm1235_vm14 = vcmask 64512  }
  0xe9   : > { %1191 = vmatpush.msra.mxu0 %v1168_v43  ;;  %v1167_v44 = vld [vmem:[%s3249_s7 + $0x10] sm:$0xff]  ;;  %v1166_v47 = vld [vmem:[%s3249_s7 + $0x8] sm:$0xff]  ;;  %v1165_v49 = vld [vmem:[%s3249_s7] sm:$0xff]  ;;  %s3662_s7 = scalar_lea.vmem [#allocation3], %s3207_s9  ;;  %s3664_s28 = scalar_lea.vmem [#allocation8], %s3207_s9  ;;  %vm1271_vm15 = vcmask 60416  }
  0xea   : > { %1226 = vmatpush.msra.mxu1 %v1204_v40  ;;  %v2391_v0 = vld [vmem:[%s3662_s7] ss:$0 sm:$0xff]  ;;  %s2839_s5 = smov 120   ;;  %s3665_s2 = scalar_lea.vmem [#allocation7], %s3207_s9 }
  0xeb   : > { %1192 = vmatpush.msra.mxu0 %v1167_v44  ;;  %v2392_v3 = vld [vmem:[%s3663_s1] ss:$0 sm:$0xff]  ;;  %s3666_s26 = sld [smem:[#allocation34_spill]]  ;;  %s2840_s24 = smov 96  }
  0xec   : > { %v3296_v15 = vld [vmem:[#allocation2] sm:$0xff]  ;;  %1227 = vmatpush.msra.mxu1 %v1203_v41  ;;  %s2842_s15 = smov 112   ;;  %s2843_s19 = smov 88  }
  0xed   : > { %v1137_v8 = vld [vmem:[%s3660_s6] sm:$0xff]  ;;  %v3291_v11 = vld [vmem:[#allocation2 + $0x8] sm:$0xf]  ;;  %v1075_v16 = vsel %vm1074_vm3, %v3296_v15, 0.0  ;;  %1193 = vmatpush.msra.mxu0 %v1166_v47  ;;  %s2841_s6 = smov 104   ;;  %s2845_s7 = smov 80  }
  0xee   : > { %v1139_v9 = vld [vmem:[%s3661_s3] sm:$0xff]  ;;  %v1138_v10 = vmul.f32 5.656854, %v1137_v8  ;;  %v1079_v12 = vsel %vm1078_vm2, %v3291_v11, 0.0  ;;  %v2401_v18 = vpop.eup %2400  ;;  %1228 = vmatpush.msra.mxu1 %v1202_v42  ;;  %s2844_s3 = smov 72   ;;  %s2846_s1 = smov 8  }
  0xef   : > { %1080 = vadd.xlane.f32.xlu1 %v1079_v12  ;;  %v1083_v19 = vmul.f32 32.0, %v2401_v18  ;;  %vm1087_vm4 = vweird.f32 %v2401_v18  ;;  %1194 = vmatpush.msra.mxu0 %v1165_v49  ;;  %s3675_s0 = scalar_lea.vmem [#allocation14], %s3207_s9  ;;  %s3676_s17 = scalar_lea.vmem [#allocation16], %s3207_s9 }
  0xf0   : > { %v1140_v13 = vadd.f32 %v1139_v9, %v1138_v10 }
  0xf1   : > { %v1084_v20 = vsub.f32 1.0, %v1083_v19  ;;  %s3667_s4 = smov %s3666_s26 }
  0xf2   : > { %v1141_v14 = vsel %vm1074_vm3, %v1140_v13, 0.0  ;;  %v3359_v39 = vld [vmem:[%s3667_s4 + $0x8] sm:$0xf] }
  0xf3   : > { %1142 = vadd.xlane.f32.xlu0 %v1141_v14  ;;  %v1085_v21 = vmul.f32 %v2401_v18, %v1084_v20 }
  0xf5   : > { %v1086_v22 = vadd.f32 %v2401_v18, %v1085_v21 }
  0xf7   : > { %v3300_v23 = vsel %vm1087_vm4, %v2401_v18, %v1086_v22 }
  0xfb   : > { %1076 = vadd.xlane.f32.xlu0 %v1075_v16 }
 0x162   : > { %v1081_v28 = vpop.xlane.xlu1 %1080 }
 0x163   : > { %v1090_v32 = vmul.f32 %v3300_v23, %v1081_v28 }
 0x165   : > { %v3310_v34 = vsub.f32 %v3291_v11, %v1090_v32 }
 0x166   : > { %v1143_v24 = vpop.xlane.xlu0 %1142 }
 0x167   : > { %v1144_v25 = vmul.f32 %v1143_v24, %v3300_v23  ;;  %v1094_v37 = vmul.f32 %v3310_v34, %v3310_v34 }
 0x169   : > { %v1145_v26 = vsub.f32 %v1140_v13, %v1144_v25  ;;  %v1098_v38 = vsel %vm1078_vm2, %v1094_v37, 0.0 }
 0x16b   : > { %v1146_v27 = vmul.f32 %v1145_v26, %v1145_v26 }
 0x16d   : > { %v1147_v29 = vsel %vm1074_vm3, %v1146_v27, 0.0  ;;  %v2393_v27 = vld [vmem:[%s3664_s28] ss:$0 sm:$0xff]  ;;  %s2847_s28 = smov 16  }
 0x16e   : > { %1148 = vadd.xlane.f32.xlu1 %v1147_v29  ;;  %v1077_v30 = vpop.xlane.xlu0 %1076 }
 0x16f   : > { %v1089_v31 = vmul.f32 %v3300_v23, %v1077_v30  ;;  %v2394_v30 = vld [vmem:[%s3665_s2] ss:$0 sm:$0xff]  ;;  %s3674_s2 = scalar_lea.vmem [#allocation13], %s3207_s9 }
 0x171   : > { %v3307_v33 = vsub.f32 %v3296_v15, %v1089_v31 }
 0x173   : > { %v1093_v35 = vmul.f32 %v3307_v33, %v3307_v33 }
 0x175   : > { %v1095_v36 = vsel %vm1074_vm3, %v1093_v35, 0.0  ;;  %v3352_v35 = vld [vmem:[%s3666_s26] sm:$0xff] }
 0x176   : > { %1096 = vadd.xlane.f32.xlu2 %v1095_v36 }
 0x17e   : > { %1099 = vadd.xlane.f32.xlu2 %v1098_v38 }
 0x1e1   : > { %v1149_v45 = vpop.xlane.xlu1 %1148 }
 0x1e2   : > { %v1150_v46 = vmul.f32 %v1149_v45, %v3300_v23 }
 0x1e4   : > { %v1151_v48 = vadd.f32 1e-05, %v1150_v46 }
 0x1e6   : > { %2402 = vrsqrt.f32 %v1151_v48  ;;  %vm1158_vm6 = vweird.f32 %v1151_v48 }
 0x1e9   : > { %v1097_v50 = vpop.xlane.xlu2 %1096 }
 0x1ea   : > { %v1101_v51 = vmul.f32 %v1097_v50, %v3300_v23 }
 0x1ec   : > { %v2403_v52 = vpop.eup %2402  ;;  %v1103_v53 = vadd.f32 1e-05, %v1101_v51 }
 0x1ed   : > { %v1153_v54 = vmul.f32 %v2403_v52, %v1151_v48  ;;  %vm1159_vm5 = vweird.f32 %v2403_v52 }
 0x1ee   : > { %2404 = vrsqrt.f32 %v1103_v53  ;;  %vm1160_vm7 = vmor %vm1158_vm6, %vm1159_vm5  ;;  %vm1111_vm9 = vweird.f32 %v1103_v53 }
 0x1ef   : > { %v1154_v55 = vmul.f32 %v2403_v52, %v1153_v54 }
 0x1f1   : > { %v1155_v56 = vmul.f32 0.5, %v1154_v55  ;;  %v1100_v57 = vpop.xlane.xlu2 %1099 }
 0x1f2   : > { %v1102_v58 = vmul.f32 %v1100_v57, %v3300_v23 }
 0x1f3   : > { %v1156_v59 = vsub.f32 1.5, %v1155_v56 }
 0x1f4   : > { %v2405_v60 = vpop.eup %2404  ;;  %v1104_v61 = vadd.f32 1e-05, %v1102_v58 }
 0x1f5   : > { %v1157_v62 = vmul.f32 %v2403_v52, %v1156_v59  ;;  %v1106_v63 = vmul.f32 %v2405_v60, %v1103_v53  ;;  %vm1112_vm8 = vweird.f32 %v2405_v60 }
 0x1f6   : > { %2406 = vrsqrt.f32 %v1104_v61  ;;  %vm1113_vm10 = vmor %vm1111_vm9, %vm1112_vm8  ;;  %vm1121_vm12 = vweird.f32 %v1104_v61 }
 0x1f7   : > { %v1161_v1 = vsel %vm1160_vm7, %v2403_v52, %v1157_v62  ;;  %v1107_v2 = vmul.f32 %v2405_v60, %v1106_v63 }
 0x1f8   : > { %v1162_v4 = vmul.f32 %v1161_v1, %v1145_v26 }
 0x1f9   : > { %v1108_v5 = vmul.f32 0.5, %v1107_v2 }
 0x1fa   : > { %v1163_v6 = vmul.f32 %v2391_v0, %v1162_v4 }
 0x1fb   : > { %v1109_v7 = vsub.f32 1.5, %v1108_v5 }
 0x1fc   : > { %v2407_v8 = vpop.eup %2406  ;;  %v1164_v9 = vadd.f32 %v2392_v3, %v1163_v6 }
 0x1fd   : > { %v1110_v10 = vmul.f32 %v2405_v60, %v1109_v7  ;;  %v1116_v12 = vmul.f32 %v2407_v8, %v1104_v61  ;;  %vm1122_vm11 = vweird.f32 %v2407_v8 }
 0x1fe   : > { %2246 = vmatmul.msk.f32.vlgmr.msra.gmra.mxu1 %vm1074_vm3, %v1164_v9  ;;  %vm1123_vm13 = vmor %vm1121_vm12, %vm1122_vm11 }
 0x1ff   : > { %v1114_v13 = vsel %vm1113_vm10, %v2405_v60, %v1110_v10  ;;  %v1117_v14 = vmul.f32 %v2407_v8, %v1116_v12 }
 0x200   : > { %v1125_v16 = vmul.f32 %v1114_v13, %v3307_v33 }
 0x201   : > { %v1118_v17 = vmul.f32 0.5, %v1117_v14 }
 0x202   : > { %v1130_v18 = vmul.f32 %v2391_v0, %v1125_v16 }
 0x203   : > { %v1119_v19 = vsub.f32 1.5, %v1118_v17 }
 0x204   : > { %v1135_v20 = vadd.f32 %v2392_v3, %v1130_v18 }
 0x205   : > { %v1120_v21 = vmul.f32 %v2407_v8, %v1119_v19 }
 0x206   : > { %2244 = vmatmul.msk.f32.vlgmr.msra.gmra.mxu0 %vm1074_vm3, %v1135_v20 }
 0x207   : > { %v1124_v22 = vsel %vm1123_vm13, %v2407_v8, %v1120_v21 }
 0x208   : > { %v1126_v24 = vmul.f32 %v1124_v22, %v3310_v34 }
 0x20a   : > { %v1131_v25 = vmul.f32 %v2391_v0, %v1126_v24 }
 0x20c   : > { %v1136_v26 = vadd.f32 %v2392_v3, %v1131_v25 }
 0x20e   : > { %2245 = vmatmul.msk.f32.gmra.mxu0 %vm1074_vm3, %v1136_v26 }
 0x27b   : > { %v1230_v28 = vpop.f32.mrf.mxu1 }
 0x27c   : > { %v3340_v29 = vadd.f32 %v2393_v27, %v1230_v28 }
 0x27e   : > { %2247 = vmatpush.xpose.msk.msra.mxu2 %vm1235_vm14, %v3340_v29  ;;  %1353 = vrot.lane.b32.xlu2 %v3340_v29, %s2839_s5 }
 0x283   : > { %v1196_v31 = vpop.f32.mrf.mxu0 }
 0x284   : > { %v1197_v32 = vadd.f32 %v2394_v30, %v1196_v31 }
 0x286   : > { %2248 = vmatmul.msk.f32.vlgmr.msra.gmra.mxu2 %vm1235_vm14, %v1197_v32 }
 0x28b   : > { %v1199_v33 = vpop.f32.mrf.mxu0 }
 0x28c   : > { %v1200_v34 = vadd.f32 %v2394_v30, %v1199_v33 }
 0x28e   : > { %2249 = vmatmul.msk.f32.gmra.mxu2 %vm1235_vm14, %v1200_v34 }
 0x2d8   : > { %v1354_v54 = vpop.permute.xlu2 %1353 }
 0x309   : > { %v1262_v36 = vpop.f32.mrf.mxu2 }
 0x30a   : > { %v1263_v37 = vadd.f32 %v1262_v36, %v3352_v35 }
 0x30c   : > { %v1268_v38 = vsel %vm1235_vm14, %v1263_v37, -inf }
 0x30d   : > { %1269 = vmax.xlane.f32.xlu1 %v1268_v38 }
 0x311   : > { %v1265_v40 = vpop.f32.mrf.mxu2 }
 0x312   : > { %v1266_v41 = vadd.f32 %v1265_v40, %v3359_v39 }
 0x314   : > { %v1272_v42 = vsel %vm1271_vm15, %v1266_v41, -inf }
 0x315   : > { %1273 = vmax.xlane.f32.xlu0 %v1272_v42 }
 0x326   : > { %1349 = vrot.lane.b32.xlu1 %v1197_v32, %s2839_s5 }
 0x329   : > { %1317 = vrot.lane.b32.xlu0 %v3340_v29, %s2840_s24 }
 0x331   : > { %1351 = vrot.lane.b32.xlu0 %v1200_v34, %s2839_s5  ;;  %s2848_s5 = smov 24  }
 0x339   : > { %1583 = vrot.lane.b32.xlu0 %v3340_v29, %s2841_s6 }
 0x341   : > { %1466 = vrot.lane.b32.xlu0 %v1200_v34, %s2842_s15 }
 0x380   : > { %v1270_v43 = vpop.xlane.xlu1 %1269 }
 0x381   : > { %v1275_v44 = vsub.f32 %v1263_v37, %v1270_v43 }
 0x383   : > { %v1277_v45 = vmul.f32 1.442695, %v1275_v44 }
 0x385   : > { %2408 = vpow2.f32 %v1277_v45 }
 0x388   : > { %v1274_v46 = vpop.xlane.xlu0 %1273 }
 0x389   : > { %v1276_v47 = vsub.f32 %v1266_v41, %v1274_v46 }
 0x38b   : > { %v2409_v48 = vpop.eup %2408  ;;  %v1279_v49 = vmul.f32 1.442695, %v1276_v47 }
 0x38c   : > { %v1281_v50 = vsel %vm1235_vm14, %v2409_v48, 0.0 }
 0x38d   : > { %2410 = vpow2.f32 %v1279_v49  ;;  %1282 = vadd.xlane.f32.xlu1 %v1281_v50 }
 0x393   : > { %v2411_v51 = vpop.eup %2410 }
 0x394   : > { %v1284_v52 = vsel %vm1271_vm15, %v2411_v51, 0.0 }
 0x395   : > { %1285 = vadd.xlane.f32.xlu2 %v1284_v52 }
 0x398   : > { %v1350_v57 = vpop.permute.xlu1 %1349 }
 0x39b   : > { %v1318_v53 = vpop.permute.xlu0 %1317 }
 0x39c   : > { %1341 = vmatpush.msrb.mxu2 %v1318_v53  ;;  %2279 = vmatpush.msra.mxu3 %v1318_v53 }
 0x39e   : > { %2252 = vmatpush.xpose.msk.msrb.mxu3 %vm1235_vm14, %v1354_v54 }
 0x3a3   : > { %v1352_v55 = vpop.permute.xlu0 %1351 }
 0x3a6   : > { %1579 = vrot.lane.b32.xlu1 %v1197_v32, %s2841_s6 }
 0x3ab   : > { %v1584_v56 = vpop.permute.xlu0 %1583 }
 0x3ac   : > { %2262 = vmatpush.xpose.msk.msrb.mxu1 %vm1235_vm14, %v1584_v56 }
 0x3ad   : > { %1468 = vrot.lane.b32.xlu2 %v3340_v29, %s2842_s15 }
 0x3b3   : > { %v1467_v25 = vpop.permute.xlu0 %1466 }
 0x3b5   : > { %1464 = vrot.lane.b32.xlu2 %v1197_v32, %s2842_s15 }
 0x3bd   : > { %1581 = vrot.lane.b32.xlu2 %v1200_v34, %s2841_s6 }
 0x400   : > { %v1283_v58 = vpop.xlane.xlu1 %1282 }
 0x401   : > { %2412 = vrcp.f32 %v1283_v58  ;;  %v1298_v63 = vand.u32 2147483648, %v1283_v58  ;;  %v1296_v1 = vand.u32 2147483647, %v1283_v58  ;;  %vm1292_vm1 = vweird.f32 %v1283_v58 }
 0x403   : > { %v1299_v4 = vor.u32 1.1754944e-38, %v1298_v63  ;;  %vm1297_vm5 = vcmp.eq.f32.partialorder %v1296_v1, 8.507059e+37 }
 0x407   : > { %v2413_v59 = vpop.eup %2412 }
 0x408   : > { %v1288_v60 = vmul.f32 %v2413_v59, %v1283_v58  ;;  %v1286_v61 = vpop.xlane.xlu2 %1285  ;;  %vm1293_vm0 = vweird.f32 %v2413_v59 }
 0x409   : > { %2414 = vrcp.f32 %v1286_v61  ;;  %vm1294_vm4 = vmor %vm1292_vm1, %vm1293_vm0  ;;  %v1313_v12 = vand.u32 2147483648, %v1286_v61  ;;  %v1311_v14 = vand.u32 2147483647, %v1286_v61  ;;  %vm1307_vm7 = vweird.f32 %v1286_v61 }
 0x40a   : > { %v1289_v62 = vsub.f32 1.0, %v1288_v60 }
 0x40b   : > { %v1314_v17 = vor.u32 1.1754944e-38, %v1313_v12  ;;  %vm1312_vm9 = vcmp.eq.f32.partialorder %v1311_v14, 8.507059e+37 }
 0x40c   : > { %v1290_v0 = vmul.f32 %v2413_v59, %v1289_v62 }
 0x40e   : > { %v1291_v2 = vadd.f32 %v2413_v59, %v1290_v0 }
 0x40f   : > { %v2415_v3 = vpop.eup %2414 }
 0x410   : > { %v1303_v5 = vmul.f32 %v2415_v3, %v1286_v61  ;;  %v1469_v6 = vpop.permute.xlu2 %1468  ;;  %v1295_v7 = vsel %vm1294_vm4, %v2413_v59, %v1291_v2  ;;  %vm1308_vm6 = vweird.f32 %v2415_v3 }
 0x411   : > { %2257 = vmatpush.xpose.msk.msra.mxu2 %vm1235_vm14, %v1469_v6  ;;  %v1300_v8 = vsel %vm1297_vm5, %v1299_v4, %v1295_v7  ;;  %vm1309_vm8 = vmor %vm1307_vm7, %vm1308_vm6 }
 0x412   : > { %v1304_v9 = vsub.f32 1.0, %v1303_v5  ;;  %v1301_v10 = vmul.f32 %v2409_v48, %v1300_v8 }
 0x414   : > { %v1305_v13 = vmul.f32 %v2415_v3, %v1304_v9  ;;  %2250 = vmatmul.msk.f32.vlgmr.msrb.gmra.mxu2 %vm1235_vm14, %v1301_v10 }
 0x416   : > { %v1306_v16 = vadd.f32 %v2415_v3, %v1305_v13 }
 0x418   : > { %v1580_v18 = vpop.permute.xlu1 %1579  ;;  %v1465_v19 = vpop.permute.xlu2 %1464  ;;  %v1310_v20 = vsel %vm1309_vm8, %v2415_v3, %v1306_v16 }
 0x419   : > { %2263 = vmatmul.msk.f32.vlgmr.msrb.gmra.mxu1 %vm1235_vm14, %v1580_v18  ;;  %v1315_v21 = vsel %vm1312_vm9, %v1314_v17, %v1310_v20 }
 0x41a   : > { %v1316_v22 = vmul.f32 %v2411_v51, %v1315_v21 }
 0x41c   : > { %2251 = vmatmul.msk.f32.vlgmr.msra.gmra.mxu3 %vm1235_vm14, %v1316_v22  ;;  %2258 = vmatmul.msk.f32.vlgmr.msra.gmra.mxu2 %vm1235_vm14, %v1465_v19 }
 0x420   : > { %v1582_v24 = vpop.permute.xlu2 %1581 }
 0x421   : > { %2264 = vmatmul.msk.f32.gmra.mxu1 %vm1235_vm14, %v1582_v24 }
 0x424   : > { %2253 = vmatmul.msk.f32.vlgmr.msrb.gmra.mxu3 %vm1235_vm14, %v1350_v57  ;;  %2259 = vmatmul.msk.f32.gmra.mxu2 %vm1235_vm14, %v1467_v25 }
 0x42c   : > { %2254 = vmatmul.msk.f32.gmra.mxu3 %vm1235_vm14, %v1352_v55 }
 0x496   : > { %v1608_v26 = vpop.f32.mrf.mxu1 }
 0x497   : > { %v1609_v27 = vadd.f32 %v1608_v26, %v3352_v35  ;;  %v3380_v28 = vpop.f32.mrf.mxu2 }
 0x499   : > { %v1614_v30 = vsel %vm1235_vm14, %v1609_v27, -inf }
 0x49a   : > { %1615 = vmax.xlane.f32.xlu2 %v1614_v30 }
 0x49e   : > { %v1611_v46 = vpop.f32.mrf.mxu1 }
 0x49f   : > { %v3383_v31 = vpop.f32.mrf.mxu3  ;;  %v1493_v32 = vpop.f32.mrf.mxu2  ;;  %v1612_v47 = vadd.f32 %v1611_v46, %v3359_v39 }
 0x4a0   : > { %v1494_v41 = vadd.f32 %v1493_v32, %v3352_v35 }
 0x4a1   : > { %v1617_v48 = vsel %vm1271_vm15, %v1612_v47, -inf }
 0x4a2   : > { %v1499_v45 = vsel %vm1235_vm14, %v1494_v41, -inf }
 0x4a7   : > { %v1378_v33 = vpop.f32.mrf.mxu3  ;;  %v1496_v34 = vpop.f32.mrf.mxu2 }
 0x4a8   : > { %v1379_v36 = vadd.f32 %v1378_v33, %v3352_v35  ;;  %v1497_v37 = vadd.f32 %v1496_v34, %v3359_v39 }
 0x4aa   : > { %v1384_v38 = vsel %vm1235_vm14, %v1379_v36, -inf  ;;  %v1502_v40 = vsel %vm1271_vm15, %v1497_v37, -inf }
 0x4ab   : > { %1385 = vmax.xlane.f32.xlu1 %v1384_v38  ;;  %1503 = vmax.xlane.f32.xlu2 %v1502_v40 }
 0x4af   : > { %v1381_v42 = vpop.f32.mrf.mxu3 }
 0x4b0   : > { %v1382_v43 = vadd.f32 %v1381_v42, %v3359_v39 }
 0x4b2   : > { %v1387_v44 = vsel %vm1271_vm15, %v1382_v43, -inf }
 0x4b3   : > { %1388 = vmax.xlane.f32.xlu0 %v1387_v44  ;;  %1500 = vmax.xlane.f32.xlu1 %v1499_v45 }
 0x4bb   : > { %1618 = vmax.xlane.f32.xlu0 %v1617_v48 }
 0x50d   : > { %v1616_v49 = vpop.xlane.xlu2 %1615 }
 0x50e   : > { %v1620_v50 = vsub.f32 %v1609_v27, %v1616_v49 }
 0x510   : > { %v1622_v51 = vmul.f32 1.442695, %v1620_v50 }
 0x512   : > { %2416 = vpow2.f32 %v1622_v51 }
 0x518   : > { %v3395_v35 = vpop.eup %2416 }
 0x519   : > { %v1626_v52 = vsel %vm1235_vm14, %v3395_v35, 0.0 }
 0x51a   : > { %1627 = vadd.xlane.f32.xlu2 %v1626_v52 }
 0x51e   : > { %v1386_v53 = vpop.xlane.xlu1 %1385  ;;  %v1504_v39 = vpop.xlane.xlu2 %1503 }
 0x51f   : > { %v1390_v54 = vsub.f32 %v1379_v36, %v1386_v53  ;;  %v1506_v61 = vsub.f32 %v1497_v37, %v1504_v39 }
 0x521   : > { %v1392_v55 = vmul.f32 1.442695, %v1390_v54  ;;  %v1509_v63 = vmul.f32 1.442695, %v1506_v61 }
 0x523   : > { %2418 = vpow2.f32 %v1392_v55 }
 0x526   : > { %v1389_v56 = vpop.xlane.xlu0 %1388  ;;  %v1501_v57 = vpop.xlane.xlu1 %1500 }
 0x527   : > { %v1505_v58 = vsub.f32 %v1494_v41, %v1501_v57  ;;  %v1391_v4 = vsub.f32 %v1382_v43, %v1389_v56 }
 0x529   : > { %v2419_v59 = vpop.eup %2418  ;;  %v1507_v60 = vmul.f32 1.442695, %v1505_v58  ;;  %v1394_v6 = vmul.f32 1.442695, %v1391_v4 }
 0x52a   : > { %v1396_v62 = vsel %vm1235_vm14, %v2419_v59, 0.0 }
 0x52b   : > { %1397 = vadd.xlane.f32.xlu1 %v1396_v62  ;;  %2420 = vpow2.f32 %v1507_v60 }
 0x52c   : > { %2422 = vpow2.f32 %v1509_v63 }
 0x52e   : > { %v1619_v0 = vpop.xlane.xlu0 %1618 }
 0x52f   : > { %v1621_v1 = vsub.f32 %v1612_v47, %v1619_v0 }
 0x531   : > { %v1624_v2 = vmul.f32 1.442695, %v1621_v1  ;;  %v3400_v3 = vpop.eup %2420 }
 0x532   : > { %v1511_v5 = vsel %vm1235_vm14, %v3400_v3, 0.0  ;;  %v3404_v7 = vpop.eup %2422 }
 0x533   : > { %2424 = vpow2.f32 %v1624_v2  ;;  %1512 = vadd.xlane.f32.xlu0 %v1511_v5  ;;  %v1514_v10 = vsel %vm1271_vm15, %v3404_v7, 0.0 }
 0x534   : > { %2426 = vpow2.f32 %v1394_v6 }
 0x539   : > { %v3406_v8 = vpop.eup %2424 }
 0x53a   : > { %v1629_v9 = vsel %vm1271_vm15, %v3406_v8, 0.0  ;;  %v3412_v12 = vpop.eup %2426 }
 0x53b   : > { %1630 = vadd.xlane.f32.xlu2 %v1629_v9  ;;  %1515 = vadd.xlane.f32.xlu0 %v1514_v10  ;;  %v1399_v13 = vsel %vm1271_vm15, %v3412_v12, 0.0 }
 0x543   : > { %1400 = vadd.xlane.f32.xlu0 %v1399_v13 }
 0x544   : > { %1432 = vrot.lane.b32.xlu1 %v3340_v29, %s2843_s19 }
 0x553   : > { %1662 = vrot.lane.b32.xlu2 %v3340_v29, %s2844_s3 }
 0x557   : > { %1547 = vrot.lane.b32.xlu0 %v3340_v29, %s2845_s7 }
 0x58d   : > { %v3419_v17 = vpop.xlane.xlu2 %1627 }
 0x58e   : > { %v1643_v9 = vand.u32 2147483648, %v3419_v17 }
 0x59e   : > { %v1398_v14 = vpop.xlane.xlu1 %1397 }
 0x59f   : > { %2428 = vrcp.f32 %v1398_v14  ;;  %v1413_v24 = vand.u32 2147483648, %v1398_v14  ;;  %vm1407_vm11 = vweird.f32 %v1398_v14  ;;  %v1411_v25 = vand.u32 2147483647, %v1398_v14 }
 0x5a1   : > { %v1414_v32 = vor.u32 1.1754944e-38, %v1413_v24  ;;  %vm1412_vm13 = vcmp.eq.f32.partialorder %v1411_v25, 8.507059e+37 }
 0x5a5   : > { %v2429_v16 = vpop.eup %2428 }
 0x5a6   : > { %v1403_v18 = vmul.f32 %v2429_v16, %v1398_v14  ;;  %v1513_v19 = vpop.xlane.xlu0 %1512  ;;  %vm1408_vm10 = vweird.f32 %v2429_v16  ;;  %v1641_v14 = vand.u32 2147483647, %v3419_v17 }
 0x5a7   : > { %2430 = vrcp.f32 %v1513_v19  ;;  %vm1409_vm12 = vmor %vm1407_vm11, %vm1408_vm10  ;;  %v1528_v53 = vand.u32 2147483648, %v1513_v19  ;;  %vm1522_vm0 = vweird.f32 %v1513_v19  ;;  %v1526_v56 = vand.u32 2147483647, %v1513_v19 }
 0x5a8   : > { %v1404_v20 = vsub.f32 1.0, %v1403_v18  ;;  %2432 = vrcp.f32 %v3419_v17  ;;  %vm1637_vm11 = vweird.f32 %v3419_v17 }
 0x5a9   : > { %v1529_v63 = vor.u32 1.1754944e-38, %v1528_v53  ;;  %vm1527_vm7 = vcmp.eq.f32.partialorder %v1526_v56, 8.507059e+37 }
 0x5aa   : > { %v1405_v21 = vmul.f32 %v2429_v16, %v1404_v20 }
 0x5ac   : > { %v1406_v22 = vadd.f32 %v2429_v16, %v1405_v21 }
 0x5ad   : > { %v2431_v30 = vpop.eup %2430 }
 0x5ae   : > { %v3421_v26 = vpop.xlane.xlu2 %1630  ;;  %v3423_v27 = vpop.xlane.xlu0 %1515  ;;  %v1410_v29 = vsel %vm1409_vm12, %v2429_v16, %v1406_v22  ;;  %v1518_v34 = vmul.f32 %v2431_v30, %v1513_v19  ;;  %vm1523_vm15 = vweird.f32 %v2431_v30  ;;  %v1822_v19 = vld [vmem:[%s3264_s22 + $0x8] sm:$0xff] }
 0x5af   : > { %v1415_v33 = vsel %vm1412_vm13, %v1414_v32, %v1410_v29  ;;  %2434 = vrcp.f32 %v3423_v27  ;;  %v3427_v40 = vpop.eup %2432  ;;  %vm3440_vm1 = vmor %vm1522_vm0, %vm1523_vm15  ;;  %v1543_v16 = vand.u32 2147483648, %v3423_v27  ;;  %vm1537_vm13 = vweird.f32 %v3423_v27 }
 0x5b0   : > { %v1416_v38 = vmul.f32 %v2419_v59, %v1415_v33  ;;  %v1519_v42 = vsub.f32 1.0, %v1518_v34  ;;  %v1633_v44 = vmul.f32 %v3427_v40, %v3419_v17  ;;  %vm1638_vm6 = vweird.f32 %v3427_v40 }
 0x5b1   : > { %vm3460_vm12 = vmor %vm1637_vm11, %vm1638_vm6  ;;  %v1541_v22 = vand.u32 2147483647, %v3423_v27  ;;  %vm1642_vm0 = vcmp.eq.f32.partialorder %v1641_v14, 8.507059e+37  ;;  %v1544_v29 = vor.u32 1.1754944e-38, %v1543_v16  ;;  %v1658_v32 = vand.u32 2147483648, %v3421_v26  ;;  %v1824_v16 = vld [vmem:[%s3264_s22 + $0x18] sm:$0xff] }
 0x5b2   : > { %v1520_v45 = vmul.f32 %v2431_v30, %v1519_v42  ;;  %v1634_v48 = vsub.f32 1.0, %v1633_v44  ;;  %v1656_v34 = vand.u32 2147483647, %v3421_v26  ;;  %v1729_v44 = vld [vmem:[%s3259_s21 + $0x18] sm:$0xff] }
 0x5b3   : > { %1752 = vmatpush.msrb.mxu2 %v1729_v44  ;;  %v1866_v44 = vld [vmem:[%s3269_s27 + $0x30] sm:$0xff] }
 0x5b4   : > { %v1521_v51 = vadd.f32 %v2431_v30, %v1520_v45  ;;  %v1635_v55 = vmul.f32 %v3427_v40, %v1634_v48  ;;  %v1728_v45 = vld [vmem:[%s3259_s21 + $0x10] sm:$0xff] }
 0x5b5   : > { %v3430_v43 = vpop.eup %2434  ;;  %1753 = vmatpush.msrb.mxu2 %v1728_v45 }
 0x5b6   : > { %v1433_v36 = vpop.permute.xlu1 %1432  ;;  %v1663_v37 = vpop.permute.xlu2 %1662  ;;  %v1533_v46 = vmul.f32 %v3430_v43, %v3423_v27  ;;  %v1525_v62 = vsel %vm3440_vm1, %v2431_v30, %v1521_v51  ;;  %v1636_v1 = vadd.f32 %v3427_v40, %v1635_v55  ;;  %vm1538_vm10 = vweird.f32 %v3430_v43 }
 0x5b7   : > { %v1401_v41 = vpop.xlane.xlu0 %1400  ;;  %1456 = vmatpush.msra.mxu3 %v1433_v36  ;;  %v1530_v6 = vsel %vm1527_vm7, %v1529_v63, %v1525_v62  ;;  %vm1539_vm15 = vmor %vm1537_vm13, %vm1538_vm10  ;;  %vm1542_vm1 = vcmp.eq.f32.partialorder %v1541_v22, 8.507059e+37  ;;  %vm1657_vm7 = vcmp.eq.f32.partialorder %v1656_v34, 8.507059e+37 }
 0x5b8   : > { %2436 = vrcp.f32 %v1401_v41  ;;  %2255 = vmatmul.msk.f32.vlgmr.msra.gmra.mxu3 %vm1235_vm14, %v1416_v38  ;;  %v1534_v52 = vsub.f32 1.0, %v1533_v46  ;;  %v1428_v57 = vand.u32 2147483648, %v1401_v41  ;;  %v1426_v60 = vand.u32 2147483647, %v1401_v41  ;;  %v1727_v46 = vld [vmem:[%s3259_s21 + $0x8] sm:$0xff] }
 0x5b9   : > { %1686 = vmatpush.msrb.mxu3 %v1663_v37  ;;  %2438 = vrcp.f32 %v3421_v26  ;;  %vm1422_vm5 = vweird.f32 %v1401_v41  ;;  %v1531_v21 = vmul.f32 %v3400_v3, %v1530_v6  ;;  %v1640_v17 = vsel %vm3460_vm12, %v3427_v40, %v1636_v1  ;;  %1754 = vmatpush.msrb.mxu2 %v1727_v46 }
 0x5ba   : > { %v1535_v61 = vmul.f32 %v3430_v43, %v1534_v52  ;;  %v1429_v2 = vor.u32 1.1754944e-38, %v1428_v57  ;;  %vm1427_vm9 = vcmp.eq.f32.partialorder %v1426_v60, 8.507059e+37  ;;  %v1659_v38 = vor.u32 1.1754944e-38, %v1658_v32 }
 0x5bc   : > { %v1536_v13 = vadd.f32 %v3430_v43, %v1535_v61 }
 0x5be   : > { %v2437_v47 = vpop.eup %2436  ;;  %v1540_v25 = vsel %vm1539_vm15, %v3430_v43, %v1536_v13 }
 0x5bf   : > { %v1418_v49 = vmul.f32 %v2437_v47, %v1401_v41  ;;  %v3437_v50 = vpop.eup %2438  ;;  %vm1423_vm4 = vweird.f32 %v2437_v47  ;;  %v1545_v27 = vsel %vm1542_vm1, %v1544_v29, %v1540_v25  ;;  %v1873_v25 = vld [vmem:[%s3269_s27 + $0x68] sm:$0xff] }
 0x5c0   : > { %v1648_v58 = vmul.f32 %v3437_v50, %v3421_v26  ;;  %vm1424_vm8 = vmor %vm1422_vm5, %vm1423_vm4  ;;  %vm1653_vm4 = vweird.f32 %v3437_v50  ;;  %vm1652_vm5 = vweird.f32 %v3421_v26  ;;  %v1546_v36 = vmul.f32 %v3404_v7, %v1545_v27  ;;  %v1872_v27 = vld [vmem:[%s3269_s27 + $0x60] sm:$0xff] }
 0x5c1   : > { %v1419_v54 = vsub.f32 1.0, %v1418_v49  ;;  %vm1654_vm6 = vmor %vm1652_vm5, %vm1653_vm4 }
 0x5c2   : > { %v1649_v4 = vsub.f32 1.0, %v1648_v58 }
 0x5c3   : > { %v1420_v59 = vmul.f32 %v2437_v47, %v1419_v54 }
 0x5c4   : > { %v1650_v24 = vmul.f32 %v3437_v50, %v1649_v4 }
 0x5c5   : > { %v1421_v0 = vadd.f32 %v2437_v47, %v1420_v59 }
 0x5c6   : > { %v1651_v30 = vadd.f32 %v3437_v50, %v1650_v24  ;;  %v1875_v24 = vld [vmem:[%s3269_s27 + $0x78] sm:$0xff] }
 0x5c7   : > { %v1425_v5 = vsel %vm1424_vm8, %v2437_v47, %v1421_v0  ;;  %v1726_v47 = vld [vmem:[%s3259_s21] sm:$0xff]  ;;  %vm1720_vm8 = vcmask 130048   ;;  %s3672_s21 = scalar_lea.vmem [#allocation10], %s3207_s9  ;;  %1876 = vmatpush.msra.mxu1 %v1875_v24 }
 0x5c8   : > { %v1430_v10 = vsel %vm1427_vm9, %v1429_v2, %v1425_v5  ;;  %v1655_v37 = vsel %vm1654_vm6, %v3437_v50, %v1651_v30  ;;  %1755 = vmatpush.msrb.mxu2 %v1726_v47  ;;  %vm1723_vm9 = vcmask 195584   ;;  %v2395_v59 = vld [vmem:[%s3672_s21] ss:$0 sm:$0xff] }
 0x5c9   : > { %v1431_v18 = vmul.f32 %v3412_v12, %v1430_v10  ;;  %v1548_v20 = vpop.permute.xlu0 %1547  ;;  %v1644_v12 = vor.u32 1.1754944e-38, %v1643_v9  ;;  %v1660_v40 = vsel %vm1657_vm7, %v1659_v38, %v1655_v37  ;;  %v1869_v38 = vld [vmem:[%s3269_s27 + $0x48] sm:$0xff] }
 0x5ca   : > { %1571 = vmatpush.msrb.mxu0 %v1548_v20  ;;  %v1661_v41 = vmul.f32 %v3406_v8, %v1660_v40  ;;  %v1821_v20 = vld [vmem:[%s3264_s22] sm:$0xff] }
 0x5cb   : > { %2256 = vmatmul.msk.f32.gmra.mxu3 %vm1235_vm14, %v1431_v18  ;;  %2260 = vmatmul.msk.f32.vlgmr.msrb.gmra.mxu0 %vm1235_vm14, %v1531_v21  ;;  %v1645_v3 = vsel %vm1642_vm0, %v1644_v12, %v1640_v17  ;;  %v1823_v18 = vld [vmem:[%s3264_s22 + $0x10] sm:$0xff]  ;;  %s3673_s22 = scalar_lea.vmem [#allocation11], %s3207_s9 }
 0x5cc   : > { %v1646_v33 = vmul.f32 %v3395_v35, %v1645_v3  ;;  %1847 = vmatpush.msra.mxu0 %v1824_v16  ;;  %v1874_v12 = vld [vmem:[%s3269_s27 + $0x70] sm:$0xff] }
 0x5cd   : > { %1877 = vmatpush.msra.mxu1 %v1874_v12 }
 0x5ce   : > { %1848 = vmatpush.msra.mxu0 %v1823_v18 }
 0x5cf   : > { %1878 = vmatpush.msra.mxu1 %v1873_v25 }
 0x5d0   : > { %1849 = vmatpush.msra.mxu0 %v1822_v19 }
 0x5d1   : > { %1879 = vmatpush.msra.mxu1 %v1872_v27 }
 0x5d2   : > { %1850 = vmatpush.msra.mxu0 %v1821_v20 }
 0x5d3   : > { %2265 = vmatmul.msk.f32.vlgmr.msrb.gmra.mxu3 %vm1235_vm14, %v1646_v33  ;;  %2261 = vmatmul.msk.f32.gmra.mxu0 %vm1235_vm14, %v1546_v36  ;;  %v1871_v33 = vld [vmem:[%s3269_s27 + $0x58] sm:$0xff]  ;;  %v1870_v36 = vld [vmem:[%s3269_s27 + $0x50] sm:$0xff] }
 0x5d4   : > { %1880 = vmatpush.msra.mxu1 %v1871_v33 }
 0x5d6   : > { %1881 = vmatpush.msra.mxu1 %v1870_v36 }
 0x5d8   : > { %1882 = vmatpush.msra.mxu1 %v1869_v38 }
 0x5db   : > { %2266 = vmatmul.msk.f32.gmra.mxu3 %vm1235_vm14, %v1661_v41  ;;  %v1868_v41 = vld [vmem:[%s3269_s27 + $0x40] sm:$0xff] }
 0x5dc   : > { %1883 = vmatpush.msra.mxu1 %v1868_v41 }
 0x63b   : > { %v1458_v35 = vpop.f32.mrf.mxu3 }
 0x63c   : > { %1696 = vrot.lane.b32.xlu1 %v1458_v35, %s2846_s1 }
 0x648   : > { %v1573_v7 = vpop.f32.mrf.mxu0 }
 0x649   : > { %1704 = vrot.lane.b32.xlu1 %v1573_v7, %s2847_s28 }
 0x64e   : > { %v1461_v26 = vpop.f32.mrf.mxu3 }
 0x64f   : > { %1698 = vrot.lane.b32.xlu0 %v1461_v26, %s2846_s1  ;;  %v1867_v26 = vld [vmem:[%s3269_s27 + $0x38] sm:$0xff] }
 0x650   : > { %v1576_v42 = vpop.f32.mrf.mxu0  ;;  %1884 = vmatpush.msra.mxu1 %v1867_v26 }
 0x651   : > { %1706 = vrot.lane.b32.xlu1 %v1576_v42, %s2847_s28 }
 0x652   : > { %1885 = vmatpush.msra.mxu1 %v1866_v44 }
 0x656   : > { %v1688_v43 = vpop.f32.mrf.mxu3 }
 0x657   : > { %1712 = vrot.lane.b32.xlu2 %v1688_v43, %s2848_s5 }
 0x65e   : > { %v1691_v8 = vpop.f32.mrf.mxu3 }
 0x65f   : > { %1714 = vrot.lane.b32.xlu2 %v1691_v8, %s2848_s5  ;;  %v2396_v8 = vld [vmem:[%s3673_s22] ss:$0 sm:$0xff] }
 0x6ae   : > { %v1697_v48 = vpop.permute.xlu1 %1696 }
 0x6af   : > { %v1718_v50 = vsel %vm1235_vm14, %v3380_v28, %v1697_v48  ;;  %v2397_v48 = vld [vmem:[%s3674_s2] ss:$0 sm:$0xff] }
 0x6b1   : > { %v1713_v49 = vpop.permute.xlu2 %1712 }
 0x6b9   : > { %v1715_v57 = vpop.permute.xlu2 %1714 }
 0x6bb   : > { %v1705_v51 = vpop.permute.xlu1 %1704 }
 0x6bc   : > { %v1721_v52 = vsel %vm1720_vm8, %v1718_v50, %v1705_v51 }
 0x6bd   : > { %v1724_v53 = vsel %vm1723_vm9, %v1721_v52, %v1713_v49  ;;  %v1865_v49 = vld [vmem:[%s3269_s27 + $0x28] sm:$0xff]  ;;  %v1864_v52 = vld [vmem:[%s3269_s27 + $0x20] sm:$0xff] }
 0x6be   : > { %2267 = vmatmul.msk.f32.vlgmr.msrb.gmra.mxu2 %vm1074_vm3, %v1724_v53  ;;  %1886 = vmatpush.msra.mxu1 %v1865_v49 }
 0x6c0   : > { %1887 = vmatpush.msra.mxu1 %v1864_v52 }
 0x6c1   : > { %v1699_v54 = vpop.permute.xlu0 %1698 }
 0x6c2   : > { %v1719_v55 = vsel %vm1235_vm14, %v3383_v31, %v1699_v54 }
 0x6c3   : > { %v1707_v56 = vpop.permute.xlu1 %1706 }
 0x6c4   : > { %v1722_v39 = vsel %vm1720_vm8, %v1719_v55, %v1707_v56  ;;  %v1863_v55 = vld [vmem:[%s3269_s27 + $0x18] sm:$0xff] }
 0x6c5   : > { %v1725_v58 = vsel %vm1723_vm9, %v1722_v39, %v1715_v57  ;;  %1888 = vmatpush.msra.mxu1 %v1863_v55 }
 0x6c6   : > { %2268 = vmatmul.msk.f32.gmra.mxu2 %vm1074_vm3, %v1725_v58 }
 0x741   : > { %v1757_v60 = vpop.f32.mrf.mxu2 }
 0x742   : > { %v1758_v61 = vadd.f32 %v2395_v59, %v1757_v60  ;;  %v1862_v60 = vld [vmem:[%s3269_s27 + $0x10] sm:$0xff] }
 0x743   : > { %1889 = vmatpush.msra.mxu1 %v1862_v60 }
 0x744   : > { %v3499_v28 = vadd.f32 %v1758_v61, %v3296_v15  ;;  %v1861_v61 = vld [vmem:[%s3269_s27 + $0x8] sm:$0xff] }
 0x745   : > { %1890 = vmatpush.msra.mxu1 %v1861_v61 }
 0x746   : > { %v1767_v62 = vsel %vm1074_vm3, %v3499_v28, 0.0 }
 0x747   : > { %1768 = vadd.xlane.f32.xlu0 %v1767_v62  ;;  %v1860_v62 = vld [vmem:[%s3269_s27] sm:$0xff]  ;;  %s3677_s27 = sld [smem:[#allocation27_spill]] }
 0x748   : > { %1891 = vmatpush.msra.mxu1 %v1860_v62 }
 0x749   : > { %v1760_v63 = vpop.f32.mrf.mxu2 }
 0x74a   : > { %v1761_v0 = vadd.f32 %v2395_v59, %v1760_v63  ;;  %v2398_v63 = vld [vmem:[%s3675_s0] ss:$0 sm:$0xff] }
 0x74c   : > { %v3504_v31 = vadd.f32 %v1761_v0, %v3291_v11 }
 0x74d   : > { %p2271_p5 = scmp.ne.s32.totalorder %s3677_s27, 1 }
 0x74e   : > { %v1770_v1 = vsel %vm1078_vm2, %v3504_v31, 0.0  ;;  %s3678_s30 = sld [smem:[#allocation44_spill]] (!%p2271_p5) }
 0x74f   : > { %1771 = vadd.xlane.f32.xlu1 %v1770_v1 }
 0x7ba   : > { %v1769_v2 = vpop.xlane.xlu0 %1768 }
 0x7bb   : > { %v1773_v15 = vmul.f32 %v1769_v2, %v3300_v23 }
 0x7bd   : > { %v1775_v4 = vsub.f32 %v3499_v28, %v1773_v15 }
 0x7bf   : > { %v1777_v5 = vmul.f32 %v1775_v4, %v1775_v4 }
 0x7c1   : > { %v1779_v6 = vsel %vm1074_vm3, %v1777_v5, 0.0 }
 0x7c2   : > { %1780 = vadd.xlane.f32.xlu2 %v1779_v6  ;;  %v1772_v9 = vpop.xlane.xlu1 %1771  ;;  %v2399_v6 = vld [vmem:[%s3676_s17] ss:$0 sm:$0xff] }
 0x7c3   : > { %v1774_v11 = vmul.f32 %v1772_v9, %v3300_v23 }
 0x7c5   : > { %v3513_v10 = vsub.f32 %v3504_v31, %v1774_v11 }
 0x7c7   : > { %v1778_v13 = vmul.f32 %v3513_v10, %v3513_v10 }
 0x7c9   : > { %v1782_v14 = vsel %vm1078_vm2, %v1778_v13, 0.0 }
 0x7ca   : > { %1783 = vadd.xlane.f32.xlu0 %v1782_v14 }
 0x835   : > { %v1781_v21 = vpop.xlane.xlu2 %1780 }
 0x836   : > { %v1785_v22 = vmul.f32 %v1781_v21, %v3300_v23 }
 0x838   : > { %v1787_v17 = vadd.f32 1e-05, %v1785_v22 }
 0x83a   : > { %2440 = vrsqrt.f32 %v1787_v17  ;;  %vm1795_vm10 = vweird.f32 %v1787_v17 }
 0x83d   : > { %v1784_v29 = vpop.xlane.xlu0 %1783 }
 0x83e   : > { %v1786_v3 = vmul.f32 %v1784_v29, %v3300_v23 }
 0x840   : > { %v2441_v30 = vpop.eup %2440  ;;  %v1788_v32 = vadd.f32 1e-05, %v1786_v3 }
 0x841   : > { %v1790_v34 = vmul.f32 %v2441_v30, %v1787_v17  ;;  %vm1796_vm14 = vweird.f32 %v2441_v30 }
 0x842   : > { %2442 = vrsqrt.f32 %v1788_v32  ;;  %vm1797_vm11 = vmor %vm1795_vm10, %vm1796_vm14  ;;  %vm1805_vm13 = vweird.f32 %v1788_v32 }
 0x843   : > { %v1791_v37 = vmul.f32 %v2441_v30, %v1790_v34 }
 0x845   : > { %v1792_v40 = vmul.f32 0.5, %v1791_v37 }
 0x847   : > { %v1793_v35 = vsub.f32 1.5, %v1792_v40 }
 0x848   : > { %v2443_v7 = vpop.eup %2442 }
 0x849   : > { %v1794_v42 = vmul.f32 %v2441_v30, %v1793_v35  ;;  %v1800_v43 = vmul.f32 %v2443_v7, %v1788_v32  ;;  %vm1806_vm12 = vweird.f32 %v2443_v7 }
 0x84a   : > { %vm1807_vm15 = vmor %vm1805_vm13, %vm1806_vm12 }
 0x84b   : > { %v1798_v45 = vsel %vm1797_vm11, %v2441_v30, %v1794_v42  ;;  %v1801_v46 = vmul.f32 %v2443_v7, %v1800_v43 }
 0x84c   : > { %v1809_v47 = vmul.f32 %v1798_v45, %v1775_v4 }
 0x84d   : > { %v1802_v50 = vmul.f32 0.5, %v1801_v46 }
 0x84e   : > { %v1814_v51 = vmul.f32 %v2396_v8, %v1809_v47 }
 0x84f   : > { %v1803_v53 = vsub.f32 1.5, %v1802_v50 }
 0x850   : > { %v1819_v54 = vadd.f32 %v2397_v48, %v1814_v51 }
 0x851   : > { %v1804_v56 = vmul.f32 %v2443_v7, %v1803_v53 }
 0x852   : > { %2269 = vmatmul.msk.f32.vlgmr.msra.gmra.mxu0 %vm1074_vm3, %v1819_v54 }
 0x853   : > { %v1808_v57 = vsel %vm1807_vm15, %v2443_v7, %v1804_v56 }
 0x854   : > { %v1810_v39 = vmul.f32 %v1808_v57, %v3513_v10 }
 0x856   : > { %v1815_v58 = vmul.f32 %v2396_v8, %v1810_v39 }
 0x858   : > { %v1820_v59 = vadd.f32 %v2397_v48, %v1815_v58 }
 0x85a   : > { %2270 = vmatmul.msk.f32.gmra.mxu0 %vm1074_vm3, %v1820_v59 }
 0x8cf   : > { %v1852_v0 = vpop.f32.mrf.mxu0 }
 0x8d0   : > { %v1853_v1 = vadd.f32 %v2398_v63, %v1852_v0 }
 0x8d2   : > { %v1858_v2 = vmax.f32 %v1853_v1, 0.0 }
 0x8d4   : > { %1892 = vmatmul.f32.vlgmr.msra.gmra.mxu1 %v1858_v2 }
 0x8d7   : > { %v1855_v15 = vpop.f32.mrf.mxu0 }
 0x8d8   : > { %v1856_v4 = vadd.f32 %v2398_v63, %v1855_v15 }
 0x8da   : > { %v1859_v5 = vmax.f32 %v1856_v4, 0.0 }
 0x8dc   : > { %1895 = vmatmul.f32.gmra.mxu1 %v1859_v5 }
 0x951   : > { %v1893_v9 = vpop.f32.mrf.mxu1 }
 0x952   : > { %v1899_v11 = vadd.f32 %v1893_v9, %v3499_v28 }
 0x954   : > { %v1905_v10 = vadd.f32 %v2399_v6, %v1899_v11 }
 0x956   : > { %1907 = vst.msk [vmem:[#allocation2] sm:$0xff] %vm1074_vm3, %v1905_v10 }
 0x959   : > { %v1896_v13 = vpop.f32.mrf.mxu1 }
 0x95a   : > { %v1900_v14 = vadd.f32 %v1896_v13, %v3504_v31  ;;  %1912 = sbr.rel (%p2271_p5) target bundleno = 2676 (0xa74), region = 156 }
 0x95c   : > { %v1906_v16 = vadd.f32 %v2399_v6, %v1900_v14 }
 0x95e   : > { %1908 = vst.msk [vmem:[#allocation2 + $0x8] sm:$0xf] %vm1078_vm2, %v1906_v16 }
 0x95f   : > { %v1915_v18 = vsel %vm1074_vm3, %v1905_v10, 0.0  ;;  %v1918_v19 = vsel %vm1078_vm2, %v1906_v16, 0.0  ;;  %v2444_v42 = vld [vmem:[#allocation17] ss:$0 sm:$0xff]  ;;  %v2445_v45 = vld [vmem:[#allocation19] ss:$0 sm:$0xff] }
 0x960   : > { %1916 = vadd.xlane.f32.xlu0 %v1915_v18 }
 0x968   : > { %1919 = vadd.xlane.f32.xlu0 %v1918_v19 }
 0x9d3   : > { %v1917_v20 = vpop.xlane.xlu0 %1916 }
 0x9d4   : > { %v1921_v28 = vmul.f32 %v1917_v20, %v3300_v23 }
 0x9d6   : > { %v1923_v21 = vsub.f32 %v1905_v10, %v1921_v28 }
 0x9d8   : > { %v1925_v22 = vmul.f32 %v1923_v21, %v1923_v21 }
 0x9da   : > { %v1927_v17 = vsel %vm1074_vm3, %v1925_v22, 0.0 }
 0x9db   : > { %1928 = vadd.xlane.f32.xlu1 %v1927_v17  ;;  %v1920_v31 = vpop.xlane.xlu0 %1919 }
 0x9dc   : > { %v1922_v24 = vmul.f32 %v1920_v31, %v3300_v23 }
 0x9de   : > { %v1924_v12 = vsub.f32 %v1906_v16, %v1922_v24 }
 0x9e0   : > { %v1926_v25 = vmul.f32 %v1924_v12, %v1924_v12 }
 0x9e2   : > { %v1930_v29 = vsel %vm1078_vm2, %v1926_v25, 0.0 }
 0x9e3   : > { %1931 = vadd.xlane.f32.xlu1 %v1930_v29 }
 0xa4e   : > { %v1929_v3 = vpop.xlane.xlu1 %1928 }
 0xa4f   : > { %v1933_v27 = vmul.f32 %v1929_v3, %v3300_v23 }
 0xa51   : > { %v1935_v30 = vadd.f32 1e-05, %v1933_v27 }
 0xa53   : > { %2446 = vrsqrt.f32 %v1935_v30  ;;  %vm1943_vm1 = vweird.f32 %v1935_v30 }
 0xa56   : > { %v1932_v32 = vpop.xlane.xlu1 %1931 }
 0xa57   : > { %v1934_v33 = vmul.f32 %v1932_v32, %v3300_v23 }
 0xa59   : > { %v2447_v34 = vpop.eup %2446  ;;  %v1936_v36 = vadd.f32 1e-05, %v1934_v33 }
 0xa5a   : > { %v1938_v37 = vmul.f32 %v2447_v34, %v1935_v30  ;;  %vm1944_vm0 = vweird.f32 %v2447_v34 }
 0xa5b   : > { %2448 = vrsqrt.f32 %v1936_v36  ;;  %vm1945_vm4 = vmor %vm1943_vm1, %vm1944_vm0  ;;  %vm1953_vm6 = vweird.f32 %v1936_v36 }
 0xa5c   : > { %v1939_v38 = vmul.f32 %v2447_v34, %v1938_v37 }
 0xa5e   : > { %v1940_v40 = vmul.f32 0.5, %v1939_v38 }
 0xa60   : > { %v1941_v41 = vsub.f32 1.5, %v1940_v40 }
 0xa61   : > { %v2449_v35 = vpop.eup %2448 }
 0xa62   : > { %v1942_v7 = vmul.f32 %v2447_v34, %v1941_v41  ;;  %v1948_v26 = vmul.f32 %v2449_v35, %v1936_v36  ;;  %vm1954_vm5 = vweird.f32 %v2449_v35 }
 0xa63   : > { %vm1955_vm7 = vmor %vm1953_vm6, %vm1954_vm5 }
 0xa64   : > { %v1946_v43 = vsel %vm1945_vm4, %v2447_v34, %v1942_v7  ;;  %v1949_v8 = vmul.f32 %v2449_v35, %v1948_v26 }
 0xa65   : > { %v1957_v44 = vmul.f32 %v1946_v43, %v1923_v21 }
 0xa66   : > { %v1950_v46 = vmul.f32 0.5, %v1949_v8 }
 0xa67   : > { %v1962_v23 = vmul.f32 %v2444_v42, %v1957_v44 }
 0xa68   : > { %v1951_v47 = vsub.f32 1.5, %v1950_v46 }
 0xa69   : > { %v1967_v48 = vadd.f32 %v2445_v45, %v1962_v23 }
 0xa6a   : > { %v1952_v49 = vmul.f32 %v2449_v35, %v1951_v47 }
 0xa6b   : > { %1969 = vst.msk [vmem:[%s3678_s30] sm:$0xff] %vm1074_vm3, %v1967_v48 }
 0xa6c   : > { %v1956_v50 = vsel %vm1955_vm7, %v2449_v35, %v1952_v49 }
 0xa6d   : > { %v1958_v51 = vmul.f32 %v1956_v50, %v1924_v12 }
 0xa6f   : > { %v1963_v52 = vmul.f32 %v2444_v42, %v1958_v51 }
 0xa71   : > { %v1968_v53 = vadd.f32 %v2445_v45, %v1963_v52 }
 0xa73   : > { %1970 = vst.msk [vmem:[%s3678_s30 + $0x8] sm:$0xf] %vm1078_vm2, %v1968_v53 }
 0xa74 PF: > { %s3679_s27 = sld [smem:[#allocation28_spill]]  ;;  %s3682_s2 = smov %s2826_s25 }
 0xa75   : > { %s3680_s6 = sld [smem:[#allocation26_spill]] }
 0xa76   : > { %s3681_s26 = sld [smem:[#allocation29_spill]] }
 0xa7a   : > { %p44_p8 = scmp.ge.s32.totalorder %s3679_s27, 4  }
 0xa7b   : > { %s3683_s25 = smov %s3680_s6 }
 0xa7c   :  { %46 = sbr.rel (!%p44_p8) target bundleno = 28 (0x1c), region = 267 }
 0xa81   :  { %1982 = vsyncpa [#allocation4], 1 }
 0xa82   :  { %1984 = vsyncpa [#allocation4 + $0x1], 1 }
 0xa83   :  { %1985 = vsyncpa [#allocation6], 1 }
 0xa84   :  { %1987 = vsyncpa [#allocation6 + $0x1], 1 }
 0xa85   :  { %1988 = vsyncpa [#allocation9], 1 }
 0xa86   :  { %1990 = vsyncpa [#allocation9 + $0x1], 1 }
 0xa87   :  { %1991 = vsyncpa [#allocation12], 1 }
 0xa88   :  { %1993 = vsyncpa [#allocation12 + $0x1], 1 }
 0xa89   :  { %1994 = vsyncpa [#allocation15], 1 }
 0xa8a   :  { %1996 = vsyncpa [#allocation15 + $0x1], 1 }
 0xa8b   :  { %1997 = vsyncpa [#allocation18], 1 }

// kernel: forward.8
= control target key start
LH: loop header
LB: loop body
LE: loop exit
PB: predicated region body
PF: predicated region fallthrough
CT: control target
= control target key end

     0   :  { %s2569_s0 = inlined_call_operand.vmem [shape: f32[12,32], index: 0, kind: input, shape index: {}, may-alias: {0,1}]   ;;  %s2570_s1 = inlined_call_operand.vmem [shape: f32[12,32], index: 1, kind: input, shape index: {}, may-alias: {0,1}]   ;;  %s2571_s2 = inlined_call_operand.vmem [shape: f32[12,32], index: 2, kind: input, shape index: {}, may-alias: {2,3}]   ;;  %s2572_s3 = inlined_call_operand.vmem [shape: f32[12,32], index: 3, kind: input, shape index: {}, may-alias: {2,3}]   ;;  %s2573_s4 = inlined_call_operand.vmem [shape: f32[12,12], index: 4, kind: input, shape index: {}]   ;;  %s2574_s5 = inlined_call_operand.vmem [shape: f32[3,1,32], index: 5, kind: input, shape index: {}]   ;;  %s2575_s6 = inlined_call_operand.vmem [shape: f32[3,1,32], index: 6, kind: input, shape index: {}]   ;;  %s2576_s7 = inlined_call_operand.vmem [shape: f32[3,32,32], index: 7, kind: input, shape index: {}]   ;;  %s2577_s8 = inlined_call_operand.vmem [shape: f32[3,1,32], index: 8, kind: input, shape index: {}]   ;;  %s2578_s9 = inlined_call_operand.vmem [shape: f32[3,32,64], index: 9, kind: input, shape index: {}]   ;;  %s2579_s10 = inlined_call_operand.vmem [shape: f32[3,1,64], index: 10, kind: input, shape index: {}]   ;;  %s2580_s11 = inlined_call_operand.vmem [shape: f32[3,32,32], index: 11, kind: input, shape index: {}]   ;;  %s2581_s12 = inlined_call_operand.vmem [shape: f32[3,1,32], index: 12, kind: input, shape index: {}]   ;;  %s2582_s13 = inlined_call_operand.vmem [shape: f32[3,1,32], index: 13, kind: input, shape index: {}]   ;;  %s2583_s14 = inlined_call_operand.vmem [shape: f32[3,1,32], index: 14, kind: input, shape index: {}]   ;;  %s2584_s15 = inlined_call_operand.vmem [shape: f32[3,32,128], index: 15, kind: input, shape index: {}]   ;;  %s2585_s16 = inlined_call_operand.vmem [shape: f32[3,1,128], index: 16, kind: input, shape index: {}]   ;;  %s2586_s17 = inlined_call_operand.vmem [shape: f32[3,128,32], index: 17, kind: input, shape index: {}]   ;;  %s2587_s18 = inlined_call_operand.vmem [shape: f32[3,1,32], index: 18, kind: input, shape index: {}]   ;;  %s2588_s19 = inlined_call_operand.vmem [shape: f32[1,32], index: 19, kind: input, shape index: {}]   ;;  %s2589_s20 = inlined_call_operand.vmem [shape: f32[1,32], index: 20, kind: input, shape index: {}]   ;;  %s2590_s21 = inlined_call_operand.vmem [shape: f32[12,32], index: 21, kind: output, shape index: {}]  }
   0x1   :  { %2596 = sst [smem:[#allocation4_spill]] %s2569_s0 }
   0x2   :  { %2597 = sst [smem:[#allocation5_spill]] %s2571_s2  ;;  %s2197_s2 = smov 0  }
   0x3   :  { %2598 = sst [smem:[#allocation6_spill]] %s2573_s4 }
   0x4   :  { %2599 = sst [smem:[#allocation7_spill]] %s2574_s5 }
   0x5   :  { %2600 = sst [smem:[#allocation8_spill]] %s2576_s7 }
   0x6   :  { %2601 = sst [smem:[#allocation9_spill]] %s2577_s8 }
   0x7   :  { %2602 = sst [smem:[#allocation10_spill]] %s2578_s9 }
   0x8   :  { %2603 = sst [smem:[#allocation11_spill]] %s2580_s11 }
   0x9   :  { %2604 = sst [smem:[#allocation12_spill]] %s2588_s19 }
   0xa   :  { %2605 = sst [smem:[#allocation13_spill]] %s2589_s20 }
   0xb   :  { %2606 = sst [smem:[#allocation14_spill]] %s2590_s21 }
   0xc LB: > { %2607 = sst [smem:[#allocation3_spill]] %s2074_s2  ;;  %s2203_s25 = sadd.s32 4294967295, %s2074_s2   ;;  %s2074_s2 = sphi %s2197_s2, %s31_s2  }
   0xd   : > { %p1930_p0 = scmp.ge.s32.totalorder %s2074_s2, 1  ;;  %p694_p1 = scmp.lt.s32.totalorder %s2074_s2, 4 }
   0xf   : > { %p695_p2 = pnand %p1930_p0, %p694_p1 }
  0x10   : > { %p796_p3 = scmp.lt.s32.totalorder (!%p695_p2), %s2203_s25, 2  ;;  %s2610_s7 = sld [smem:[#allocation8_spill]] (!%p695_p2) }
  0x11   : > { %698 = sbr.rel (%p695_p2) target bundleno = 2225 (0x8b1), region = 104  ;;  %s2611_s9 = sld [smem:[#allocation10_spill]] (!%p695_p2) }
  0x12   : > { %s2612_s11 = sld [smem:[#allocation11_spill]] (!%p695_p2)  ;;  %p1941_p4 = scmp.ne.s32.totalorder (!%p695_p2), %s2203_s25, 0 }
  0x16   : > { %s2209_s26 = scalar_select %p796_p3, %s2203_s25, 2 }
  0x17   : > { %s2613_s2 = sld [smem:[#allocation4_spill]] (!%p1941_p4) }
  0x18   : > { %s1981_s5 = sshll.u32 %s2209_s26, 5  ;;  %s847_s21 = scalar_lea.vmem %s2587_s18, %s2209_s26 }
  0x19   : > { %s2227_s3 = scalar_lea.vmem %s2610_s7, %s1981_s5  ;;  %s2232_s20 = scalar_lea.vmem %s2611_s9, %s1981_s5 }
  0x1a   : > { %s2241_s19 = scalar_lea.vmem %s2612_s11, %s1981_s5  ;;  %s2258_s28 = scalar_lea.vmem %s2584_s15, %s1981_s5 }
  0x1b   : > { %s1985_s11 = sshll.u32 %s2209_s26, 7  ;;  %851 = sbr.rel (%p1941_p4) target bundleno = 39 (0x27), region = 108 }
  0x1c   : > { %s2268_s24 = scalar_lea.vmem %s2586_s17, %s1985_s11  ;;  %s2615_s4 = sld [smem:[#allocation5_spill]] (!%p1941_p4) }
  0x1d   : > { %s2614_s29 = smov (!%p1941_p4), %s2613_s2 }
  0x20   : > { %v852_v0 = vld [vmem:[%s2613_s2] sm:$0xff]  ;;  %v853_v2 = vld [vmem:[%s2614_s29 + $0x8] sm:$0xf]  ;;  %vm860_vm0 = vcmask 261120   ;;  %vm862_vm1 = vcmask 257024  }
  0x21   : > { %v854_v3 = vmul.f32 5.656854, %v852_v0  ;;  %v855_v4 = vmul.f32 5.656854, %v853_v2 }
  0x22   : > { %v856_v1 = vld [vmem:[%s2615_s4] sm:$0xff]  ;;  %v857_v5 = vld [vmem:[%s2615_s4 + $0x8] sm:$0xf] }
  0x23   : > { %v858_v6 = vadd.f32 %v856_v1, %v854_v3  ;;  %v859_v7 = vadd.f32 %v857_v5, %v855_v4 }
  0x25   : > { %861 = vst.msk [vmem:[#allocation2] sm:$0xff] %vm860_vm0, %v858_v6 }
  0x26   : > { %863 = vst.msk [vmem:[#allocation2 + $0x8] sm:$0xf] %vm862_vm1, %v859_v7 }
  0x27 PF: > { %vm872_vm2 = vcmask 257024   ;;  %vm868_vm3 = vcmask 261120   ;;  %v2076_v12 = vmov 32.0   ;;  %v934_v29 = vld [vmem:[%s2227_s3 + $0x18] sm:$0xff]  ;;  %v933_v30 = vld [vmem:[%s2227_s3 + $0x10] sm:$0xff]  ;;  %v932_v31 = vld [vmem:[%s2227_s3 + $0x8] sm:$0xff]  ;;  %s2618_s1 = scalar_lea.vmem %s2575_s6, %s2209_s26  ;;  %s2621_s7 = scalar_lea.vmem %s2579_s10, %s2209_s26 }
  0x28   : > { %2020 = vrcp.f32 %v2076_v12  ;;  %1986 = vmatpush.msra.mxu1 %v934_v29  ;;  %957 = vmatpush.msra.mxu0 %v934_v29  ;;  %v931_v32 = vld [vmem:[%s2227_s3] sm:$0xff]  ;;  %v971_v33 = vld [vmem:[%s2232_s20 + $0x18] sm:$0xff]  ;;  %v970_v34 = vld [vmem:[%s2232_s20 + $0x10] sm:$0xff]  ;;  %s2619_s5 = sld [smem:[#allocation9_spill]]  ;;  %s2077_s30 = smov 120   ;;  %vm1001_vm11 = vcmask 64512  }
  0x29   : > { %v969_v35 = vld [vmem:[%s2232_s20 + $0x8] sm:$0xff]  ;;  %v968_v38 = vld [vmem:[%s2232_s20] sm:$0xff]  ;;  %s2616_s20 = sld [smem:[#allocation7_spill]]  ;;  %s2078_s9 = smov 104   ;;  %vm1098_vm12 = vcmask 1043456   ;;  %vm1037_vm13 = vcmask 97280  }
  0x2a   : > { %1987 = vmatpush.msra.mxu1 %v933_v30  ;;  %958 = vmatpush.msra.mxu0 %v933_v30  ;;  %v2012_v55 = vld [vmem:[%s2618_s1] ss:$0 sm:$0xff]  ;;  %s2622_s1 = sld [smem:[#allocation6_spill]]  ;;  %vm1041_vm14 = vcmask 93184   ;;  %s2084_s11 = smov 8  }
  0x2b   : > { %v2014_v4 = vld [vmem:[%s2621_s7] ss:$0 sm:$0xff]  ;;  %s2085_s22 = smov 16   ;;  %s2086_s7 = smov 24  }
  0x2c   : > { %v2291_v10 = vld [vmem:[#allocation2] sm:$0xff]  ;;  %1988 = vmatpush.msra.mxu1 %v932_v31  ;;  %959 = vmatpush.msra.mxu0 %v932_v31  ;;  %s2624_s0 = scalar_lea.vmem %s2582_s13, %s2209_s26  ;;  %s2625_s8 = scalar_lea.vmem %s2583_s14, %s2209_s26 }
  0x2d   : > { %v2287_v8 = vld [vmem:[#allocation2 + $0x8] sm:$0xf]  ;;  %v869_v11 = vsel %vm868_vm3, %v2291_v10, 0.0  ;;  %p1978_p5 = scmp.ne.s32.totalorder %s2203_s25, 2 }
  0x2e   : > { %v873_v9 = vsel %vm872_vm2, %v2287_v8, 0.0  ;;  %v2021_v13 = vpop.eup %2020  ;;  %1989 = vmatpush.msra.mxu1 %v931_v32  ;;  %960 = vmatpush.msra.mxu0 %v931_v32  ;;  %s2620_s2 = scalar_lea.vmem %s2619_s5, %s2209_s26  ;;  %s2081_s5 = smov 88  }
  0x2f   : > { %874 = vadd.xlane.f32.xlu0 %v873_v9  ;;  %v877_v14 = vmul.f32 32.0, %v2021_v13  ;;  %vm881_vm4 = vweird.f32 %v2021_v13  ;;  %s2617_s3 = scalar_lea.vmem %s2616_s20, %s2209_s26  ;;  %v2013_v1 = vld [vmem:[%s2620_s2] ss:$0 sm:$0xff]  ;;  %s2079_s20 = smov 112  }
  0x30   : > { %988 = vmatpush.msrb.mxu1 %v971_v33  ;;  %v2011_v51 = vld [vmem:[%s2617_s3] ss:$0 sm:$0xff]  ;;  %s2080_s3 = smov 96   ;;  %v1000_v31 = vld [vmem:[%s2622_s1 + $0x8] sm:$0xf]  ;;  %s2082_s2 = smov 72  }
  0x31   : > { %v878_v15 = vsub.f32 1.0, %v877_v14 }
  0x32   : > { %989 = vmatpush.msrb.mxu1 %v970_v34 }
  0x33   : > { %v879_v16 = vmul.f32 %v2021_v13, %v878_v15 }
  0x34   : > { %990 = vmatpush.msrb.mxu1 %v969_v35 }
  0x35   : > { %v880_v17 = vadd.f32 %v2021_v13, %v879_v16 }
  0x36   : > { %991 = vmatpush.msrb.mxu1 %v968_v38 }
  0x37   : > { %870 = vadd.xlane.f32.xlu0 %v869_v11  ;;  %v2295_v18 = vsel %vm881_vm4, %v2021_v13, %v880_v17 }
  0xa2   : > { %v875_v19 = vpop.xlane.xlu0 %874 }
  0xa3   : > { %v884_v20 = vmul.f32 %v2295_v18, %v875_v19 }
  0xa5   : > { %v886_v21 = vsub.f32 %v2287_v8, %v884_v20 }
  0xa7   : > { %v888_v22 = vmul.f32 %v886_v21, %v886_v21 }
  0xa9   : > { %v892_v23 = vsel %vm872_vm2, %v888_v22, 0.0 }
  0xaa   : > { %893 = vadd.xlane.f32.xlu1 %v892_v23  ;;  %v871_v24 = vpop.xlane.xlu0 %870 }
  0xab   : > { %v883_v25 = vmul.f32 %v2295_v18, %v871_v24 }
  0xad   : > { %v885_v26 = vsub.f32 %v2291_v10, %v883_v25 }
  0xaf   : > { %v887_v27 = vmul.f32 %v885_v26, %v885_v26 }
  0xb1   : > { %v889_v28 = vsel %vm868_vm3, %v887_v27, 0.0 }
  0xb2   : > { %890 = vadd.xlane.f32.xlu1 %v889_v28 }
 0x11d   : > { %v894_v36 = vpop.xlane.xlu1 %893 }
 0x11e   : > { %v896_v37 = vmul.f32 %v894_v36, %v2295_v18 }
 0x120   : > { %v898_v39 = vadd.f32 1e-05, %v896_v37 }
 0x122   : > { %2022 = vrsqrt.f32 %v898_v39  ;;  %vm915_vm6 = vweird.f32 %v898_v39 }
 0x125   : > { %v891_v40 = vpop.xlane.xlu1 %890 }
 0x126   : > { %v895_v41 = vmul.f32 %v891_v40, %v2295_v18 }
 0x128   : > { %v2023_v42 = vpop.eup %2022  ;;  %v897_v43 = vadd.f32 1e-05, %v895_v41 }
 0x129   : > { %v910_v44 = vmul.f32 %v2023_v42, %v898_v39  ;;  %vm916_vm5 = vweird.f32 %v2023_v42 }
 0x12a   : > { %2024 = vrsqrt.f32 %v897_v43  ;;  %vm917_vm7 = vmor %vm915_vm6, %vm916_vm5  ;;  %vm905_vm9 = vweird.f32 %v897_v43 }
 0x12b   : > { %v911_v45 = vmul.f32 %v2023_v42, %v910_v44 }
 0x12d   : > { %v912_v46 = vmul.f32 0.5, %v911_v45 }
 0x12f   : > { %v913_v47 = vsub.f32 1.5, %v912_v46 }
 0x130   : > { %v2025_v48 = vpop.eup %2024 }
 0x131   : > { %v914_v49 = vmul.f32 %v2023_v42, %v913_v47  ;;  %v900_v50 = vmul.f32 %v2025_v48, %v897_v43  ;;  %vm906_vm8 = vweird.f32 %v2025_v48 }
 0x132   : > { %vm907_vm10 = vmor %vm905_vm9, %vm906_vm8 }
 0x133   : > { %v918_v52 = vsel %vm917_vm7, %v2023_v42, %v914_v49  ;;  %v901_v53 = vmul.f32 %v2025_v48, %v900_v50 }
 0x134   : > { %v920_v54 = vmul.f32 %v918_v52, %v886_v21 }
 0x135   : > { %v902_v56 = vmul.f32 0.5, %v901_v53 }
 0x136   : > { %v925_v57 = vmul.f32 %v2011_v51, %v920_v54 }
 0x137   : > { %v903_v58 = vsub.f32 1.5, %v902_v56 }
 0x138   : > { %v930_v59 = vadd.f32 %v2012_v55, %v925_v57 }
 0x139   : > { %v904_v60 = vmul.f32 %v2025_v48, %v903_v58 }
 0x13a   : > { %1943 = vmatmul.msk.f32.vlgmr.msra.gmra.mxu1 %vm868_vm3, %v930_v59 }
 0x13b   : > { %v908_v61 = vsel %vm907_vm10, %v2025_v48, %v904_v60 }
 0x13c   : > { %v919_v62 = vmul.f32 %v908_v61, %v885_v26  ;;  %v999_v26 = vld [vmem:[%s2622_s1] sm:$0xff] }
 0x13e   : > { %v924_v63 = vmul.f32 %v2011_v51, %v919_v62 }
 0x140   : > { %v929_v0 = vadd.f32 %v2012_v55, %v924_v63 }
 0x142   : > { %1942 = vmatmul.msk.f32.vlgmr.msra.gmra.mxu0 %vm868_vm3, %v929_v0  ;;  %1944 = vmatmul.msk.f32.vlgmr.msrb.gmra.mxu1 %vm868_vm3, %v929_v0 }
 0x14a   : > { %1945 = vmatmul.msk.f32.gmra.mxu1 %vm868_vm3, %v930_v59 }
 0x1b7   : > { %v965_v2 = vpop.f32.mrf.mxu1 }
 0x1b8   : > { %v966_v3 = vadd.f32 %v2013_v1, %v965_v2 }
 0x1ba   : > { %1126 = vrot.lane.b32.xlu1 %v966_v3, %s2077_s30 }
 0x1bf   : > { %v962_v5 = vpop.f32.mrf.mxu0  ;;  %v993_v6 = vpop.f32.mrf.mxu1 }
 0x1c0   : > { %v963_v7 = vadd.f32 %v2013_v1, %v962_v5  ;;  %v2337_v9 = vadd.f32 %v2014_v4, %v993_v6 }
 0x1c2   : > { %1128 = vrot.lane.b32.xlu2 %v2337_v9, %s2077_s30  ;;  %1370 = vrot.lane.b32.xlu1 %v963_v7, %s2078_s9 }
 0x1c3   : > { %1124 = vrot.lane.b32.xlu0 %v963_v7, %s2077_s30 }
 0x1c7   : > { %v996_v11 = vpop.f32.mrf.mxu1 }
 0x1c8   : > { %v2340_v12 = vadd.f32 %v2014_v4, %v996_v11 }
 0x1ca   : > { %1946 = vmatpush.xpose.msk.msra.mxu2 %vm1001_vm11, %v2340_v12  ;;  %1251 = vrot.lane.b32.xlu2 %v2337_v9, %s2079_s20 }
 0x1cb   : > { %1374 = vrot.lane.b32.xlu0 %v2337_v9, %s2078_s9 }
 0x1ce   : > { %1947 = vmatpush.xpose.msk.msra.mxu2 %vm1001_vm11, %v2337_v9 }
 0x1d1   : > { %1948 = vmatmul.msk.f32.vlgmr.msra.gmra.mxu2 %vm1001_vm11, %v963_v7 }
 0x1d2   : > { %1130 = vrot.lane.b32.xlu2 %v2340_v12, %s2077_s30  ;;  %s2083_s30 = smov 80  }
 0x1d3   : > { %1249 = vrot.lane.b32.xlu0 %v966_v3, %s2079_s20 }
 0x1d9   : > { %1949 = vmatmul.msk.f32.gmra.mxu2 %vm1001_vm11, %v966_v3 }
 0x1da   : > { %1253 = vrot.lane.b32.xlu2 %v2340_v12, %s2079_s20 }
 0x1e2   : > { %1376 = vrot.lane.b32.xlu2 %v2340_v12, %s2078_s9 }
 0x1ea   : > { %1247 = vrot.lane.b32.xlu2 %v963_v7, %s2079_s20  ;;  %s2623_s20 = scalar_lea.vmem %s2581_s12, %s2209_s26 }
 0x1f2   : > { %1372 = vrot.lane.b32.xlu2 %v966_v3, %s2078_s9 }
 0x1fa   : > { %1089 = vrot.lane.b32.xlu2 %v2340_v12, %s2080_s3 }
 0x21c   : > { %v1129_v13 = vpop.permute.xlu2 %1128 }
 0x224   : > { %v1252_v14 = vpop.permute.xlu2 %1251 }
 0x22c   : > { %v1131_v15 = vpop.permute.xlu2 %1130  ;;  %v1127_v16 = vpop.permute.xlu1 %1126 }
 0x22d   : > { %1953 = vmatpush.xpose.msk.msrb.mxu2 %vm1001_vm11, %v1131_v15  ;;  %1990 = vmatpush.xpose.msk.msra.mxu3 %vm1001_vm11, %v1131_v15 }
 0x231   : > { %1954 = vmatpush.xpose.msk.msrb.mxu2 %vm1001_vm11, %v1129_v13  ;;  %1991 = vmatpush.xpose.msk.msra.mxu3 %vm1001_vm11, %v1129_v13 }
 0x234   : > { %v1254_v17 = vpop.permute.xlu2 %1253  ;;  %1956 = vmatmul.msk.f32.vlgmr.msra.gmra.mxu3 %vm1001_vm11, %v1127_v16  ;;  %v1371_v22 = vpop.permute.xlu1 %1370 }
 0x235   : > { %v1125_v19 = vpop.permute.xlu0 %1124  ;;  %1960 = vmatpush.xpose.msk.msra.mxu1 %vm1001_vm11, %v1254_v17 }
 0x236   : > { %1955 = vmatmul.msk.f32.vlgmr.msrb.gmra.mxu2 %vm1001_vm11, %v1125_v19 }
 0x239   : > { %1961 = vmatpush.xpose.msk.msra.mxu1 %vm1001_vm11, %v1252_v14 }
 0x23c   : > { %v1377_v20 = vpop.permute.xlu2 %1376 }
 0x23d   : > { %1967 = vmatpush.xpose.msk.msrb.mxu3 %vm1001_vm11, %v1377_v20  ;;  %v1375_v21 = vpop.permute.xlu0 %1374 }
 0x241   : > { %1968 = vmatpush.xpose.msk.msrb.mxu3 %vm1001_vm11, %v1375_v21 }
 0x244   : > { %v1248_v23 = vpop.permute.xlu2 %1247  ;;  %1969 = vmatmul.msk.f32.vlgmr.msrb.gmra.mxu3 %vm1001_vm11, %v1371_v22 }
 0x245   : > { %1962 = vmatmul.msk.f32.vlgmr.msra.gmra.mxu1 %vm1001_vm11, %v1248_v23  ;;  %v1250_v24 = vpop.permute.xlu0 %1249 }
 0x24c   : > { %v1373_v25 = vpop.permute.xlu2 %1372 }
 0x24d   : > { %1963 = vmatmul.msk.f32.gmra.mxu1 %vm1001_vm11, %v1250_v24  ;;  %1970 = vmatmul.msk.f32.gmra.mxu3 %vm1001_vm11, %v1373_v25 }
 0x254   : > { %v1090_v27 = vpop.permute.xlu2 %1089  ;;  %v1031_v28 = vpop.f32.mrf.mxu2 }
 0x255   : > { %v1032_v29 = vadd.f32 %v1031_v28, %v999_v26  ;;  %1950 = vmatpush.msk.msrb.mxu0 %vm1098_vm12, %v1090_v27 }
 0x257   : > { %v1038_v30 = vsel %vm1037_vm13, %v1032_v29, -inf }
 0x258   : > { %1039 = vmax.xlane.f32.xlu1 %v1038_v30 }
 0x25c   : > { %v1034_v32 = vpop.f32.mrf.mxu2 }
 0x25d   : > { %v1035_v33 = vadd.f32 %v1034_v32, %v1000_v31 }
 0x25f   : > { %v1042_v34 = vsel %vm1041_vm14, %v1035_v33, -inf }
 0x260   : > { %1043 = vmax.xlane.f32.xlu0 %v1042_v34 }
 0x2b7   : > { %v1160_v35 = vpop.f32.mrf.mxu3 }
 0x2b8   : > { %v1161_v36 = vadd.f32 %v1160_v35, %v1000_v31 }
 0x2b9   : > { %v1157_v37 = vpop.f32.mrf.mxu2 }
 0x2ba   : > { %v1158_v38 = vadd.f32 %v1157_v37, %v999_v26  ;;  %v1166_v39 = vsel %vm1041_vm14, %v1161_v36, -inf }
 0x2bb   : > { %1167 = vmax.xlane.f32.xlu1 %v1166_v39 }
 0x2bc   : > { %v1163_v40 = vsel %vm1037_vm13, %v1158_v38, -inf }
 0x2bd   : > { %1164 = vmax.xlane.f32.xlu2 %v1163_v40 }
 0x2c2   : > { %v1280_v41 = vpop.f32.mrf.mxu1 }
 0x2c3   : > { %v1281_v42 = vadd.f32 %v1280_v41, %v999_v26 }
 0x2c5   : > { %v1286_v43 = vsel %vm1037_vm13, %v1281_v42, -inf }
 0x2c6   : > { %1287 = vmax.xlane.f32.xlu0 %v1286_v43 }
 0x2c7   : > { %v1403_v44 = vpop.f32.mrf.mxu3 }
 0x2c8   : > { %v1404_v45 = vadd.f32 %v1403_v44, %v999_v26 }
 0x2ca   : > { %v1283_v46 = vpop.f32.mrf.mxu1  ;;  %v1409_v47 = vsel %vm1037_vm13, %v1404_v45, -inf }
 0x2cb   : > { %v1284_v48 = vadd.f32 %v1283_v46, %v1000_v31  ;;  %1410 = vmax.xlane.f32.xlu2 %v1409_v47  ;;  %v1040_v49 = vpop.xlane.xlu1 %1039 }
 0x2cc   : > { %v1045_v50 = vsub.f32 %v1032_v29, %v1040_v49 }
 0x2cd   : > { %v1289_v51 = vsel %vm1041_vm14, %v1284_v48, -inf }
 0x2ce   : > { %v1047_v52 = vmul.f32 1.442695, %v1045_v50  ;;  %1290 = vmax.xlane.f32.xlu1 %v1289_v51 }
 0x2d0   : > { %2026 = vpow2.f32 %v1047_v52  ;;  %v1406_v55 = vpop.f32.mrf.mxu3 }
 0x2d1   : > { %v2391_v57 = vadd.f32 %v1406_v55, %v1000_v31 }
 0x2d3   : > { %v1044_v56 = vpop.xlane.xlu0 %1043  ;;  %v1412_v60 = vsel %vm1041_vm14, %v2391_v57, -inf }
 0x2d4   : > { %v1046_v58 = vsub.f32 %v1035_v33, %v1044_v56 }
 0x2d6   : > { %v2383_v53 = vpop.eup %2026  ;;  %v1049_v59 = vmul.f32 1.442695, %v1046_v58 }
 0x2d7   : > { %v1051_v54 = vsel %vm1037_vm13, %v2383_v53, 0.0 }
 0x2d8   : > { %1052 = vadd.xlane.f32.xlu2 %v1051_v54  ;;  %2028 = vpow2.f32 %v1049_v59 }
 0x2da   : > { %1211 = vrot.lane.b32.xlu0 %v2337_v9, %s2081_s5 }
 0x2de   : > { %v2395_v61 = vpop.eup %2028 }
 0x2df   : > { %v1054_v62 = vsel %vm1041_vm14, %v2395_v61, 0.0 }
 0x2e7   : > { %1087 = vrot.lane.b32.xlu1 %v2337_v9, %s2080_s3 }
 0x2f0   : > { %1213 = vrot.lane.b32.xlu2 %v2340_v12, %s2081_s5 }
 0x304   : > { %1413 = vmax.xlane.f32.xlu0 %v1412_v60 }
 0x311   : > { %1055 = vadd.xlane.f32.xlu1 %v1054_v62 }
 0x32e   : > { %v1168_v63 = vpop.xlane.xlu1 %1167 }
 0x32f   : > { %v1170_v11 = vsub.f32 %v1161_v36, %v1168_v63 }
 0x330   : > { %v1165_v0 = vpop.xlane.xlu2 %1164 }
 0x331   : > { %v1169_v3 = vsub.f32 %v1158_v38, %v1165_v0  ;;  %v1173_v17 = vmul.f32 1.442695, %v1170_v11 }
 0x333   : > { %v1171_v5 = vmul.f32 1.442695, %v1169_v3 }
 0x339   : > { %v1288_v1 = vpop.xlane.xlu0 %1287 }
 0x33a   : > { %v1292_v2 = vsub.f32 %v1281_v42, %v1288_v1 }
 0x33c   : > { %v1294_v4 = vmul.f32 1.442695, %v1292_v2 }
 0x33e   : > { %2030 = vpow2.f32 %v1294_v4  ;;  %v1411_v13 = vpop.xlane.xlu2 %1410 }
 0x33f   : > { %2032 = vpow2.f32 %v1171_v5  ;;  %v1415_v22 = vsub.f32 %v1404_v45, %v1411_v13 }
 0x341   : > { %v1291_v6 = vpop.xlane.xlu1 %1290  ;;  %v1417_v25 = vmul.f32 1.442695, %v1415_v22 }
 0x342   : > { %v1293_v7 = vsub.f32 %v1284_v48, %v1291_v6 }
 0x344   : > { %v2399_v14 = vpop.eup %2030  ;;  %v1296_v15 = vmul.f32 1.442695, %v1293_v7 }
 0x345   : > { %v1298_v16 = vsel %vm1037_vm13, %v2399_v14, 0.0  ;;  %v2403_v19 = vpop.eup %2032 }
 0x346   : > { %2034 = vpow2.f32 %v1296_v15  ;;  %1299 = vadd.xlane.f32.xlu0 %v1298_v16  ;;  %v1175_v23 = vsel %vm1037_vm13, %v2403_v19, 0.0 }
 0x347   : > { %2036 = vpow2.f32 %v1173_v17 }
 0x34b   : > { %v1053_v20 = vpop.xlane.xlu2 %1052 }
 0x34c   : > { %v2405_v21 = vpop.eup %2034  ;;  %2038 = vrcp.f32 %v1053_v20  ;;  %v1068_v31 = vand.u32 2147483648, %v1053_v20  ;;  %v1066_v33 = vand.u32 2147483647, %v1053_v20  ;;  %vm1062_vm0 = vweird.f32 %v1053_v20  ;;  %v1212_v40 = vpop.permute.xlu0 %1211 }
 0x34d   : > { %v1301_v24 = vsel %vm1041_vm14, %v2405_v21, 0.0  ;;  %v2411_v26 = vpop.eup %2036  ;;  %2040 = vpow2.f32 %v1417_v25 }
 0x34e   : > { %1176 = vadd.xlane.f32.xlu0 %v1175_v23  ;;  %1302 = vadd.xlane.f32.xlu1 %v1301_v24  ;;  %v1178_v30 = vsel %vm1041_vm14, %v2411_v26, 0.0  ;;  %v1069_v37 = vor.u32 1.1754944e-38, %v1068_v31  ;;  %vm1067_vm4 = vcmp.eq.f32.partialorder %v1066_v33, 8.507059e+37 }
 0x352   : > { %v2039_v27 = vpop.eup %2038 }
 0x353   : > { %v1058_v28 = vmul.f32 %v2039_v27, %v1053_v20  ;;  %vm1063_vm15 = vweird.f32 %v2039_v27  ;;  %v2415_v36 = vpop.eup %2040  ;;  %v1214_v38 = vpop.permute.xlu2 %1213 }
 0x354   : > { %vm1064_vm1 = vmor %vm1062_vm0, %vm1063_vm15  ;;  %v1421_v42 = vsel %vm1037_vm13, %v2415_v36, 0.0 }
 0x355   : > { %v1059_v29 = vsub.f32 1.0, %v1058_v28 }
 0x356   : > { %1179 = vadd.xlane.f32.xlu0 %v1178_v30 }
 0x357   : > { %v1060_v32 = vmul.f32 %v2039_v27, %v1059_v29 }
 0x359   : > { %v1061_v34 = vadd.f32 %v2039_v27, %v1060_v32  ;;  %v1088_v35 = vpop.permute.xlu1 %1087 }
 0x35a   : > { %1116 = vmatpush.msrb.mxu0 %v1088_v35 }
 0x35b   : > { %v1065_v39 = vsel %vm1064_vm1, %v2039_v27, %v1061_v34 }
 0x35c   : > { %1957 = vmatpush.msk.msra.mxu0 %vm1098_vm12, %v1214_v38  ;;  %v1070_v41 = vsel %vm1067_vm4, %v1069_v37, %v1065_v39 }
 0x35d   : > { %v1071_v43 = vmul.f32 %v2383_v53, %v1070_v41 }
 0x35e   : > { %1239 = vmatpush.msra.mxu0 %v1212_v40  ;;  %1422 = vadd.xlane.f32.xlu0 %v1421_v42 }
 0x35f   : > { %1951 = vmatmul.msk.f32.vlgmr.msrb.gmra.mxu0 %vm1037_vm13, %v1071_v43 }
 0x367   : > { %1457 = vrot.lane.b32.xlu1 %v2337_v9, %s2082_s2 }
 0x372   : > { %1336 = vrot.lane.b32.xlu0 %v2340_v12, %s2083_s30 }
 0x377   : > { %v1414_v44 = vpop.xlane.xlu0 %1413 }
 0x378   : > { %v1416_v45 = vsub.f32 %v2391_v57, %v1414_v44 }
 0x37a   : > { %v1419_v46 = vmul.f32 1.442695, %v1416_v45  ;;  %1334 = vrot.lane.b32.xlu0 %v2337_v9, %s2083_s30  ;;  %s2626_s30 = scalar_lea.vmem %s2585_s16, %s2209_s26 }
 0x37c   : > { %2042 = vpow2.f32 %v1419_v46 }
 0x382   : > { %v2426_v47 = vpop.eup %2042  ;;  %1459 = vrot.lane.b32.xlu0 %v2340_v12, %s2082_s2 }
 0x383   : > { %v1424_v48 = vsel %vm1041_vm14, %v2426_v47, 0.0 }
 0x384   : > { %1425 = vadd.xlane.f32.xlu2 %v1424_v48  ;;  %v1056_v49 = vpop.xlane.xlu1 %1055 }
 0x385   : > { %2044 = vrcp.f32 %v1056_v49  ;;  %v1083_v53 = vand.u32 2147483648, %v1056_v49  ;;  %v1081_v55 = vand.u32 2147483647, %v1056_v49  ;;  %vm1077_vm6 = vweird.f32 %v1056_v49 }
 0x387   : > { %v1084_v56 = vor.u32 1.1754944e-38, %v1083_v53  ;;  %vm1082_vm8 = vcmp.eq.f32.partialorder %v1081_v55, 8.507059e+37 }
 0x38b   : > { %v2045_v50 = vpop.eup %2044 }
 0x38c   : > { %v1073_v51 = vmul.f32 %v2045_v50, %v1056_v49  ;;  %vm1078_vm5 = vweird.f32 %v2045_v50 }
 0x38d   : > { %vm1079_vm7 = vmor %vm1077_vm6, %vm1078_vm5 }
 0x38e   : > { %v1074_v52 = vsub.f32 1.0, %v1073_v51 }
 0x390   : > { %v1075_v54 = vmul.f32 %v2045_v50, %v1074_v52 }
 0x392   : > { %v1076_v9 = vadd.f32 %v2045_v50, %v1075_v54 }
 0x394   : > { %v1080_v57 = vsel %vm1079_vm7, %v2045_v50, %v1076_v9 }
 0x395   : > { %v1085_v12 = vsel %vm1082_vm8, %v1084_v56, %v1080_v57 }
 0x396   : > { %v1086_v58 = vmul.f32 %v2395_v61, %v1085_v12 }
 0x398   : > { %1952 = vmatmul.msk.f32.gmra.mxu0 %vm1037_vm13, %v1086_v58 }
 0x3b9   : > { %v2433_v59 = vpop.xlane.xlu0 %1299 }
 0x3ba   : > { %v1315_v41 = vand.u32 2147483648, %v2433_v59  ;;  %vm1309_vm7 = vweird.f32 %v2433_v59  ;;  %v1313_v42 = vand.u32 2147483647, %v2433_v59 }
 0x3bc   : > { %v1316_v46 = vor.u32 1.1754944e-38, %v1315_v41 }
 0x3c1   : > { %v1177_v60 = vpop.xlane.xlu0 %1176  ;;  %v2436_v15 = vpop.xlane.xlu1 %1302 }
 0x3c2   : > { %2046 = vrcp.f32 %v1177_v60  ;;  %v1192_v2 = vand.u32 2147483648, %v1177_v60  ;;  %v1190_v4 = vand.u32 2147483647, %v1177_v60  ;;  %vm1186_vm10 = vweird.f32 %v1177_v60 }
 0x3c3   : > { %v1330_v51 = vand.u32 2147483648, %v2436_v15  ;;  %v1328_v55 = vand.u32 2147483647, %v2436_v15 }
 0x3c4   : > { %v1193_v6 = vor.u32 1.1754944e-38, %v1192_v2  ;;  %vm1191_vm15 = vcmp.eq.f32.partialorder %v1190_v4, 8.507059e+37 }
 0x3c5   : > { %v1331_v12 = vor.u32 1.1754944e-38, %v1330_v51 }
 0x3c8   : > { %v2047_v62 = vpop.eup %2046 }
 0x3c9   : > { %v1182_v63 = vmul.f32 %v2047_v62, %v1177_v60  ;;  %v1180_v0 = vpop.xlane.xlu0 %1179  ;;  %vm1187_vm9 = vweird.f32 %v2047_v62 }
 0x3ca   : > { %2048 = vrcp.f32 %v1180_v0  ;;  %vm1188_vm14 = vmor %vm1186_vm10, %vm1187_vm9  ;;  %v1207_v22 = vand.u32 2147483648, %v1180_v0  ;;  %v1205_v25 = vand.u32 2147483647, %v1180_v0  ;;  %vm1201_vm1 = vweird.f32 %v1180_v0 }
 0x3cb   : > { %v1183_v1 = vsub.f32 1.0, %v1182_v63  ;;  %2050 = vrcp.f32 %v2433_v59  ;;  %vm1314_vm9 = vcmp.eq.f32.partialorder %v1313_v42, 8.507059e+37 }
 0x3cc   : > { %2052 = vrcp.f32 %v2436_v15  ;;  %v1208_v29 = vor.u32 1.1754944e-38, %v1207_v22  ;;  %vm1206_vm5 = vcmp.eq.f32.partialorder %v1205_v25, 8.507059e+37 }
 0x3cd   : > { %v1184_v3 = vmul.f32 %v2047_v62, %v1183_v1 }
 0x3cf   : > { %v1185_v5 = vadd.f32 %v2047_v62, %v1184_v3 }
 0x3d0   : > { %v2049_v61 = vpop.eup %2048 }
 0x3d1   : > { %v1189_v7 = vsel %vm1188_vm14, %v2047_v62, %v1185_v5  ;;  %v1197_v11 = vmul.f32 %v2049_v61, %v1180_v0  ;;  %v2051_v16 = vpop.eup %2050  ;;  %v1423_v23 = vpop.xlane.xlu0 %1422  ;;  %vm1202_vm0 = vweird.f32 %v2049_v61  ;;  %vm1324_vm14 = vweird.f32 %v2436_v15 }
 0x3d2   : > { %v1194_v13 = vsel %vm1191_vm15, %v1193_v6, %v1189_v7  ;;  %v1305_v27 = vmul.f32 %v2051_v16, %v2433_v59  ;;  %2054 = vrcp.f32 %v1423_v23  ;;  %vm1203_vm4 = vmor %vm1201_vm1, %vm1202_vm0  ;;  %v2053_v32 = vpop.eup %2052  ;;  %vm1310_vm6 = vweird.f32 %v2051_v16 }
 0x3d3   : > { %v1198_v17 = vsub.f32 1.0, %v1197_v11  ;;  %v1195_v20 = vmul.f32 %v2403_v19, %v1194_v13  ;;  %v1320_v37 = vmul.f32 %v2053_v32, %v2436_v15  ;;  %vm1311_vm8 = vmor %vm1309_vm7, %vm1310_vm6  ;;  %vm1325_vm10 = vweird.f32 %v2053_v32 }
 0x3d4   : > { %v1306_v31 = vsub.f32 1.0, %v1305_v27  ;;  %v1438_v9 = vand.u32 2147483648, %v1423_v23  ;;  %vm1326_vm0 = vmor %vm1324_vm14, %vm1325_vm10  ;;  %vm1432_vm1 = vweird.f32 %v1423_v23  ;;  %v1436_v56 = vand.u32 2147483647, %v1423_v23  ;;  %v1528_v27 = vld [vmem:[%s2241_s19 + $0x18] sm:$0xff] }
 0x3d5   : > { %v1199_v24 = vmul.f32 %v2049_v61, %v1198_v17  ;;  %1958 = vmatmul.msk.f32.vlgmr.msra.gmra.mxu0 %vm1037_vm13, %v1195_v20  ;;  %v1321_v40 = vsub.f32 1.0, %v1320_v37  ;;  %1551 = vmatpush.msrb.mxu1 %v1528_v27  ;;  %vm1522_vm10 = vcmask 195584  }
 0x3d6   : > { %v1307_v35 = vmul.f32 %v2051_v16, %v1306_v31  ;;  %v1439_v59 = vor.u32 1.1754944e-38, %v1438_v9  ;;  %vm1437_vm6 = vcmp.eq.f32.partialorder %v1436_v56, 8.507059e+37 }
 0x3d7   : > { %v1200_v28 = vadd.f32 %v2049_v61, %v1199_v24  ;;  %v1322_v45 = vmul.f32 %v2053_v32, %v1321_v40 }
 0x3d8   : > { %v2055_v34 = vpop.eup %2054  ;;  %v1308_v39 = vadd.f32 %v2051_v16, %v1307_v35 }
 0x3d9   : > { %v1204_v30 = vsel %vm1203_vm4, %v2049_v61, %v1200_v28  ;;  %v1428_v38 = vmul.f32 %v2055_v34, %v1423_v23  ;;  %v1323_v50 = vadd.f32 %v2053_v32, %v1322_v45  ;;  %vm1433_vm15 = vweird.f32 %v2055_v34  ;;  %v1458_v0 = vpop.permute.xlu1 %1457  ;;  %v1527_v28 = vld [vmem:[%s2241_s19 + $0x10] sm:$0xff] }
 0x3da   : > { %v1209_v19 = vsel %vm1206_vm5, %v1208_v29, %v1204_v30  ;;  %vm1434_vm4 = vmor %vm1432_vm1, %vm1433_vm15  ;;  %vm1329_vm5 = vcmp.eq.f32.partialorder %v1328_v55, 8.507059e+37  ;;  %v1526_v29 = vld [vmem:[%s2241_s19 + $0x8] sm:$0xff]  ;;  %1552 = vmatpush.msrb.mxu1 %v1527_v28  ;;  %v1525_v30 = vld [vmem:[%s2241_s19] sm:$0xff]  ;;  %s2628_s19 = sld [smem:[#allocation13_spill]] (!%p1978_p5) }
 0x3db   : > { %v1210_v33 = vmul.f32 %v2411_v26, %v1209_v19  ;;  %v1429_v43 = vsub.f32 1.0, %v1428_v38  ;;  %v1312_v26 = vsel %vm1311_vm8, %v2051_v16, %v1308_v39  ;;  %v1327_v57 = vsel %vm1326_vm0, %v2053_v32, %v1323_v50  ;;  %v1667_v28 = vld [vmem:[%s2268_s24 + $0x40] sm:$0xff] }
 0x3dc   : > { %v1317_v49 = vsel %vm1314_vm9, %v1316_v46, %v1312_v26  ;;  %v1332_v60 = vsel %vm1329_vm5, %v1331_v12, %v1327_v57  ;;  %v1118_v16 = vpop.f32.mrf.mxu0  ;;  %1553 = vmatpush.msrb.mxu1 %v1526_v29 }
 0x3dd   : > { %1959 = vmatmul.msk.f32.gmra.mxu0 %vm1037_vm13, %v1210_v33  ;;  %v1430_v48 = vmul.f32 %v2055_v34, %v1429_v43  ;;  %v1318_v54 = vmul.f32 %v2399_v14, %v1317_v49  ;;  %v1333_v14 = vmul.f32 %v2405_v21, %v1332_v60  ;;  %v2015_v43 = vld [vmem:[%s2623_s20] ss:$0 sm:$0xff]  ;;  %v1621_v60 = vld [vmem:[%s2258_s28 + $0x8] sm:$0xff] }
 0x3de   : > { %1554 = vmatpush.msrb.mxu1 %v1525_v30  ;;  %v1666_v30 = vld [vmem:[%s2268_s24 + $0x38] sm:$0xff] }
 0x3df   : > { %v1431_v52 = vadd.f32 %v2055_v34, %v1430_v48 }
 0x3e1   : > { %v1435_v58 = vsel %vm1434_vm4, %v2055_v34, %v1431_v52 }
 0x3e2   : > { %v1440_v62 = vsel %vm1437_vm6, %v1439_v59, %v1435_v58  ;;  %v1623_v58 = vld [vmem:[%s2258_s28 + $0x18] sm:$0xff]  ;;  %v1622_v59 = vld [vmem:[%s2258_s28 + $0x10] sm:$0xff] }
 0x3e3   : > { %v1441_v1 = vmul.f32 %v2415_v36, %v1440_v62  ;;  %v1620_v62 = vld [vmem:[%s2258_s28] sm:$0xff]  ;;  %s2629_s28 = sld [smem:[#allocation14_spill]] (!%p1978_p5) }
 0x3e4   : > { %v1337_v44 = vpop.permute.xlu0 %1336 }
 0x3e5   : > { %1964 = vmatpush.msk.msra.mxu2 %vm1098_vm12, %v1337_v44 }
 0x3ec   : > { %v1335_v53 = vpop.permute.xlu0 %1334 }
 0x3ed   : > { %1362 = vmatpush.msra.mxu2 %v1335_v53 }
 0x3ee   : > { %1965 = vmatmul.msk.f32.vlgmr.msra.gmra.mxu2 %vm1037_vm13, %v1318_v54 }
 0x3ef   : > { %1646 = vmatpush.msrb.mxu2 %v1623_v58 }
 0x3f1   : > { %1647 = vmatpush.msrb.mxu2 %v1622_v59 }
 0x3f3   : > { %1648 = vmatpush.msrb.mxu2 %v1621_v60 }
 0x3f4   : > { %v1460_v63 = vpop.permute.xlu0 %1459 }
 0x3f5   : > { %1971 = vmatpush.msk.msrb.mxu0 %vm1098_vm12, %v1460_v63  ;;  %1649 = vmatpush.msrb.mxu2 %v1620_v62 }
 0x3f6   : > { %1966 = vmatmul.msk.f32.gmra.mxu2 %vm1037_vm13, %v1333_v14 }
 0x3f7   : > { %v1426_v2 = vpop.xlane.xlu2 %1425  ;;  %1485 = vmatpush.msrb.mxu0 %v1458_v0 }
 0x3f8   : > { %2056 = vrcp.f32 %v1426_v2  ;;  %1972 = vmatmul.msk.f32.vlgmr.msrb.gmra.mxu0 %vm1037_vm13, %v1441_v1  ;;  %v1453_v61 = vand.u32 2147483648, %v1426_v2  ;;  %v1451_v7 = vand.u32 2147483647, %v1426_v2  ;;  %vm1447_vm8 = vweird.f32 %v1426_v2 }
 0x3fa   : > { %v1454_v11 = vor.u32 1.1754944e-38, %v1453_v61  ;;  %vm1452_vm9 = vcmp.eq.f32.partialorder %v1451_v7, 8.507059e+37  ;;  %v1673_v61 = vld [vmem:[%s2268_s24 + $0x70] sm:$0xff]  ;;  %v1672_v7 = vld [vmem:[%s2268_s24 + $0x68] sm:$0xff] }
 0x3fe   : > { %v2057_v3 = vpop.eup %2056 }
 0x3ff   : > { %v1443_v4 = vmul.f32 %v2057_v3, %v1426_v2  ;;  %vm1448_vm7 = vweird.f32 %v2057_v3 }
 0x400   : > { %vm1449_vm12 = vmor %vm1447_vm8, %vm1448_vm7 }
 0x401   : > { %v1444_v5 = vsub.f32 1.0, %v1443_v4 }
 0x403   : > { %v1445_v6 = vmul.f32 %v2057_v3, %v1444_v5  ;;  %v1674_v5 = vld [vmem:[%s2268_s24 + $0x78] sm:$0xff] }
 0x404   : > { %1675 = vmatpush.msra.mxu3 %v1674_v5 }
 0x405   : > { %v1446_v21 = vadd.f32 %v2057_v3, %v1445_v6 }
 0x406   : > { %1676 = vmatpush.msra.mxu3 %v1673_v61 }
 0x407   : > { %v1450_v13 = vsel %vm1449_vm12, %v2057_v3, %v1446_v21 }
 0x408   : > { %v1455_v15 = vsel %vm1452_vm9, %v1454_v11, %v1450_v13  ;;  %1677 = vmatpush.msra.mxu3 %v1672_v7 }
 0x409   : > { %v1456_v36 = vmul.f32 %v2426_v47, %v1455_v15  ;;  %v1671_v15 = vld [vmem:[%s2268_s24 + $0x60] sm:$0xff] }
 0x40a   : > { %1678 = vmatpush.msra.mxu3 %v1671_v15 }
 0x40b   : > { %1973 = vmatmul.msk.f32.gmra.mxu0 %vm1037_vm13, %v1456_v36  ;;  %vm1519_vm13 = vcmask 130048   ;;  %v2016_v36 = vld [vmem:[%s2624_s0] ss:$0 sm:$0xff] }
 0x415   : > { %v1121_v17 = vpop.f32.mrf.mxu0 }
 0x452   : > { %v1241_v20 = vpop.f32.mrf.mxu0 }
 0x453   : > { %1495 = vrot.lane.b32.xlu0 %v1241_v20, %s2084_s11  ;;  %v1670_v20 = vld [vmem:[%s2268_s24 + $0x58] sm:$0xff] }
 0x454   : > { %1679 = vmatpush.msra.mxu3 %v1670_v20 }
 0x45a   : > { %v1244_v22 = vpop.f32.mrf.mxu0 }
 0x45b   : > { %1497 = vrot.lane.b32.xlu0 %v1244_v22, %s2084_s11 }
 0x471   : > { %v1364_v23 = vpop.f32.mrf.mxu2 }
 0x472   : > { %1503 = vrot.lane.b32.xlu2 %v1364_v23, %s2085_s22  ;;  %v2017_v23 = vld [vmem:[%s2625_s8] ss:$0 sm:$0xff] }
 0x475   : > { %v1487_v24 = vpop.f32.mrf.mxu0 }
 0x476   : > { %1511 = vrot.lane.b32.xlu0 %v1487_v24, %s2086_s7  ;;  %v1669_v24 = vld [vmem:[%s2268_s24 + $0x50] sm:$0xff] }
 0x477   : > { %1680 = vmatpush.msra.mxu3 %v1669_v24 }
 0x479   : > { %v1367_v47 = vpop.f32.mrf.mxu2 }
 0x47a   : > { %1505 = vrot.lane.b32.xlu1 %v1367_v47, %s2085_s22 }
 0x488   : > { %v1490_v25 = vpop.f32.mrf.mxu0 }
 0x489   : > { %1513 = vrot.lane.b32.xlu0 %v1490_v25, %s2086_s7  ;;  %v1668_v25 = vld [vmem:[%s2268_s24 + $0x48] sm:$0xff] }
 0x48a   : > { %1681 = vmatpush.msra.mxu3 %v1668_v25 }
 0x48c   : > { %1682 = vmatpush.msra.mxu3 %v1667_v28 }
 0x48e   : > { %1683 = vmatpush.msra.mxu3 %v1666_v30 }
 0x4c5   : > { %v1496_v31 = vpop.permute.xlu0 %1495 }
 0x4c6   : > { %v1517_v33 = vsel %vm1001_vm11, %v1118_v16, %v1496_v31 }
 0x4cc   : > { %v1504_v32 = vpop.permute.xlu2 %1503 }
 0x4cd   : > { %v1498_v19 = vpop.permute.xlu0 %1497  ;;  %v1520_v34 = vsel %vm1519_vm13, %v1517_v33, %v1504_v32  ;;  %v1664_v33 = vld [vmem:[%s2268_s24 + $0x28] sm:$0xff] }
 0x4ce   : > { %v1518_v39 = vsel %vm1001_vm11, %v1121_v17, %v1498_v19  ;;  %v1665_v19 = vld [vmem:[%s2268_s24 + $0x30] sm:$0xff] }
 0x4cf   : > { %1684 = vmatpush.msra.mxu3 %v1665_v19 }
 0x4d1   : > { %1685 = vmatpush.msra.mxu3 %v1664_v33 }
 0x4e8   : > { %v1512_v35 = vpop.permute.xlu0 %1511 }
 0x4e9   : > { %v1523_v37 = vsel %vm1522_vm10, %v1520_v34, %v1512_v35  ;;  %v1663_v35 = vld [vmem:[%s2268_s24 + $0x20] sm:$0xff] }
 0x4ea   : > { %1974 = vmatmul.msk.f32.vlgmr.msrb.gmra.mxu1 %vm868_vm3, %v1523_v37  ;;  %1686 = vmatpush.msra.mxu3 %v1663_v35 }
 0x4ec   : > { %v1506_v38 = vpop.permute.xlu1 %1505 }
 0x4ed   : > { %v1521_v40 = vsel %vm1519_vm13, %v1518_v39, %v1506_v38  ;;  %v1662_v38 = vld [vmem:[%s2268_s24 + $0x18] sm:$0xff] }
 0x4ee   : > { %1687 = vmatpush.msra.mxu3 %v1662_v38 }
 0x4fb   : > { %v1514_v41 = vpop.permute.xlu0 %1513 }
 0x4fc   : > { %v1524_v42 = vsel %vm1522_vm10, %v1521_v40, %v1514_v41 }
 0x4fd   : > { %1975 = vmatmul.msk.f32.gmra.mxu1 %vm868_vm3, %v1524_v42 }
 0x567   : > { %v1556_v44 = vpop.f32.mrf.mxu1 }
 0x568   : > { %v1557_v26 = vadd.f32 %v2015_v43, %v1556_v44  ;;  %v1661_v44 = vld [vmem:[%s2268_s24 + $0x10] sm:$0xff] }
 0x569   : > { %1688 = vmatpush.msra.mxu3 %v1661_v44 }
 0x56a   : > { %v2475_v45 = vadd.f32 %v1557_v26, %v2291_v10  ;;  %v1660_v26 = vld [vmem:[%s2268_s24 + $0x8] sm:$0xff] }
 0x56b   : > { %1689 = vmatpush.msra.mxu3 %v1660_v26 }
 0x56c   : > { %v1566_v46 = vsel %vm868_vm3, %v2475_v45, 0.0 }
 0x56d   : > { %1567 = vadd.xlane.f32.xlu2 %v1566_v46  ;;  %v1659_v46 = vld [vmem:[%s2268_s24] sm:$0xff]  ;;  %s2627_s24 = sld [smem:[#allocation12_spill]] (!%p1978_p5) }
 0x56e   : > { %1690 = vmatpush.msra.mxu3 %v1659_v46 }
 0x57a   : > { %v1559_v48 = vpop.f32.mrf.mxu1 }
 0x57b   : > { %v1560_v49 = vadd.f32 %v2015_v43, %v1559_v48  ;;  %v2018_v48 = vld [vmem:[%s2626_s30] ss:$0 sm:$0xff] }
 0x57d   : > { %v2480_v50 = vadd.f32 %v1560_v49, %v2287_v8 }
 0x57f   : > { %v1569_v51 = vsel %vm872_vm2, %v2480_v50, 0.0 }
 0x580   : > { %1570 = vadd.xlane.f32.xlu1 %v1569_v51 }
 0x5e0   : > { %v1568_v52 = vpop.xlane.xlu2 %1567 }
 0x5e1   : > { %v1572_v10 = vmul.f32 %v1568_v52, %v2295_v18 }
 0x5e3   : > { %v1574_v53 = vsub.f32 %v2475_v45, %v1572_v10 }
 0x5e5   : > { %v1576_v54 = vmul.f32 %v1574_v53, %v1574_v53 }
 0x5e7   : > { %v1578_v55 = vsel %vm868_vm3, %v1576_v54, 0.0 }
 0x5e8   : > { %1579 = vadd.xlane.f32.xlu0 %v1578_v55  ;;  %v2019_v55 = vld [vmem:[%s847_s21] ss:$0 sm:$0xff] }
 0x5f3   : > { %v1571_v9 = vpop.xlane.xlu1 %1570 }
 0x5f4   : > { %v1573_v8 = vmul.f32 %v1571_v9, %v2295_v18 }
 0x5f6   : > { %v2489_v56 = vsub.f32 %v2480_v50, %v1573_v8 }
 0x5f8   : > { %v1577_v57 = vmul.f32 %v2489_v56, %v2489_v56 }
 0x5fa   : > { %v1581_v12 = vsel %vm872_vm2, %v1577_v57, 0.0 }
 0x5fb   : > { %1582 = vadd.xlane.f32.xlu2 %v1581_v12 }
 0x65b   : > { %v1580_v63 = vpop.xlane.xlu0 %1579 }
 0x65c   : > { %v1584_v14 = vmul.f32 %v1580_v63, %v2295_v18 }
 0x65e   : > { %v1586_v0 = vadd.f32 1e-05, %v1584_v14 }
 0x660   : > { %2058 = vrsqrt.f32 %v1586_v0  ;;  %vm1594_vm14 = vweird.f32 %v1586_v0 }
 0x666   : > { %v2059_v1 = vpop.eup %2058 }
 0x667   : > { %v1589_v2 = vmul.f32 %v2059_v1, %v1586_v0  ;;  %vm1595_vm11 = vweird.f32 %v2059_v1 }
 0x668   : > { %vm1596_vm15 = vmor %vm1594_vm14, %vm1595_vm11 }
 0x669   : > { %v1590_v3 = vmul.f32 %v2059_v1, %v1589_v2 }
 0x66b   : > { %v1591_v4 = vmul.f32 0.5, %v1590_v3 }
 0x66d   : > { %v1592_v6 = vsub.f32 1.5, %v1591_v4 }
 0x66e   : > { %v1583_v21 = vpop.xlane.xlu2 %1582 }
 0x66f   : > { %v1593_v11 = vmul.f32 %v2059_v1, %v1592_v6  ;;  %v1585_v13 = vmul.f32 %v1583_v21, %v2295_v18 }
 0x671   : > { %v1597_v16 = vsel %vm1596_vm15, %v2059_v1, %v1593_v11  ;;  %v1587_v17 = vadd.f32 1e-05, %v1585_v13 }
 0x672   : > { %v1608_v22 = vmul.f32 %v1597_v16, %v1574_v53 }
 0x673   : > { %2060 = vrsqrt.f32 %v1587_v17  ;;  %vm1604_vm1 = vweird.f32 %v1587_v17 }
 0x674   : > { %v1613_v47 = vmul.f32 %v2016_v36, %v1608_v22 }
 0x676   : > { %v1618_v27 = vadd.f32 %v2017_v23, %v1613_v47 }
 0x678   : > { %1976 = vmatmul.msk.f32.vlgmr.msrb.gmra.mxu2 %vm868_vm3, %v1618_v27 }
 0x679   : > { %v2061_v29 = vpop.eup %2060 }
 0x67a   : > { %v1599_v31 = vmul.f32 %v2061_v29, %v1587_v17  ;;  %vm1605_vm0 = vweird.f32 %v2061_v29 }
 0x67b   : > { %vm1606_vm4 = vmor %vm1604_vm1, %vm1605_vm0 }
 0x67c   : > { %v1600_v32 = vmul.f32 %v2061_v29, %v1599_v31 }
 0x67e   : > { %v1601_v34 = vmul.f32 0.5, %v1600_v32 }
 0x680   : > { %v1602_v37 = vsub.f32 1.5, %v1601_v34 }
 0x682   : > { %v1603_v39 = vmul.f32 %v2061_v29, %v1602_v37 }
 0x684   : > { %v1607_v40 = vsel %vm1606_vm4, %v2061_v29, %v1603_v39 }
 0x685   : > { %v1609_v41 = vmul.f32 %v1607_v40, %v2489_v56 }
 0x687   : > { %v1614_v42 = vmul.f32 %v2016_v36, %v1609_v41 }
 0x689   : > { %v1619_v43 = vadd.f32 %v2017_v23, %v1614_v42 }
 0x68b   : > { %1977 = vmatmul.msk.f32.gmra.mxu2 %vm868_vm3, %v1619_v43 }
 0x6fb   : > { %v1651_v49 = vpop.f32.mrf.mxu2 }
 0x6fc   : > { %v1652_v51 = vadd.f32 %v2018_v48, %v1651_v49 }
 0x6fe   : > { %v1657_v52 = vmax.f32 %v1652_v51, 0.0 }
 0x700   : > { %1691 = vmatmul.f32.vlgmr.msra.gmra.mxu3 %v1657_v52 }
 0x70e   : > { %v1654_v10 = vpop.f32.mrf.mxu2 }
 0x70f   : > { %v1655_v53 = vadd.f32 %v2018_v48, %v1654_v10 }
 0x711   : > { %v1658_v54 = vmax.f32 %v1655_v53, 0.0 }
 0x713   : > { %1694 = vmatmul.f32.gmra.mxu3 %v1658_v54 }
 0x783   : > { %v1692_v9 = vpop.f32.mrf.mxu3 }
 0x784   : > { %v1698_v8 = vadd.f32 %v1692_v9, %v2475_v45 }
 0x786   : > { %v1704_v56 = vadd.f32 %v2019_v55, %v1698_v8 }
 0x788   : > { %1706 = vst.msk [vmem:[#allocation2] sm:$0xff] %vm868_vm3, %v1704_v56 }
 0x796   : > { %v1695_v57 = vpop.f32.mrf.mxu3 }
 0x797   : > { %v1699_v12 = vadd.f32 %v1695_v57, %v2480_v50  ;;  %1711 = sbr.rel (%p1978_p5) target bundleno = 2225 (0x8b1), region = 112 }
 0x799   : > { %v1705_v58 = vadd.f32 %v2019_v55, %v1699_v12 }
 0x79b   : > { %1707 = vst.msk [vmem:[#allocation2 + $0x8] sm:$0xf] %vm872_vm2, %v1705_v58 }
 0x79c   : > { %v1714_v59 = vsel %vm868_vm3, %v1704_v56, 0.0  ;;  %v1717_v60 = vsel %vm872_vm2, %v1705_v58, 0.0  ;;  %v2062_v24 = vld [vmem:[%s2627_s24] ss:$0 sm:$0xff] }
 0x79d   : > { %1715 = vadd.xlane.f32.xlu0 %v1714_v59  ;;  %v2063_v27 = vld [vmem:[%s2628_s19] ss:$0 sm:$0xff] }
 0x7a5   : > { %1718 = vadd.xlane.f32.xlu0 %v1717_v60 }
 0x810   : > { %v1716_v62 = vpop.xlane.xlu0 %1715 }
 0x811   : > { %v1720_v45 = vmul.f32 %v1716_v62, %v2295_v18 }
 0x813   : > { %v1722_v63 = vsub.f32 %v1704_v56, %v1720_v45 }
 0x815   : > { %v1724_v14 = vmul.f32 %v1722_v63, %v1722_v63 }
 0x817   : > { %v1726_v0 = vsel %vm868_vm3, %v1724_v14, 0.0 }
 0x818   : > { %1727 = vadd.xlane.f32.xlu1 %v1726_v0  ;;  %v1719_v50 = vpop.xlane.xlu0 %1718 }
 0x819   : > { %v1721_v1 = vmul.f32 %v1719_v50, %v2295_v18 }
 0x81b   : > { %v1723_v2 = vsub.f32 %v1705_v58, %v1721_v1 }
 0x81d   : > { %v1725_v3 = vmul.f32 %v1723_v2, %v1723_v2 }
 0x81f   : > { %v1729_v4 = vsel %vm872_vm2, %v1725_v3, 0.0 }
 0x820   : > { %1730 = vadd.xlane.f32.xlu1 %v1729_v4 }
 0x88b   : > { %v1728_v5 = vpop.xlane.xlu1 %1727 }
 0x88c   : > { %v1732_v61 = vmul.f32 %v1728_v5, %v2295_v18 }
 0x88e   : > { %v1734_v6 = vadd.f32 1e-05, %v1732_v61 }
 0x890   : > { %2064 = vrsqrt.f32 %v1734_v6  ;;  %vm1742_vm6 = vweird.f32 %v1734_v6 }
 0x893   : > { %v1731_v7 = vpop.xlane.xlu1 %1730 }
 0x894   : > { %v1733_v21 = vmul.f32 %v1731_v7, %v2295_v18 }
 0x896   : > { %v2065_v11 = vpop.eup %2064  ;;  %v1735_v13 = vadd.f32 1e-05, %v1733_v21 }
 0x897   : > { %v1737_v15 = vmul.f32 %v2065_v11, %v1734_v6  ;;  %vm1743_vm5 = vweird.f32 %v2065_v11 }
 0x898   : > { %2066 = vrsqrt.f32 %v1735_v13  ;;  %vm1744_vm7 = vmor %vm1742_vm6, %vm1743_vm5  ;;  %vm1752_vm12 = vweird.f32 %v1735_v13 }
 0x899   : > { %v1738_v36 = vmul.f32 %v2065_v11, %v1737_v15 }
 0x89b   : > { %v1739_v16 = vmul.f32 0.5, %v1738_v36 }
 0x89d   : > { %v1740_v17 = vsub.f32 1.5, %v1739_v16 }
 0x89e   : > { %v2067_v20 = vpop.eup %2066 }
 0x89f   : > { %v1741_v22 = vmul.f32 %v2065_v11, %v1740_v17  ;;  %v1747_v23 = vmul.f32 %v2067_v20, %v1735_v13  ;;  %vm1753_vm8 = vweird.f32 %v2067_v20 }
 0x8a0   : > { %vm1754_vm9 = vmor %vm1752_vm12, %vm1753_vm8 }
 0x8a1   : > { %v1745_v47 = vsel %vm1744_vm7, %v2065_v11, %v1741_v22  ;;  %v1748_v25 = vmul.f32 %v2067_v20, %v1747_v23 }
 0x8a2   : > { %v1756_v18 = vmul.f32 %v1745_v47, %v1722_v63 }
 0x8a3   : > { %v1749_v28 = vmul.f32 0.5, %v1748_v25 }
 0x8a4   : > { %v1761_v29 = vmul.f32 %v2062_v24, %v1756_v18 }
 0x8a5   : > { %v1750_v30 = vsub.f32 1.5, %v1749_v28 }
 0x8a6   : > { %v1766_v31 = vadd.f32 %v2063_v27, %v1761_v29 }
 0x8a7   : > { %v1751_v19 = vmul.f32 %v2067_v20, %v1750_v30 }
 0x8a8   : > { %1768 = vst.msk [vmem:[%s2629_s28] sm:$0xff] %vm868_vm3, %v1766_v31 }
 0x8a9   : > { %v1755_v32 = vsel %vm1754_vm9, %v2067_v20, %v1751_v19 }
 0x8aa   : > { %v1757_v33 = vmul.f32 %v1755_v32, %v1723_v2 }
 0x8ac   : > { %v1762_v34 = vmul.f32 %v2062_v24, %v1757_v33 }
 0x8ae   : > { %v1767_v35 = vadd.f32 %v2063_v27, %v1762_v34 }
 0x8b0   : > { %1769 = vst.msk [vmem:[%s2629_s28 + $0x8] sm:$0xf] %vm872_vm2, %v1767_v35 }
 0x8b1 PF: > { %s2630_s23 = sld [smem:[#allocation3_spill]] }
 0x8b7   : > { %s31_s2 = sadd.s32 1, %s2630_s23  }
 0x8b8   : > { %p28_p6 = scmp.ge.s32.totalorder %s31_s2, 5  }
 0x8ba   :  { %30 = sbr.rel (!%p28_p6) target bundleno = 12 (0xc), region = 177 }

// kernel: forward.11
= control target key start
LH: loop header
LB: loop body
LE: loop exit
PB: predicated region body
PF: predicated region fallthrough
CT: control target
= control target key end

     0   :  { %vm69_vm0 = vcmask 64512   ;;  %vm43_vm1 = vcmask 1043456   ;;  %vm39_vm2 = vcmask 97280   ;;  %s397_s0 = inlined_call_operand.vmem [shape: f32[12,32], index: 0, kind: input, shape index: {}]   ;;  %s398_s1 = inlined_call_operand.vmem [shape: f32[8,32], index: 1, kind: input, shape index: {}]   ;;  %s399_s2 = inlined_call_operand.vmem [shape: f32[2,12], index: 2, kind: input, shape index: {}]   ;;  %s400_s3 = inlined_call_operand.vmem [shape: f32[2,8], index: 3, kind: input, shape index: {}]   ;;  %s401_s4 = inlined_call_operand.vmem [shape: f32[64,32], index: 4, kind: input, shape index: {}]   ;;  %s402_s5 = inlined_call_operand.vmem [shape: f32[1,32], index: 5, kind: input, shape index: {}]   ;;  %s403_s6 = inlined_call_operand.vmem [shape: f32[32,16], index: 6, kind: input, shape index: {}]   ;;  %s404_s7 = inlined_call_operand.vmem [shape: f32[1,16], index: 7, kind: input, shape index: {}]   ;;  %s405_s8 = inlined_call_operand.vmem [shape: f32[16,128], index: 8, kind: input, shape index: {}]   ;;  %s406_s9 = inlined_call_operand.vmem [shape: f32[1,128], index: 9, kind: input, shape index: {}]   ;;  %s407_s10 = inlined_call_operand.hbm [shape: f32[2,128], index: 10, kind: output, shape index: {}]  }
   0x1   :  { %v68_v0 = vld [vmem:[%s398_s1] sm:$0xff]  ;;  %v38_v2 = vld [vmem:[%s397_s0 + $0x8] sm:$0xf] }
   0x2   :  { %v67_v1 = vld [vmem:[%s400_s3] sm:$0x3]  ;;  %88 = vmatpush.msra.mxu1 %v68_v0  ;;  %228 = vmatpush.msk.msra.mxu0 %vm43_vm1, %v38_v2 }
   0x3   :  { %v37_v3 = vld [vmem:[%s397_s0] sm:$0xff]  ;;  %230 = vmatmul.msk.f32.vlgmr.msra.gmra.mxu1 %vm69_vm0, %v67_v1 }
   0x4   :  { %v36_v4 = vld [vmem:[%s399_s2] sm:$0x3] }
   0x5   :  { %15 = vsyncpa [#allocation3], 0  ;;  %62 = vmatpush.msra.mxu0 %v37_v3  ;;  %v106_v5 = vld [vmem:[%s401_s4 + $0x38] sm:$0xff]  ;;  %v105_v6 = vld [vmem:[%s401_s4 + $0x30] sm:$0xff]  ;;  %s269_s13 = smov 32   ;;  %vm97_vm3 = vcmask 261120  }
   0x6   :  { %229 = vmatmul.msk.f32.vlgmr.msra.gmra.mxu0 %vm39_vm2, %v36_v4  ;;  %123 = vmatpush.msra.mxu2 %v106_v5  ;;  %v104_v7 = vld [vmem:[%s401_s4 + $0x28] sm:$0xff]  ;;  %v103_v8 = vld [vmem:[%s401_s4 + $0x20] sm:$0xff]  ;;  %v102_v9 = vld [vmem:[%s401_s4 + $0x18] sm:$0xff]  ;;  %vm111_vm4 = vcmask 523264   ;;  %vm173_vm5 = vcmask 130048   ;;  %vm197_vm6 = vcmask 1041408  }
   0x7   :  { %v101_v10 = vld [vmem:[%s401_s4 + $0x10] sm:$0xff]  ;;  %v100_v11 = vld [vmem:[%s401_s4 + $0x8] sm:$0xff]  ;;  %v99_v13 = vld [vmem:[%s401_s4] sm:$0xff]  ;;  %s219_s28 = sshll.u32 %s407_s10, 4  ;;  %s220_s28 = int_to_ptr.hbm [resolvable:$true] %s219_s28 }
   0x8   :  { %124 = vmatpush.msra.mxu2 %v105_v6  ;;  %v139_v14 = vld [vmem:[%s403_s6 + $0x18] sm:$0xff]  ;;  %v138_v18 = vld [vmem:[%s403_s6 + $0x10] sm:$0xff]  ;;  %v137_v19 = vld [vmem:[%s403_s6 + $0x8] sm:$0xff] }
   0x9   :  { %159 = vmatpush.msra.mxu3 %v139_v14  ;;  %v136_v20 = vld [vmem:[%s403_s6] sm:$0xff]  ;;  %v168_v21 = vld [vmem:[%s405_s8 + $0x8] sm:$0xff] }
   0xa   :  { %125 = vmatpush.msra.mxu2 %v104_v7  ;;  %v167_v22 = vld [vmem:[%s405_s8] sm:$0xff]  ;;  %191 = vmatpush.msrb.mxu1 %v168_v21 }
   0xb   :  { %160 = vmatpush.msra.mxu3 %v138_v18  ;;  %v236_v23 = vld [vmem:[%s402_s5] ss:$0 sm:$0xff]  ;;  %s270_s5 = smov [#allocation2]  }
   0xc   :  { %126 = vmatpush.msra.mxu2 %v103_v8  ;;  %192 = vmatpush.msrb.mxu1 %v167_v22  ;;  %v237_v27 = vld [vmem:[%s404_s7] ss:$0 sm:$0xff]  ;;  %s217_s7 = sshll.u32 %s270_s5, 4  ;;  %s218_s7 = int_to_ptr.vmem [resolvable:$true] %s217_s7 }
   0xd   :  { %161 = vmatpush.msra.mxu3 %v137_v19  ;;  %v238_v30 = vld [vmem:[%s406_s9] ss:$0 sm:$0xff] }
   0xe   :  { %127 = vmatpush.msra.mxu2 %v102_v9 }
   0xf   :  { %162 = vmatpush.msra.mxu3 %v136_v20 }
  0x10   :  { %128 = vmatpush.msra.mxu2 %v101_v10 }
  0x12   :  { %129 = vmatpush.msra.mxu2 %v100_v11 }
  0x14   :  { %130 = vmatpush.msra.mxu2 %v99_v13 }
  0x80   :  { %v90_v12 = vpop.f32.mrf.mxu1 }
  0x81   :  { %94 = vrot.lane.b32.xlu0 %v90_v12, %s269_s13 }
  0x83   :  { %v64_v15 = vpop.f32.mrf.mxu0 }
  0xf3   :  { %v95_v16 = vpop.permute.xlu0 %94 }
  0xf4   :  { %v98_v17 = vsel %vm97_vm3, %v64_v15, %v95_v16 }
  0xf5   :  { %231 = vmatmul.msk.f32.vlgmr.msra.gmra.mxu2 %vm111_vm4, %v98_v17 }
 0x178   :  { %v132_v24 = vpop.f32.mrf.mxu2 }
 0x179   :  { %v133_v25 = vadd.f32 %v236_v23, %v132_v24 }
 0x17b   :  { %v135_v26 = vmax.f32 %v133_v25, 0.0 }
 0x17d   :  { %232 = vmatmul.msk.f32.vlgmr.msra.gmra.mxu3 %vm97_vm3, %v135_v26 }
 0x200   :  { %v164_v28 = vpop.f32.mrf.mxu3 }
 0x201   :  { %v165_v29 = vadd.f32 %v237_v27, %v164_v28 }
 0x203   :  { %233 = vmatmul.msk.f32.vlgmr.msrb.gmra.mxu1 %vm173_vm5, %v165_v29 }
 0x280   :  { %v194_v31 = vpop.f32.mrf.mxu1 }
 0x281   :  { %v195_v32 = vadd.f32 %v238_v30, %v194_v31 }
 0x283   :  { %v198_v33 = vsel %vm197_vm6, %v195_v32, -inf }
 0x284   :  { %199 = vmax.xlane.f32.xlu0 %v198_v33 }
 0x2f7   :  { %v200_v34 = vpop.xlane.xlu0 %199 }
 0x2f8   :  { %v201_v35 = vsub.f32 %v195_v32, %v200_v34 }
 0x2fa   :  { %v202_v36 = vmul.f32 1.442695, %v201_v35 }
 0x2fc   :  { %239 = vpow2.f32 %v202_v36 }
 0x302   :  { %v240_v37 = vpop.eup %239 }
 0x303   :  { %v204_v38 = vsel %vm197_vm6, %v240_v37, 0.0 }
 0x304   :  { %205 = vadd.xlane.f32.xlu1 %v204_v38 }
 0x377   :  { %v206_v39 = vpop.xlane.xlu1 %205 }
 0x378   :  { %241 = vlog2.f32 %v206_v39 }
 0x37e   :  { %v242_v40 = vpop.eup %241 }
 0x37f   :  { %v208_v41 = vmul.f32 0.6931472, %v242_v40 }
 0x381   :  { %v209_v42 = vadd.f32 %v208_v41, %v200_v34 }
 0x383   :  { %v210_v43 = vsub.f32 %v195_v32, %v209_v42 }
 0x385   :  { %211 = vst [vmem:[#allocation2] sm:$0x3] %v210_v43 }
 0x386   :  { %222 = dma.vmem_to_hbm [thread:$0]  %s218_s7, 32, %s220_s28, [#allocation3]  }
 0x387   :  { %267 = dma.done.wait [#allocation3], 32  }
 0x388   :  { %268 = vsyncadd [#allocation3], 4294967264 }
 0x389   :  { %227 = vsyncpa [#allocation3], 1 }

</bundles_post_ra>
